<compile_context>
chip_gen: v6e
topology: v6e:2x2x1
jax: 0.10.0
libtpu: 0.0.40
codegen_flags: <defaults>
</compile_context>

<pallas_src>
import functools

import jax
import jax.numpy as jnp
from jax.experimental import pallas as pl
from jax.experimental.pallas import tpu as pltpu


def _layer_norm(x, gamma, beta, eps=1e-5):
    # PyTorch nn.LayerNorm: biased variance, eps inside sqrt.
    mean = jnp.mean(x, axis=-1, keepdims=True)
    var = jnp.mean((x - mean) ** 2, axis=-1, keepdims=True)
    return (x - mean) * jax.lax.rsqrt(var + eps) * gamma + beta


def transformer_block_kernel(n_heads, head_dim,
                             q_ref, k_ref, v_ref,
                             wq_ref, wk_ref, wv_ref,
                             wo_ref, bo_ref,
                             g1_ref, be1_ref,
                             w1_ref, b1_ref, w2_ref, b2_ref,
                             g2_ref, be2_ref,
                             o_ref,
                             qp_scr, m_scr, l_scr, acc_scr):
    f32 = jnp.float32
    dtype = q_ref.dtype
    H, D = n_heads, head_dim
    j = pl.program_id(2)
    last_j = pl.num_programs(2) - 1

    @pl.when(j == 0)
    def _init():
        m_scr[...] = jnp.full(m_scr.shape, -jnp.inf, f32)
        l_scr[...] = jnp.zeros(l_scr.shape, f32)
        acc_scr[...] = jnp.zeros(acc_scr.shape, f32)
        # One lane-dense (TQ, E) x (E, E) projection; 1/sqrt(D) already folded into Wq.
        qp_scr[...] = jnp.dot(q_ref[...], wq_ref[...],
                              preferred_element_type=f32).astype(qp_scr.dtype)

    # K/V projections for this key/value tile: one full-width MXU matmul each
    # (block-diagonal weights, pre-transposed to (in, out) in the wrapper).
    kp = jnp.dot(k_ref[...], wk_ref[...], preferred_element_type=f32).astype(dtype)
    vp = jnp.dot(v_ref[...], wv_ref[...], preferred_element_type=f32).astype(dtype)

    # Per-head online-softmax update.  H is small; each head writes its result directly
    # into the (TQ, E) VMEM accumulator (no python list, no lane concat).
    for h in range(H):
        sl = slice(h * D, (h + 1) * D)
        qh = qp_scr[:, sl]                       # (TQ, D)
        kh = kp[:, sl]                           # (TK, D)
        vh = vp[:, sl]                           # (TK, D)

        # scores = qh @ kh^T expressed via dot_general (no explicit transpose).
        s = jax.lax.dot_general(qh, kh, (((1,), (1,)), ((), ())),
                                preferred_element_type=f32)        # (TQ, TK) f32

        m_prev = m_scr[h]                                          # (TQ, 1)
        m_new = jnp.maximum(m_prev, jnp.max(s, axis=-1, keepdims=True))
        alpha = jnp.exp(m_prev - m_new)
        p = jnp.exp(s - m_new)                                     # f32
        l_scr[h] = alpha * l_scr[h] + jnp.sum(p, axis=-1, keepdims=True)
        pv = jnp.dot(p.astype(dtype), vh, preferred_element_type=f32)   # (TQ, D)
        acc_scr[:, sl] = alpha * acc_scr[:, sl] + pv
        m_scr[h] = m_new

    @pl.when(j == last_j)
    def _finalize():
        # Normalize each head chunk in place (EUP reciprocal, not a VALU divide).
        for h in range(H):
            sl = slice(h * D, (h + 1) * D)
            acc_scr[:, sl] = acc_scr[:, sl] * pl.reciprocal(l_scr[h], approx=True)
        attn = acc_scr[...]                                        # (TQ, E) f32

        # fc_out (weights already (in, out)).
        out = jnp.dot(attn.astype(dtype), wo_ref[...],
                      preferred_element_type=f32) + bo_ref[...].astype(f32)

        # residual + norm1 (dropout == identity in eval mode).
        x1 = _layer_norm(out + q_ref[...].astype(f32),
                         g1_ref[...].astype(f32), be1_ref[...].astype(f32))

        # feed-forward: Linear -> ReLU -> Linear.
        # TODO(synk): for very large `hidden` the FFN weights should be streamed over an
        # extra "arbitrary" hidden-dim grid axis instead of being fully VMEM-resident.
        hid = jnp.dot(x1.astype(dtype), w1_ref[...],
                      preferred_element_type=f32) + b1_ref[...].astype(f32)
        hid = jnp.maximum(hid, 0.0)
        ff = jnp.dot(hid.astype(dtype), w2_ref[...],
                     preferred_element_type=f32) + b2_ref[...].astype(f32)

        # residual + norm2 (+ identity dropout).
        x2 = _layer_norm(ff + x1, g2_ref[...].astype(f32), be2_ref[...].astype(f32))
        o_ref[...] = x2.astype(o_ref.dtype)


def transformer_block(q, k, v, params, n_heads, *, tq=None, tk=None):
    B, Lq, E = q.shape
    Lk = k.shape[1]
    H = n_heads
    D = E // H
    hidden = params["w1"].shape[0]
    dtype = q.dtype

    TQ = tq or (128 if Lq % 128 == 0 else Lq)
    TK = tk or (128 if Lk % 128 == 0 else Lk)

    # --- wrapper-side (XLA) weight prep: all layout work done once, none in-kernel ---
    scale = 1.0 / float(D) ** 0.5
    eye = jnp.eye(H, dtype=params["wq"].dtype)
    # PyTorch Linear weights are (out, in); pre-transpose to (in, out) and replicate the
    # shared per-head (D, D) projection as a block-diagonal (E, E) matrix.  Fold the
    # 1/sqrt(D) softmax scale into Wq.
    wq_bd = (jnp.kron(eye, params["wq"].T) * scale).astype(dtype)
    wk_bd = jnp.kron(eye, params["wk"].T).astype(dtype)
    wv_bd = jnp.kron(eye, params["wv"].T).astype(dtype)
    wo_t = params["wo"].T.astype(dtype)      # (E, E)
    w1_t = params["w1"].T.astype(dtype)      # (E, hidden)
    w2_t = params["w2"].T.astype(dtype)      # (hidden, E)

    kernel = functools.partial(transformer_block_kernel, H, D)

    def rep_spec(shape):
        zeros = (0,) * len(shape)
        return pl.BlockSpec(shape, lambda b, i, j, _z=zeros: _z)

    grid = (B, Lq // TQ, Lk // TK)

    # VMEM budget from actual block residency, with headroom, capped below v7x physical.
    itm = q.dtype.itemsize
    est = (2 * (2 * TQ * E + 2 * TK * E) * itm          # double-buffered q/k/v/out blocks
           + 2 * (4 * E * E + 2 * E * hidden) * itm     # resident weights
           + TQ * E * itm + (TQ * E + 2 * H * TQ * 128) * 4)   # scratch (lane padded)
    vmem_limit = int(min(max(2 * est, 8 << 20), 48 << 20))

    return pl.pallas_call(
        kernel,
        out_shape=jax.ShapeDtypeStruct((B, Lq, E), q.dtype),
        grid=grid,
        in_specs=[
            pl.BlockSpec((None, TQ, E), lambda b, i, j: (b, i, 0)),   # q
            pl.BlockSpec((None, TK, E), lambda b, i, j: (b, j, 0)),   # k
            pl.BlockSpec((None, TK, E), lambda b, i, j: (b, j, 0)),   # v
            rep_spec((E, E)), rep_spec((E, E)), rep_spec((E, E)),     # block-diag Wq/Wk/Wv
            rep_spec((E, E)), rep_spec((1, E)),                       # Wo, bo
            rep_spec((1, E)), rep_spec((1, E)),                       # norm1 gamma/beta
            rep_spec((E, hidden)), rep_spec((1, hidden)),             # W1, b1
            rep_spec((hidden, E)), rep_spec((1, E)),                  # W2, b2
            rep_spec((1, E)), rep_spec((1, E)),                       # norm2 gamma/beta
        ],
        out_specs=pl.BlockSpec((None, TQ, E), lambda b, i, j: (b, i, 0)),
        scratch_shapes=[
            pltpu.VMEM((TQ, E), dtype),           # projected Q tile (persists across k steps)
            pltpu.VMEM((H, TQ, 1), jnp.float32),  # running max per head
            pltpu.VMEM((H, TQ, 1), jnp.float32),  # running softmax denom per head
            pltpu.VMEM((TQ, E), jnp.float32),     # attention accumulator (head chunks in place)
        ],
        compiler_params=pltpu.CompilerParams(
            dimension_semantics=("parallel", "parallel", "arbitrary"),
            vmem_limit_bytes=vmem_limit),
    )(q, k, v,
      wq_bd, wk_bd, wv_bd,
      wo_t, params["bo"],
      params["g1"], params["be1"],
      w1_t, params["b1"], w2_t, params["b2"],
      params["g2"], params["be2"])


def reference(q, k, v, p, n_heads):
    """Pure-JAX replica of the PyTorch forward pass (eval mode)."""
    B, Lq, E = q.shape
    D = E // n_heads

    def heads(x):
        return x.reshape(B, -1, n_heads, D)

    qh = jnp.einsum('blhd,od->bhlo', heads(q), p["wq"])
    kh = jnp.einsum('blhd,od->bhlo', heads(k), p["wk"])
    vh = jnp.einsum('blhd,od->bhlo', heads(v), p["wv"])
    scores = jnp.einsum('bhqd,bhkd->bhqk', qh, kh) / jnp.sqrt(jnp.float32(D))
    attn = jax.nn.softmax(scores, axis=-1)
    out = jnp.einsum('bhqk,bhkd->bqhd', attn, vh).reshape(B, Lq, E)
    out = out @ p["wo"].T + p["bo"][0]

    x1 = _layer_norm(out + q, p["g1"][0], p["be1"][0])
    hid = jnp.maximum(x1 @ p["w1"].T + p["b1"][0], 0.0)
    ff = hid @ p["w2"].T + p["b2"][0]
    return _layer_norm(ff + x1, p["g2"][0], p["be2"][0])


if __name__ == "__main__":
    # Small but lane-dense shapes: E = 128 keeps all stores/loads 128-lane aligned,
    # L = 256 exercises both the q-tile parallel axis and the online-softmax k loop.
    B, L, E, H = 2, 256, 128, 4
    D = E // H
    expansion = 2
    hidden = expansion * E

    key = jax.random.PRNGKey(0)
    ks = jax.random.split(key, 12)
    f32 = jnp.float32

    params = {
        "wq": jax.random.normal(ks[0], (D, D), f32) * 0.2,
        "wk": jax.random.normal(ks[1], (D, D), f32) * 0.2,
        "wv": jax.random.normal(ks[2], (D, D), f32) * 0.2,
        "wo": jax.random.normal(ks[3], (E, E), f32) * 0.05,
        "bo": jax.random.normal(ks[4], (1, E), f32) * 0.05,
        "g1": jnp.ones((1, E), f32),
        "be1": jnp.zeros((1, E), f32),
        "w1": jax.random.normal(ks[5], (hidden, E), f32) * 0.05,
        "b1": jax.random.normal(ks[6], (1, hidden), f32) * 0.05,
        "w2": jax.random.normal(ks[7], (E, hidden), f32) * 0.05,
        "b2": jax.random.normal(ks[8], (1, E), f32) * 0.05,
        "g2": jnp.ones((1, E), f32),
        "be2": jnp.zeros((1, E), f32),
    }

    q = jax.random.normal(ks[9], (B, L, E), f32)
    k = jax.random.normal(ks[10], (B, L, E), f32)
    v = jax.random.normal(ks[11], (B, L, E), f32)

    out = transformer_block(q, k, v, params, H)
    out = jax.block_until_ready(out)

    ref = reference(q, k, v, params, H)
    assert out.shape == (B, L, E), out.shape
    err = float(jnp.max(jnp.abs(out - ref)))
    assert err < 2e-2, f"max abs err = {err}"

    print("KERNEL_OK")
</pallas_src>

<mosaic_0001>
module attributes {stable_mosaic.version = 11 : i64} {
  func.func @transformer_block_kernel(%arg0: i32, %arg1: i32, %arg2: i32, %arg3: memref<1x128x128xf32, #tpu.memory_space<vmem>>, %arg4: memref<1x128x128xf32, #tpu.memory_space<vmem>>, %arg5: memref<1x128x128xf32, #tpu.memory_space<vmem>>, %arg6: memref<128x128xf32, #tpu.memory_space<vmem>>, %arg7: memref<128x128xf32, #tpu.memory_space<vmem>>, %arg8: memref<128x128xf32, #tpu.memory_space<vmem>>, %arg9: memref<128x128xf32, #tpu.memory_space<vmem>>, %arg10: memref<1x128xf32, #tpu.memory_space<vmem>>, %arg11: memref<1x128xf32, #tpu.memory_space<vmem>>, %arg12: memref<1x128xf32, #tpu.memory_space<vmem>>, %arg13: memref<128x256xf32, #tpu.memory_space<vmem>>, %arg14: memref<1x256xf32, #tpu.memory_space<vmem>>, %arg15: memref<256x128xf32, #tpu.memory_space<vmem>>, %arg16: memref<1x128xf32, #tpu.memory_space<vmem>>, %arg17: memref<1x128xf32, #tpu.memory_space<vmem>>, %arg18: memref<1x128xf32, #tpu.memory_space<vmem>>, %arg19: memref<1x128x128xf32, #tpu.memory_space<vmem>>, %arg20: memref<128x128xf32, #tpu.memory_space<vmem>>, %arg21: memref<4x128x1xf32, #tpu.memory_space<vmem>>, %arg22: memref<4x128x1xf32, #tpu.memory_space<vmem>>, %arg23: memref<128x128xf32, #tpu.memory_space<vmem>>) attributes {dimension_semantics = [#tpu.dimension_semantics<parallel>, #tpu.dimension_semantics<parallel>, #tpu.dimension_semantics<arbitrary>], iteration_bounds = array<i64: 2, 2, 2>, scalar_prefetch = 0 : i64, scratch_operands = 4 : i64, tpu.core_type = #tpu.core_type<tc>, window_params = [{transform_indices = @transform_0, window_bounds = array<i64: 1, 128, 128>}, {transform_indices = @transform_1, window_bounds = array<i64: 1, 128, 128>}, {transform_indices = @transform_2, window_bounds = array<i64: 1, 128, 128>}, {pipeline_mode = #tpu.pipeline_mode<synchronous>, transform_indices = @transform_3, window_bounds = array<i64: 128, 128>}, {pipeline_mode = #tpu.pipeline_mode<synchronous>, transform_indices = @transform_4, window_bounds = array<i64: 128, 128>}, {pipeline_mode = #tpu.pipeline_mode<synchronous>, transform_indices = @transform_5, window_bounds = array<i64: 128, 128>}, {pipeline_mode = #tpu.pipeline_mode<synchronous>, transform_indices = @transform_6, window_bounds = array<i64: 128, 128>}, {pipeline_mode = #tpu.pipeline_mode<synchronous>, transform_indices = @transform_7, window_bounds = array<i64: 1, 128>}, {pipeline_mode = #tpu.pipeline_mode<synchronous>, transform_indices = @transform_8, window_bounds = array<i64: 1, 128>}, {pipeline_mode = #tpu.pipeline_mode<synchronous>, transform_indices = @transform_9, window_bounds = array<i64: 1, 128>}, {pipeline_mode = #tpu.pipeline_mode<synchronous>, transform_indices = @transform_10, window_bounds = array<i64: 128, 256>}, {pipeline_mode = #tpu.pipeline_mode<synchronous>, transform_indices = @transform_11, window_bounds = array<i64: 1, 256>}, {pipeline_mode = #tpu.pipeline_mode<synchronous>, transform_indices = @transform_12, window_bounds = array<i64: 256, 128>}, {pipeline_mode = #tpu.pipeline_mode<synchronous>, transform_indices = @transform_13, window_bounds = array<i64: 1, 128>}, {pipeline_mode = #tpu.pipeline_mode<synchronous>, transform_indices = @transform_14, window_bounds = array<i64: 1, 128>}, {pipeline_mode = #tpu.pipeline_mode<synchronous>, transform_indices = @transform_15, window_bounds = array<i64: 1, 128>}, {transform_indices = @transform_16, window_bounds = array<i64: 1, 128, 128>}]} {
    %c0_i32 = arith.constant 0 : i32
    %0 = arith.cmpi eq, %arg2, %c0_i32 : i32
    %1 = arith.extui %0 : i1 to i32
    %c0_i32_0 = arith.constant 0 : i32
    %2 = arith.cmpi ne, %1, %c0_i32_0 : i32
    scf.if %2 {
      %cst_94 = arith.constant 0xFF800000 : f32
      %142 = vector.broadcast %cst_94 : f32 to vector<4x128x1xf32>
      %c0_95 = arith.constant 0 : index
      %c0_96 = arith.constant 0 : index
      %c0_97 = arith.constant 0 : index
      %143 = vector.load %arg21[%c0_95, %c0_96, %c0_97] : memref<4x128x1xf32, #tpu.memory_space<vmem>>, vector<4x128x1xf32>
      tpu.vector_store %arg21[%c0_95, %c0_96, %c0_97], %142 {strides = array<i32>} : memref<4x128x1xf32, #tpu.memory_space<vmem>>, vector<4x128x1xf32>,
      %cst_98 = arith.constant 0.000000e+00 : f32
      %144 = vector.broadcast %cst_98 : f32 to vector<4x128x1xf32>
      %c0_99 = arith.constant 0 : index
      %c0_100 = arith.constant 0 : index
      %c0_101 = arith.constant 0 : index
      %145 = vector.load %arg22[%c0_99, %c0_100, %c0_101] : memref<4x128x1xf32, #tpu.memory_space<vmem>>, vector<4x128x1xf32>
      tpu.vector_store %arg22[%c0_99, %c0_100, %c0_101], %144 {strides = array<i32>} : memref<4x128x1xf32, #tpu.memory_space<vmem>>, vector<4x128x1xf32>,
      %cst_102 = arith.constant 0.000000e+00 : f32
      %146 = vector.broadcast %cst_102 : f32 to vector<128x128xf32>
      %c0_103 = arith.constant 0 : index
      %c0_104 = arith.constant 0 : index
      %147 = vector.load %arg23[%c0_103, %c0_104] : memref<128x128xf32, #tpu.memory_space<vmem>>, vector<128x128xf32>
      tpu.vector_store %arg23[%c0_103, %c0_104], %146 {strides = array<i32>} : memref<128x128xf32, #tpu.memory_space<vmem>>, vector<128x128xf32>,
      %c0_105 = arith.constant 0 : index
      %c0_106 = arith.constant 0 : index
      %c0_107 = arith.constant 0 : index
      %148 = vector.load %arg3[%c0_105, %c0_106, %c0_107] : memref<1x128x128xf32, #tpu.memory_space<vmem>>, vector<1x128x128xf32>
      %149 = vector.shape_cast %148 : vector<1x128x128xf32> to vector<128x128xf32>
      %c0_108 = arith.constant 0 : index
      %c0_109 = arith.constant 0 : index
      %150 = vector.load %arg6[%c0_108, %c0_109] : memref<128x128xf32, #tpu.memory_space<vmem>>, vector<128x128xf32>
      %cst_110 = arith.constant dense<0.000000e+00> : vector<128x128xf32>
      %151 = tpu.matmul %149, %150, %cst_110 {dimension_numbers = #tpu.dot_dimension_numbers<[1], [0], [0], [1], [0, 0, 1, 1], [], []>} : vector<128x128xf32>, vector<128x128xf32>, vector<128x128xf32> -> vector<128x128xf32>
      %c0_111 = arith.constant 0 : index
      %c0_112 = arith.constant 0 : index
      %152 = vector.load %arg20[%c0_111, %c0_112] : memref<128x128xf32, #tpu.memory_space<vmem>>, vector<128x128xf32>
      tpu.vector_store %arg20[%c0_111, %c0_112], %151 {strides = array<i32>} : memref<128x128xf32, #tpu.memory_space<vmem>>, vector<128x128xf32>,
    } else {
    }
    %c0 = arith.constant 0 : index
    %c0_1 = arith.constant 0 : index
    %c0_2 = arith.constant 0 : index
    %3 = vector.load %arg4[%c0, %c0_1, %c0_2] : memref<1x128x128xf32, #tpu.memory_space<vmem>>, vector<1x128x128xf32>
    %4 = vector.shape_cast %3 : vector<1x128x128xf32> to vector<128x128xf32>
    %c0_3 = arith.constant 0 : index
    %c0_4 = arith.constant 0 : index
    %5 = vector.load %arg7[%c0_3, %c0_4] : memref<128x128xf32, #tpu.memory_space<vmem>>, vector<128x128xf32>
    %cst = arith.constant dense<0.000000e+00> : vector<128x128xf32>
    %6 = tpu.matmul %4, %5, %cst {dimension_numbers = #tpu.dot_dimension_numbers<[1], [0], [0], [1], [0, 0, 1, 1], [], []>} : vector<128x128xf32>, vector<128x128xf32>, vector<128x128xf32> -> vector<128x128xf32>
    %c0_5 = arith.constant 0 : index
    %c0_6 = arith.constant 0 : index
    %c0_7 = arith.constant 0 : index
    %7 = vector.load %arg5[%c0_5, %c0_6, %c0_7] : memref<1x128x128xf32, #tpu.memory_space<vmem>>, vector<1x128x128xf32>
    %8 = vector.shape_cast %7 : vector<1x128x128xf32> to vector<128x128xf32>
    %c0_8 = arith.constant 0 : index
    %c0_9 = arith.constant 0 : index
    %9 = vector.load %arg8[%c0_8, %c0_9] : memref<128x128xf32, #tpu.memory_space<vmem>>, vector<128x128xf32>
    %cst_10 = arith.constant dense<0.000000e+00> : vector<128x128xf32>
    %10 = tpu.matmul %8, %9, %cst_10 {dimension_numbers = #tpu.dot_dimension_numbers<[1], [0], [0], [1], [0, 0, 1, 1], [], []>} : vector<128x128xf32>, vector<128x128xf32>, vector<128x128xf32> -> vector<128x128xf32>
    %c0_11 = arith.constant 0 : index
    %c0_12 = arith.constant 0 : index
    %11 = vector.load %arg20[%c0_11, %c0_12] : memref<128x128xf32, #tpu.memory_space<vmem>>, vector<128x32xf32>
    %12 = vector.extract_strided_slice %6 {offsets = [0, 0], sizes = [128, 32], strides = [1, 1]} : vector<128x128xf32> to vector<128x32xf32>
    %13 = vector.extract_strided_slice %10 {offsets = [0, 0], sizes = [128, 32], strides = [1, 1]} : vector<128x128xf32> to vector<128x32xf32>
    %cst_13 = arith.constant dense<0.000000e+00> : vector<128x128xf32>
    %14 = tpu.matmul %11, %12, %cst_13 {dimension_numbers = #tpu.dot_dimension_numbers<[1], [1], [0], [0], [0, 0, 1, 0], [], []>} : vector<128x32xf32>, vector<128x32xf32>, vector<128x128xf32> -> vector<128x128xf32>
    %c0_14 = arith.constant 0 : index
    %c0_15 = arith.constant 0 : index
    %c0_16 = arith.constant 0 : index
    %15 = vector.load %arg21[%c0_14, %c0_15, %c0_16] : memref<4x128x1xf32, #tpu.memory_space<vmem>>, vector<1x128x1xf32>
    %16 = vector.shape_cast %15 : vector<1x128x1xf32> to vector<128x1xf32>
    %cst_17 = arith.constant dense<0xFF800000> : vector<128xf32>
    %17 = vector.multi_reduction <maximumf>, %14, %cst_17 [1] : vector<128x128xf32> to vector<128xf32>
    %18 = vector.shape_cast %17 : vector<128xf32> to vector<128x1xf32>
    %19 = arith.maximumf %16, %18 : vector<128x1xf32>
    %20 = arith.subf %16, %19 : vector<128x1xf32>
    %21 = math.exp %20 : vector<128x1xf32>
    %22 = vector.broadcast %19 : vector<128x1xf32> to vector<128x128xf32>
    %23 = arith.subf %14, %22 : vector<128x128xf32>
    %24 = math.exp %23 : vector<128x128xf32>
    %c0_18 = arith.constant 0 : index
    %c0_19 = arith.constant 0 : index
    %c0_20 = arith.constant 0 : index
    %25 = vector.load %arg22[%c0_18, %c0_19, %c0_20] : memref<4x128x1xf32, #tpu.memory_space<vmem>>, vector<1x128x1xf32>
    %26 = vector.shape_cast %25 : vector<1x128x1xf32> to vector<128x1xf32>
    %27 = arith.mulf %21, %26 : vector<128x1xf32>
    %cst_21 = arith.constant dense<0.000000e+00> : vector<128xf32>
    %28 = vector.multi_reduction <add>, %24, %cst_21 [1] : vector<128x128xf32> to vector<128xf32>
    %29 = vector.shape_cast %28 : vector<128xf32> to vector<128x1xf32>
    %30 = arith.addf %27, %29 : vector<128x1xf32>
    %c0_22 = arith.constant 0 : index
    %c0_23 = arith.constant 0 : index
    %c0_24 = arith.constant 0 : index
    %31 = vector.load %arg22[%c0_22, %c0_23, %c0_24] : memref<4x128x1xf32, #tpu.memory_space<vmem>>, vector<1x128x1xf32>
    %32 = vector.shape_cast %31 : vector<1x128x1xf32> to vector<128x1xf32>
    %33 = vector.shape_cast %30 : vector<128x1xf32> to vector<1x128x1xf32>
    tpu.vector_store %arg22[%c0_22, %c0_23, %c0_24], %33 {strides = array<i32>} : memref<4x128x1xf32, #tpu.memory_space<vmem>>, vector<1x128x1xf32>,
    %cst_25 = arith.constant dense<0.000000e+00> : vector<128x32xf32>
    %34 = tpu.matmul %24, %13, %cst_25 {dimension_numbers = #tpu.dot_dimension_numbers<[1], [0], [0], [1], [0, 0, 1, 1], [], []>} : vector<128x128xf32>, vector<128x32xf32>, vector<128x32xf32> -> vector<128x32xf32>
    %c0_26 = arith.constant 0 : index
    %c0_27 = arith.constant 0 : index
    %35 = vector.load %arg23[%c0_26, %c0_27] : memref<128x128xf32, #tpu.memory_space<vmem>>, vector<128x32xf32>
    %36 = vector.broadcast %21 : vector<128x1xf32> to vector<128x32xf32>
    %37 = arith.mulf %36, %35 : vector<128x32xf32>
    %38 = arith.addf %37, %34 : vector<128x32xf32>
    %c0_28 = arith.constant 0 : index
    %c0_29 = arith.constant 0 : index
    %39 = vector.load %arg23[%c0_28, %c0_29] : memref<128x128xf32, #tpu.memory_space<vmem>>, vector<128x32xf32>
    tpu.vector_store %arg23[%c0_28, %c0_29], %38 {strides = array<i32>} : memref<128x128xf32, #tpu.memory_space<vmem>>, vector<128x32xf32>,
    %c0_30 = arith.constant 0 : index
    %c0_31 = arith.constant 0 : index
    %c0_32 = arith.constant 0 : index
    %40 = vector.load %arg21[%c0_30, %c0_31, %c0_32] : memref<4x128x1xf32, #tpu.memory_space<vmem>>, vector<1x128x1xf32>
    %41 = vector.shape_cast %40 : vector<1x128x1xf32> to vector<128x1xf32>
    %42 = vector.shape_cast %19 : vector<128x1xf32> to vector<1x128x1xf32>
    tpu.vector_store %arg21[%c0_30, %c0_31, %c0_32], %42 {strides = array<i32>} : memref<4x128x1xf32, #tpu.memory_space<vmem>>, vector<1x128x1xf32>,
    %c0_33 = arith.constant 0 : index
    %c32 = arith.constant 32 : index
    %43 = vector.load %arg20[%c0_33, %c32] : memref<128x128xf32, #tpu.memory_space<vmem>>, vector<128x32xf32>
    %44 = vector.extract_strided_slice %6 {offsets = [0, 32], sizes = [128, 32], strides = [1, 1]} : vector<128x128xf32> to vector<128x32xf32>
    %45 = vector.extract_strided_slice %10 {offsets = [0, 32], sizes = [128, 32], strides = [1, 1]} : vector<128x128xf32> to vector<128x32xf32>
    %cst_34 = arith.constant dense<0.000000e+00> : vector<128x128xf32>
    %46 = tpu.matmul %43, %44, %cst_34 {dimension_numbers = #tpu.dot_dimension_numbers<[1], [1], [0], [0], [0, 0, 1, 0], [], []>} : vector<128x32xf32>, vector<128x32xf32>, vector<128x128xf32> -> vector<128x128xf32>
    %c1 = arith.constant 1 : index
    %c0_35 = arith.constant 0 : index
    %c0_36 = arith.constant 0 : index
    %47 = vector.load %arg21[%c1, %c0_35, %c0_36] : memref<4x128x1xf32, #tpu.memory_space<vmem>>, vector<1x128x1xf32>
    %48 = vector.shape_cast %47 : vector<1x128x1xf32> to vector<128x1xf32>
    %cst_37 = arith.constant dense<0xFF800000> : vector<128xf32>
    %49 = vector.multi_reduction <maximumf>, %46, %cst_37 [1] : vector<128x128xf32> to vector<128xf32>
    %50 = vector.shape_cast %49 : vector<128xf32> to vector<128x1xf32>
    %51 = arith.maximumf %48, %50 : vector<128x1xf32>
    %52 = arith.subf %48, %51 : vector<128x1xf32>
    %53 = math.exp %52 : vector<128x1xf32>
    %54 = vector.broadcast %51 : vector<128x1xf32> to vector<128x128xf32>
    %55 = arith.subf %46, %54 : vector<128x128xf32>
    %56 = math.exp %55 : vector<128x128xf32>
    %c1_38 = arith.constant 1 : index
    %c0_39 = arith.constant 0 : index
    %c0_40 = arith.constant 0 : index
    %57 = vector.load %arg22[%c1_38, %c0_39, %c0_40] : memref<4x128x1xf32, #tpu.memory_space<vmem>>, vector<1x128x1xf32>
    %58 = vector.shape_cast %57 : vector<1x128x1xf32> to vector<128x1xf32>
    %59 = arith.mulf %53, %58 : vector<128x1xf32>
    %cst_41 = arith.constant dense<0.000000e+00> : vector<128xf32>
    %60 = vector.multi_reduction <add>, %56, %cst_41 [1] : vector<128x128xf32> to vector<128xf32>
    %61 = vector.shape_cast %60 : vector<128xf32> to vector<128x1xf32>
    %62 = arith.addf %59, %61 : vector<128x1xf32>
    %c1_42 = arith.constant 1 : index
    %c0_43 = arith.constant 0 : index
    %c0_44 = arith.constant 0 : index
    %63 = vector.load %arg22[%c1_42, %c0_43, %c0_44] : memref<4x128x1xf32, #tpu.memory_space<vmem>>, vector<1x128x1xf32>
    %64 = vector.shape_cast %63 : vector<1x128x1xf32> to vector<128x1xf32>
    %65 = vector.shape_cast %62 : vector<128x1xf32> to vector<1x128x1xf32>
    tpu.vector_store %arg22[%c1_42, %c0_43, %c0_44], %65 {strides = array<i32>} : memref<4x128x1xf32, #tpu.memory_space<vmem>>, vector<1x128x1xf32>,
    %cst_45 = arith.constant dense<0.000000e+00> : vector<128x32xf32>
    %66 = tpu.matmul %56, %45, %cst_45 {dimension_numbers = #tpu.dot_dimension_numbers<[1], [0], [0], [1], [0, 0, 1, 1], [], []>} : vector<128x128xf32>, vector<128x32xf32>, vector<128x32xf32> -> vector<128x32xf32>
    %c0_46 = arith.constant 0 : index
    %c32_47 = arith.constant 32 : index
    %67 = vector.load %arg23[%c0_46, %c32_47] : memref<128x128xf32, #tpu.memory_space<vmem>>, vector<128x32xf32>
    %68 = vector.broadcast %53 : vector<128x1xf32> to vector<128x32xf32>
    %69 = arith.mulf %68, %67 : vector<128x32xf32>
    %70 = arith.addf %69, %66 : vector<128x32xf32>
    %c0_48 = arith.constant 0 : index
    %c32_49 = arith.constant 32 : index
    %71 = vector.load %arg23[%c0_48, %c32_49] : memref<128x128xf32, #tpu.memory_space<vmem>>, vector<128x32xf32>
    tpu.vector_store %arg23[%c0_48, %c32_49], %70 {strides = array<i32>} : memref<128x128xf32, #tpu.memory_space<vmem>>, vector<128x32xf32>,
    %c1_50 = arith.constant 1 : index
    %c0_51 = arith.constant 0 : index
    %c0_52 = arith.constant 0 : index
    %72 = vector.load %arg21[%c1_50, %c0_51, %c0_52] : memref<4x128x1xf32, #tpu.memory_space<vmem>>, vector<1x128x1xf32>
    %73 = vector.shape_cast %72 : vector<1x128x1xf32> to vector<128x1xf32>
    %74 = vector.shape_cast %51 : vector<128x1xf32> to vector<1x128x1xf32>
    tpu.vector_store %arg21[%c1_50, %c0_51, %c0_52], %74 {strides = array<i32>} : memref<4x128x1xf32, #tpu.memory_space<vmem>>, vector<1x128x1xf32>,
    %c0_53 = arith.constant 0 : index
    %c64 = arith.constant 64 : index
    %75 = vector.load %arg20[%c0_53, %c64] : memref<128x128xf32, #tpu.memory_space<vmem>>, vector<128x32xf32>
    %76 = vector.extract_strided_slice %6 {offsets = [0, 64], sizes = [128, 32], strides = [1, 1]} : vector<128x128xf32> to vector<128x32xf32>
    %77 = vector.extract_strided_slice %10 {offsets = [0, 64], sizes = [128, 32], strides = [1, 1]} : vector<128x128xf32> to vector<128x32xf32>
    %cst_54 = arith.constant dense<0.000000e+00> : vector<128x128xf32>
    %78 = tpu.matmul %75, %76, %cst_54 {dimension_numbers = #tpu.dot_dimension_numbers<[1], [1], [0], [0], [0, 0, 1, 0], [], []>} : vector<128x32xf32>, vector<128x32xf32>, vector<128x128xf32> -> vector<128x128xf32>
    %c2 = arith.constant 2 : index
    %c0_55 = arith.constant 0 : index
    %c0_56 = arith.constant 0 : index
    %79 = vector.load %arg21[%c2, %c0_55, %c0_56] : memref<4x128x1xf32, #tpu.memory_space<vmem>>, vector<1x128x1xf32>
    %80 = vector.shape_cast %79 : vector<1x128x1xf32> to vector<128x1xf32>
    %cst_57 = arith.constant dense<0xFF800000> : vector<128xf32>
    %81 = vector.multi_reduction <maximumf>, %78, %cst_57 [1] : vector<128x128xf32> to vector<128xf32>
    %82 = vector.shape_cast %81 : vector<128xf32> to vector<128x1xf32>
    %83 = arith.maximumf %80, %82 : vector<128x1xf32>
    %84 = arith.subf %80, %83 : vector<128x1xf32>
    %85 = math.exp %84 : vector<128x1xf32>
    %86 = vector.broadcast %83 : vector<128x1xf32> to vector<128x128xf32>
    %87 = arith.subf %78, %86 : vector<128x128xf32>
    %88 = math.exp %87 : vector<128x128xf32>
    %c2_58 = arith.constant 2 : index
    %c0_59 = arith.constant 0 : index
    %c0_60 = arith.constant 0 : index
    %89 = vector.load %arg22[%c2_58, %c0_59, %c0_60] : memref<4x128x1xf32, #tpu.memory_space<vmem>>, vector<1x128x1xf32>
    %90 = vector.shape_cast %89 : vector<1x128x1xf32> to vector<128x1xf32>
    %91 = arith.mulf %85, %90 : vector<128x1xf32>
    %cst_61 = arith.constant dense<0.000000e+00> : vector<128xf32>
    %92 = vector.multi_reduction <add>, %88, %cst_61 [1] : vector<128x128xf32> to vector<128xf32>
    %93 = vector.shape_cast %92 : vector<128xf32> to vector<128x1xf32>
    %94 = arith.addf %91, %93 : vector<128x1xf32>
    %c2_62 = arith.constant 2 : index
    %c0_63 = arith.constant 0 : index
    %c0_64 = arith.constant 0 : index
    %95 = vector.load %arg22[%c2_62, %c0_63, %c0_64] : memref<4x128x1xf32, #tpu.memory_space<vmem>>, vector<1x128x1xf32>
    %96 = vector.shape_cast %95 : vector<1x128x1xf32> to vector<128x1xf32>
    %97 = vector.shape_cast %94 : vector<128x1xf32> to vector<1x128x1xf32>
    tpu.vector_store %arg22[%c2_62, %c0_63, %c0_64], %97 {strides = array<i32>} : memref<4x128x1xf32, #tpu.memory_space<vmem>>, vector<1x128x1xf32>,
    %cst_65 = arith.constant dense<0.000000e+00> : vector<128x32xf32>
    %98 = tpu.matmul %88, %77, %cst_65 {dimension_numbers = #tpu.dot_dimension_numbers<[1], [0], [0], [1], [0, 0, 1, 1], [], []>} : vector<128x128xf32>, vector<128x32xf32>, vector<128x32xf32> -> vector<128x32xf32>
    %c0_66 = arith.constant 0 : index
    %c64_67 = arith.constant 64 : index
    %99 = vector.load %arg23[%c0_66, %c64_67] : memref<128x128xf32, #tpu.memory_space<vmem>>, vector<128x32xf32>
    %100 = vector.broadcast %85 : vector<128x1xf32> to vector<128x32xf32>
    %101 = arith.mulf %100, %99 : vector<128x32xf32>
    %102 = arith.addf %101, %98 : vector<128x32xf32>
    %c0_68 = arith.constant 0 : index
    %c64_69 = arith.constant 64 : index
    %103 = vector.load %arg23[%c0_68, %c64_69] : memref<128x128xf32, #tpu.memory_space<vmem>>, vector<128x32xf32>
    tpu.vector_store %arg23[%c0_68, %c64_69], %102 {strides = array<i32>} : memref<128x128xf32, #tpu.memory_space<vmem>>, vector<128x32xf32>,
    %c2_70 = arith.constant 2 : index
    %c0_71 = arith.constant 0 : index
    %c0_72 = arith.constant 0 : index
    %104 = vector.load %arg21[%c2_70, %c0_71, %c0_72] : memref<4x128x1xf32, #tpu.memory_space<vmem>>, vector<1x128x1xf32>
    %105 = vector.shape_cast %104 : vector<1x128x1xf32> to vector<128x1xf32>
    %106 = vector.shape_cast %83 : vector<128x1xf32> to vector<1x128x1xf32>
    tpu.vector_store %arg21[%c2_70, %c0_71, %c0_72], %106 {strides = array<i32>} : memref<4x128x1xf32, #tpu.memory_space<vmem>>, vector<1x128x1xf32>,
    %c0_73 = arith.constant 0 : index
    %c96 = arith.constant 96 : index
    %107 = vector.load %arg20[%c0_73, %c96] : memref<128x128xf32, #tpu.memory_space<vmem>>, vector<128x32xf32>
    %108 = vector.extract_strided_slice %6 {offsets = [0, 96], sizes = [128, 32], strides = [1, 1]} : vector<128x128xf32> to vector<128x32xf32>
    %109 = vector.extract_strided_slice %10 {offsets = [0, 96], sizes = [128, 32], strides = [1, 1]} : vector<128x128xf32> to vector<128x32xf32>
    %cst_74 = arith.constant dense<0.000000e+00> : vector<128x128xf32>
    %110 = tpu.matmul %107, %108, %cst_74 {dimension_numbers = #tpu.dot_dimension_numbers<[1], [1], [0], [0], [0, 0, 1, 0], [], []>} : vector<128x32xf32>, vector<128x32xf32>, vector<128x128xf32> -> vector<128x128xf32>
    %c3 = arith.constant 3 : index
    %c0_75 = arith.constant 0 : index
    %c0_76 = arith.constant 0 : index
    %111 = vector.load %arg21[%c3, %c0_75, %c0_76] : memref<4x128x1xf32, #tpu.memory_space<vmem>>, vector<1x128x1xf32>
    %112 = vector.shape_cast %111 : vector<1x128x1xf32> to vector<128x1xf32>
    %cst_77 = arith.constant dense<0xFF800000> : vector<128xf32>
    %113 = vector.multi_reduction <maximumf>, %110, %cst_77 [1] : vector<128x128xf32> to vector<128xf32>
    %114 = vector.shape_cast %113 : vector<128xf32> to vector<128x1xf32>
    %115 = arith.maximumf %112, %114 : vector<128x1xf32>
    %116 = arith.subf %112, %115 : vector<128x1xf32>
    %117 = math.exp %116 : vector<128x1xf32>
    %118 = vector.broadcast %115 : vector<128x1xf32> to vector<128x128xf32>
    %119 = arith.subf %110, %118 : vector<128x128xf32>
    %120 = math.exp %119 : vector<128x128xf32>
    %c3_78 = arith.constant 3 : index
    %c0_79 = arith.constant 0 : index
    %c0_80 = arith.constant 0 : index
    %121 = vector.load %arg22[%c3_78, %c0_79, %c0_80] : memref<4x128x1xf32, #tpu.memory_space<vmem>>, vector<1x128x1xf32>
    %122 = vector.shape_cast %121 : vector<1x128x1xf32> to vector<128x1xf32>
    %123 = arith.mulf %117, %122 : vector<128x1xf32>
    %cst_81 = arith.constant dense<0.000000e+00> : vector<128xf32>
    %124 = vector.multi_reduction <add>, %120, %cst_81 [1] : vector<128x128xf32> to vector<128xf32>
    %125 = vector.shape_cast %124 : vector<128xf32> to vector<128x1xf32>
    %126 = arith.addf %123, %125 : vector<128x1xf32>
    %c3_82 = arith.constant 3 : index
    %c0_83 = arith.constant 0 : index
    %c0_84 = arith.constant 0 : index
    %127 = vector.load %arg22[%c3_82, %c0_83, %c0_84] : memref<4x128x1xf32, #tpu.memory_space<vmem>>, vector<1x128x1xf32>
    %128 = vector.shape_cast %127 : vector<1x128x1xf32> to vector<128x1xf32>
    %129 = vector.shape_cast %126 : vector<128x1xf32> to vector<1x128x1xf32>
    tpu.vector_store %arg22[%c3_82, %c0_83, %c0_84], %129 {strides = array<i32>} : memref<4x128x1xf32, #tpu.memory_space<vmem>>, vector<1x128x1xf32>,
    %cst_85 = arith.constant dense<0.000000e+00> : vector<128x32xf32>
    %130 = tpu.matmul %120, %109, %cst_85 {dimension_numbers = #tpu.dot_dimension_numbers<[1], [0], [0], [1], [0, 0, 1, 1], [], []>} : vector<128x128xf32>, vector<128x32xf32>, vector<128x32xf32> -> vector<128x32xf32>
    %c0_86 = arith.constant 0 : index
    %c96_87 = arith.constant 96 : index
    %131 = vector.load %arg23[%c0_86, %c96_87] : memref<128x128xf32, #tpu.memory_space<vmem>>, vector<128x32xf32>
    %132 = vector.broadcast %117 : vector<128x1xf32> to vector<128x32xf32>
    %133 = arith.mulf %132, %131 : vector<128x32xf32>
    %134 = arith.addf %133, %130 : vector<128x32xf32>
    %c0_88 = arith.constant 0 : index
    %c96_89 = arith.constant 96 : index
    %135 = vector.load %arg23[%c0_88, %c96_89] : memref<128x128xf32, #tpu.memory_space<vmem>>, vector<128x32xf32>
    tpu.vector_store %arg23[%c0_88, %c96_89], %134 {strides = array<i32>} : memref<128x128xf32, #tpu.memory_space<vmem>>, vector<128x32xf32>,
    %c3_90 = arith.constant 3 : index
    %c0_91 = arith.constant 0 : index
    %c0_92 = arith.constant 0 : index
    %136 = vector.load %arg21[%c3_90, %c0_91, %c0_92] : memref<4x128x1xf32, #tpu.memory_space<vmem>>, vector<1x128x1xf32>
    %137 = vector.shape_cast %136 : vector<1x128x1xf32> to vector<128x1xf32>
    %138 = vector.shape_cast %115 : vector<128x1xf32> to vector<1x128x1xf32>
    tpu.vector_store %arg21[%c3_90, %c0_91, %c0_92], %138 {strides = array<i32>} : memref<4x128x1xf32, #tpu.memory_space<vmem>>, vector<1x128x1xf32>,
    %c1_i32 = arith.constant 1 : i32
    %139 = arith.cmpi eq, %arg2, %c1_i32 : i32
    %140 = arith.extui %139 : i1 to i32
    %c0_i32_93 = arith.constant 0 : i32
    %141 = arith.cmpi ne, %140, %c0_i32_93 : i32
    scf.if %141 {
      %c0_94 = arith.constant 0 : index
      %c0_95 = arith.constant 0 : index
      %142 = vector.load %arg23[%c0_94, %c0_95] : memref<128x128xf32, #tpu.memory_space<vmem>>, vector<128x32xf32>
      %c0_96 = arith.constant 0 : index
      %c0_97 = arith.constant 0 : index
      %c0_98 = arith.constant 0 : index
      %143 = vector.load %arg22[%c0_96, %c0_97, %c0_98] : memref<4x128x1xf32, #tpu.memory_space<vmem>>, vector<1x128x1xf32>
      %144 = vector.shape_cast %143 : vector<1x128x1xf32> to vector<128x1xf32>
      %145 = tpu.reciprocal %144 {approx = true} : vector<128x1xf32> -> vector<128x1xf32>
      %146 = vector.broadcast %145 : vector<128x1xf32> to vector<128x32xf32>
      %147 = arith.mulf %142, %146 : vector<128x32xf32>
      %c0_99 = arith.constant 0 : index
      %c0_100 = arith.constant 0 : index
      %148 = vector.load %arg23[%c0_99, %c0_100] : memref<128x128xf32, #tpu.memory_space<vmem>>, vector<128x32xf32>
      tpu.vector_store %arg23[%c0_99, %c0_100], %147 {strides = array<i32>} : memref<128x128xf32, #tpu.memory_space<vmem>>, vector<128x32xf32>,
      %c0_101 = arith.constant 0 : index
      %c32_102 = arith.constant 32 : index
      %149 = vector.load %arg23[%c0_101, %c32_102] : memref<128x128xf32, #tpu.memory_space<vmem>>, vector<128x32xf32>
      %c1_103 = arith.constant 1 : index
      %c0_104 = arith.constant 0 : index
      %c0_105 = arith.constant 0 : index
      %150 = vector.load %arg22[%c1_103, %c0_104, %c0_105] : memref<4x128x1xf32, #tpu.memory_space<vmem>>, vector<1x128x1xf32>
      %151 = vector.shape_cast %150 : vector<1x128x1xf32> to vector<128x1xf32>
      %152 = tpu.reciprocal %151 {approx = true} : vector<128x1xf32> -> vector<128x1xf32>
      %153 = vector.broadcast %152 : vector<128x1xf32> to vector<128x32xf32>
      %154 = arith.mulf %149, %153 : vector<128x32xf32>
      %c0_106 = arith.constant 0 : index
      %c32_107 = arith.constant 32 : index
      %155 = vector.load %arg23[%c0_106, %c32_107] : memref<128x128xf32, #tpu.memory_space<vmem>>, vector<128x32xf32>
      tpu.vector_store %arg23[%c0_106, %c32_107], %154 {strides = array<i32>} : memref<128x128xf32, #tpu.memory_space<vmem>>, vector<128x32xf32>,
      %c0_108 = arith.constant 0 : index
      %c64_109 = arith.constant 64 : index
      %156 = vector.load %arg23[%c0_108, %c64_109] : memref<128x128xf32, #tpu.memory_space<vmem>>, vector<128x32xf32>
      %c2_110 = arith.constant 2 : index
      %c0_111 = arith.constant 0 : index
      %c0_112 = arith.constant 0 : index
      %157 = vector.load %arg22[%c2_110, %c0_111, %c0_112] : memref<4x128x1xf32, #tpu.memory_space<vmem>>, vector<1x128x1xf32>
      %158 = vector.shape_cast %157 : vector<1x128x1xf32> to vector<128x1xf32>
      %159 = tpu.reciprocal %158 {approx = true} : vector<128x1xf32> -> vector<128x1xf32>
      %160 = vector.broadcast %159 : vector<128x1xf32> to vector<128x32xf32>
      %161 = arith.mulf %156, %160 : vector<128x32xf32>
      %c0_113 = arith.constant 0 : index
      %c64_114 = arith.constant 64 : index
      %162 = vector.load %arg23[%c0_113, %c64_114] : memref<128x128xf32, #tpu.memory_space<vmem>>, vector<128x32xf32>
      tpu.vector_store %arg23[%c0_113, %c64_114], %161 {strides = array<i32>} : memref<128x128xf32, #tpu.memory_space<vmem>>, vector<128x32xf32>,
      %c0_115 = arith.constant 0 : index
      %c96_116 = arith.constant 96 : index
      %163 = vector.load %arg23[%c0_115, %c96_116] : memref<128x128xf32, #tpu.memory_space<vmem>>, vector<128x32xf32>
      %c3_117 = arith.constant 3 : index
      %c0_118 = arith.constant 0 : index
      %c0_119 = arith.constant 0 : index
      %164 = vector.load %arg22[%c3_117, %c0_118, %c0_119] : memref<4x128x1xf32, #tpu.memory_space<vmem>>, vector<1x128x1xf32>
      %165 = vector.shape_cast %164 : vector<1x128x1xf32> to vector<128x1xf32>
      %166 = tpu.reciprocal %165 {approx = true} : vector<128x1xf32> -> vector<128x1xf32>
      %167 = vector.broadcast %166 : vector<128x1xf32> to vector<128x32xf32>
      %168 = arith.mulf %163, %167 : vector<128x32xf32>
      %c0_120 = arith.constant 0 : index
      %c96_121 = arith.constant 96 : index
      %169 = vector.load %arg23[%c0_120, %c96_121] : memref<128x128xf32, #tpu.memory_space<vmem>>, vector<128x32xf32>
      tpu.vector_store %arg23[%c0_120, %c96_121], %168 {strides = array<i32>} : memref<128x128xf32, #tpu.memory_space<vmem>>, vector<128x32xf32>,
      %c0_122 = arith.constant 0 : index
      %c0_123 = arith.constant 0 : index
      %170 = vector.load %arg23[%c0_122, %c0_123] : memref<128x128xf32, #tpu.memory_space<vmem>>, vector<128x128xf32>
      %c0_124 = arith.constant 0 : index
      %c0_125 = arith.constant 0 : index
      %171 = vector.load %arg9[%c0_124, %c0_125] : memref<128x128xf32, #tpu.memory_space<vmem>>, vector<128x128xf32>
      %cst_126 = arith.constant dense<0.000000e+00> : vector<128x128xf32>
      %172 = tpu.matmul %170, %171, %cst_126 {dimension_numbers = #tpu.dot_dimension_numbers<[1], [0], [0], [1], [0, 0, 1, 1], [], []>} : vector<128x128xf32>, vector<128x128xf32>, vector<128x128xf32> -> vector<128x128xf32>
      %c0_127 = arith.constant 0 : index
      %c0_128 = arith.constant 0 : index
      %173 = vector.load %arg10[%c0_127, %c0_128] : memref<1x128xf32, #tpu.memory_space<vmem>>, vector<1x128xf32>
      %174 = vector.broadcast %173 : vector<1x128xf32> to vector<128x128xf32>
      %175 = arith.addf %172, %174 : vector<128x128xf32>
      %c0_129 = arith.constant 0 : index
      %c0_130 = arith.constant 0 : index
      %c0_131 = arith.constant 0 : index
      %176 = vector.load %arg3[%c0_129, %c0_130, %c0_131] : memref<1x128x128xf32, #tpu.memory_space<vmem>>, vector<1x128x128xf32>
      %177 = vector.shape_cast %176 : vector<1x128x128xf32> to vector<128x128xf32>
      %178 = arith.addf %175, %177 : vector<128x128xf32>
      %c0_132 = arith.constant 0 : index
      %c0_133 = arith.constant 0 : index
      %179 = vector.load %arg11[%c0_132, %c0_133] : memref<1x128xf32, #tpu.memory_space<vmem>>, vector<1x128xf32>
      %c0_134 = arith.constant 0 : index
      %c0_135 = arith.constant 0 : index
      %180 = vector.load %arg12[%c0_134, %c0_135] : memref<1x128xf32, #tpu.memory_space<vmem>>, vector<1x128xf32>
      %cst_136 = arith.constant dense<0.000000e+00> : vector<128xf32>
      %181 = vector.multi_reduction <add>, %178, %cst_136 [1] : vector<128x128xf32> to vector<128xf32>
      %182 = vector.shape_cast %181 : vector<128xf32> to vector<128x1xf32>
      %cst_137 = arith.constant 1.280000e+02 : f32
      %183 = vector.broadcast %cst_137 : f32 to vector<128x1xf32>
      %184 = arith.divf %182, %183 : vector<128x1xf32>
      %185 = vector.broadcast %184 : vector<128x1xf32> to vector<128x128xf32>
      %186 = arith.subf %178, %185 : vector<128x128xf32>
      %187 = arith.mulf %186, %186 : vector<128x128xf32>
      %cst_138 = arith.constant dense<0.000000e+00> : vector<128xf32>
      %188 = vector.multi_reduction <add>, %187, %cst_138 [1] : vector<128x128xf32> to vector<128xf32>
      %189 = vector.shape_cast %188 : vector<128xf32> to vector<128x1xf32>
      %cst_139 = arith.constant 1.280000e+02 : f32
      %190 = vector.broadcast %cst_139 : f32 to vector<128x1xf32>
      %191 = arith.divf %189, %190 : vector<128x1xf32>
      %192 = vector.broadcast %184 : vector<128x1xf32> to vector<128x128xf32>
      %193 = arith.subf %178, %192 : vector<128x128xf32>
      %cst_140 = arith.constant 9.99999974E-6 : f32
      %194 = vector.broadcast %cst_140 : f32 to vector<128x1xf32>
      %195 = arith.addf %191, %194 : vector<128x1xf32>
      %196 = math.rsqrt %195 : vector<128x1xf32>
      %197 = vector.broadcast %196 : vector<128x1xf32> to vector<128x128xf32>
      %198 = arith.mulf %193, %197 : vector<128x128xf32>
      %199 = vector.broadcast %179 : vector<1x128xf32> to vector<128x128xf32>
      %200 = arith.mulf %198, %199 : vector<128x128xf32>
      %201 = vector.broadcast %180 : vector<1x128xf32> to vector<128x128xf32>
      %202 = arith.addf %200, %201 : vector<128x128xf32>
      %c0_141 = arith.constant 0 : index
      %c0_142 = arith.constant 0 : index
      %203 = vector.load %arg13[%c0_141, %c0_142] : memref<128x256xf32, #tpu.memory_space<vmem>>, vector<128x256xf32>
      %cst_143 = arith.constant dense<0.000000e+00> : vector<128x256xf32>
      %204 = tpu.matmul %202, %203, %cst_143 {dimension_numbers = #tpu.dot_dimension_numbers<[1], [0], [0], [1], [0, 0, 1, 1], [], []>} : vector<128x128xf32>, vector<128x256xf32>, vector<128x256xf32> -> vector<128x256xf32>
      %c0_144 = arith.constant 0 : index
      %c0_145 = arith.constant 0 : index
      %205 = vector.load %arg14[%c0_144, %c0_145] : memref<1x256xf32, #tpu.memory_space<vmem>>, vector<1x256xf32>
      %206 = vector.broadcast %205 : vector<1x256xf32> to vector<128x256xf32>
      %207 = arith.addf %204, %206 : vector<128x256xf32>
      %cst_146 = arith.constant 0.000000e+00 : f32
      %208 = vector.broadcast %cst_146 : f32 to vector<128x256xf32>
      %209 = arith.maximumf %207, %208 : vector<128x256xf32>
      %c0_147 = arith.constant 0 : index
      %c0_148 = arith.constant 0 : index
      %210 = vector.load %arg15[%c0_147, %c0_148] : memref<256x128xf32, #tpu.memory_space<vmem>>, vector<256x128xf32>
      %cst_149 = arith.constant dense<0.000000e+00> : vector<128x128xf32>
      %211 = tpu.matmul %209, %210, %cst_149 {dimension_numbers = #tpu.dot_dimension_numbers<[1], [0], [0], [1], [0, 0, 1, 1], [], []>} : vector<128x256xf32>, vector<256x128xf32>, vector<128x128xf32> -> vector<128x128xf32>
      %c0_150 = arith.constant 0 : index
      %c0_151 = arith.constant 0 : index
      %212 = vector.load %arg16[%c0_150, %c0_151] : memref<1x128xf32, #tpu.memory_space<vmem>>, vector<1x128xf32>
      %213 = vector.broadcast %212 : vector<1x128xf32> to vector<128x128xf32>
      %214 = arith.addf %211, %213 : vector<128x128xf32>
      %215 = arith.addf %214, %202 : vector<128x128xf32>
      %c0_152 = arith.constant 0 : index
      %c0_153 = arith.constant 0 : index
      %216 = vector.load %arg17[%c0_152, %c0_153] : memref<1x128xf32, #tpu.memory_space<vmem>>, vector<1x128xf32>
      %c0_154 = arith.constant 0 : index
      %c0_155 = arith.constant 0 : index
      %217 = vector.load %arg18[%c0_154, %c0_155] : memref<1x128xf32, #tpu.memory_space<vmem>>, vector<1x128xf32>
      %cst_156 = arith.constant dense<0.000000e+00> : vector<128xf32>
      %218 = vector.multi_reduction <add>, %215, %cst_156 [1] : vector<128x128xf32> to vector<128xf32>
      %219 = vector.shape_cast %218 : vector<128xf32> to vector<128x1xf32>
      %cst_157 = arith.constant 1.280000e+02 : f32
      %220 = vector.broadcast %cst_157 : f32 to vector<128x1xf32>
      %221 = arith.divf %219, %220 : vector<128x1xf32>
      %222 = vector.broadcast %221 : vector<128x1xf32> to vector<128x128xf32>
      %223 = arith.subf %215, %222 : vector<128x128xf32>
      %224 = arith.mulf %223, %223 : vector<128x128xf32>
      %cst_158 = arith.constant dense<0.000000e+00> : vector<128xf32>
      %225 = vector.multi_reduction <add>, %224, %cst_158 [1] : vector<128x128xf32> to vector<128xf32>
      %226 = vector.shape_cast %225 : vector<128xf32> to vector<128x1xf32>
      %cst_159 = arith.constant 1.280000e+02 : f32
      %227 = vector.broadcast %cst_159 : f32 to vector<128x1xf32>
      %228 = arith.divf %226, %227 : vector<128x1xf32>
      %229 = vector.broadcast %221 : vector<128x1xf32> to vector<128x128xf32>
      %230 = arith.subf %215, %229 : vector<128x128xf32>
      %cst_160 = arith.constant 9.99999974E-6 : f32
      %231 = vector.broadcast %cst_160 : f32 to vector<128x1xf32>
      %232 = arith.addf %228, %231 : vector<128x1xf32>
      %233 = math.rsqrt %232 : vector<128x1xf32>
      %234 = vector.broadcast %233 : vector<128x1xf32> to vector<128x128xf32>
      %235 = arith.mulf %230, %234 : vector<128x128xf32>
      %236 = vector.broadcast %216 : vector<1x128xf32> to vector<128x128xf32>
      %237 = arith.mulf %235, %236 : vector<128x128xf32>
      %238 = vector.broadcast %217 : vector<1x128xf32> to vector<128x128xf32>
      %239 = arith.addf %237, %238 : vector<128x128xf32>
      %c0_161 = arith.constant 0 : index
      %c0_162 = arith.constant 0 : index
      %c0_163 = arith.constant 0 : index
      %240 = vector.load %arg19[%c0_161, %c0_162, %c0_163] : memref<1x128x128xf32, #tpu.memory_space<vmem>>, vector<1x128x128xf32>
      %241 = vector.shape_cast %240 : vector<1x128x128xf32> to vector<128x128xf32>
      %242 = vector.shape_cast %239 : vector<128x128xf32> to vector<1x128x128xf32>
      tpu.vector_store %arg19[%c0_161, %c0_162, %c0_163], %242 {strides = array<i32>} : memref<1x128x128xf32, #tpu.memory_space<vmem>>, vector<1x128x128xf32>,
    } else {
    }
    return
  }
  func.func @transform_0(%arg0: i32, %arg1: i32, %arg2: i32) -> (i32, i32, i32) {
    %c0_i32 = arith.constant 0 : i32
    %c0_i32_0 = arith.constant 0 : i32
    return %arg0, %arg1, %c0_i32 : i32, i32, i32
  }
  func.func @transform_1(%arg0: i32, %arg1: i32, %arg2: i32) -> (i32, i32, i32) {
    %c0_i32 = arith.constant 0 : i32
    %c0_i32_0 = arith.constant 0 : i32
    return %arg0, %arg2, %c0_i32 : i32, i32, i32
  }
  func.func @transform_2(%arg0: i32, %arg1: i32, %arg2: i32) -> (i32, i32, i32) {
    %c0_i32 = arith.constant 0 : i32
    %c0_i32_0 = arith.constant 0 : i32
    return %arg0, %arg2, %c0_i32 : i32, i32, i32
  }
  func.func @transform_3(%arg0: i32, %arg1: i32, %arg2: i32) -> (i32, i32) {
    %c0_i32 = arith.constant 0 : i32
    %c0_i32_0 = arith.constant 0 : i32
    %c0_i32_1 = arith.constant 0 : i32
    return %c0_i32, %c0_i32_0 : i32, i32
  }
  func.func @transform_4(%arg0: i32, %arg1: i32, %arg2: i32) -> (i32, i32) {
    %c0_i32 = arith.constant 0 : i32
    %c0_i32_0 = arith.constant 0 : i32
    %c0_i32_1 = arith.constant 0 : i32
    return %c0_i32, %c0_i32_0 : i32, i32
  }
  func.func @transform_5(%arg0: i32, %arg1: i32, %arg2: i32) -> (i32, i32) {
    %c0_i32 = arith.constant 0 : i32
    %c0_i32_0 = arith.constant 0 : i32
    %c0_i32_1 = arith.constant 0 : i32
    return %c0_i32, %c0_i32_0 : i32, i32
  }
  func.func @transform_6(%arg0: i32, %arg1: i32, %arg2: i32) -> (i32, i32) {
    %c0_i32 = arith.constant 0 : i32
    %c0_i32_0 = arith.constant 0 : i32
    %c0_i32_1 = arith.constant 0 : i32
    return %c0_i32, %c0_i32_0 : i32, i32
  }
  func.func @transform_7(%arg0: i32, %arg1: i32, %arg2: i32) -> (i32, i32) {
    %c0_i32 = arith.constant 0 : i32
    %c0_i32_0 = arith.constant 0 : i32
    %c0_i32_1 = arith.constant 0 : i32
    return %c0_i32, %c0_i32_0 : i32, i32
  }
  func.func @transform_8(%arg0: i32, %arg1: i32, %arg2: i32) -> (i32, i32) {
    %c0_i32 = arith.constant 0 : i32
    %c0_i32_0 = arith.constant 0 : i32
    %c0_i32_1 = arith.constant 0 : i32
    return %c0_i32, %c0_i32_0 : i32, i32
  }
  func.func @transform_9(%arg0: i32, %arg1: i32, %arg2: i32) -> (i32, i32) {
    %c0_i32 = arith.constant 0 : i32
    %c0_i32_0 = arith.constant 0 : i32
    %c0_i32_1 = arith.constant 0 : i32
    return %c0_i32, %c0_i32_0 : i32, i32
  }
  func.func @transform_10(%arg0: i32, %arg1: i32, %arg2: i32) -> (i32, i32) {
    %c0_i32 = arith.constant 0 : i32
    %c0_i32_0 = arith.constant 0 : i32
    %c0_i32_1 = arith.constant 0 : i32
    return %c0_i32, %c0_i32_0 : i32, i32
  }
  func.func @transform_11(%arg0: i32, %arg1: i32, %arg2: i32) -> (i32, i32) {
    %c0_i32 = arith.constant 0 : i32
    %c0_i32_0 = arith.constant 0 : i32
    %c0_i32_1 = arith.constant 0 : i32
    return %c0_i32, %c0_i32_0 : i32, i32
  }
  func.func @transform_12(%arg0: i32, %arg1: i32, %arg2: i32) -> (i32, i32) {
    %c0_i32 = arith.constant 0 : i32
    %c0_i32_0 = arith.constant 0 : i32
    %c0_i32_1 = arith.constant 0 : i32
    return %c0_i32, %c0_i32_0 : i32, i32
  }
  func.func @transform_13(%arg0: i32, %arg1: i32, %arg2: i32) -> (i32, i32) {
    %c0_i32 = arith.constant 0 : i32
    %c0_i32_0 = arith.constant 0 : i32
    %c0_i32_1 = arith.constant 0 : i32
    return %c0_i32, %c0_i32_0 : i32, i32
  }
  func.func @transform_14(%arg0: i32, %arg1: i32, %arg2: i32) -> (i32, i32) {
    %c0_i32 = arith.constant 0 : i32
    %c0_i32_0 = arith.constant 0 : i32
    %c0_i32_1 = arith.constant 0 : i32
    return %c0_i32, %c0_i32_0 : i32, i32
  }
  func.func @transform_15(%arg0: i32, %arg1: i32, %arg2: i32) -> (i32, i32) {
    %c0_i32 = arith.constant 0 : i32
    %c0_i32_0 = arith.constant 0 : i32
    %c0_i32_1 = arith.constant 0 : i32
    return %c0_i32, %c0_i32_0 : i32, i32
  }
  func.func @transform_16(%arg0: i32, %arg1: i32, %arg2: i32) -> (i32, i32, i32) {
    %c0_i32 = arith.constant 0 : i32
    %c0_i32_0 = arith.constant 0 : i32
    return %arg0, %arg1, %c0_i32 : i32, i32, i32
  }
}

</mosaic_0001>

<bundles_post_ra>
// kernel: tpu_custom_call.1
= control target key start
LH: loop header
LB: loop body
LE: loop exit
PB: predicated region body
PF: predicated region fallthrough
CT: control target
= control target key end

     0   :  { %s14152_s0 = inlined_call_operand.hbm [shape: f32[2,256,128], index: 0, kind: input, shape index: {}]   ;;  %s14153_s1 = inlined_call_operand.hbm [shape: f32[2,256,128], index: 1, kind: input, shape index: {}]   ;;  %s14154_s2 = inlined_call_operand.hbm [shape: f32[2,256,128], index: 2, kind: input, shape index: {}]   ;;  %s14155_s3 = inlined_call_operand.hbm [shape: f32[128,128], index: 3, kind: input, shape index: {}]   ;;  %s14156_s4 = inlined_call_operand.hbm [shape: f32[128,128], index: 4, kind: input, shape index: {}]   ;;  %s14157_s5 = inlined_call_operand.hbm [shape: f32[128,128], index: 5, kind: input, shape index: {}]   ;;  %s14158_s6 = inlined_call_operand.hbm [shape: f32[128,128], index: 6, kind: input, shape index: {}]   ;;  %s14159_s7 = inlined_call_operand.vmem [shape: f32[1,128], index: 7, kind: input, shape index: {}]   ;;  %s14160_s8 = inlined_call_operand.vmem [shape: f32[1,128], index: 8, kind: input, shape index: {}]   ;;  %s14161_s9 = inlined_call_operand.vmem [shape: f32[1,128], index: 9, kind: input, shape index: {}]   ;;  %s14162_s10 = inlined_call_operand.hbm [shape: f32[128,256], index: 10, kind: input, shape index: {}]   ;;  %s14163_s11 = inlined_call_operand.vmem [shape: f32[1,256], index: 11, kind: input, shape index: {}]   ;;  %s14164_s12 = inlined_call_operand.hbm [shape: f32[256,128], index: 12, kind: input, shape index: {}]   ;;  %s14165_s13 = inlined_call_operand.vmem [shape: f32[1,128], index: 13, kind: input, shape index: {}]   ;;  %s14166_s14 = inlined_call_operand.vmem [shape: f32[1,128], index: 14, kind: input, shape index: {}]   ;;  %s14167_s15 = inlined_call_operand.vmem [shape: f32[1,128], index: 15, kind: input, shape index: {}]   ;;  %s14168_s16 = inlined_call_operand.hbm [shape: f32[2,256,128], index: 16, kind: output, shape index: {}]  }
   0x1   :  { %14344 = sst [smem:[#allocation137_spill]] %s14152_s0 }
   0x2   :  { %14345 = sst [smem:[#allocation138_spill]] %s14153_s1 }
   0x3   :  { %14346 = sst [smem:[#allocation139_spill]] %s14154_s2 }
   0x4   :  { %14347 = sst [smem:[#allocation140_spill]] %s14155_s3 }
   0x5   :  { %14348 = sst [smem:[#allocation141_spill]] %s14156_s4 }
   0x6   :  { %14349 = sst [smem:[#allocation142_spill]] %s14157_s5 }
   0x7   :  { %14350 = sst [smem:[#allocation143_spill]] %s14158_s6 }
   0x8   :  { %14351 = sst [smem:[#allocation144_spill]] %s14159_s7 }
   0x9   :  { %14352 = sst [smem:[#allocation145_spill]] %s14160_s8 }
   0xa   :  { %14353 = sst [smem:[#allocation146_spill]] %s14161_s9 }
   0xb   :  { %14354 = sst [smem:[#allocation147_spill]] %s14162_s10 }
   0xc   :  { %14355 = sst [smem:[#allocation148_spill]] %s14163_s11 }
   0xd   :  { %14356 = sst [smem:[#allocation149_spill]] %s14164_s12 }
   0xe   :  { %14357 = sst [smem:[#allocation150_spill]] %s14165_s13 }
   0xf   :  { %14358 = sst [smem:[#allocation151_spill]] %s14166_s14 }
  0x10   :  { %14359 = sst [smem:[#allocation152_spill]] %s14167_s15 }
  0x11   :  { %14360 = sst [smem:[#allocation153_spill]] %s14168_s16 }
  0x12   :  { %21 = vsyncpa [#allocation7], 0 }
  0x13   :  { %23 = vsyncpa [#allocation7 + $0x1], 0 }
  0x14   :  { %24 = vsyncpa [#allocation10], 0 }
  0x15   :  { %26 = vsyncpa [#allocation10 + $0x1], 0 }
  0x16   :  { %27 = vsyncpa [#allocation13], 0 }
  0x17   :  { %28 = vsyncpa [#allocation16], 0 }
  0x18   :  { %29 = vsyncpa [#allocation19], 0 }
  0x19   :  { %30 = vsyncpa [#allocation8], 0 }
  0x1a   :  { %32 = vsyncpa [#allocation8 + $0x1], 0  ;;  %s10045_s21 = smov 0   ;;  %s10047_s22 = smov 0  }
  0x1b   :  { %s10049_s23 = smov 0   ;;  %s10051_s24 = smov 0  }
  0x1c   :  { %s10053_s25 = smov 0   ;;  %s10055_s26 = smov 0  }
  0x1d   :  { %s10057_s27 = smov 0   ;;  %s10059_s28 = smov 0  }
  0x1e   :  { %s10061_s29 = smov 0   ;;  %s10063_s30 = smov 0  }
  0x1f   :  { %s10065_s0 = smov 0   ;;  %s10067_s17 = smov 0  }
  0x20   :  { %s10069_s18 = smov 0  }
  0x21 LB: > { %14361 = sst [smem:[#allocation28_spill]] %s9890_s22  ;;  %s10111_s19 = sadd.s32 4294967295, %s9934_s18   ;;  %s9934_s18 = sphi %s10069_s18, %s38_s18   ;;  %s9930_s17 = sphi %s10067_s17, %s14845_s17   ;;  %s9926_s0 = sphi %s10065_s0, %s14834_s0   ;;  %s9922_s30 = sphi %s10063_s30, %s14844_s30   ;;  %s9918_s29 = sphi %s10061_s29, %s14843_s29   ;;  %s9914_s28 = sphi %s10059_s28, %s14842_s28   ;;  %s9910_s27 = sphi %s10057_s27, %s14841_s27   ;;  %s9906_s26 = sphi %s10055_s26, %s14840_s26   ;;  %s9902_s25 = sphi %s10053_s25, %s14839_s25   ;;  %s9898_s24 = sphi %s10051_s24, %s14838_s24   ;;  %s9894_s23 = sphi %s10049_s23, %s14837_s23   ;;  %s9890_s22 = sphi %s10047_s22, %s14830_s22   ;;  %s9886_s21 = sphi %s10045_s21, %s14829_s21  }
  0x22   : > { %14362 = sst [smem:[#allocation29_spill]] %s9894_s23  ;;  %p7514_p0 = scmp.ge.s32.totalorder %s9934_s18, 1 }
  0x23   : > { %14363 = sst [smem:[#allocation30_spill]] %s9898_s24  ;;  %p14187_p1 = scmp.eq.s32.totalorder %s10111_s19, 0 }
  0x24   : > { %14364 = sst [smem:[#allocation31_spill]] %s9902_s25  ;;  %p447_p2 = scmp.lt.s32.totalorder %s9934_s18, 9 }
  0x25   : > { %14365 = sst [smem:[#allocation32_spill]] %s9910_s27  ;;  %s9936_s16 = smov [#allocation12]  }
  0x26   : > { %14366 = sst [smem:[#allocation33_spill]] %s9914_s28  ;;  %p10116_p3 = pnand %p7514_p0, %p447_p2 }
  0x27   : > { %14367 = sst [smem:[#allocation34_spill]] %s9918_s29  ;;  %s459_s29 = sshll.u32 %s9936_s16, 4  ;;  %s460_s29 = int_to_ptr.vmem [resolvable:$true] %s459_s29 }
  0x28   : > { %14368 = sst [smem:[#allocation35_spill]] %s9926_s0  ;;  %p8919_p4 = pneg %p10116_p3 }
  0x29   : > { %14369 = sst [smem:[#allocation36_spill]] %s10111_s19  ;;  %s9937_s15 = smov [#allocation15]  }
  0x2a   : > { %s14370_s20 = scalar_select %p10116_p3, 1, 0 }
  0x2b   : > { %p10124_p5 = pnand %p8919_p4, %p14187_p1  ;;  %s485_s14 = sshll.u32 %s9937_s15, 4  ;;  %s486_s14 = int_to_ptr.vmem [resolvable:$true] %s485_s14 }
  0x2c   : > { %14371 = sst [smem:[#allocation37_spill]] %s14370_s20  ;;  %s9938_s13 = smov [#allocation18]  }
  0x2d   : > { %s520_s11 = sshll.u32 %s9938_s13, 4  ;;  %p10130_p6 = pneg %p10124_p5  ;;  %s521_s11 = int_to_ptr.vmem [resolvable:$true] %s520_s11 }
  0x2e   : > { %s9553_s16 = scalar_lea.vmem %s460_s29, 2048  ;;  %p9561_p10 = scmp.lt.s32.totalorder %s460_s29, %s460_s29 }
  0x2f   : > { %p9554_p7 = scmp.ne.s32.totalorder %s460_s29, %s9553_s16  ;;  %p9562_p11 = scmp.lt.s32.totalorder %s9553_s16, %s9553_s16 }
  0x31   : > { %p9556_p8 = pnand %p9554_p7, %p10130_p6  ;;  %p9563_p12 = por %p9562_p11, %p9561_p10 }
  0x33   : > { %p9557_p9 = pneg %p9556_p8 }
  0x35   : > { %p9564_p13 = pnand %p9563_p12, %p9557_p9 }
  0x37   : > { %9567 = shalt.err (!%p9564_p13)
}
  0x38   : > { %s14171_s15 = smov 128   ;;  %s14173_s13 = smov 8  }
  0x39   : > { %s14374_s3 = sld [smem:[#allocation140_spill]]  ;;  %s9579_s27 = scalar_lea.vmem %s486_s14, 2048 }
  0x3a   : > { %p9580_p0 = scmp.ne.s32.totalorder %s486_s14, %s9579_s27  ;;  %p9587_p7 = scmp.lt.s32.totalorder %s486_s14, %s486_s14 }
  0x3b   : > { %p9588_p8 = scmp.lt.s32.totalorder %s9579_s27, %s9579_s27 }
  0x3c   : > { %p9582_p2 = pnand %p9580_p0, %p10130_p6 }
  0x3d   : > { %p9589_p9 = por %p9588_p8, %p9587_p7 }
  0x3e   : > { %p9583_p4 = pneg %p9582_p2 }
  0x3f   : > { %8922 = dma.hbm_to_vmem [thread:$0]  (!%p10124_p5), %s14374_s3, 2048, %s460_s29, [#allocation13], %s14171_s15, %s14171_s15, %s14173_s13  }
  0x40   : > { %p9590_p10 = pnand %p9589_p9, %p9583_p4 }
  0x42   : > { %9593 = shalt.err (!%p9590_p10)
}
  0x43   : > { %s14375_s5 = sld [smem:[#allocation142_spill]]  ;;  %s9605_s7 = scalar_lea.vmem %s521_s11, 4096 }
  0x44   : > { %p9606_p11 = scmp.ne.s32.totalorder %s521_s11, %s9605_s7  ;;  %p9613_p0 = scmp.lt.s32.totalorder %s521_s11, %s521_s11 }
  0x45   : > { %p9614_p2 = scmp.lt.s32.totalorder %s9605_s7, %s9605_s7 }
  0x46   : > { %p9608_p12 = pnand %p9606_p11, %p10130_p6 }
  0x47   : > { %p9615_p4 = por %p9614_p2, %p9613_p0 }
  0x48   : > { %p9609_p13 = pneg %p9608_p12 }
  0x49   : > { %8928 = dma.hbm_to_vmem [thread:$0]  (!%p10124_p5), %s14375_s5, 2048, %s486_s14, [#allocation16], %s14171_s15, %s14171_s15, %s14173_s13  }
  0x4a   : > { %p9616_p7 = pnand %p9615_p4, %p9609_p13 }
  0x4c   : > { %9619 = shalt.err (!%p9616_p7)
}
  0x4d   : > { %s9941_s8 = smov 256   ;;  %s9942_s14 = smov 16  }
  0x4e   : > { %s14376_s10 = sld [smem:[#allocation147_spill]]  ;;  %s50_s20 = sadd.s32 1, %s9922_s30 }
  0x4f   : > { %p10162_p8 = scmp.ge.s32.totalorder %s50_s20, 2  ;;  %p14186_p9 = scmp.eq.s32.totalorder %s9934_s18, 0 }
  0x50   : > { %p101_p10 = scmp.ne.s32.totalorder %s9894_s23, %s9890_s22  ;;  %p107_p11 = scmp.ne.s32.totalorder %s9890_s22, %s9886_s21 }
  0x51   : > { %s14847_s20 = smov (%p10162_p8, %s50_s20), 0  ;;  %p14185_p12 = scmp.lt.s32.totalorder %s9934_s18, 8 }
  0x52   : > { %p10180_p13 = por %p101_p10, %p14186_p9  ;;  %p10186_p0 = por %p107_p11, %p14187_p1 }
  0x53   : > { %s582_s27 = sand.u32 1, %s9934_s18   ;;  %s584_s29 = sand.u32 1, %s9894_s23  }
  0x54   : > { %8934 = dma.hbm_to_vmem [thread:$0]  (!%p10124_p5), %s14376_s10, 4096, %s521_s11, [#allocation19], %s9941_s8, %s9941_s8, %s9942_s14  }
  0x55   : > { %s14379_s8 = scalar_select %p10186_p0, 1, 0 }
  0x56   : > { %s14184_s14 = sshll.u32 %s9930_s17, 5  ;;  %s7526_s21 = sshll.u32 %s584_s29, 7 }
  0x57   : > { %14380 = sst [smem:[#allocation38_spill]] %s14379_s8  ;;  %s7527_s7 = sshll.u32 %s9922_s30, 4 }
  0x58   : > { %s592_s15 = sadd.s32 %s7527_s7, %s14184_s14  ;;  %s586_s3 = scalar_lea.vmem [#allocation9], %s7526_s21 }
  0x59   : > { %s7529_s13 = sshll.u32 %s592_s15, 7  ;;  %s595_s5 = sshll.u32 %s586_s3, 4  ;;  %s596_s5 = int_to_ptr.vmem [resolvable:$true] %s595_s5 }
  0x5a   : > { %s14381_s1 = sld [smem:[#allocation138_spill]]  ;;  %p10203_p2 = pnand %p14185_p12, %p10180_p13 }
  0x5b   : > { %s14383_s2 = sld [smem:[#allocation139_spill]]  ;;  %s609_s3 = scalar_lea.vmem [#allocation11], %s7526_s21 }
  0x5c   : > { %s10214_s7 = sshll.u32 %s609_s3, 4  ;;  %s10216_s10 = scalar_lea.sflag [#allocation10], %s582_s27  ;;  %s10260_s7 = int_to_ptr.vmem [resolvable:$true] %s10214_s7 }
  0x5d   : > { %p14188_p4 = pneg %p10203_p2  ;;  %s9633_s22 = scalar_lea.vmem %s596_s5, 2048 }
  0x5e   : > { %p9634_p7 = scmp.ne.s32.totalorder %s596_s5, %s9633_s22  ;;  %s9943_s11 = smov [#allocation9]  }
  0x5f   : > { %s9638_s14 = sshll.u32 %s9943_s11, 4  ;;  %s9639_s14 = int_to_ptr.vmem [resolvable:$false] %s9638_s14 }
  0x60   : > { %s594_s24 = scalar_lea.hbm %s14381_s1, %s7529_s13  ;;  %p9636_p10 = pnand %p9634_p7, %p14188_p4 }
  0x61   : > { %s10212_s15 = scalar_lea.hbm %s14383_s2, %s7529_s13  ;;  %s9640_s29 = scalar_lea.vmem %s9639_s14, 4096 }
  0x62   : > { %14384 = sst [smem:[#allocation39_spill]] %s10212_s15  ;;  %p9637_p11 = pneg %p9636_p10 }
  0x63   : > { %p9641_p13 = scmp.lt.s32.totalorder %s596_s5, %s9639_s14  ;;  %p9642_p12 = scmp.lt.s32.totalorder %s9640_s29, %s9633_s22 }
  0x65   : > { %p9643_p9 = por %p9642_p12, %p9641_p13 }
  0x67   : > { %p9644_p1 = pnand %p9643_p9, %p9637_p11 }
  0x69   : > { %9647 = shalt.err (!%p9644_p1)
}
  0x6a   : > { %s14385_s23 = smov 8   ;;  %s14386_s13 = smov 128  }
  0x6b   : > { %8944 = dma.hbm_to_vmem [thread:$0]  (!%p10203_p2), %s594_s24, 2048, %s596_s5, %s10216_s10, %s14386_s13, %s14386_s13, %s14385_s23  }
  0x6c   : > { %s9944_s8 = smov [#allocation14]   ;;  %s9945_s21 = smov [#allocation17]  }
  0x6d   : > { %s472_s27 = sshll.u32 %s9944_s8, 4  ;;  %s498_s3 = sshll.u32 %s9945_s21, 4  ;;  %s473_s27 = int_to_ptr.vmem [resolvable:$true] %s472_s27  ;;  %s499_s3 = int_to_ptr.vmem [resolvable:$true] %s498_s3 }
  0x6e   : > { %s9659_s11 = scalar_lea.vmem %s473_s27, 2048  ;;  %p9667_p1 = scmp.lt.s32.totalorder %s473_s27, %s473_s27 }
  0x6f   : > { %p9660_p7 = scmp.ne.s32.totalorder %s473_s27, %s9659_s11  ;;  %p9668_p10 = scmp.lt.s32.totalorder %s9659_s11, %s9659_s11 }
  0x71   : > { %p9662_p12 = pnand %p9660_p7, %p10130_p6  ;;  %p9669_p11 = por %p9668_p10, %p9667_p1 }
  0x73   : > { %p9663_p9 = pneg %p9662_p12 }
  0x75   : > { %p9670_p13 = pnand %p9669_p11, %p9663_p9 }
  0x77   : > { %9673 = shalt.err (!%p9670_p13)
}
  0x78   : > { %s14387_s4 = sld [smem:[#allocation141_spill]]  ;;  %s9685_s14 = scalar_lea.vmem %s499_s3, 2048 }
  0x79   : > { %p9686_p4 = scmp.ne.s32.totalorder %s499_s3, %s9685_s14  ;;  %p9693_p0 = scmp.lt.s32.totalorder %s499_s3, %s499_s3 }
  0x7a   : > { %p9694_p3 = scmp.lt.s32.totalorder %s9685_s14, %s9685_s14 }
  0x7b   : > { %p9688_p7 = pnand %p9686_p4, %p10130_p6 }
  0x7c   : > { %p9695_p1 = por %p9694_p3, %p9693_p0 }
  0x7d   : > { %p9689_p12 = pneg %p9688_p7 }
  0x7e   : > { %8925 = dma.hbm_to_vmem [thread:$0]  (!%p10124_p5), %s14387_s4, 2048, %s473_s27, [#allocation13], %s14386_s13, %s14386_s13, %s14385_s23  }
  0x7f   : > { %p9696_p9 = pnand %p9695_p1, %p9689_p12 }
  0x81   : > { %9699 = shalt.err (!%p9696_p9)
}
  0x82   : > { %s14388_s6 = sld [smem:[#allocation143_spill]]  ;;  %s9946_s8 = smov [#allocation20]  }
  0x83   : > { %s536_s27 = sshll.u32 %s9946_s8, 4  ;;  %s537_s27 = int_to_ptr.vmem [resolvable:$true] %s536_s27 }
  0x84   : > { %s9711_s21 = scalar_lea.vmem %s537_s27, 4096  ;;  %p9719_p0 = scmp.lt.s32.totalorder %s537_s27, %s537_s27 }
  0x85   : > { %p9712_p4 = scmp.ne.s32.totalorder %s537_s27, %s9711_s21  ;;  %p9720_p11 = scmp.lt.s32.totalorder %s9711_s21, %s9711_s21 }
  0x87   : > { %p9714_p10 = pnand %p9712_p4, %p10130_p6  ;;  %p9721_p13 = por %p9720_p11, %p9719_p0 }
  0x88   : > { %8931 = dma.hbm_to_vmem [thread:$0]  (!%p10124_p5), %s14388_s6, 2048, %s499_s3, [#allocation16], %s14386_s13, %s14386_s13, %s14385_s23  }
  0x89   : > { %p9715_p3 = pneg %p9714_p10 }
  0x8b   : > { %p9722_p7 = pnand %p9721_p13, %p9715_p3 }
  0x8d   : > { %9725 = shalt.err (!%p9722_p7)
}
  0x8e   : > { %s14389_s12 = sld [smem:[#allocation149_spill]]  ;;  %s7513_s28 = sadd.s32 4294967294, %s9934_s18  }
  0x8f   : > { %s14390_s9 = sld [smem:[#allocation30_spill]]  ;;  %s53_s24 = sadd.s32 1, %s9926_s0 }
  0x90   : > { %s14391_s5 = sld [smem:[#allocation36_spill]]  ;;  %s14849_s24 = smov (!%p10162_p8, %s53_s24), %s9926_s0 }
  0x91   : > { %p73_p6 = scmp.ne.s32.totalorder %s9906_s26, %s9902_s25  ;;  %p55_p1 = scmp.ge.s32.totalorder %s14849_s24, 2 }
  0x92   : > { %s66_s14 = sadd.s32 1, %s9906_s26  ;;  %s14396_s16 = sadd.s32 1, %s9930_s17 }
  0x93   : > { %s14851_s24 = smov (%p55_p1, %s14849_s24), 0  ;;  %s14853_s16 = smov (!%p55_p1, %s14396_s16), %s9930_s17 }
  0x94   : > { %8937 = dma.hbm_to_vmem [thread:$0]  (!%p10124_p5), %s14389_s12, 4096, %s537_s27, [#allocation19], %s14386_s13, %s14386_s13, %s14385_s23  }
  0x95   : > { %p79_p12 = scmp.ne.s32.totalorder %s9902_s25, %s14390_s9  ;;  %14395 = sst [smem:[#allocation41_spill]] %s14851_s24 }
  0x96   : > { %p434_p9 = scmp.eq.s32.totalorder %s14391_s5, 7  ;;  %p14392_p5 = scmp.eq.s32.totalorder %s14391_s5, 0 }
  0x97   : > { %p14397_p8 = scmp.eq.s32.totalorder %s9934_s18, 0  ;;  %s14401_s27 = sld [smem:[#allocation29_spill]] }
  0x98   : > { %p10278_p4 = por %p14392_p5, %p79_p12  ;;  %p10293_p3 = por %p434_p9, %p73_p6 }
  0x99   : > { %p10289_p10 = por %p14397_p8, %p73_p6  ;;  %p59_p0 = scmp.ge.s32.totalorder %s14853_s16, 2 }
  0x9a   : > { %s14393_s29 = scalar_select %p10278_p4, 1, 0 }
  0x9b   : > { %s14399_s8 = scalar_select %p10293_p3, 1, 0 }
  0x9c   : > { %14394 = sst [smem:[#allocation40_spill]] %s14393_s29  ;;  %p440_p11 = scmp.eq.s32.totalorder %s7513_s28, 7 }
  0x9d   : > { %14400 = sst [smem:[#allocation42_spill]] %s14399_s8  ;;  %s62_s21 = ssub.s32 %s9926_s0, %s14851_s24 }
  0x9e   : > { %s14200_s11 = sand.u32 1, %s9906_s26   ;;  %s14855_s16 = smov (%p59_p0, %s14853_s16), 0 }
  0x9f   : > { %14402 = sst [smem:[#allocation43_spill]] %s14855_s16  ;;  %p10305_p13 = por %p440_p11, %p79_p12 }
  0xa0   : > { %s7523_s5 = sshll.u32 %s9926_s0, 4  ;;  %s61_s1 = ssub.s32 %s9930_s17, %s14855_s16 }
  0xa1   : > { %s14403_s3 = scalar_select %p10305_p13, 1, 0 }
  0xa2   : > { %s7522_s2 = sshll.u32 %s14200_s11, 7  ;;  %s63_s28 = sor.u32 %s62_s21, %s61_s1 }
  0xa3   : > { %14404 = sst [smem:[#allocation44_spill]] %s14403_s3  ;;  %s14405_s4 = ssub.s32 %s9922_s30, %s14847_s20 }
  0xa4   : > { %s91_s6 = sor.u32 %s14405_s4, %s61_s1  ;;  %p64_p7 = scmp.eq.s32.totalorder %s63_s28, 0 }
  0xa5   : > { %p92_p6 = scmp.eq.s32.totalorder %s91_s6, 0  ;;  %s14406_s9 = sshll.u32 %s9930_s17, 5 }
  0xa6   : > { %s569_s12 = sadd.s32 %s14406_s9, %s7523_s5  ;;  %s14407_s8 = sadd.s32 1, %s14401_s27 }
  0xa7   : > { %s10320_s24 = scalar_select %p64_p7, %s9906_s26, %s66_s14  }
  0xa8   : > { %s14857_s27 = smov (!%p92_p6, %s14401_s27), %s14407_s8  ;;  %s7525_s0 = sshll.u32 %s569_s12, 7 }
  0xa9   : > { %s563_s3 = scalar_lea.vmem [#allocation6], %s7522_s2  ;;  %s14408_s11 = sld [smem:[#allocation137_spill]] }
  0xaa   : > { %s572_s16 = sshll.u32 %s563_s3, 4  ;;  %p14409_p12 = scmp.lt.s32.totalorder %s9934_s18, 8  ;;  %s10332_s16 = int_to_ptr.vmem [resolvable:$true] %s572_s16 }
  0xab   : > { %s9739_s4 = scalar_lea.vmem %s10260_s7, 2048  ;;  %p14411_p5 = pneg %p10203_p2 }
  0xac   : > { %p10338_p1 = pnand %p14409_p12, %p10289_p10  ;;  %p9740_p9 = scmp.ne.s32.totalorder %s10260_s7, %s9739_s4 }
  0xad   : > { %s9947_s2 = smov [#allocation11]  }
  0xae   : > { %p9742_p8 = pnand %p9740_p9, %p14411_p5  ;;  %s9744_s6 = sshll.u32 %s9947_s2, 4  ;;  %s9745_s6 = int_to_ptr.vmem [resolvable:$false] %s9744_s6 }
  0xaf   : > { %s10330_s15 = scalar_lea.hbm %s14408_s11, %s7525_s0  ;;  %s9746_s12 = scalar_lea.vmem %s9745_s6, 4096 }
  0xb0   : > { %p9743_p0 = pneg %p9742_p8  ;;  %p9747_p11 = scmp.lt.s32.totalorder %s10260_s7, %s9745_s6 }
  0xb1   : > { %p9748_p7 = scmp.lt.s32.totalorder %s9746_s12, %s9739_s4 }
  0xb3   : > { %p9749_p6 = por %p9748_p7, %p9747_p11 }
  0xb5   : > { %p9750_p13 = pnand %p9749_p6, %p9743_p0 }
  0xb7   : > { %9753 = shalt.err (!%p9750_p13)
}
  0xb8   : > { %s14412_s25 = sld [smem:[#allocation39_spill]]  ;;  %s14413_s0 = sand.u32 1, %s9906_s26  }
  0xb9   : > { %s560_s14 = scalar_lea.sflag [#allocation7], %s14413_s0  ;;  %p9756_p10 = pneg %p10338_p1 }
  0xba   : > { %s9767_s29 = scalar_lea.vmem %s10332_s16, 2048  ;;  %s9948_s19 = smov [#allocation6]  }
  0xbb   : > { %p9768_p13 = scmp.ne.s32.totalorder %s10332_s16, %s9767_s29  ;;  %s9772_s22 = sshll.u32 %s9948_s19, 4  ;;  %s9773_s22 = int_to_ptr.vmem [resolvable:$false] %s9772_s22 }
  0xbc   : > { %s9774_s8 = scalar_lea.vmem %s9773_s22, 4096  ;;  %p9775_p5 = scmp.lt.s32.totalorder %s10332_s16, %s9773_s22 }
  0xbd   : > { %p9770_p12 = pnand %p9768_p13, %p9756_p10  ;;  %p9776_p8 = scmp.lt.s32.totalorder %s9774_s8, %s9767_s29 }
  0xbe   : > { %8947 = dma.hbm_to_vmem [thread:$0]  (!%p10203_p2), %s14412_s25, 2048, %s10260_s7, %s10216_s10, %s14386_s13, %s14386_s13, %s14385_s23  }
  0xbf   : > { %p9771_p9 = pneg %p9770_p12  ;;  %p9777_p0 = por %p9776_p8, %p9775_p5 }
  0xc1   : > { %p9778_p11 = pnand %p9777_p0, %p9771_p9 }
  0xc3   : > { %9781 = shalt.err (!%p9778_p11)
}
  0xc4   : > { %8941 = dma.hbm_to_vmem [thread:$0]  (!%p10338_p1), %s10330_s15, 2048, %s10332_s16, %s560_s14, %s14386_s13, %s14386_s13, %s14385_s23  }
  0xc5   : > { %s14414_s7 = sld [smem:[#allocation37_spill]] }
  0xcb   : > { %p14415_p2 = scmp.ne.s32.totalorder %s14414_s7, 0 }
  0xcd   : > { %630 = sbr.rel (%p14415_p2) target bundleno = 4866 (0x1302), region = 84 }
  0xd2   : > { %s14416_s10 = sld [smem:[#allocation31_spill]] }
  0xd8   : > { %s10373_s11 = sand.u32 1, %s14416_s10  }
  0xd9   : > { %s7535_s3 = sshll.u32 %s10373_s11, 7  ;;  %s633_s5 = scalar_lea.sflag [#allocation7], %s10373_s11 }
  0xda   : > { %s10377_s28 = scalar_lea.vmem [#allocation6], %s7535_s3 }
  0xdb   : > { %9861 = dma.done.wait (%p10278_p4), %s633_s5, 2048  }
  0xdc   : > { %9863 = vsyncadd (%p10278_p4), %s633_s5, 4294965248  ;;  %s14418_s9 = sld [smem:[#allocation36_spill]] }
  0xdd   : > { %s14419_s15 = sld [smem:[#allocation28_spill]] }
  0xde   : > { %s14420_s23 = sld [smem:[#allocation38_spill]] }
  0xe2   : > { %s641_s13 = sand.u32 1, %s14418_s9  }
  0xe3   : > { %s643_s16 = sand.u32 1, %s14419_s15   ;;  %s642_s4 = scalar_lea.sflag [#allocation10], %s641_s13 }
  0xe4   : > { %s7536_s1 = sshll.u32 %s643_s16, 7  ;;  %p14421_p1 = scmp.ne.s32.totalorder %s14420_s23, 0 }
  0xe5   : > { %s10385_s2 = scalar_lea.vmem [#allocation9], %s7536_s1 }
  0xe6   : > { %9865 = dma.done.wait (%p14421_p1), %s642_s4, 4096  }
  0xe7   : > { %9867 = vsyncadd (%p14421_p1), %s642_s4, 4294963200  ;;  %s10391_s6 = scalar_lea.vmem [#allocation11], %s7536_s1  ;;  %p14422_p7 = scmp.eq.s32.totalorder %s14418_s9, 0 }
  0xe9   : > { %9869 = dma.done.wait (%p14422_p7), [#allocation13], 4096   ;;  %p14423_p4 = pmov %p14422_p7 }
  0xeb   : > { %9871 = vsyncadd (%p14423_p4), [#allocation13], 4294963200  ;;  %p14424_p6 = pmov %p14423_p4 }
  0xec   : > { %p14425_p10 = pmov %p14423_p4 }
  0xed   : > { %9873 = dma.done.wait (%p14424_p6), [#allocation16], 4096  }
  0xee   : > { %9875 = vsyncadd (%p14425_p10), [#allocation16], 4294963200  ;;  %p14426_p13 = pmov %p14423_p4 }
  0xef   : > { %p14427_p12 = pmov %p14423_p4 }
  0xf0   : > { %9877 = dma.done.wait (%p14426_p13), [#allocation19], 8192  }
  0xf1   : > { %9879 = vsyncadd (%p14427_p12), [#allocation19], 4294959104  ;;  %s10405_s12 = scalar_lea.vmem [#allocation21], %s7535_s3  ;;  %s14428_s25 = sld [smem:[#allocation32_spill]] }
  0xf7   : > { %p7545_p9 = scmp.ne.s32.totalorder %s14428_s25, 0 }
  0xf9   : > { %744 = sbr.rel (%p7545_p9) target bundleno = 496 (0x1f0), region = 124 }
  0xfe   : > { %vm745_vm0 = vcmask 7168   ;;  %v10408_v0 = vld [vmem:[#allocation12 + $0x78] sm:$0xff]  ;;  %v10410_v1 = vld [vmem:[#allocation12 + $0x70] sm:$0xff]  ;;  %v9949_v2 = vmov -inf   ;;  %v9950_v3 = vmov 0.0   ;;  %v919_v4 = vld [vmem:[#allocation12 + $0x68] sm:$0xff] }
  0xff   : > { %746 = vst.msk [vmem:[#allocation3] sm:$0xff] %vm745_vm0, %v9949_v2  ;;  %747 = vst.msk [vmem:[#allocation3 + $0x8] sm:$0xff] %vm745_vm0, %v9949_v2  ;;  %8151 = vmatprep.subr.mxu0 %v10408_v0  ;;  %8823 = vmatprep.subr.mxu1 %v10408_v0  ;;  %v918_v5 = vld [vmem:[#allocation12 + $0x60] sm:$0xff]  ;;  %v917_v6 = vld [vmem:[#allocation12 + $0x58] sm:$0xff] }
 0x100   : > { %748 = vst.msk [vmem:[#allocation3 + $0x10] sm:$0xff] %vm745_vm0, %v9949_v2  ;;  %749 = vst.msk [vmem:[#allocation3 + $0x18] sm:$0xff] %vm745_vm0, %v9949_v2  ;;  %8152 = vmatpush3.msra.mxu0 %v10408_v0  ;;  %8839 = vmatpush3.msra.mxu1 %v10408_v0  ;;  %v916_v7 = vld [vmem:[#allocation12 + $0x50] sm:$0xff]  ;;  %v915_v8 = vld [vmem:[#allocation12 + $0x48] sm:$0xff] }
 0x101   : > { %750 = vst.msk [vmem:[#allocation3 + $0x20] sm:$0xff] %vm745_vm0, %v9949_v2  ;;  %751 = vst.msk [vmem:[#allocation3 + $0x28] sm:$0xff] %vm745_vm0, %v9949_v2  ;;  %8153 = vmatprep.subr.mxu0 %v10410_v1  ;;  %8824 = vmatprep.subr.mxu1 %v10410_v1  ;;  %v914_v9 = vld [vmem:[#allocation12 + $0x40] sm:$0xff]  ;;  %v913_v10 = vld [vmem:[#allocation12 + $0x38] sm:$0xff] }
 0x102   : > { %752 = vst.msk [vmem:[#allocation3 + $0x30] sm:$0xff] %vm745_vm0, %v9949_v2  ;;  %753 = vst.msk [vmem:[#allocation3 + $0x38] sm:$0xff] %vm745_vm0, %v9949_v2  ;;  %8154 = vmatpush3.msra.mxu0 %v10410_v1  ;;  %8840 = vmatpush3.msra.mxu1 %v10410_v1  ;;  %v912_v11 = vld [vmem:[#allocation12 + $0x30] sm:$0xff]  ;;  %v911_v12 = vld [vmem:[#allocation12 + $0x28] sm:$0xff] }
 0x103   : > { %754 = vst.msk [vmem:[#allocation3 + $0x40] sm:$0xff] %vm745_vm0, %v9949_v2  ;;  %755 = vst.msk [vmem:[#allocation3 + $0x48] sm:$0xff] %vm745_vm0, %v9949_v2  ;;  %8155 = vmatprep.subr.mxu0 %v919_v4  ;;  %8825 = vmatprep.subr.mxu1 %v919_v4  ;;  %v910_v13 = vld [vmem:[#allocation12 + $0x20] sm:$0xff]  ;;  %v909_v14 = vld [vmem:[#allocation12 + $0x18] sm:$0xff] }
 0x104   : > { %756 = vst.msk [vmem:[#allocation3 + $0x50] sm:$0xff] %vm745_vm0, %v9949_v2  ;;  %757 = vst.msk [vmem:[#allocation3 + $0x58] sm:$0xff] %vm745_vm0, %v9949_v2  ;;  %8156 = vmatpush3.msra.mxu0 %v919_v4  ;;  %8841 = vmatpush3.msra.mxu1 %v919_v4  ;;  %v908_v15 = vld [vmem:[#allocation12 + $0x10] sm:$0xff]  ;;  %v907_v16 = vld [vmem:[#allocation12 + $0x8] sm:$0xff] }
 0x105   : > { %758 = vst.msk [vmem:[#allocation3 + $0x60] sm:$0xff] %vm745_vm0, %v9949_v2  ;;  %759 = vst.msk [vmem:[#allocation3 + $0x68] sm:$0xff] %vm745_vm0, %v9949_v2  ;;  %8157 = vmatprep.subr.mxu0 %v918_v5  ;;  %8826 = vmatprep.subr.mxu1 %v918_v5  ;;  %v906_v17 = vld [vmem:[#allocation12] sm:$0xff]  ;;  %v891_v20 = vld [vmem:[%s10377_s28 + $0x8] sm:$0xff] }
 0x106   : > { %760 = vst.msk [vmem:[#allocation3 + $0x70] sm:$0xff] %vm745_vm0, %v9949_v2  ;;  %761 = vst.msk [vmem:[#allocation3 + $0x78] sm:$0xff] %vm745_vm0, %v9949_v2  ;;  %8158 = vmatpush3.msra.mxu0 %v918_v5  ;;  %8842 = vmatpush3.msra.mxu1 %v918_v5  ;;  %v890_v18 = vld [vmem:[%s10377_s28] sm:$0xff]  ;;  %v899_v21 = vld [vmem:[%s10377_s28 + $0x48] sm:$0xff] }
 0x107   : > { %762 = vst.msk [vmem:[#allocation3 + $0x80] sm:$0xff] %vm745_vm0, %v9949_v2  ;;  %763 = vst.msk [vmem:[#allocation3 + $0x88] sm:$0xff] %vm745_vm0, %v9949_v2  ;;  %8159 = vmatprep.subr.mxu0 %v917_v6  ;;  %8827 = vmatprep.subr.mxu1 %v917_v6  ;;  %v898_v19 = vld [vmem:[%s10377_s28 + $0x40] sm:$0xff]  ;;  %v892_v22 = vld [vmem:[%s10377_s28 + $0x10] sm:$0xff] }
 0x108   : > { %764 = vst.msk [vmem:[#allocation3 + $0x90] sm:$0xff] %vm745_vm0, %v9949_v2  ;;  %765 = vst.msk [vmem:[#allocation3 + $0x98] sm:$0xff] %vm745_vm0, %v9949_v2  ;;  %8160 = vmatpush3.msra.mxu0 %v917_v6  ;;  %8843 = vmatpush3.msra.mxu1 %v917_v6  ;;  %v900_v23 = vld [vmem:[%s10377_s28 + $0x50] sm:$0xff]  ;;  %v893_v24 = vld [vmem:[%s10377_s28 + $0x18] sm:$0xff] }
 0x109   : > { %766 = vst.msk [vmem:[#allocation3 + $0xa0] sm:$0xff] %vm745_vm0, %v9949_v2  ;;  %767 = vst.msk [vmem:[#allocation3 + $0xa8] sm:$0xff] %vm745_vm0, %v9949_v2  ;;  %8161 = vmatprep.subr.mxu0 %v916_v7  ;;  %8828 = vmatprep.subr.mxu1 %v916_v7  ;;  %v901_v25 = vld [vmem:[%s10377_s28 + $0x58] sm:$0xff]  ;;  %v894_v26 = vld [vmem:[%s10377_s28 + $0x20] sm:$0xff] }
 0x10a   : > { %768 = vst.msk [vmem:[#allocation3 + $0xb0] sm:$0xff] %vm745_vm0, %v9949_v2  ;;  %769 = vst.msk [vmem:[#allocation3 + $0xb8] sm:$0xff] %vm745_vm0, %v9949_v2  ;;  %8162 = vmatpush3.msra.mxu0 %v916_v7  ;;  %8844 = vmatpush3.msra.mxu1 %v916_v7  ;;  %v902_v27 = vld [vmem:[%s10377_s28 + $0x60] sm:$0xff]  ;;  %v895_v28 = vld [vmem:[%s10377_s28 + $0x28] sm:$0xff] }
 0x10b   : > { %770 = vst.msk [vmem:[#allocation3 + $0xc0] sm:$0xff] %vm745_vm0, %v9949_v2  ;;  %771 = vst.msk [vmem:[#allocation3 + $0xc8] sm:$0xff] %vm745_vm0, %v9949_v2  ;;  %8163 = vmatprep.subr.mxu0 %v915_v8  ;;  %8829 = vmatprep.subr.mxu1 %v915_v8  ;;  %v903_v29 = vld [vmem:[%s10377_s28 + $0x68] sm:$0xff]  ;;  %v896_v30 = vld [vmem:[%s10377_s28 + $0x30] sm:$0xff] }
 0x10c   : > { %772 = vst.msk [vmem:[#allocation3 + $0xd0] sm:$0xff] %vm745_vm0, %v9949_v2  ;;  %773 = vst.msk [vmem:[#allocation3 + $0xd8] sm:$0xff] %vm745_vm0, %v9949_v2  ;;  %8164 = vmatpush3.msra.mxu0 %v915_v8  ;;  %8845 = vmatpush3.msra.mxu1 %v915_v8  ;;  %v904_v31 = vld [vmem:[%s10377_s28 + $0x70] sm:$0xff]  ;;  %v897_v32 = vld [vmem:[%s10377_s28 + $0x38] sm:$0xff] }
 0x10d   : > { %774 = vst.msk [vmem:[#allocation3 + $0xe0] sm:$0xff] %vm745_vm0, %v9949_v2  ;;  %775 = vst.msk [vmem:[#allocation3 + $0xe8] sm:$0xff] %vm745_vm0, %v9949_v2  ;;  %8165 = vmatprep.subr.mxu0 %v914_v9  ;;  %8830 = vmatprep.subr.mxu1 %v914_v9  ;;  %v905_v33 = vld [vmem:[%s10377_s28 + $0x78] sm:$0xff] }
 0x10e   : > { %776 = vst.msk [vmem:[#allocation3 + $0xf0] sm:$0xff] %vm745_vm0, %v9949_v2  ;;  %777 = vst.msk [vmem:[#allocation3 + $0xf8] sm:$0xff] %vm745_vm0, %v9949_v2  ;;  %8166 = vmatpush3.msra.mxu0 %v914_v9  ;;  %8846 = vmatpush3.msra.mxu1 %v914_v9 }
 0x10f   : > { %778 = vst.msk [vmem:[#allocation3 + $0x100] sm:$0xff] %vm745_vm0, %v9949_v2  ;;  %779 = vst.msk [vmem:[#allocation3 + $0x108] sm:$0xff] %vm745_vm0, %v9949_v2  ;;  %8167 = vmatprep.subr.mxu0 %v913_v10  ;;  %8831 = vmatprep.subr.mxu1 %v913_v10 }
 0x110   : > { %780 = vst.msk [vmem:[#allocation3 + $0x110] sm:$0xff] %vm745_vm0, %v9949_v2  ;;  %781 = vst.msk [vmem:[#allocation3 + $0x118] sm:$0xff] %vm745_vm0, %v9949_v2  ;;  %8168 = vmatpush3.msra.mxu0 %v913_v10  ;;  %8847 = vmatpush3.msra.mxu1 %v913_v10 }
 0x111   : > { %782 = vst.msk [vmem:[#allocation3 + $0x120] sm:$0xff] %vm745_vm0, %v9949_v2  ;;  %783 = vst.msk [vmem:[#allocation3 + $0x128] sm:$0xff] %vm745_vm0, %v9949_v2  ;;  %8169 = vmatprep.subr.mxu0 %v912_v11  ;;  %8832 = vmatprep.subr.mxu1 %v912_v11 }
 0x112   : > { %784 = vst.msk [vmem:[#allocation3 + $0x130] sm:$0xff] %vm745_vm0, %v9949_v2  ;;  %785 = vst.msk [vmem:[#allocation3 + $0x138] sm:$0xff] %vm745_vm0, %v9949_v2  ;;  %8170 = vmatpush3.msra.mxu0 %v912_v11  ;;  %8848 = vmatpush3.msra.mxu1 %v912_v11 }
 0x113   : > { %786 = vst.msk [vmem:[#allocation3 + $0x140] sm:$0xff] %vm745_vm0, %v9949_v2  ;;  %787 = vst.msk [vmem:[#allocation3 + $0x148] sm:$0xff] %vm745_vm0, %v9949_v2  ;;  %8171 = vmatprep.subr.mxu0 %v911_v12  ;;  %8833 = vmatprep.subr.mxu1 %v911_v12 }
 0x114   : > { %788 = vst.msk [vmem:[#allocation3 + $0x150] sm:$0xff] %vm745_vm0, %v9949_v2  ;;  %789 = vst.msk [vmem:[#allocation3 + $0x158] sm:$0xff] %vm745_vm0, %v9949_v2  ;;  %8172 = vmatpush3.msra.mxu0 %v911_v12  ;;  %8849 = vmatpush3.msra.mxu1 %v911_v12 }
 0x115   : > { %790 = vst.msk [vmem:[#allocation3 + $0x160] sm:$0xff] %vm745_vm0, %v9949_v2  ;;  %791 = vst.msk [vmem:[#allocation3 + $0x168] sm:$0xff] %vm745_vm0, %v9949_v2  ;;  %8173 = vmatprep.subr.mxu0 %v910_v13  ;;  %8834 = vmatprep.subr.mxu1 %v910_v13 }
 0x116   : > { %792 = vst.msk [vmem:[#allocation3 + $0x170] sm:$0xff] %vm745_vm0, %v9949_v2  ;;  %793 = vst.msk [vmem:[#allocation3 + $0x178] sm:$0xff] %vm745_vm0, %v9949_v2  ;;  %8174 = vmatpush3.msra.mxu0 %v910_v13  ;;  %8850 = vmatpush3.msra.mxu1 %v910_v13 }
 0x117   : > { %794 = vst.msk [vmem:[#allocation3 + $0x180] sm:$0xff] %vm745_vm0, %v9949_v2  ;;  %795 = vst.msk [vmem:[#allocation3 + $0x188] sm:$0xff] %vm745_vm0, %v9949_v2  ;;  %8175 = vmatprep.subr.mxu0 %v909_v14  ;;  %8835 = vmatprep.subr.mxu1 %v909_v14 }
 0x118   : > { %796 = vst.msk [vmem:[#allocation3 + $0x190] sm:$0xff] %vm745_vm0, %v9949_v2  ;;  %797 = vst.msk [vmem:[#allocation3 + $0x198] sm:$0xff] %vm745_vm0, %v9949_v2  ;;  %8176 = vmatpush3.msra.mxu0 %v909_v14  ;;  %8851 = vmatpush3.msra.mxu1 %v909_v14 }
 0x119   : > { %798 = vst.msk [vmem:[#allocation3 + $0x1a0] sm:$0xff] %vm745_vm0, %v9949_v2  ;;  %799 = vst.msk [vmem:[#allocation3 + $0x1a8] sm:$0xff] %vm745_vm0, %v9949_v2  ;;  %8177 = vmatprep.subr.mxu0 %v908_v15  ;;  %8836 = vmatprep.subr.mxu1 %v908_v15 }
 0x11a   : > { %800 = vst.msk [vmem:[#allocation3 + $0x1b0] sm:$0xff] %vm745_vm0, %v9949_v2  ;;  %801 = vst.msk [vmem:[#allocation3 + $0x1b8] sm:$0xff] %vm745_vm0, %v9949_v2  ;;  %8178 = vmatpush3.msra.mxu0 %v908_v15  ;;  %8852 = vmatpush3.msra.mxu1 %v908_v15 }
 0x11b   : > { %802 = vst.msk [vmem:[#allocation3 + $0x1c0] sm:$0xff] %vm745_vm0, %v9949_v2  ;;  %803 = vst.msk [vmem:[#allocation3 + $0x1c8] sm:$0xff] %vm745_vm0, %v9949_v2  ;;  %8179 = vmatprep.subr.mxu0 %v907_v16  ;;  %8837 = vmatprep.subr.mxu1 %v907_v16 }
 0x11c   : > { %804 = vst.msk [vmem:[#allocation3 + $0x1d0] sm:$0xff] %vm745_vm0, %v9949_v2  ;;  %805 = vst.msk [vmem:[#allocation3 + $0x1d8] sm:$0xff] %vm745_vm0, %v9949_v2  ;;  %8180 = vmatpush3.msra.mxu0 %v907_v16  ;;  %8853 = vmatpush3.msra.mxu1 %v907_v16 }
 0x11d   : > { %806 = vst.msk [vmem:[#allocation3 + $0x1e0] sm:$0xff] %vm745_vm0, %v9949_v2  ;;  %807 = vst.msk [vmem:[#allocation3 + $0x1e8] sm:$0xff] %vm745_vm0, %v9949_v2  ;;  %8181 = vmatprep.subr.mxu0 %v906_v17  ;;  %8838 = vmatprep.subr.mxu1 %v906_v17 }
 0x11e   : > { %808 = vst.msk [vmem:[#allocation3 + $0x1f0] sm:$0xff] %vm745_vm0, %v9949_v2  ;;  %809 = vst.msk [vmem:[#allocation3 + $0x1f8] sm:$0xff] %vm745_vm0, %v9949_v2  ;;  %8182 = vmatpush3.msra.mxu0 %v906_v17  ;;  %8854 = vmatpush3.msra.mxu1 %v906_v17 }
 0x11f   : > { %810 = vst.msk [vmem:[#allocation4] sm:$0xff] %vm745_vm0, %v9950_v3  ;;  %811 = vst.msk [vmem:[#allocation4 + $0x8] sm:$0xff] %vm745_vm0, %v9950_v3  ;;  %8183 = vmatprep.mubr.f32.mxu0 %v890_v18  ;;  %8195 = vmatprep.mubr.f32.mxu1 %v898_v19 }
 0x120   : > { %812 = vst.msk [vmem:[#allocation4 + $0x10] sm:$0xff] %vm745_vm0, %v9950_v3  ;;  %813 = vst.msk [vmem:[#allocation4 + $0x18] sm:$0xff] %vm745_vm0, %v9950_v3  ;;  %8184 = vmatmul.mubr.f32.vlgmr.msra.gmra.mxu0 %v891_v20  ;;  %8196 = vmatmul.mubr.f32.vlgmr.msra.gmra.mxu1 %v899_v21 }
 0x121   : > { %814 = vst.msk [vmem:[#allocation4 + $0x20] sm:$0xff] %vm745_vm0, %v9950_v3  ;;  %815 = vst.msk [vmem:[#allocation4 + $0x28] sm:$0xff] %vm745_vm0, %v9950_v3  ;;  %8186 = vmatprep.mubr.f32.mxu0 %v892_v22  ;;  %8198 = vmatprep.mubr.f32.mxu1 %v900_v23 }
 0x122   : > { %816 = vst.msk [vmem:[#allocation4 + $0x30] sm:$0xff] %vm745_vm0, %v9950_v3  ;;  %817 = vst.msk [vmem:[#allocation4 + $0x38] sm:$0xff] %vm745_vm0, %v9950_v3 }
 0x123   : > { %818 = vst.msk [vmem:[#allocation4 + $0x40] sm:$0xff] %vm745_vm0, %v9950_v3  ;;  %819 = vst.msk [vmem:[#allocation4 + $0x48] sm:$0xff] %vm745_vm0, %v9950_v3 }
 0x124   : > { %820 = vst.msk [vmem:[#allocation4 + $0x50] sm:$0xff] %vm745_vm0, %v9950_v3  ;;  %821 = vst.msk [vmem:[#allocation4 + $0x58] sm:$0xff] %vm745_vm0, %v9950_v3  ;;  %8187 = vmatmul.mubr.f32.gmra.mxu0 %v893_v24  ;;  %8199 = vmatmul.mubr.f32.gmra.mxu1 %v901_v25 }
 0x125   : > { %822 = vst.msk [vmem:[#allocation4 + $0x60] sm:$0xff] %vm745_vm0, %v9950_v3  ;;  %823 = vst.msk [vmem:[#allocation4 + $0x68] sm:$0xff] %vm745_vm0, %v9950_v3  ;;  %8189 = vmatprep.mubr.f32.mxu0 %v894_v26  ;;  %8201 = vmatprep.mubr.f32.mxu1 %v902_v27 }
 0x126   : > { %824 = vst.msk [vmem:[#allocation4 + $0x70] sm:$0xff] %vm745_vm0, %v9950_v3  ;;  %825 = vst.msk [vmem:[#allocation4 + $0x78] sm:$0xff] %vm745_vm0, %v9950_v3 }
 0x127   : > { %826 = vst.msk [vmem:[#allocation4 + $0x80] sm:$0xff] %vm745_vm0, %v9950_v3  ;;  %827 = vst.msk [vmem:[#allocation4 + $0x88] sm:$0xff] %vm745_vm0, %v9950_v3 }
 0x128   : > { %828 = vst.msk [vmem:[#allocation4 + $0x90] sm:$0xff] %vm745_vm0, %v9950_v3  ;;  %829 = vst.msk [vmem:[#allocation4 + $0x98] sm:$0xff] %vm745_vm0, %v9950_v3  ;;  %8190 = vmatmul.mubr.f32.gmra.mxu0 %v895_v28  ;;  %8202 = vmatmul.mubr.f32.gmra.mxu1 %v903_v29 }
 0x129   : > { %830 = vst.msk [vmem:[#allocation4 + $0xa0] sm:$0xff] %vm745_vm0, %v9950_v3  ;;  %831 = vst.msk [vmem:[#allocation4 + $0xa8] sm:$0xff] %vm745_vm0, %v9950_v3  ;;  %8192 = vmatprep.mubr.f32.mxu0 %v896_v30  ;;  %8204 = vmatprep.mubr.f32.mxu1 %v904_v31 }
 0x12a   : > { %832 = vst.msk [vmem:[#allocation4 + $0xb0] sm:$0xff] %vm745_vm0, %v9950_v3  ;;  %833 = vst.msk [vmem:[#allocation4 + $0xb8] sm:$0xff] %vm745_vm0, %v9950_v3 }
 0x12b   : > { %834 = vst.msk [vmem:[#allocation4 + $0xc0] sm:$0xff] %vm745_vm0, %v9950_v3  ;;  %835 = vst.msk [vmem:[#allocation4 + $0xc8] sm:$0xff] %vm745_vm0, %v9950_v3 }
 0x12c   : > { %836 = vst.msk [vmem:[#allocation4 + $0xd0] sm:$0xff] %vm745_vm0, %v9950_v3  ;;  %837 = vst.msk [vmem:[#allocation4 + $0xd8] sm:$0xff] %vm745_vm0, %v9950_v3  ;;  %8193 = vmatmul.mubr.f32.gmra.mxu0 %v897_v32  ;;  %8205 = vmatmul.mubr.f32.gmra.mxu1 %v905_v33 }
 0x12d   : > { %838 = vst.msk [vmem:[#allocation4 + $0xe0] sm:$0xff] %vm745_vm0, %v9950_v3  ;;  %839 = vst.msk [vmem:[#allocation4 + $0xe8] sm:$0xff] %vm745_vm0, %v9950_v3 }
 0x12e   : > { %840 = vst.msk [vmem:[#allocation4 + $0xf0] sm:$0xff] %vm745_vm0, %v9950_v3  ;;  %841 = vst.msk [vmem:[#allocation4 + $0xf8] sm:$0xff] %vm745_vm0, %v9950_v3 }
 0x12f   : > { %842 = vst.msk [vmem:[#allocation4 + $0x100] sm:$0xff] %vm745_vm0, %v9950_v3  ;;  %843 = vst.msk [vmem:[#allocation4 + $0x108] sm:$0xff] %vm745_vm0, %v9950_v3 }
 0x130   : > { %844 = vst.msk [vmem:[#allocation4 + $0x110] sm:$0xff] %vm745_vm0, %v9950_v3  ;;  %845 = vst.msk [vmem:[#allocation4 + $0x118] sm:$0xff] %vm745_vm0, %v9950_v3 }
 0x131   : > { %846 = vst.msk [vmem:[#allocation4 + $0x120] sm:$0xff] %vm745_vm0, %v9950_v3  ;;  %847 = vst.msk [vmem:[#allocation4 + $0x128] sm:$0xff] %vm745_vm0, %v9950_v3 }
 0x132   : > { %848 = vst.msk [vmem:[#allocation4 + $0x130] sm:$0xff] %vm745_vm0, %v9950_v3  ;;  %849 = vst.msk [vmem:[#allocation4 + $0x138] sm:$0xff] %vm745_vm0, %v9950_v3 }
 0x133   : > { %850 = vst.msk [vmem:[#allocation4 + $0x140] sm:$0xff] %vm745_vm0, %v9950_v3  ;;  %851 = vst.msk [vmem:[#allocation4 + $0x148] sm:$0xff] %vm745_vm0, %v9950_v3 }
 0x134   : > { %852 = vst.msk [vmem:[#allocation4 + $0x150] sm:$0xff] %vm745_vm0, %v9950_v3  ;;  %853 = vst.msk [vmem:[#allocation4 + $0x158] sm:$0xff] %vm745_vm0, %v9950_v3 }
 0x135   : > { %854 = vst.msk [vmem:[#allocation4 + $0x160] sm:$0xff] %vm745_vm0, %v9950_v3  ;;  %855 = vst.msk [vmem:[#allocation4 + $0x168] sm:$0xff] %vm745_vm0, %v9950_v3 }
 0x136   : > { %856 = vst.msk [vmem:[#allocation4 + $0x170] sm:$0xff] %vm745_vm0, %v9950_v3  ;;  %857 = vst.msk [vmem:[#allocation4 + $0x178] sm:$0xff] %vm745_vm0, %v9950_v3 }
 0x137   : > { %858 = vst.msk [vmem:[#allocation4 + $0x180] sm:$0xff] %vm745_vm0, %v9950_v3  ;;  %859 = vst.msk [vmem:[#allocation4 + $0x188] sm:$0xff] %vm745_vm0, %v9950_v3 }
 0x138   : > { %860 = vst.msk [vmem:[#allocation4 + $0x190] sm:$0xff] %vm745_vm0, %v9950_v3  ;;  %861 = vst.msk [vmem:[#allocation4 + $0x198] sm:$0xff] %vm745_vm0, %v9950_v3 }
 0x139   : > { %862 = vst.msk [vmem:[#allocation4 + $0x1a0] sm:$0xff] %vm745_vm0, %v9950_v3  ;;  %863 = vst.msk [vmem:[#allocation4 + $0x1a8] sm:$0xff] %vm745_vm0, %v9950_v3 }
 0x13a   : > { %864 = vst.msk [vmem:[#allocation4 + $0x1b0] sm:$0xff] %vm745_vm0, %v9950_v3  ;;  %865 = vst.msk [vmem:[#allocation4 + $0x1b8] sm:$0xff] %vm745_vm0, %v9950_v3 }
 0x13b   : > { %866 = vst.msk [vmem:[#allocation4 + $0x1c0] sm:$0xff] %vm745_vm0, %v9950_v3  ;;  %867 = vst.msk [vmem:[#allocation4 + $0x1c8] sm:$0xff] %vm745_vm0, %v9950_v3 }
 0x13c   : > { %868 = vst.msk [vmem:[#allocation4 + $0x1d0] sm:$0xff] %vm745_vm0, %v9950_v3  ;;  %869 = vst.msk [vmem:[#allocation4 + $0x1d8] sm:$0xff] %vm745_vm0, %v9950_v3 }
 0x13d   : > { %870 = vst.msk [vmem:[#allocation4 + $0x1e0] sm:$0xff] %vm745_vm0, %v9950_v3  ;;  %871 = vst.msk [vmem:[#allocation4 + $0x1e8] sm:$0xff] %vm745_vm0, %v9950_v3 }
 0x13e   : > { %872 = vst.msk [vmem:[#allocation4 + $0x1f0] sm:$0xff] %vm745_vm0, %v9950_v3  ;;  %873 = vst.msk [vmem:[#allocation4 + $0x1f8] sm:$0xff] %vm745_vm0, %v9950_v3 }
 0x13f   : > { %874 = vst [vmem:[#allocation5] sm:$0xff] %v9950_v3  ;;  %875 = vst [vmem:[#allocation5 + $0x8] sm:$0xff] %v9950_v3 }
 0x140   : > { %876 = vst [vmem:[#allocation5 + $0x10] sm:$0xff] %v9950_v3  ;;  %877 = vst [vmem:[#allocation5 + $0x18] sm:$0xff] %v9950_v3 }
 0x141   : > { %878 = vst [vmem:[#allocation5 + $0x20] sm:$0xff] %v9950_v3  ;;  %879 = vst [vmem:[#allocation5 + $0x28] sm:$0xff] %v9950_v3 }
 0x142   : > { %880 = vst [vmem:[#allocation5 + $0x30] sm:$0xff] %v9950_v3  ;;  %881 = vst [vmem:[#allocation5 + $0x38] sm:$0xff] %v9950_v3 }
 0x143   : > { %882 = vst [vmem:[#allocation5 + $0x40] sm:$0xff] %v9950_v3  ;;  %883 = vst [vmem:[#allocation5 + $0x48] sm:$0xff] %v9950_v3 }
 0x144   : > { %884 = vst [vmem:[#allocation5 + $0x50] sm:$0xff] %v9950_v3  ;;  %885 = vst [vmem:[#allocation5 + $0x58] sm:$0xff] %v9950_v3 }
 0x145   : > { %886 = vst [vmem:[#allocation5 + $0x60] sm:$0xff] %v9950_v3  ;;  %887 = vst [vmem:[#allocation5 + $0x68] sm:$0xff] %v9950_v3 }
 0x146   : > { %888 = vst [vmem:[#allocation5 + $0x70] sm:$0xff] %v9950_v3  ;;  %889 = vst [vmem:[#allocation5 + $0x78] sm:$0xff] %v9950_v3 }
 0x1e0   : > { %v8185_v34 = vpop.f32.mrf.mxu0  ;;  %v8197_v35 = vpop.f32.mrf.mxu1 }
 0x1e1   : > { %1068 = vst [vmem:[#allocation2] sm:$0xff] %v8185_v34  ;;  %1076 = vst [vmem:[#allocation2 + $0x20] sm:$0xff] %v8197_v35 }
 0x1e2   : > { %v988_v36 = vpop.f32.mrf.mxu0  ;;  %v1028_v37 = vpop.f32.mrf.mxu1 }
 0x1e3   : > { %1067 = vst [vmem:[#allocation2 + $0x30] sm:$0xff] %v988_v36  ;;  %1075 = vst [vmem:[#allocation2 + $0x40] sm:$0xff] %v1028_v37 }
 0x1e4   : > { %v8188_v38 = vpop.f32.mrf.mxu0  ;;  %v8200_v39 = vpop.f32.mrf.mxu1 }
 0x1e5   : > { %1070 = vst [vmem:[#allocation2 + $0x18] sm:$0xff] %v8188_v38  ;;  %1078 = vst [vmem:[#allocation2 + $0x38] sm:$0xff] %v8200_v39 }
 0x1e6   : > { %v998_v40 = vpop.f32.mrf.mxu0  ;;  %v1038_v41 = vpop.f32.mrf.mxu1 }
 0x1e7   : > { %1069 = vst [vmem:[#allocation2 + $0x58] sm:$0xff] %v998_v40  ;;  %1077 = vst [vmem:[#allocation2 + $0x10] sm:$0xff] %v1038_v41 }
 0x1e8   : > { %v8191_v42 = vpop.f32.mrf.mxu0  ;;  %v8203_v43 = vpop.f32.mrf.mxu1 }
 0x1e9   : > { %1072 = vst [vmem:[#allocation2 + $0x68] sm:$0xff] %v8191_v42  ;;  %1080 = vst [vmem:[#allocation2 + $0x70] sm:$0xff] %v8203_v43 }
 0x1ea   : > { %v1008_v44 = vpop.f32.mrf.mxu0  ;;  %v1048_v45 = vpop.f32.mrf.mxu1 }
 0x1eb   : > { %1071 = vst [vmem:[#allocation2 + $0x50] sm:$0xff] %v1008_v44  ;;  %1079 = vst [vmem:[#allocation2 + $0x60] sm:$0xff] %v1048_v45 }
 0x1ec   : > { %v8194_v46 = vpop.f32.mrf.mxu0  ;;  %v8206_v47 = vpop.f32.mrf.mxu1 }
 0x1ed   : > { %1074 = vst [vmem:[#allocation2 + $0x48] sm:$0xff] %v8194_v46  ;;  %1082 = vst [vmem:[#allocation2 + $0x28] sm:$0xff] %v8206_v47 }
 0x1ee   : > { %v1018_v48 = vpop.f32.mrf.mxu0  ;;  %v1058_v49 = vpop.f32.mrf.mxu1 }
 0x1ef   : > { %1073 = vst [vmem:[#allocation2 + $0x8] sm:$0xff] %v1018_v48  ;;  %1081 = vst [vmem:[#allocation2 + $0x78] sm:$0xff] %v1058_v49 }
 0x1f0 PF: > { %v1114_v50 = vld [vmem:[#allocation14 + $0x78] sm:$0xff]  ;;  %v1113_v51 = vld [vmem:[#allocation14 + $0x70] sm:$0xff]  ;;  %v1112_v52 = vld [vmem:[#allocation14 + $0x68] sm:$0xff]  ;;  %vm1453_vm1 = vcmask 261120   ;;  %vm2015_vm2 = vcmask 7168   ;;  %s9952_s0 = smov 96  }
 0x1f1   : > { %8207 = vmatprep.subr.mxu0 %v1114_v50  ;;  %v1111_v53 = vld [vmem:[#allocation14 + $0x60] sm:$0xff]  ;;  %v1110_v55 = vld [vmem:[#allocation14 + $0x58] sm:$0xff]  ;;  %v1109_v56 = vld [vmem:[#allocation14 + $0x50] sm:$0xff]  ;;  %s9953_s14 = smov 64   ;;  %s9954_s29 = smov 32   ;;  %vm3381_vm3 = vcmask 523520  }
 0x1f2   : > { %8208 = vmatpush3.msra.mxu0 %v1114_v50  ;;  %v1083_v54 = vld [vmem:[%s10385_s2] sm:$0xff]  ;;  %v1108_v57 = vld [vmem:[#allocation14 + $0x48] sm:$0xff]  ;;  %v1106_v59 = vld [vmem:[#allocation14 + $0x38] sm:$0xff]  ;;  %vm4442_vm4 = vcmask 785920   ;;  %vm5503_vm5 = vcmask 1048320   ;;  %s14813_s19 = sld [smem:[#allocation32_spill]] }
 0x1f3   : > { %8209 = vmatprep.subr.mxu0 %v1113_v51  ;;  %8239 = vmatprep.mubr.f32.mxu0 %v1083_v54  ;;  %v1107_v58 = vld [vmem:[#allocation14 + $0x40] sm:$0xff]  ;;  %v1105_v60 = vld [vmem:[#allocation14 + $0x30] sm:$0xff]  ;;  %v1104_v61 = vld [vmem:[#allocation14 + $0x28] sm:$0xff] }
 0x1f4   : > { %8210 = vmatpush3.msra.mxu0 %v1113_v51  ;;  %v1103_v62 = vld [vmem:[#allocation14 + $0x20] sm:$0xff]  ;;  %v1102_v63 = vld [vmem:[#allocation14 + $0x18] sm:$0xff]  ;;  %v1101_v0 = vld [vmem:[#allocation14 + $0x10] sm:$0xff] }
 0x1f5   : > { %8211 = vmatprep.subr.mxu0 %v1112_v52  ;;  %v1100_v1 = vld [vmem:[#allocation14 + $0x8] sm:$0xff]  ;;  %v1099_v2 = vld [vmem:[#allocation14] sm:$0xff]  ;;  %v1085_v4 = vld [vmem:[%s10385_s2 + $0x10] sm:$0xff] }
 0x1f6   : > { %8212 = vmatpush3.msra.mxu0 %v1112_v52  ;;  %v1084_v3 = vld [vmem:[%s10385_s2 + $0x8] sm:$0xff]  ;;  %v1086_v5 = vld [vmem:[%s10385_s2 + $0x18] sm:$0xff]  ;;  %v1087_v6 = vld [vmem:[%s10385_s2 + $0x20] sm:$0xff] }
 0x1f7   : > { %8213 = vmatprep.subr.mxu0 %v1111_v53  ;;  %v1088_v7 = vld [vmem:[%s10385_s2 + $0x28] sm:$0xff]  ;;  %v1089_v8 = vld [vmem:[%s10385_s2 + $0x30] sm:$0xff]  ;;  %v1090_v9 = vld [vmem:[%s10385_s2 + $0x38] sm:$0xff] }
 0x1f8   : > { %8214 = vmatpush3.msra.mxu0 %v1111_v53  ;;  %v1091_v10 = vld [vmem:[%s10385_s2 + $0x40] sm:$0xff]  ;;  %v1092_v11 = vld [vmem:[%s10385_s2 + $0x48] sm:$0xff]  ;;  %v1093_v12 = vld [vmem:[%s10385_s2 + $0x50] sm:$0xff]  ;;  %p7674_p5 = scmp.ne.s32.totalorder %s14813_s19, 1 }
 0x1f9   : > { %8215 = vmatprep.subr.mxu0 %v1110_v55  ;;  %v1094_v13 = vld [vmem:[%s10385_s2 + $0x58] sm:$0xff]  ;;  %v1095_v14 = vld [vmem:[%s10385_s2 + $0x60] sm:$0xff]  ;;  %v1096_v15 = vld [vmem:[%s10385_s2 + $0x68] sm:$0xff]  ;;  %s14814_s7 = sld [smem:[#allocation144_spill]] (!%p7674_p5) }
 0x1fa   : > { %8216 = vmatpush3.msra.mxu0 %v1110_v55  ;;  %v1097_v16 = vld [vmem:[%s10385_s2 + $0x70] sm:$0xff]  ;;  %v1098_v17 = vld [vmem:[%s10385_s2 + $0x78] sm:$0xff]  ;;  %v1289_v21 = vld [vmem:[#allocation15 + $0x68] sm:$0xff]  ;;  %s14815_s3 = sld [smem:[#allocation145_spill]] (!%p7674_p5) }
 0x1fb   : > { %8217 = vmatprep.subr.mxu0 %v1109_v56  ;;  %v10724_v18 = vld [vmem:[#allocation2 + $0x30] sm:$0xff]  ;;  %v1291_v19 = vld [vmem:[#allocation15 + $0x78] sm:$0xff]  ;;  %v1288_v22 = vld [vmem:[#allocation15 + $0x60] sm:$0xff]  ;;  %s14816_s9 = sld [smem:[#allocation146_spill]] (!%p7674_p5) }
 0x1fc   : > { %8218 = vmatpush3.msra.mxu0 %v1109_v56  ;;  %v1290_v20 = vld [vmem:[#allocation15 + $0x70] sm:$0xff]  ;;  %8263 = vmatprep.subr.mxu1 %v1291_v19  ;;  %v1260_v23 = vld [vmem:[%s10391_s6] sm:$0xff]  ;;  %v1287_v24 = vld [vmem:[#allocation15 + $0x58] sm:$0xff]  ;;  %s14817_s13 = sld [smem:[#allocation148_spill]] (!%p7674_p5) }
 0x1fd   : > { %8219 = vmatprep.subr.mxu0 %v1108_v57  ;;  %8264 = vmatpush3.msra.mxu1 %v1291_v19  ;;  %v1286_v26 = vld [vmem:[#allocation15 + $0x50] sm:$0xff]  ;;  %v1285_v28 = vld [vmem:[#allocation15 + $0x48] sm:$0xff]  ;;  %v1284_v30 = vld [vmem:[#allocation15 + $0x40] sm:$0xff]  ;;  %s14818_s4 = sld [smem:[#allocation150_spill]] (!%p7674_p5) }
 0x1fe   : > { %8220 = vmatpush3.msra.mxu0 %v1108_v57  ;;  %8265 = vmatprep.subr.mxu1 %v1290_v20  ;;  %v1283_v32 = vld [vmem:[#allocation15 + $0x38] sm:$0xff]  ;;  %v1282_v34 = vld [vmem:[#allocation15 + $0x30] sm:$0xff]  ;;  %v1281_v36 = vld [vmem:[#allocation15 + $0x28] sm:$0xff]  ;;  %s14819_s25 = sld [smem:[#allocation151_spill]] (!%p7674_p5) }
 0x1ff   : > { %8221 = vmatprep.subr.mxu0 %v1107_v58  ;;  %8266 = vmatpush3.msra.mxu1 %v1290_v20  ;;  %v1280_v38 = vld [vmem:[#allocation15 + $0x20] sm:$0xff]  ;;  %v1279_v40 = vld [vmem:[#allocation15 + $0x18] sm:$0xff]  ;;  %v1278_v42 = vld [vmem:[#allocation15 + $0x10] sm:$0xff] }
 0x200   : > { %8222 = vmatpush3.msra.mxu0 %v1107_v58  ;;  %8267 = vmatprep.subr.mxu1 %v1289_v21  ;;  %v1277_v44 = vld [vmem:[#allocation15 + $0x8] sm:$0xff]  ;;  %v1276_v46 = vld [vmem:[#allocation15] sm:$0xff]  ;;  %v1262_v50 = vld [vmem:[%s10391_s6 + $0x10] sm:$0xff] }
 0x201   : > { %8223 = vmatprep.subr.mxu0 %v1106_v59  ;;  %8268 = vmatpush3.msra.mxu1 %v1289_v21  ;;  %v1261_v48 = vld [vmem:[%s10391_s6 + $0x8] sm:$0xff]  ;;  %v1263_v52 = vld [vmem:[%s10391_s6 + $0x18] sm:$0xff]  ;;  %v1264_v54 = vld [vmem:[%s10391_s6 + $0x20] sm:$0xff] }
 0x202   : > { %8224 = vmatpush3.msra.mxu0 %v1106_v59  ;;  %8295 = vmatprep.mubr.f32.mxu1 %v1260_v23  ;;  %v1265_v56 = vld [vmem:[%s10391_s6 + $0x28] sm:$0xff]  ;;  %v1266_v57 = vld [vmem:[%s10391_s6 + $0x30] sm:$0xff]  ;;  %v1267_v58 = vld [vmem:[%s10391_s6 + $0x38] sm:$0xff] }
 0x203   : > { %8225 = vmatprep.subr.mxu0 %v1105_v60  ;;  %8269 = vmatprep.subr.mxu1 %v1288_v22  ;;  %v1268_v59 = vld [vmem:[%s10391_s6 + $0x40] sm:$0xff] }
 0x204   : > { %8226 = vmatpush3.msra.mxu0 %v1105_v60  ;;  %8270 = vmatpush3.msra.mxu1 %v1288_v22  ;;  %v1269_v60 = vld [vmem:[%s10391_s6 + $0x48] sm:$0xff] }
 0x205   : > { %8227 = vmatprep.subr.mxu0 %v1104_v61  ;;  %8271 = vmatprep.subr.mxu1 %v1287_v24 }
 0x206   : > { %8228 = vmatpush3.msra.mxu0 %v1104_v61  ;;  %8272 = vmatpush3.msra.mxu1 %v1287_v24  ;;  %v10834_v61 = vld [vmem:[#allocation2] sm:$0xff] }
 0x207   : > { %8229 = vmatprep.subr.mxu0 %v1103_v62  ;;  %8273 = vmatprep.subr.mxu1 %v1286_v26 }
 0x208   : > { %8230 = vmatpush3.msra.mxu0 %v1103_v62  ;;  %8274 = vmatpush3.msra.mxu1 %v1286_v26  ;;  %v10836_v62 = vld [vmem:[#allocation2 + $0x58] sm:$0xff] }
 0x209   : > { %8231 = vmatprep.subr.mxu0 %v1102_v63  ;;  %8275 = vmatprep.subr.mxu1 %v1285_v28 }
 0x20a   : > { %8232 = vmatpush3.msra.mxu0 %v1102_v63  ;;  %8276 = vmatpush3.msra.mxu1 %v1285_v28  ;;  %v10842_v63 = vld [vmem:[#allocation2 + $0x18] sm:$0xff] }
 0x20b   : > { %8233 = vmatprep.subr.mxu0 %v1101_v0  ;;  %8277 = vmatprep.subr.mxu1 %v1284_v30 }
 0x20c   : > { %8234 = vmatpush3.msra.mxu0 %v1101_v0  ;;  %8278 = vmatpush3.msra.mxu1 %v1284_v30  ;;  %v10844_v0 = vld [vmem:[#allocation2 + $0x50] sm:$0xff]  ;;  %v9951_v30 = vmov 0  }
 0x20d   : > { %8235 = vmatprep.subr.mxu0 %v1100_v1  ;;  %8279 = vmatprep.subr.mxu1 %v1283_v32 }
 0x20e   : > { %8236 = vmatpush3.msra.mxu0 %v1100_v1  ;;  %8280 = vmatpush3.msra.mxu1 %v1283_v32  ;;  %v10850_v1 = vld [vmem:[#allocation2 + $0x68] sm:$0xff] }
 0x20f   : > { %8237 = vmatprep.subr.mxu0 %v1099_v2  ;;  %8281 = vmatprep.subr.mxu1 %v1282_v34 }
 0x210   : > { %8238 = vmatpush3.msra.mxu0 %v1099_v2  ;;  %8282 = vmatpush3.msra.mxu1 %v1282_v34  ;;  %v10852_v2 = vld [vmem:[#allocation2 + $0x8] sm:$0xff] }
 0x211   : > { %8240 = vmatmul.mubr.f32.vlgmr.msra.gmra.mxu0 %v1084_v3  ;;  %8283 = vmatprep.subr.mxu1 %v1281_v36  ;;  %v10858_v3 = vld [vmem:[#allocation2 + $0x48] sm:$0xff] }
 0x212   : > { %8242 = vmatprep.mubr.f32.mxu0 %v1085_v4  ;;  %8284 = vmatpush3.msra.mxu1 %v1281_v36  ;;  %v10860_v4 = vld [vmem:[#allocation2 + $0x40] sm:$0xff] }
 0x213   : > { %8285 = vmatprep.subr.mxu1 %v1280_v38  ;;  %9090 = vset.pattern.permute.xlu0 %v9951_v30 }
 0x214   : > { %8286 = vmatpush3.msra.mxu1 %v1280_v38  ;;  %9091 = vset.pattern.permute.xlu1 %v9951_v30 }
 0x215   : > { %8243 = vmatmul.mubr.f32.gmra.mxu0 %v1086_v5  ;;  %8287 = vmatprep.subr.mxu1 %v1279_v40  ;;  %v10866_v5 = vld [vmem:[#allocation2 + $0x20] sm:$0xff] }
 0x216   : > { %8245 = vmatprep.mubr.f32.mxu0 %v1087_v6  ;;  %8288 = vmatpush3.msra.mxu1 %v1279_v40  ;;  %v10868_v6 = vld [vmem:[#allocation2 + $0x10] sm:$0xff] }
 0x217   : > { %8289 = vmatprep.subr.mxu1 %v1278_v42 }
 0x218   : > { %8290 = vmatpush3.msra.mxu1 %v1278_v42 }
 0x219   : > { %8246 = vmatmul.mubr.f32.gmra.mxu0 %v1088_v7  ;;  %8291 = vmatprep.subr.mxu1 %v1277_v44  ;;  %v10874_v7 = vld [vmem:[#allocation2 + $0x38] sm:$0xff] }
 0x21a   : > { %8248 = vmatprep.mubr.f32.mxu0 %v1089_v8  ;;  %8292 = vmatpush3.msra.mxu1 %v1277_v44  ;;  %v10876_v8 = vld [vmem:[#allocation2 + $0x60] sm:$0xff] }
 0x21b   : > { %8293 = vmatprep.subr.mxu1 %v1276_v46 }
 0x21c   : > { %8294 = vmatpush3.msra.mxu1 %v1276_v46 }
 0x21d   : > { %8249 = vmatmul.mubr.f32.gmra.mxu0 %v1090_v9  ;;  %8296 = vmatmul.mubr.f32.vlgmr.msra.gmra.mxu1 %v1261_v48  ;;  %v10882_v9 = vld [vmem:[#allocation2 + $0x70] sm:$0xff] }
 0x21e   : > { %8251 = vmatprep.mubr.f32.mxu0 %v1091_v10  ;;  %8298 = vmatprep.mubr.f32.mxu1 %v1262_v50  ;;  %v10884_v10 = vld [vmem:[#allocation2 + $0x78] sm:$0xff] }
 0x221   : > { %8252 = vmatmul.mubr.f32.gmra.mxu0 %v1092_v11  ;;  %8299 = vmatmul.mubr.f32.gmra.mxu1 %v1263_v52  ;;  %v10890_v11 = vld [vmem:[#allocation2 + $0x28] sm:$0xff] }
 0x222   : > { %8254 = vmatprep.mubr.f32.mxu0 %v1093_v12  ;;  %8301 = vmatprep.mubr.f32.mxu1 %v1264_v54  ;;  %v1270_v12 = vld [vmem:[%s10391_s6 + $0x50] sm:$0xff] }
 0x225   : > { %8255 = vmatmul.mubr.f32.gmra.mxu0 %v1094_v13  ;;  %8302 = vmatmul.mubr.f32.gmra.mxu1 %v1265_v56  ;;  %v1271_v13 = vld [vmem:[%s10391_s6 + $0x58] sm:$0xff] }
 0x226   : > { %8257 = vmatprep.mubr.f32.mxu0 %v1095_v14  ;;  %8304 = vmatprep.mubr.f32.mxu1 %v1266_v57  ;;  %v1272_v14 = vld [vmem:[%s10391_s6 + $0x60] sm:$0xff] }
 0x229   : > { %8258 = vmatmul.mubr.f32.gmra.mxu0 %v1096_v15  ;;  %8305 = vmatmul.mubr.f32.gmra.mxu1 %v1267_v58  ;;  %v1273_v15 = vld [vmem:[%s10391_s6 + $0x68] sm:$0xff] }
 0x22a   : > { %8260 = vmatprep.mubr.f32.mxu0 %v1097_v16  ;;  %8307 = vmatprep.mubr.f32.mxu1 %v1268_v59  ;;  %v1274_v16 = vld [vmem:[%s10391_s6 + $0x70] sm:$0xff] }
 0x22d   : > { %8261 = vmatmul.mubr.f32.gmra.mxu0 %v1098_v17  ;;  %8308 = vmatmul.mubr.f32.gmra.mxu1 %v1269_v60  ;;  %v1275_v17 = vld [vmem:[%s10391_s6 + $0x78] sm:$0xff] }
 0x22e   : > { %8351 = vmatprep.mubr.msk.f32.mxu0 %vm1453_vm1, %v10724_v18  ;;  %8310 = vmatprep.mubr.f32.mxu1 %v1270_v12 }
 0x231   : > { %8311 = vmatmul.mubr.f32.gmra.mxu1 %v1271_v13 }
 0x232   : > { %8313 = vmatprep.mubr.f32.mxu1 %v1272_v14 }
 0x235   : > { %8314 = vmatmul.mubr.f32.gmra.mxu1 %v1273_v15 }
 0x236   : > { %8316 = vmatprep.mubr.f32.mxu1 %v1274_v16 }
 0x239   : > { %8317 = vmatmul.mubr.f32.gmra.mxu1 %v1275_v17 }
 0x2d1   : > { %v10729_v25 = vpop.f32.mrf.mxu0 }
 0x2d3   : > { %v10731_v27 = vpop.f32.mrf.mxu0 }
 0x2d5   : > { %v10733_v29 = vpop.f32.mrf.mxu0 }
 0x2d7   : > { %v10735_v31 = vpop.f32.mrf.mxu0 }
 0x2d9   : > { %v10737_v33 = vpop.f32.mrf.mxu0 }
 0x2db   : > { %v10739_v35 = vpop.f32.mrf.mxu0 }
 0x2dd   : > { %v10741_v37 = vpop.f32.mrf.mxu0  ;;  %v10948_v48 = vpop.f32.mrf.mxu1 }
 0x2de   : > { %14441 = vst [vmem:[#allocation57_spill] sm:$0xff] %v10948_v48 }
 0x2df   : > { %v10743_v39 = vpop.f32.mrf.mxu0  ;;  %v10950_v50 = vpop.f32.mrf.mxu1 }
 0x2e0   : > { %14442 = vst [vmem:[#allocation58_spill] sm:$0xff] %v10950_v50 }
 0x2e1   : > { %v10745_v41 = vpop.f32.mrf.mxu0  ;;  %v10952_v52 = vpop.f32.mrf.mxu1 }
 0x2e2   : > { %14429 = vst [vmem:[#allocation45_spill] sm:$0xff] %v10745_v41  ;;  %14443 = vst [vmem:[#allocation59_spill] sm:$0xff] %v10952_v52 }
 0x2e3   : > { %v10747_v43 = vpop.f32.mrf.mxu0  ;;  %v10954_v54 = vpop.f32.mrf.mxu1 }
 0x2e4   : > { %14430 = vst [vmem:[#allocation46_spill] sm:$0xff] %v10747_v43  ;;  %14444 = vst [vmem:[#allocation60_spill] sm:$0xff] %v10954_v54 }
 0x2e5   : > { %v10749_v45 = vpop.f32.mrf.mxu0  ;;  %v10956_v56 = vpop.f32.mrf.mxu1 }
 0x2e6   : > { %14431 = vst [vmem:[#allocation47_spill] sm:$0xff] %v10749_v45  ;;  %14445 = vst [vmem:[#allocation61_spill] sm:$0xff] %v10956_v56 }
 0x2e7   : > { %v10751_v47 = vpop.f32.mrf.mxu0  ;;  %v10958_v57 = vpop.f32.mrf.mxu1 }
 0x2e8   : > { %14432 = vst [vmem:[#allocation48_spill] sm:$0xff] %v10751_v47  ;;  %14446 = vst [vmem:[#allocation62_spill] sm:$0xff] %v10958_v57 }
 0x2e9   : > { %v10754_v49 = vpop.f32.mrf.mxu0  ;;  %v10960_v58 = vpop.f32.mrf.mxu1 }
 0x2ea   : > { %14433 = vst [vmem:[#allocation49_spill] sm:$0xff] %v10754_v49  ;;  %14447 = vst [vmem:[#allocation63_spill] sm:$0xff] %v10960_v58 }
 0x2eb   : > { %v10757_v51 = vpop.f32.mrf.mxu0  ;;  %v10962_v59 = vpop.f32.mrf.mxu1 }
 0x2ec   : > { %14434 = vst [vmem:[#allocation50_spill] sm:$0xff] %v10757_v51  ;;  %14448 = vst [vmem:[#allocation64_spill] sm:$0xff] %v10962_v59 }
 0x2ed   : > { %v10760_v53 = vpop.f32.mrf.mxu0  ;;  %v10964_v60 = vpop.f32.mrf.mxu1 }
 0x2ee   : > { %14435 = vst [vmem:[#allocation51_spill] sm:$0xff] %v10760_v53  ;;  %8319 = vmatprep.subr.msk.mxu0 %vm1453_vm1, %v10760_v53  ;;  %14449 = vst [vmem:[#allocation65_spill] sm:$0xff] %v10964_v60 }
 0x2ef   : > { %v10765_v55 = vpop.f32.mrf.mxu0  ;;  %8320 = vmatpush3.xpose.msk.msra.mxu0 %vm1453_vm1, %v10760_v53  ;;  %v10966_v12 = vpop.f32.mrf.mxu1 }
 0x2f0   : > { %14436 = vst [vmem:[#allocation52_spill] sm:$0xff] %v10765_v55  ;;  %8321 = vmatprep.subr.msk.mxu0 %vm1453_vm1, %v10765_v55  ;;  %14450 = vst [vmem:[#allocation66_spill] sm:$0xff] %v10966_v12 }
 0x2f1   : > { %v10968_v13 = vpop.f32.mrf.mxu1 }
 0x2f2   : > { %14451 = vst [vmem:[#allocation67_spill] sm:$0xff] %v10968_v13 }
 0x2f3   : > { %8322 = vmatpush3.xpose.msk.msra.mxu0 %vm1453_vm1, %v10765_v55  ;;  %v10970_v14 = vpop.f32.mrf.mxu1 }
 0x2f4   : > { %8323 = vmatprep.subr.msk.mxu0 %vm1453_vm1, %v10754_v49  ;;  %14452 = vst [vmem:[#allocation68_spill] sm:$0xff] %v10970_v14 }
 0x2f5   : > { %v10972_v15 = vpop.f32.mrf.mxu1 }
 0x2f6   : > { %14453 = vst [vmem:[#allocation69_spill] sm:$0xff] %v10972_v15 }
 0x2f7   : > { %8324 = vmatpush3.xpose.msk.msra.mxu0 %vm1453_vm1, %v10754_v49  ;;  %v10974_v16 = vpop.f32.mrf.mxu1 }
 0x2f8   : > { %8325 = vmatprep.subr.msk.mxu0 %vm1453_vm1, %v10757_v51  ;;  %14454 = vst [vmem:[#allocation70_spill] sm:$0xff] %v10974_v16 }
 0x2f9   : > { %v10976_v17 = vpop.f32.mrf.mxu1 }
 0x2fa   : > { %14455 = vst [vmem:[#allocation71_spill] sm:$0xff] %v10976_v17  ;;  %8375 = vmatprep.subr.mxu1 %v10976_v17 }
 0x2fb   : > { %8326 = vmatpush3.xpose.msk.msra.mxu0 %vm1453_vm1, %v10757_v51  ;;  %v10979_v30 = vpop.f32.mrf.mxu1  ;;  %8376 = vmatpush3.msra.mxu1 %v10976_v17 }
 0x2fc   : > { %8327 = vmatprep.subr.msk.mxu0 %vm1453_vm1, %v10749_v45  ;;  %14456 = vst [vmem:[#allocation72_spill] sm:$0xff] %v10979_v30  ;;  %8377 = vmatprep.subr.mxu1 %v10979_v30 }
 0x2fd   : > { %8378 = vmatpush3.msra.mxu1 %v10979_v30 }
 0x2fe   : > { %8379 = vmatprep.subr.mxu1 %v10972_v15 }
 0x2ff   : > { %8328 = vmatpush3.xpose.msk.msra.mxu0 %vm1453_vm1, %v10749_v45  ;;  %8380 = vmatpush3.msra.mxu1 %v10972_v15 }
 0x300   : > { %8329 = vmatprep.subr.msk.mxu0 %vm1453_vm1, %v10751_v47  ;;  %8381 = vmatprep.subr.mxu1 %v10974_v16 }
 0x301   : > { %8382 = vmatpush3.msra.mxu1 %v10974_v16 }
 0x302   : > { %8383 = vmatprep.subr.mxu1 %v10968_v13 }
 0x303   : > { %8330 = vmatpush3.xpose.msk.msra.mxu0 %vm1453_vm1, %v10751_v47  ;;  %8384 = vmatpush3.msra.mxu1 %v10968_v13 }
 0x304   : > { %8331 = vmatprep.subr.msk.mxu0 %vm1453_vm1, %v10745_v41  ;;  %8385 = vmatprep.subr.mxu1 %v10970_v14 }
 0x305   : > { %8386 = vmatpush3.msra.mxu1 %v10970_v14 }
 0x306   : > { %8387 = vmatprep.subr.mxu1 %v10964_v60 }
 0x307   : > { %8332 = vmatpush3.xpose.msk.msra.mxu0 %vm1453_vm1, %v10745_v41  ;;  %8388 = vmatpush3.msra.mxu1 %v10964_v60 }
 0x308   : > { %8333 = vmatprep.subr.msk.mxu0 %vm1453_vm1, %v10747_v43  ;;  %8389 = vmatprep.subr.mxu1 %v10966_v12 }
 0x309   : > { %8390 = vmatpush3.msra.mxu1 %v10966_v12 }
 0x30a   : > { %8391 = vmatprep.subr.mxu1 %v10960_v58 }
 0x30b   : > { %8334 = vmatpush3.xpose.msk.msra.mxu0 %vm1453_vm1, %v10747_v43  ;;  %8392 = vmatpush3.msra.mxu1 %v10960_v58 }
 0x30c   : > { %8335 = vmatprep.subr.msk.mxu0 %vm1453_vm1, %v10741_v37  ;;  %8393 = vmatprep.subr.mxu1 %v10962_v59 }
 0x30d   : > { %8394 = vmatpush3.msra.mxu1 %v10962_v59  ;;  %v11014_v59 = vld [vmem:[#allocation3 + $0x18] sm:$0xff] }
 0x30e   : > { %8395 = vmatprep.subr.mxu1 %v10956_v56  ;;  %14458 = vst [vmem:[#allocation74_spill] sm:$0xff] %v11014_v59 }
 0x30f   : > { %8336 = vmatpush3.xpose.msk.msra.mxu0 %vm1453_vm1, %v10741_v37  ;;  %8396 = vmatpush3.msra.mxu1 %v10956_v56  ;;  %v11012_v56 = vld [vmem:[#allocation3] sm:$0xff] }
 0x310   : > { %8337 = vmatprep.subr.msk.mxu0 %vm1453_vm1, %v10743_v39  ;;  %8397 = vmatprep.subr.mxu1 %v10958_v57  ;;  %14457 = vst [vmem:[#allocation73_spill] sm:$0xff] %v11012_v56 }
 0x311   : > { %8398 = vmatpush3.msra.mxu1 %v10958_v57 }
 0x312   : > { %8399 = vmatprep.subr.mxu1 %v10952_v52 }
 0x313   : > { %8338 = vmatpush3.xpose.msk.msra.mxu0 %vm1453_vm1, %v10743_v39  ;;  %8400 = vmatpush3.msra.mxu1 %v10952_v52 }
 0x314   : > { %8339 = vmatprep.subr.msk.mxu0 %vm1453_vm1, %v10737_v33  ;;  %8401 = vmatprep.subr.mxu1 %v10954_v54 }
 0x315   : > { %8402 = vmatpush3.msra.mxu1 %v10954_v54 }
 0x316   : > { %8403 = vmatprep.subr.mxu1 %v10948_v48 }
 0x317   : > { %8340 = vmatpush3.xpose.msk.msra.mxu0 %vm1453_vm1, %v10737_v33  ;;  %8404 = vmatpush3.msra.mxu1 %v10948_v48 }
 0x318   : > { %8341 = vmatprep.subr.msk.mxu0 %vm1453_vm1, %v10739_v35  ;;  %8405 = vmatprep.subr.mxu1 %v10950_v50 }
 0x319   : > { %8406 = vmatpush3.msra.mxu1 %v10950_v50 }
 0x31b   : > { %8342 = vmatpush3.xpose.msk.msra.mxu0 %vm1453_vm1, %v10739_v35 }
 0x31c   : > { %8343 = vmatprep.subr.msk.mxu0 %vm1453_vm1, %v10733_v29 }
 0x31f   : > { %8344 = vmatpush3.xpose.msk.msra.mxu0 %vm1453_vm1, %v10733_v29 }
 0x320   : > { %8345 = vmatprep.subr.msk.mxu0 %vm1453_vm1, %v10735_v31 }
 0x323   : > { %8346 = vmatpush3.xpose.msk.msra.mxu0 %vm1453_vm1, %v10735_v31 }
 0x324   : > { %8347 = vmatprep.subr.msk.mxu0 %vm1453_vm1, %v10729_v25 }
 0x327   : > { %8348 = vmatpush3.xpose.msk.msra.mxu0 %vm1453_vm1, %v10729_v25 }
 0x328   : > { %8349 = vmatprep.subr.msk.mxu0 %vm1453_vm1, %v10731_v27 }
 0x32b   : > { %8350 = vmatpush3.xpose.msk.msra.mxu0 %vm1453_vm1, %v10731_v27 }
 0x32e   : > { %8352 = vmatmul.mubr.msk.f32.vlgmr.msra.gmra.mxu0 %vm1453_vm1, %v10834_v61 }
 0x32f   : > { %8354 = vmatprep.mubr.msk.f32.mxu0 %vm1453_vm1, %v10836_v62 }
 0x332   : > { %8355 = vmatmul.mubr.msk.f32.gmra.mxu0 %vm1453_vm1, %v10842_v63 }
 0x333   : > { %8357 = vmatprep.mubr.msk.f32.mxu0 %vm1453_vm1, %v10844_v0 }
 0x336   : > { %8358 = vmatmul.mubr.msk.f32.gmra.mxu0 %vm1453_vm1, %v10850_v1 }
 0x337   : > { %8360 = vmatprep.mubr.msk.f32.mxu0 %vm1453_vm1, %v10852_v2 }
 0x33a   : > { %8361 = vmatmul.mubr.msk.f32.gmra.mxu0 %vm1453_vm1, %v10858_v3 }
 0x33b   : > { %8363 = vmatprep.mubr.msk.f32.mxu0 %vm1453_vm1, %v10860_v4 }
 0x33e   : > { %8364 = vmatmul.mubr.msk.f32.gmra.mxu0 %vm1453_vm1, %v10866_v5 }
 0x33f   : > { %8366 = vmatprep.mubr.msk.f32.mxu0 %vm1453_vm1, %v10868_v6 }
 0x342   : > { %8367 = vmatmul.mubr.msk.f32.gmra.mxu0 %vm1453_vm1, %v10874_v7 }
 0x343   : > { %8369 = vmatprep.mubr.msk.f32.mxu0 %vm1453_vm1, %v10876_v8 }
 0x346   : > { %8370 = vmatmul.mubr.msk.f32.gmra.mxu0 %vm1453_vm1, %v10882_v9 }
 0x347   : > { %8372 = vmatprep.mubr.msk.f32.mxu0 %vm1453_vm1, %v10884_v10 }
 0x34a   : > { %8373 = vmatmul.mubr.msk.f32.gmra.mxu0 %vm1453_vm1, %v10890_v11 }
 0x3ee   : > { %v10900_v19 = vpop.f32.mrf.mxu0 }
 0x3f0   : > { %v10902_v20 = vpop.f32.mrf.mxu0 }
 0x3f1   : > { %1711 = vmax.xlane.f32.xlu0 %v10902_v20 }
 0x3f2   : > { %v10905_v21 = vpop.f32.mrf.mxu0 }
 0x3f3   : > { %1717 = vmax.xlane.f32.xlu1 %v10905_v21 }
 0x3f4   : > { %v10908_v22 = vpop.f32.mrf.mxu0 }
 0x3f5   : > { %1713 = vmax.xlane.f32.xlu0 %v10900_v19 }
 0x3f6   : > { %v10911_v23 = vpop.f32.mrf.mxu0 }
 0x3f7   : > { %1715 = vmax.xlane.f32.xlu1 %v10908_v22 }
 0x3f8   : > { %v10914_v24 = vpop.f32.mrf.mxu0 }
 0x3f9   : > { %1719 = vmax.xlane.f32.xlu0 %v10914_v24 }
 0x3fa   : > { %v10917_v26 = vpop.f32.mrf.mxu0 }
 0x3fb   : > { %1721 = vmax.xlane.f32.xlu1 %v10911_v23 }
 0x3fc   : > { %v10920_v28 = vpop.f32.mrf.mxu0 }
 0x3fd   : > { %1723 = vmax.xlane.f32.xlu0 %v10920_v28 }
 0x3fe   : > { %v10923_v32 = vpop.f32.mrf.mxu0 }
 0x3ff   : > { %1725 = vmax.xlane.f32.xlu1 %v10917_v26 }
 0x400   : > { %v10926_v34 = vpop.f32.mrf.mxu0 }
 0x401   : > { %1727 = vmax.xlane.f32.xlu0 %v10926_v34 }
 0x402   : > { %v10929_v36 = vpop.f32.mrf.mxu0 }
 0x403   : > { %1729 = vmax.xlane.f32.xlu1 %v10923_v32 }
 0x404   : > { %v10932_v38 = vpop.f32.mrf.mxu0 }
 0x405   : > { %1731 = vmax.xlane.f32.xlu0 %v10932_v38 }
 0x406   : > { %v10935_v40 = vpop.f32.mrf.mxu0 }
 0x407   : > { %14437 = vst [vmem:[#allocation53_spill] sm:$0xff] %v10935_v40  ;;  %1733 = vmax.xlane.f32.xlu1 %v10929_v36 }
 0x408   : > { %v10938_v42 = vpop.f32.mrf.mxu0 }
 0x409   : > { %14438 = vst [vmem:[#allocation54_spill] sm:$0xff] %v10938_v42  ;;  %1735 = vmax.xlane.f32.xlu0 %v10938_v42  ;;  %v11029_v42 = vld [vmem:[#allocation3 + $0x10] sm:$0xff] }
 0x40a   : > { %v10941_v44 = vpop.f32.mrf.mxu0  ;;  %14461 = vst [vmem:[#allocation77_spill] sm:$0xff] %v11029_v42 }
 0x40b   : > { %14439 = vst [vmem:[#allocation55_spill] sm:$0xff] %v10941_v44  ;;  %1737 = vmax.xlane.f32.xlu1 %v10935_v40  ;;  %v11102_v40 = vld [vmem:[#allocation3 + $0x50] sm:$0xff] }
 0x40c   : > { %v10944_v46 = vpop.f32.mrf.mxu0  ;;  %14471 = vst [vmem:[#allocation87_spill] sm:$0xff] %v11102_v40 }
 0x40d   : > { %14440 = vst [vmem:[#allocation56_spill] sm:$0xff] %v10944_v46  ;;  %1739 = vmax.xlane.f32.xlu0 %v10944_v46 }
 0x40f   : > { %1741 = vmax.xlane.f32.xlu1 %v10941_v44  ;;  %v11019_v44 = vld [vmem:[#allocation3 + $0x8] sm:$0xff] }
 0x410   : > { %14460 = vst [vmem:[#allocation76_spill] sm:$0xff] %v11019_v44 }
 0x47a   : > { %v1712_v57 = vpop.xlane.xlu0 %1711 }
 0x47b   : > { %v11017_v52 = vmax.f32 %v11012_v56, %v1712_v57  ;;  %v11038_v56 = vld [vmem:[#allocation3 + $0x20] sm:$0xff] }
 0x47c   : > { %v1718_v58 = vpop.xlane.xlu1 %1717  ;;  %14463 = vst [vmem:[#allocation79_spill] sm:$0xff] %v11038_v56 }
 0x47d   : > { %14459 = vst [vmem:[#allocation75_spill] sm:$0xff] %v11017_v52  ;;  %2321 = vst.msk [vmem:[#allocation3] sm:$0xff] %vm2015_vm2, %v11017_v52  ;;  %v11026_v50 = vmax.f32 %v11014_v59, %v1718_v58  ;;  %1809 = vperm.xlu0 %9090, %v11017_v52  }
 0x47e   : > { %v1714_v48 = vpop.xlane.xlu0 %1713 }
 0x47f   : > { %2324 = vst.msk [vmem:[#allocation3 + $0x18] sm:$0xff] %vm2015_vm2, %v11026_v50  ;;  %v11036_v46 = vmax.f32 %v11019_v44, %v1714_v48  ;;  %v11050_v48 = vld [vmem:[#allocation3 + $0x28] sm:$0xff]  ;;  %v11059_v44 = vld [vmem:[#allocation3 + $0x30] sm:$0xff] }
 0x480   : > { %v1716_v54 = vpop.xlane.xlu1 %1715  ;;  %14464 = vst [vmem:[#allocation80_spill] sm:$0xff] %v11050_v48  ;;  %14465 = vst [vmem:[#allocation81_spill] sm:$0xff] %v11059_v44 }
 0x481   : > { %14462 = vst [vmem:[#allocation78_spill] sm:$0xff] %v11036_v46  ;;  %2322 = vst.msk [vmem:[#allocation3 + $0x8] sm:$0xff] %vm2015_vm2, %v11036_v46  ;;  %v11045_v52 = vmax.f32 %v11029_v42, %v1716_v54  ;;  %1814 = vperm.xlu1 %9091, %v11036_v46   ;;  %2423 = vrot.lane.b32.xlu0 %v10749_v45, %s9952_s0  ;;  %v11092_v45 = vld [vmem:[#allocation3 + $0x48] sm:$0xff] }
 0x482   : > { %v1720_v57 = vpop.xlane.xlu0 %1719  ;;  %14470 = vst [vmem:[#allocation86_spill] sm:$0xff] %v11092_v45 }
 0x483   : > { %2323 = vst.msk [vmem:[#allocation3 + $0x10] sm:$0xff] %vm2015_vm2, %v11045_v52  ;;  %v11057_v58 = vmax.f32 %v11038_v56, %v1720_v57  ;;  %v11072_v57 = vld [vmem:[#allocation3 + $0x38] sm:$0xff] }
 0x484   : > { %v1722_v54 = vpop.xlane.xlu1 %1721  ;;  %14466 = vst [vmem:[#allocation82_spill] sm:$0xff] %v11072_v57 }
 0x485   : > { %v11062_v46 = vmax.f32 %v11050_v48, %v1722_v54  ;;  %2431 = vrot.lane.b32.xlu1 %v10760_v53, %s9952_s0  ;;  %2419 = vrot.lane.b32.xlu0 %v10745_v41, %s9952_s0  ;;  %2325 = vst.msk [vmem:[#allocation3 + $0x20] sm:$0xff] %vm2015_vm2, %v11057_v58  ;;  %v11081_v41 = vld [vmem:[#allocation3 + $0x40] sm:$0xff] }
 0x486   : > { %v1724_v42 = vpop.xlane.xlu0 %1723  ;;  %14468 = vst [vmem:[#allocation84_spill] sm:$0xff] %v11081_v41 }
 0x487   : > { %2326 = vst.msk [vmem:[#allocation3 + $0x28] sm:$0xff] %vm2015_vm2, %v11062_v46  ;;  %v11079_v54 = vmax.f32 %v11059_v44, %v1724_v42 }
 0x488   : > { %v1726_v53 = vpop.xlane.xlu1 %1725 }
 0x489   : > { %14467 = vst [vmem:[#allocation83_spill] sm:$0xff] %v11079_v54  ;;  %v11084_v59 = vmax.f32 %v11072_v57, %v1726_v53  ;;  %2429 = vrot.lane.b32.xlu1 %v10765_v55, %s9952_s0  ;;  %2327 = vst.msk [vmem:[#allocation3 + $0x30] sm:$0xff] %vm2015_vm2, %v11079_v54  ;;  %v11113_v57 = vld [vmem:[#allocation3 + $0x58] sm:$0xff] }
 0x48a   : > { %v1728_v48 = vpop.xlane.xlu0 %1727  ;;  %14472 = vst [vmem:[#allocation88_spill] sm:$0xff] %v11113_v57 }
 0x48b   : > { %14469 = vst [vmem:[#allocation85_spill] sm:$0xff] %v11084_v59  ;;  %2328 = vst.msk [vmem:[#allocation3 + $0x38] sm:$0xff] %vm2015_vm2, %v11084_v59  ;;  %1844 = vperm.xlu0 %9090, %v11084_v59   ;;  %v11100_v53 = vmax.f32 %v11081_v41, %v1728_v48  ;;  %v11134_v41 = vld [vmem:[#allocation3 + $0x68] sm:$0xff] }
 0x48c   : > { %v1730_v55 = vpop.xlane.xlu1 %1729 }
 0x48d   : > { %v11105_v56 = vmax.f32 %v11092_v45, %v1730_v55  ;;  %2427 = vrot.lane.b32.xlu1 %v10754_v49, %s9952_s0  ;;  %2329 = vst.msk [vmem:[#allocation3 + $0x40] sm:$0xff] %vm2015_vm2, %v11100_v53  ;;  %v11123_v49 = vld [vmem:[#allocation3 + $0x60] sm:$0xff] }
 0x48e   : > { %v1732_v59 = vpop.xlane.xlu0 %1731  ;;  %14473 = vst [vmem:[#allocation89_spill] sm:$0xff] %v11123_v49 }
 0x48f   : > { %2330 = vst.msk [vmem:[#allocation3 + $0x48] sm:$0xff] %vm2015_vm2, %v11105_v56  ;;  %1839 = vperm.xlu0 %9090, %v11079_v54   ;;  %v11121_v55 = vmax.f32 %v11102_v40, %v1732_v59 }
 0x490   : > { %v1734_v44 = vpop.xlane.xlu1 %1733 }
 0x491   : > { %v11126_v42 = vmax.f32 %v11113_v57, %v1734_v44  ;;  %2425 = vrot.lane.b32.xlu1 %v10757_v51, %s9952_s0  ;;  %2331 = vst.msk [vmem:[#allocation3 + $0x50] sm:$0xff] %vm2015_vm2, %v11121_v55  ;;  %v11144_v51 = vld [vmem:[#allocation3 + $0x70] sm:$0xff] }
 0x492   : > { %v1736_v45 = vpop.xlane.xlu0 %1735 }
 0x493   : > { %14474 = vst [vmem:[#allocation90_spill] sm:$0xff] %v11126_v42  ;;  %2332 = vst.msk [vmem:[#allocation3 + $0x58] sm:$0xff] %vm2015_vm2, %v11126_v42  ;;  %1864 = vperm.xlu0 %9090, %v11126_v42   ;;  %v11142_v44 = vmax.f32 %v11123_v49, %v1736_v45  ;;  %v11155_v42 = vld [vmem:[#allocation3 + $0x78] sm:$0xff] }
 0x494   : > { %v1738_v54 = vpop.xlane.xlu1 %1737  ;;  %14476 = vst [vmem:[#allocation92_spill] sm:$0xff] %v11155_v42 }
 0x495   : > { %2421 = vrot.lane.b32.xlu1 %v10751_v47, %s9952_s0  ;;  %2333 = vst.msk [vmem:[#allocation3 + $0x60] sm:$0xff] %vm2015_vm2, %v11142_v44  ;;  %v11153_v59 = vmax.f32 %v11134_v41, %v1738_v54 }
 0x496   : > { %v1740_v57 = vpop.xlane.xlu0 %1739 }
 0x497   : > { %14475 = vst [vmem:[#allocation91_spill] sm:$0xff] %v11153_v59  ;;  %1859 = vperm.xlu0 %9090, %v11121_v55   ;;  %2334 = vst.msk [vmem:[#allocation3 + $0x68] sm:$0xff] %vm2015_vm2, %v11153_v59  ;;  %v11163_v40 = vmax.f32 %v11144_v51, %v1740_v57 }
 0x498   : > { %v1742_v48 = vpop.xlane.xlu1 %1741 }
 0x499   : > { %2417 = vrot.lane.b32.xlu1 %v10747_v43, %s9952_s0  ;;  %2335 = vst.msk [vmem:[#allocation3 + $0x70] sm:$0xff] %vm2015_vm2, %v11163_v40  ;;  %v11172_v49 = vmax.f32 %v11155_v42, %v1742_v48  ;;  %v11552_v42 = vld [vmem:[#allocation3 + $0xb0] sm:$0xff] }
 0x49a   : > { %14523 = vst [vmem:[#allocation117_spill] sm:$0xff] %v11552_v42 }
 0x49b   : > { %14477 = vst [vmem:[#allocation93_spill] sm:$0xff] %v11172_v49  ;;  %2415 = vrot.lane.b32.xlu0 %v10741_v37, %s9952_s0  ;;  %2336 = vst.msk [vmem:[#allocation3 + $0x78] sm:$0xff] %vm2015_vm2, %v11172_v49 }
 0x49d   : > { %1824 = vperm.xlu1 %9091, %v11026_v50  }
 0x49f   : > { %1879 = vperm.xlu0 %9090, %v11163_v40  }
 0x4a1   : > { %1819 = vperm.xlu1 %9091, %v11045_v52  }
 0x4a3   : > { %1884 = vperm.xlu0 %9090, %v11172_v49   ;;  %v11561_v49 = vld [vmem:[#allocation3 + $0xb8] sm:$0xff] }
 0x4a4   : > { %14525 = vst [vmem:[#allocation119_spill] sm:$0xff] %v11561_v49 }
 0x4a5   : > { %1834 = vperm.xlu1 %9091, %v11062_v46  }
 0x4a7   : > { %2409 = vrot.lane.b32.xlu0 %v10739_v35, %s9952_s0 }
 0x4a9   : > { %1829 = vperm.xlu1 %9091, %v11057_v58  }
 0x4ab   : > { %2405 = vrot.lane.b32.xlu0 %v10735_v31, %s9952_s0 }
 0x4ad   : > { %1854 = vperm.xlu1 %9091, %v11105_v56  }
 0x4af   : > { %2401 = vrot.lane.b32.xlu0 %v10731_v27, %s9952_s0 }
 0x4b1   : > { %1849 = vperm.xlu1 %9091, %v11100_v53  }
 0x4b3   : > { %2371 = vrot.lane.b32.xlu0 %v10834_v61, %s9952_s0 }
 0x4b5   : > { %1874 = vperm.xlu1 %9091, %v11153_v59   ;;  %v11592_v59 = vld [vmem:[#allocation3 + $0xd0] sm:$0xff] }
 0x4b6   : > { %14530 = vst [vmem:[#allocation124_spill] sm:$0xff] %v11592_v59 }
 0x4b7   : > { %2375 = vrot.lane.b32.xlu0 %v10842_v63, %s9952_s0 }
 0x4b9   : > { %1869 = vperm.xlu1 %9091, %v11142_v44  }
 0x4bb   : > { %2379 = vrot.lane.b32.xlu0 %v10850_v1, %s9952_s0 }
 0x4bd   : > { %2413 = vrot.lane.b32.xlu1 %v10743_v39, %s9952_s0 }
 0x4bf   : > { %2383 = vrot.lane.b32.xlu0 %v10858_v3, %s9952_s0 }
 0x4c1   : > { %2411 = vrot.lane.b32.xlu1 %v10737_v33, %s9952_s0 }
 0x4c3   : > { %2387 = vrot.lane.b32.xlu0 %v10866_v5, %s9952_s0 }
 0x4c5   : > { %2407 = vrot.lane.b32.xlu1 %v10733_v29, %s9952_s0 }
 0x4c7   : > { %2391 = vrot.lane.b32.xlu0 %v10874_v7, %s9952_s0 }
 0x4c9   : > { %2403 = vrot.lane.b32.xlu1 %v10729_v25, %s9952_s0 }
 0x4cb   : > { %2395 = vrot.lane.b32.xlu0 %v10882_v9, %s9952_s0 }
 0x4cd   : > { %2369 = vrot.lane.b32.xlu1 %v10724_v18, %s9952_s0 }
 0x4cf   : > { %2399 = vrot.lane.b32.xlu0 %v10890_v11, %s9952_s0 }
 0x4d1   : > { %2373 = vrot.lane.b32.xlu1 %v10836_v62, %s9952_s0 }
 0x4d3   : > { %3026 = vrot.lane.b32.xlu0 %v10976_v17, %s9952_s0  ;;  %v14507_v17 = vld [vmem:[#allocation60_spill] sm:$0xff] }
 0x4d5   : > { %2377 = vrot.lane.b32.xlu1 %v10844_v0, %s9952_s0 }
 0x4d7   : > { %3020 = vrot.lane.b32.xlu0 %v10974_v16, %s9952_s0 }
 0x4d9   : > { %2381 = vrot.lane.b32.xlu1 %v10852_v2, %s9952_s0 }
 0x4db   : > { %3016 = vrot.lane.b32.xlu0 %v10970_v14, %s9952_s0  ;;  %v11480_v14 = vld [vmem:[#allocation3 + $0x80] sm:$0xff] }
 0x4dc   : > { %14501 = vst [vmem:[#allocation107_spill] sm:$0xff] %v11480_v14 }
 0x4dd   : > { %2385 = vrot.lane.b32.xlu1 %v10860_v4, %s9952_s0 }
 0x4df   : > { %3012 = vrot.lane.b32.xlu0 %v10966_v12, %s9952_s0  ;;  %v11478_v12 = vld [vmem:[#allocation3 + $0x88] sm:$0xff] }
 0x4e0   : > { %14500 = vst [vmem:[#allocation106_spill] sm:$0xff] %v11478_v12 }
 0x4e1   : > { %2389 = vrot.lane.b32.xlu1 %v10868_v6, %s9952_s0 }
 0x4e5   : > { %2393 = vrot.lane.b32.xlu1 %v10876_v8, %s9952_s0 }
 0x4e9   : > { %2397 = vrot.lane.b32.xlu1 %v10884_v10, %s9952_s0 }
 0x4ed   : > { %3024 = vrot.lane.b32.xlu1 %v10979_v30, %s9952_s0  ;;  %v14504_v30 = vld [vmem:[#allocation61_spill] sm:$0xff] }
 0x4f1   : > { %3022 = vrot.lane.b32.xlu1 %v10972_v15, %s9952_s0 }
 0x4f5   : > { %3018 = vrot.lane.b32.xlu1 %v10968_v13, %s9952_s0 }
 0x4f8   : > { %v1810_v18 = vpop.permute.xlu0 %1809 }
 0x4f9   : > { %v1887_v61 = vsub.f32 %v10902_v20, %v1810_v18  ;;  %3014 = vrot.lane.b32.xlu1 %v10964_v60, %s9952_s0 }
 0x4fb   : > { %v1903_v62 = vmul.f32 1.442695, %v1887_v61 }
 0x4fc   : > { %v1815_v63 = vpop.permute.xlu1 %1814  ;;  %v2424_v0 = vpop.permute.xlu0 %2423 }
 0x4fd   : > { %9092 = vpow2.f32 %v1903_v62  ;;  %v1888_v1 = vsub.f32 %v10900_v19, %v1815_v63 }
 0x4ff   : > { %v1905_v2 = vmul.f32 1.442695, %v1888_v1 }
 0x500   : > { %v2432_v3 = vpop.permute.xlu1 %2431  ;;  %v2420_v4 = vpop.permute.xlu0 %2419 }
 0x501   : > { %9094 = vpow2.f32 %v1905_v2  ;;  %8431 = vmatprep.subr.msk.mxu1 %vm1453_vm1, %v2432_v3 }
 0x504   : > { %v2430_v5 = vpop.permute.xlu1 %2429 }
 0x506   : > { %v1845_v6 = vpop.permute.xlu0 %1844 }
 0x508   : > { %v2428_v7 = vpop.permute.xlu1 %2427 }
 0x50a   : > { %v11255_v8 = vpop.eup %9092  ;;  %v1840_v9 = vpop.permute.xlu0 %1839 }
 0x50b   : > { %8407 = vmatprep.mubr.f32.mxu1 %v11255_v8 }
 0x50c   : > { %v2426_v10 = vpop.permute.xlu1 %2425 }
 0x50e   : > { %v11258_v11 = vpop.eup %9094  ;;  %v11260_v20 = vpop.permute.xlu0 %1864 }
 0x50f   : > { %8408 = vmatmul.mubr.f32.vlgmr.msra.gmra.mxu1 %v11258_v11 }
 0x510   : > { %8432 = vmatpush3.xpose.msk.msra.mxu1 %vm1453_vm1, %v2432_v3  ;;  %v2422_v19 = vpop.permute.xlu1 %2421 }
 0x511   : > { %8433 = vmatprep.subr.msk.mxu1 %vm1453_vm1, %v2430_v5 }
 0x512   : > { %v1860_v48 = vpop.permute.xlu0 %1859 }
 0x514   : > { %8434 = vmatpush3.xpose.msk.msra.mxu1 %vm1453_vm1, %v2430_v5  ;;  %v2418_v18 = vpop.permute.xlu1 %2417 }
 0x515   : > { %8435 = vmatprep.subr.msk.mxu1 %vm1453_vm1, %v2428_v7 }
 0x516   : > { %v2416_v61 = vpop.permute.xlu0 %2415 }
 0x518   : > { %8436 = vmatpush3.xpose.msk.msra.mxu1 %vm1453_vm1, %v2428_v7  ;;  %v1825_v62 = vpop.permute.xlu1 %1824 }
 0x519   : > { %8437 = vmatprep.subr.msk.mxu1 %vm1453_vm1, %v2426_v10  ;;  %v1890_v1 = vsub.f32 %v10905_v21, %v1825_v62 }
 0x51a   : > { %v11269_v63 = vpop.permute.xlu0 %1879 }
 0x51b   : > { %v1909_v57 = vmul.f32 1.442695, %v1890_v1 }
 0x51c   : > { %8438 = vmatpush3.xpose.msk.msra.mxu1 %vm1453_vm1, %v2426_v10  ;;  %v1820_v2 = vpop.permute.xlu1 %1819  ;;  %v1893_v10 = vsub.f32 %v10920_v28, %v1840_v9  ;;  %v1898_v9 = vsub.f32 %v10929_v36, %v11260_v20  ;;  %v14479_v20 = vld [vmem:[#allocation56_spill] sm:$0xff] }
 0x51d   : > { %v1889_v3 = vsub.f32 %v10908_v22, %v1820_v2  ;;  %8439 = vmatprep.subr.msk.mxu1 %vm1453_vm1, %v2424_v0 }
 0x51e   : > { %v11275_v5 = vpop.permute.xlu0 %1884  ;;  %v1915_v2 = vmul.f32 1.442695, %v1893_v10 }
 0x51f   : > { %v1907_v45 = vmul.f32 1.442695, %v1889_v3 }
 0x520   : > { %8440 = vmatpush3.xpose.msk.msra.mxu1 %vm1453_vm1, %v2424_v0  ;;  %v1835_v7 = vpop.permute.xlu1 %1834  ;;  %v1894_v0 = vsub.f32 %v10917_v26, %v1845_v6  ;;  %v1897_v26 = vsub.f32 %v10932_v38, %v1860_v48  ;;  %v1925_v48 = vmul.f32 1.442695, %v1898_v9 }
 0x521   : > { %9096 = vpow2.f32 %v1907_v45  ;;  %8441 = vmatprep.subr.msk.mxu1 %vm1453_vm1, %v2422_v19  ;;  %v1892_v54 = vsub.f32 %v10911_v23, %v1835_v7 }
 0x522   : > { %v11280_v21 = vpop.permute.xlu0 %2409  ;;  %9098 = vpow2.f32 %v1909_v57  ;;  %v1917_v28 = vmul.f32 1.442695, %v1894_v0  ;;  %v1923_v7 = vmul.f32 1.442695, %v1897_v26 }
 0x523   : > { %v1913_v1 = vmul.f32 1.442695, %v1892_v54 }
 0x524   : > { %8442 = vmatpush3.xpose.msk.msra.mxu1 %vm1453_vm1, %v2422_v19  ;;  %v1830_v22 = vpop.permute.xlu1 %1829 }
 0x525   : > { %v1891_v62 = vsub.f32 %v10914_v24, %v1830_v22  ;;  %8443 = vmatprep.subr.msk.mxu1 %vm1453_vm1, %v2420_v4 }
 0x526   : > { %v11287_v45 = vpop.permute.xlu0 %2405 }
 0x527   : > { %v1911_v3 = vmul.f32 1.442695, %v1891_v62  ;;  %v1901_v62 = vsub.f32 %v14479_v20, %v11269_v63 }
 0x528   : > { %8444 = vmatpush3.xpose.msk.msra.mxu1 %vm1453_vm1, %v2420_v4  ;;  %v1855_v23 = vpop.permute.xlu1 %1854 }
 0x529   : > { %9100 = vpow2.f32 %v1911_v3  ;;  %8445 = vmatprep.subr.msk.mxu1 %vm1453_vm1, %v2418_v18  ;;  %v1896_v57 = vsub.f32 %v10923_v32, %v1855_v23 }
 0x52a   : > { %9102 = vpow2.f32 %v1913_v1  ;;  %v11292_v24 = vpop.permute.xlu0 %2401  ;;  %v14480_v1 = vld [vmem:[#allocation54_spill] sm:$0xff] }
 0x52b   : > { %9104 = vpow2.f32 %v1915_v2  ;;  %v1921_v19 = vmul.f32 1.442695, %v1896_v57 }
 0x52c   : > { %8446 = vmatpush3.xpose.msk.msra.mxu1 %vm1453_vm1, %v2418_v18  ;;  %v1850_v54 = vpop.permute.xlu1 %1849  ;;  %9106 = vpow2.f32 %v1917_v28  ;;  %v14478_v18 = vld [vmem:[#allocation53_spill] sm:$0xff] }
 0x52d   : > { %v1895_v6 = vsub.f32 %v10926_v34, %v1850_v54  ;;  %8447 = vmatprep.subr.msk.mxu1 %vm1453_vm1, %v2416_v61  ;;  %v1931_v54 = vmul.f32 1.442695, %v1901_v62 }
 0x52e   : > { %v11298_v4 = vpop.eup %9096  ;;  %v11302_v32 = vpop.permute.xlu0 %2371 }
 0x52f   : > { %v1919_v10 = vmul.f32 1.442695, %v1895_v6  ;;  %8410 = vmatprep.mubr.f32.mxu1 %v11298_v4  ;;  %v11305_v38 = vpop.eup %9098 }
 0x530   : > { %8448 = vmatpush3.xpose.msk.msra.mxu1 %vm1453_vm1, %v2416_v61  ;;  %v1875_v34 = vpop.permute.xlu1 %1874  ;;  %v14481_v61 = vld [vmem:[#allocation55_spill] sm:$0xff] }
 0x531   : > { %9108 = vpow2.f32 %v1919_v10  ;;  %8411 = vmatmul.mubr.f32.gmra.mxu1 %v11305_v38  ;;  %v1900_v22 = vsub.f32 %v14478_v18, %v1875_v34  ;;  %v1902_v23 = vsub.f32 %v14481_v61, %v11275_v5 }
 0x532   : > { %9110 = vpow2.f32 %v1921_v19  ;;  %v11310_v36 = vpop.permute.xlu0 %2375 }
 0x533   : > { %9112 = vpow2.f32 %v1923_v7  ;;  %v1929_v28 = vmul.f32 1.442695, %v1900_v22  ;;  %v1933_v5 = vmul.f32 1.442695, %v1902_v23 }
 0x534   : > { %v1870_v0 = vpop.permute.xlu1 %1869  ;;  %9114 = vpow2.f32 %v1925_v48 }
 0x535   : > { %v1899_v2 = vsub.f32 %v14480_v1, %v1870_v0 }
 0x536   : > { %v11315_v3 = vpop.eup %9100  ;;  %v11319_v57 = vpop.permute.xlu0 %2379 }
 0x537   : > { %v11321_v26 = vpop.eup %9102  ;;  %v1927_v6 = vmul.f32 1.442695, %v1899_v2  ;;  %8413 = vmatprep.mubr.f32.mxu1 %v11315_v3 }
 0x538   : > { %v11324_v9 = vpop.eup %9104  ;;  %v2414_v63 = vpop.permute.xlu1 %2413  ;;  %8414 = vmatmul.mubr.f32.gmra.mxu1 %v11321_v26 }
 0x539   : > { %9116 = vpow2.f32 %v1927_v6  ;;  %8416 = vmatprep.mubr.f32.mxu1 %v11324_v9  ;;  %8449 = vmatprep.subr.msk.mxu1 %vm1453_vm1, %v2414_v63  ;;  %v11330_v7 = vpop.eup %9106 }
 0x53a   : > { %9118 = vpow2.f32 %v1929_v28  ;;  %8450 = vmatpush3.xpose.msk.msra.mxu1 %vm1453_vm1, %v2414_v63  ;;  %v2384_v19 = vpop.permute.xlu0 %2383 }
 0x53b   : > { %9120 = vpow2.f32 %v1931_v54 }
 0x53c   : > { %v2412_v10 = vpop.permute.xlu1 %2411  ;;  %8417 = vmatmul.mubr.f32.gmra.mxu1 %v11330_v7  ;;  %9122 = vpow2.f32 %v1933_v5 }
 0x53d   : > { %8451 = vmatprep.subr.msk.mxu1 %vm1453_vm1, %v2412_v10 }
 0x53e   : > { %v11334_v34 = vpop.eup %9108  ;;  %8452 = vmatpush3.xpose.msk.msra.mxu1 %vm1453_vm1, %v2412_v10  ;;  %v2388_v48 = vpop.permute.xlu0 %2387 }
 0x53f   : > { %v11337_v18 = vpop.eup %9110  ;;  %8419 = vmatprep.mubr.f32.mxu1 %v11334_v34  ;;  %8453 = vmatprep.subr.msk.mxu1 %vm1453_vm1, %v11280_v21 }
 0x540   : > { %v11342_v22 = vpop.eup %9112  ;;  %v2408_v20 = vpop.permute.xlu1 %2407  ;;  %8420 = vmatmul.mubr.f32.gmra.mxu1 %v11337_v18 }
 0x541   : > { %8422 = vmatprep.mubr.f32.mxu1 %v11342_v22  ;;  %v11348_v0 = vpop.eup %9114 }
 0x542   : > { %8454 = vmatpush3.xpose.msk.msra.mxu1 %vm1453_vm1, %v11280_v21  ;;  %v2392_v62 = vpop.permute.xlu0 %2391 }
 0x543   : > { %8455 = vmatprep.subr.msk.mxu1 %vm1453_vm1, %v2408_v20 }
 0x544   : > { %v2404_v1 = vpop.permute.xlu1 %2403  ;;  %8423 = vmatmul.mubr.f32.gmra.mxu1 %v11348_v0 }
 0x546   : > { %v11352_v2 = vpop.eup %9116  ;;  %8456 = vmatpush3.xpose.msk.msra.mxu1 %vm1453_vm1, %v2408_v20  ;;  %v2396_v61 = vpop.permute.xlu0 %2395 }
 0x547   : > { %v11355_v23 = vpop.eup %9118  ;;  %8425 = vmatprep.mubr.f32.mxu1 %v11352_v2  ;;  %8457 = vmatprep.subr.msk.mxu1 %vm1453_vm1, %v11287_v45 }
 0x548   : > { %v11360_v21 = vpop.eup %9120  ;;  %v2370_v28 = vpop.permute.xlu1 %2369  ;;  %8426 = vmatmul.mubr.f32.gmra.mxu1 %v11355_v23 }
 0x549   : > { %8428 = vmatprep.mubr.f32.mxu1 %v11360_v21  ;;  %v11366_v6 = vpop.eup %9122 }
 0x54a   : > { %8458 = vmatpush3.xpose.msk.msra.mxu1 %vm1453_vm1, %v11287_v45  ;;  %v2400_v54 = vpop.permute.xlu0 %2399 }
 0x54b   : > { %8459 = vmatprep.subr.msk.mxu1 %vm1453_vm1, %v2404_v1 }
 0x54c   : > { %v2374_v63 = vpop.permute.xlu1 %2373  ;;  %8429 = vmatmul.mubr.f32.gmra.mxu1 %v11366_v6 }
 0x54d   : > { %8463 = vmatprep.mubr.msk.f32.mxu1 %vm1453_vm1, %v2370_v28 }
 0x54e   : > { %8460 = vmatpush3.xpose.msk.msra.mxu1 %vm1453_vm1, %v2404_v1  ;;  %v3027_v5 = vpop.permute.xlu0 %3026 }
 0x54f   : > { %8461 = vmatprep.subr.msk.mxu1 %vm1453_vm1, %v11292_v24  ;;  %8487 = vmatprep.subr.mxu0 %v3027_v5 }
 0x550   : > { %v2378_v10 = vpop.permute.xlu1 %2377  ;;  %8488 = vmatpush3.msra.mxu0 %v3027_v5 }
 0x552   : > { %8462 = vmatpush3.xpose.msk.msra.mxu1 %vm1453_vm1, %v11292_v24 }
 0x554   : > { %v2382_v45 = vpop.permute.xlu1 %2381 }
 0x555   : > { %8464 = vmatmul.mubr.msk.f32.vlgmr.msra.gmra.mxu1 %vm1453_vm1, %v11302_v32 }
 0x556   : > { %8466 = vmatprep.mubr.msk.f32.mxu1 %vm1453_vm1, %v2374_v63 }
 0x558   : > { %v2386_v20 = vpop.permute.xlu1 %2385 }
 0x559   : > { %8467 = vmatmul.mubr.msk.f32.gmra.mxu1 %vm1453_vm1, %v11310_v36  ;;  %v3021_v36 = vpop.permute.xlu0 %3020 }
 0x55a   : > { %8469 = vmatprep.mubr.msk.f32.mxu1 %vm1453_vm1, %v2378_v10 }
 0x55c   : > { %v2390_v1 = vpop.permute.xlu1 %2389 }
 0x55d   : > { %8470 = vmatmul.mubr.msk.f32.gmra.mxu1 %vm1453_vm1, %v11319_v57 }
 0x55e   : > { %8472 = vmatprep.mubr.msk.f32.mxu1 %vm1453_vm1, %v2382_v45 }
 0x560   : > { %v2394_v28 = vpop.permute.xlu1 %2393 }
 0x561   : > { %8473 = vmatmul.mubr.msk.f32.gmra.mxu1 %vm1453_vm1, %v2384_v19  ;;  %v3017_v19 = vpop.permute.xlu0 %3016 }
 0x562   : > { %8475 = vmatprep.mubr.msk.f32.mxu1 %vm1453_vm1, %v2386_v20 }
 0x564   : > { %v2398_v24 = vpop.permute.xlu1 %2397 }
 0x565   : > { %8476 = vmatmul.mubr.msk.f32.gmra.mxu1 %vm1453_vm1, %v2388_v48  ;;  %v3013_v63 = vpop.permute.xlu0 %3012 }
 0x566   : > { %8478 = vmatprep.mubr.msk.f32.mxu1 %vm1453_vm1, %v2390_v1 }
 0x568   : > { %v3025_v32 = vpop.permute.xlu1 %3024 }
 0x569   : > { %8489 = vmatprep.subr.mxu0 %v3025_v32  ;;  %8479 = vmatmul.mubr.msk.f32.gmra.mxu1 %vm1453_vm1, %v2392_v62 }
 0x56a   : > { %8490 = vmatpush3.msra.mxu0 %v3025_v32  ;;  %8481 = vmatprep.mubr.msk.f32.mxu1 %vm1453_vm1, %v2394_v28 }
 0x56c   : > { %v3023_v57 = vpop.permute.xlu1 %3022 }
 0x56d   : > { %8491 = vmatprep.subr.mxu0 %v3023_v57  ;;  %8482 = vmatmul.mubr.msk.f32.gmra.mxu1 %vm1453_vm1, %v2396_v61 }
 0x56e   : > { %8492 = vmatpush3.msra.mxu0 %v3023_v57  ;;  %8484 = vmatprep.mubr.msk.f32.mxu1 %vm1453_vm1, %v2398_v24 }
 0x56f   : > { %8493 = vmatprep.subr.mxu0 %v3021_v36 }
 0x570   : > { %v3019_v48 = vpop.permute.xlu1 %3018  ;;  %8494 = vmatpush3.msra.mxu0 %v3021_v36 }
 0x571   : > { %8495 = vmatprep.subr.mxu0 %v3019_v48  ;;  %8485 = vmatmul.mubr.msk.f32.gmra.mxu1 %vm1453_vm1, %v2400_v54 }
 0x572   : > { %8496 = vmatpush3.msra.mxu0 %v3019_v48 }
 0x573   : > { %8497 = vmatprep.subr.mxu0 %v3017_v19 }
 0x574   : > { %v3015_v62 = vpop.permute.xlu1 %3014  ;;  %8498 = vmatpush3.msra.mxu0 %v3017_v19 }
 0x575   : > { %8499 = vmatprep.subr.mxu0 %v3015_v62 }
 0x576   : > { %8500 = vmatpush3.msra.mxu0 %v3015_v62 }
 0x577   : > { %8501 = vmatprep.subr.mxu0 %v3013_v63 }
 0x578   : > { %8502 = vmatpush3.msra.mxu0 %v3013_v63 }
 0x5cf   : > { %v11394_v61 = vpop.f32.mrf.mxu1 }
 0x5d0   : > { %14482 = vst [vmem:[#allocation53_spill] sm:$0xff] %v11394_v61 }
 0x5d1   : > { %v11396_v5 = vpop.f32.mrf.mxu1 }
 0x5d2   : > { %14483 = vst [vmem:[#allocation56_spill] sm:$0xff] %v11396_v5 }
 0x5f1   : > { %v11398_v10 = vpop.f32.mrf.mxu1 }
 0x5f2   : > { %14484 = vst [vmem:[#allocation54_spill] sm:$0xff] %v11398_v10 }
 0x5f3   : > { %v11400_v45 = vpop.f32.mrf.mxu1 }
 0x5f4   : > { %14485 = vst [vmem:[#allocation55_spill] sm:$0xff] %v11400_v45 }
 0x5f8   : > { %v11402_v20 = vpop.f32.mrf.mxu1 }
 0x5f9   : > { %14486 = vst [vmem:[#allocation94_spill] sm:$0xff] %v11402_v20 }
 0x5fa   : > { %v11404_v54 = vpop.f32.mrf.mxu1 }
 0x5fb   : > { %14487 = vst [vmem:[#allocation95_spill] sm:$0xff] %v11404_v54 }
 0x5fc   : > { %v11406_v1 = vpop.f32.mrf.mxu1 }
 0x5fd   : > { %14488 = vst [vmem:[#allocation96_spill] sm:$0xff] %v11406_v1 }
 0x5fe   : > { %v11408_v28 = vpop.f32.mrf.mxu1 }
 0x5ff   : > { %14489 = vst [vmem:[#allocation97_spill] sm:$0xff] %v11408_v28 }
 0x600   : > { %v11410_v24 = vpop.f32.mrf.mxu1 }
 0x601   : > { %14490 = vst [vmem:[#allocation98_spill] sm:$0xff] %v11410_v24 }
 0x602   : > { %v11412_v32 = vpop.f32.mrf.mxu1 }
 0x603   : > { %14491 = vst [vmem:[#allocation99_spill] sm:$0xff] %v11412_v32 }
 0x604   : > { %v11414_v36 = vpop.f32.mrf.mxu1 }
 0x605   : > { %14492 = vst [vmem:[#allocation100_spill] sm:$0xff] %v11414_v36  ;;  %v14498_v36 = vld [vmem:[#allocation63_spill] sm:$0xff] }
 0x606   : > { %v11416_v57 = vpop.f32.mrf.mxu1 }
 0x607   : > { %14493 = vst [vmem:[#allocation101_spill] sm:$0xff] %v11416_v57  ;;  %v14499_v57 = vld [vmem:[#allocation64_spill] sm:$0xff] }
 0x608   : > { %v11418_v19 = vpop.f32.mrf.mxu1 }
 0x609   : > { %14494 = vst [vmem:[#allocation102_spill] sm:$0xff] %v11418_v19 }
 0x60a   : > { %v11420_v48 = vpop.f32.mrf.mxu1 }
 0x60b   : > { %14495 = vst [vmem:[#allocation103_spill] sm:$0xff] %v11420_v48 }
 0x60c   : > { %v11422_v62 = vpop.f32.mrf.mxu1 }
 0x60d   : > { %14496 = vst [vmem:[#allocation104_spill] sm:$0xff] %v11422_v62 }
 0x60e   : > { %v11424_v63 = vpop.f32.mrf.mxu1 }
 0x60f   : > { %14497 = vst [vmem:[#allocation105_spill] sm:$0xff] %v11424_v63 }
 0x615   : > { %v11426_v20 = vpop.f32.mrf.mxu1 }
 0x616   : > { %2661 = vmax.xlane.f32.xlu0 %v11426_v20 }
 0x617   : > { %v11429_v1 = vpop.f32.mrf.mxu1 }
 0x618   : > { %2659 = vmax.xlane.f32.xlu1 %v11429_v1 }
 0x619   : > { %v11436_v19 = vpop.f32.mrf.mxu1 }
 0x61b   : > { %v11438_v48 = vpop.f32.mrf.mxu1 }
 0x61d   : > { %v11440_v62 = vpop.f32.mrf.mxu1 }
 0x61f   : > { %v11442_v63 = vpop.f32.mrf.mxu1 }
 0x621   : > { %v11444_v24 = vpop.f32.mrf.mxu1 }
 0x623   : > { %v11446_v32 = vpop.f32.mrf.mxu1 }
 0x625   : > { %v11448_v28 = vpop.f32.mrf.mxu1 }
 0x627   : > { %v11450_v54 = vpop.f32.mrf.mxu1 }
 0x629   : > { %3010 = vrot.lane.b32.xlu1 %v14498_v36, %s9952_s0  ;;  %v11454_v36 = vpop.f32.mrf.mxu1 }
 0x62c   : > { %3008 = vrot.lane.b32.xlu0 %v14499_v57, %s9952_s0  ;;  %v11458_v57 = vpop.f32.mrf.mxu1 }
 0x62e   : > { %v11462_v10 = vpop.f32.mrf.mxu1 }
 0x630   : > { %v11466_v45 = vpop.f32.mrf.mxu1 }
 0x632   : > { %v11469_v5 = vpop.f32.mrf.mxu1 }
 0x634   : > { %v11473_v61 = vpop.f32.mrf.mxu1 }
 0x64b   : > { %2663 = vmax.xlane.f32.xlu0 %v11438_v48 }
 0x64d   : > { %2665 = vmax.xlane.f32.xlu1 %v11436_v19 }
 0x64f   : > { %2667 = vmax.xlane.f32.xlu0 %v11442_v63 }
 0x651   : > { %2669 = vmax.xlane.f32.xlu1 %v11440_v62 }
 0x653   : > { %2671 = vmax.xlane.f32.xlu0 %v11446_v32 }
 0x655   : > { %2673 = vmax.xlane.f32.xlu1 %v11444_v24 }
 0x657   : > { %2675 = vmax.xlane.f32.xlu0 %v11450_v54 }
 0x659   : > { %2677 = vmax.xlane.f32.xlu1 %v11448_v28 }
 0x65b   : > { %2679 = vmax.xlane.f32.xlu0 %v11458_v57 }
 0x65d   : > { %2681 = vmax.xlane.f32.xlu1 %v11454_v36 }
 0x65f   : > { %2683 = vmax.xlane.f32.xlu0 %v11466_v45 }
 0x661   : > { %2685 = vmax.xlane.f32.xlu1 %v11462_v10 }
 0x663   : > { %2687 = vmax.xlane.f32.xlu0 %v11473_v61 }
 0x665   : > { %2689 = vmax.xlane.f32.xlu1 %v11469_v5 }
 0x69f   : > { %v2662_v60 = vpop.xlane.xlu0 %2661 }
 0x6a0   : > { %v11483_v13 = vmax.f32 %v11478_v12, %v2662_v60 }
 0x6a1   : > { %v2660_v16 = vpop.xlane.xlu1 %2659 }
 0x6a2   : > { %14502 = vst [vmem:[#allocation108_spill] sm:$0xff] %v11483_v13  ;;  %3399 = vst.msk [vmem:[#allocation3 + $0x88] sm:$0xff] %vm2015_vm2, %v11483_v13  ;;  %v11490_v15 = vmax.f32 %v11480_v14, %v2660_v16  ;;  %2762 = vperm.xlu1 %9091, %v11483_v13   ;;  %v14505_v16 = vld [vmem:[#allocation62_spill] sm:$0xff]  ;;  %v14506_v13 = vld [vmem:[#allocation59_spill] sm:$0xff] }
 0x6a3   : > { %v3009_v12 = vpop.permute.xlu0 %3008  ;;  %v14509_v14 = vld [vmem:[#allocation58_spill] sm:$0xff] }
 0x6a4   : > { %14503 = vst [vmem:[#allocation109_spill] sm:$0xff] %v11490_v15  ;;  %3398 = vst.msk [vmem:[#allocation3 + $0x80] sm:$0xff] %vm2015_vm2, %v11490_v15  ;;  %2757 = vperm.xlu0 %9090, %v11490_v15   ;;  %v14508_v15 = vld [vmem:[#allocation57_spill] sm:$0xff] }
 0x6a5   : > { %v3011_v60 = vpop.permute.xlu1 %3010 }
 0x6a6   : > { %8503 = vmatprep.subr.mxu0 %v3011_v60  ;;  %3006 = vrot.lane.b32.xlu1 %v14504_v30, %s9952_s0  ;;  %v11533_v30 = vld [vmem:[#allocation3 + $0xa0] sm:$0xff] }
 0x6a7   : > { %8504 = vmatpush3.msra.mxu0 %v3011_v60  ;;  %v14510_v60 = vld [vmem:[#allocation51_spill] sm:$0xff]  ;;  %14519 = vst [vmem:[#allocation113_spill] sm:$0xff] %v11533_v30 }
 0x6a8   : > { %3004 = vrot.lane.b32.xlu0 %v14505_v16, %s9952_s0  ;;  %8505 = vmatprep.subr.mxu0 %v3009_v12  ;;  %v14511_v16 = vld [vmem:[#allocation52_spill] sm:$0xff] }
 0x6a9   : > { %8506 = vmatpush3.msra.mxu0 %v3009_v12  ;;  %v14512_v12 = vld [vmem:[#allocation49_spill] sm:$0xff] }
 0x6aa   : > { %3002 = vrot.lane.b32.xlu1 %v14506_v13, %s9952_s0  ;;  %v14513_v13 = vld [vmem:[#allocation47_spill] sm:$0xff] }
 0x6ac   : > { %3000 = vrot.lane.b32.xlu0 %v14507_v17, %s9952_s0  ;;  %v14514_v17 = vld [vmem:[#allocation50_spill] sm:$0xff] }
 0x6ae   : > { %2998 = vrot.lane.b32.xlu1 %v14508_v15, %s9952_s0  ;;  %v14515_v15 = vld [vmem:[#allocation45_spill] sm:$0xff] }
 0x6b0   : > { %2996 = vrot.lane.b32.xlu0 %v14509_v14, %s9952_s0 }
 0x6b2   : > { %3508 = vrot.lane.b32.xlu1 %v14510_v60, %s9953_s14  ;;  %v11526_v60 = vld [vmem:[#allocation3 + $0x90] sm:$0xff] }
 0x6b3   : > { %14516 = vst [vmem:[#allocation110_spill] sm:$0xff] %v11526_v60 }
 0x6b4   : > { %3506 = vrot.lane.b32.xlu0 %v14511_v16, %s9953_s14  ;;  %v11528_v16 = vld [vmem:[#allocation3 + $0x98] sm:$0xff] }
 0x6b5   : > { %14517 = vst [vmem:[#allocation111_spill] sm:$0xff] %v11528_v16 }
 0x6b6   : > { %3504 = vrot.lane.b32.xlu1 %v14512_v12, %s9953_s14 }
 0x6b8   : > { %3500 = vrot.lane.b32.xlu0 %v14513_v13, %s9953_s14 }
 0x6ba   : > { %3502 = vrot.lane.b32.xlu1 %v14514_v17, %s9953_s14 }
 0x6bc   : > { %3496 = vrot.lane.b32.xlu0 %v14515_v15, %s9953_s14 }
 0x6be   : > { %3498 = vrot.lane.b32.xlu1 %v10751_v47, %s9953_s14 }
 0x6c2   : > { %3494 = vrot.lane.b32.xlu1 %v10747_v43, %s9953_s14  ;;  %v11542_v43 = vld [vmem:[#allocation3 + $0xa8] sm:$0xff] }
 0x6c3   : > { %14521 = vst [vmem:[#allocation115_spill] sm:$0xff] %v11542_v43 }
 0x6d4   : > { %v2664_v12 = vpop.xlane.xlu0 %2663 }
 0x6d5   : > { %v11531_v14 = vmax.f32 %v11526_v60, %v2664_v12  ;;  %v11572_v60 = vld [vmem:[#allocation3 + $0xc0] sm:$0xff] }
 0x6d6   : > { %v2666_v13 = vpop.xlane.xlu1 %2665  ;;  %14527 = vst [vmem:[#allocation121_spill] sm:$0xff] %v11572_v60 }
 0x6d7   : > { %14518 = vst [vmem:[#allocation112_spill] sm:$0xff] %v11531_v14  ;;  %v11536_v17 = vmax.f32 %v11528_v16, %v2666_v13  ;;  %3400 = vst.msk [vmem:[#allocation3 + $0x90] sm:$0xff] %vm2015_vm2, %v11531_v14 }
 0x6d8   : > { %v2668_v15 = vpop.xlane.xlu0 %2667 }
 0x6d9   : > { %14520 = vst [vmem:[#allocation114_spill] sm:$0xff] %v11536_v17  ;;  %3401 = vst.msk [vmem:[#allocation3 + $0x98] sm:$0xff] %vm2015_vm2, %v11536_v17  ;;  %2772 = vperm.xlu0 %9090, %v11536_v17   ;;  %v11550_v13 = vmax.f32 %v11533_v30, %v2668_v15  ;;  %v11581_v17 = vld [vmem:[#allocation3 + $0xc8] sm:$0xff] }
 0x6da   : > { %v2670_v12 = vpop.xlane.xlu1 %2669  ;;  %14529 = vst [vmem:[#allocation123_spill] sm:$0xff] %v11581_v17 }
 0x6db   : > { %14522 = vst [vmem:[#allocation116_spill] sm:$0xff] %v11550_v13  ;;  %v11555_v47 = vmax.f32 %v11542_v43, %v2670_v12  ;;  %3402 = vst.msk [vmem:[#allocation3 + $0xa0] sm:$0xff] %vm2015_vm2, %v11550_v13  ;;  %v11601_v43 = vld [vmem:[#allocation3 + $0xd8] sm:$0xff] }
 0x6dc   : > { %v2672_v16 = vpop.xlane.xlu0 %2671  ;;  %14532 = vst [vmem:[#allocation126_spill] sm:$0xff] %v11601_v43 }
 0x6dd   : > { %14524 = vst [vmem:[#allocation118_spill] sm:$0xff] %v11555_v47  ;;  %3403 = vst.msk [vmem:[#allocation3 + $0xa8] sm:$0xff] %vm2015_vm2, %v11555_v47  ;;  %2782 = vperm.xlu1 %9091, %v11555_v47   ;;  %2767 = vperm.xlu0 %9090, %v11531_v14   ;;  %v11570_v15 = vmax.f32 %v11552_v42, %v2672_v16  ;;  %v11612_v14 = vld [vmem:[#allocation3 + $0xe0] sm:$0xff] }
 0x6de   : > { %v2674_v12 = vpop.xlane.xlu1 %2673  ;;  %14534 = vst [vmem:[#allocation128_spill] sm:$0xff] %v11612_v14 }
 0x6df   : > { %14526 = vst [vmem:[#allocation120_spill] sm:$0xff] %v11570_v15  ;;  %v11575_v30 = vmax.f32 %v11561_v49, %v2674_v12  ;;  %3404 = vst.msk [vmem:[#allocation3 + $0xb0] sm:$0xff] %vm2015_vm2, %v11570_v15  ;;  %v11621_v49 = vld [vmem:[#allocation3 + $0xe8] sm:$0xff] }
 0x6e0   : > { %v2676_v47 = vpop.xlane.xlu0 %2675  ;;  %14536 = vst [vmem:[#allocation130_spill] sm:$0xff] %v11621_v49 }
 0x6e1   : > { %14528 = vst [vmem:[#allocation122_spill] sm:$0xff] %v11575_v30  ;;  %3405 = vst.msk [vmem:[#allocation3 + $0xb8] sm:$0xff] %vm2015_vm2, %v11575_v30  ;;  %2792 = vperm.xlu0 %9090, %v11575_v30   ;;  %2777 = vperm.xlu1 %9091, %v11550_v13   ;;  %v11590_v16 = vmax.f32 %v11572_v60, %v2676_v47  ;;  %v11632_v13 = vld [vmem:[#allocation3 + $0xf0] sm:$0xff] }
 0x6e2   : > { %v2678_v12 = vpop.xlane.xlu1 %2677  ;;  %14538 = vst [vmem:[#allocation132_spill] sm:$0xff] %v11632_v13 }
 0x6e3   : > { %v11595_v42 = vmax.f32 %v11581_v17, %v2678_v12  ;;  %3406 = vst.msk [vmem:[#allocation3 + $0xc0] sm:$0xff] %vm2015_vm2, %v11590_v16  ;;  %v11641_v17 = vld [vmem:[#allocation3 + $0xf8] sm:$0xff] }
 0x6e4   : > { %v2680_v30 = vpop.xlane.xlu0 %2679  ;;  %14540 = vst [vmem:[#allocation134_spill] sm:$0xff] %v11641_v17 }
 0x6e5   : > { %14531 = vst [vmem:[#allocation125_spill] sm:$0xff] %v11595_v42  ;;  %3407 = vst.msk [vmem:[#allocation3 + $0xc8] sm:$0xff] %vm2015_vm2, %v11595_v42  ;;  %2802 = vperm.xlu1 %9091, %v11595_v42   ;;  %2787 = vperm.xlu0 %9090, %v11570_v15   ;;  %v11610_v47 = vmax.f32 %v11592_v59, %v2680_v30 }
 0x6e6   : > { %v2682_v12 = vpop.xlane.xlu1 %2681 }
 0x6e7   : > { %14533 = vst [vmem:[#allocation127_spill] sm:$0xff] %v11610_v47  ;;  %v11615_v60 = vmax.f32 %v11601_v43, %v2682_v12  ;;  %3408 = vst.msk [vmem:[#allocation3 + $0xd0] sm:$0xff] %vm2015_vm2, %v11610_v47  ;;  %v3415_v43 = vld [vmem:[#allocation2] sm:$0xff] }
 0x6e8   : > { %v2684_v42 = vpop.xlane.xlu0 %2683 }
 0x6e9   : > { %14535 = vst [vmem:[#allocation129_spill] sm:$0xff] %v11615_v60  ;;  %3409 = vst.msk [vmem:[#allocation3 + $0xd8] sm:$0xff] %vm2015_vm2, %v11615_v60  ;;  %2812 = vperm.xlu0 %9090, %v11615_v60   ;;  %2797 = vperm.xlu1 %9091, %v11590_v16   ;;  %v11630_v30 = vmax.f32 %v11612_v14, %v2684_v42  ;;  %v3418_v14 = vld [vmem:[#allocation2 + $0x50] sm:$0xff] }
 0x6ea   : > { %v2686_v12 = vpop.xlane.xlu1 %2685 }
 0x6eb   : > { %14537 = vst [vmem:[#allocation131_spill] sm:$0xff] %v11630_v30  ;;  %v11635_v59 = vmax.f32 %v11621_v49, %v2686_v12  ;;  %3410 = vst.msk [vmem:[#allocation3 + $0xe0] sm:$0xff] %vm2015_vm2, %v11630_v30  ;;  %v3427_v49 = vld [vmem:[#allocation2 + $0x70] sm:$0xff] }
 0x6ec   : > { %v2688_v60 = vpop.xlane.xlu0 %2687 }
 0x6ed   : > { %14539 = vst [vmem:[#allocation133_spill] sm:$0xff] %v11635_v59  ;;  %3411 = vst.msk [vmem:[#allocation3 + $0xe8] sm:$0xff] %vm2015_vm2, %v11635_v59  ;;  %2822 = vperm.xlu1 %9091, %v11635_v59   ;;  %2807 = vperm.xlu0 %9090, %v11610_v47   ;;  %v11650_v42 = vmax.f32 %v11632_v13, %v2688_v60  ;;  %v3414_v60 = vld [vmem:[#allocation2 + $0x30] sm:$0xff]  ;;  %v3421_v13 = vld [vmem:[#allocation2 + $0x48] sm:$0xff] }
 0x6ee   : > { %v2690_v12 = vpop.xlane.xlu1 %2689 }
 0x6ef   : > { %14541 = vst [vmem:[#allocation135_spill] sm:$0xff] %v11650_v42  ;;  %v11653_v15 = vmax.f32 %v11641_v17, %v2690_v12  ;;  %3412 = vst.msk [vmem:[#allocation3 + $0xf0] sm:$0xff] %vm2015_vm2, %v11650_v42  ;;  %v3416_v12 = vld [vmem:[#allocation2 + $0x58] sm:$0xff]  ;;  %v3420_v17 = vld [vmem:[#allocation2 + $0x8] sm:$0xff] }
 0x6f1   : > { %14542 = vst [vmem:[#allocation136_spill] sm:$0xff] %v11653_v15  ;;  %3413 = vst.msk [vmem:[#allocation3 + $0xf8] sm:$0xff] %vm2015_vm2, %v11653_v15  ;;  %3492 = vrot.lane.b32.xlu0 %v10741_v37, %s9953_s14  ;;  %2817 = vperm.xlu1 %9091, %v11630_v30  }
 0x6f5   : > { %3490 = vrot.lane.b32.xlu1 %v10743_v39, %s9953_s14  ;;  %2827 = vperm.xlu0 %9090, %v11650_v42   ;;  %v3419_v42 = vld [vmem:[#allocation2 + $0x68] sm:$0xff] }
 0x6f9   : > { %3488 = vrot.lane.b32.xlu1 %v10737_v33, %s9953_s14  ;;  %2832 = vperm.xlu0 %9090, %v11653_v15   ;;  %v3417_v15 = vld [vmem:[#allocation2 + $0x18] sm:$0xff] }
 0x6fd   : > { %3484 = vrot.lane.b32.xlu1 %v10733_v29, %s9953_s14  ;;  %3486 = vrot.lane.b32.xlu0 %v10739_v35, %s9953_s14 }
 0x701   : > { %3480 = vrot.lane.b32.xlu1 %v10729_v25, %s9953_s14  ;;  %3482 = vrot.lane.b32.xlu0 %v10735_v31, %s9953_s14 }
 0x705   : > { %3446 = vrot.lane.b32.xlu1 %v3414_v60, %s9953_s14  ;;  %3478 = vrot.lane.b32.xlu0 %v10731_v27, %s9953_s14  ;;  %v3422_v60 = vld [vmem:[#allocation2 + $0x40] sm:$0xff] }
 0x709   : > { %3450 = vrot.lane.b32.xlu1 %v3416_v12, %s9953_s14  ;;  %3448 = vrot.lane.b32.xlu0 %v3415_v43, %s9953_s14  ;;  %v3424_v12 = vld [vmem:[#allocation2 + $0x10] sm:$0xff]  ;;  %v3423_v43 = vld [vmem:[#allocation2 + $0x20] sm:$0xff] }
 0x70d   : > { %3454 = vrot.lane.b32.xlu1 %v3418_v14, %s9953_s14  ;;  %3452 = vrot.lane.b32.xlu0 %v3417_v15, %s9953_s14  ;;  %v3426_v14 = vld [vmem:[#allocation2 + $0x60] sm:$0xff]  ;;  %v3425_v15 = vld [vmem:[#allocation2 + $0x38] sm:$0xff] }
 0x711   : > { %3458 = vrot.lane.b32.xlu1 %v3420_v17, %s9953_s14  ;;  %3456 = vrot.lane.b32.xlu0 %v3419_v42, %s9953_s14  ;;  %v3428_v42 = vld [vmem:[#allocation2 + $0x78] sm:$0xff] }
 0x715   : > { %3462 = vrot.lane.b32.xlu1 %v3422_v60, %s9953_s14  ;;  %3460 = vrot.lane.b32.xlu0 %v3421_v13, %s9953_s14 }
 0x719   : > { %3466 = vrot.lane.b32.xlu1 %v3424_v12, %s9953_s14  ;;  %3464 = vrot.lane.b32.xlu0 %v3423_v43, %s9953_s14  ;;  %v3429_v43 = vld [vmem:[#allocation2 + $0x28] sm:$0xff] }
 0x71d   : > { %v2763_v59 = vpop.permute.xlu1 %2762  ;;  %3470 = vrot.lane.b32.xlu1 %v3426_v14, %s9953_s14  ;;  %3468 = vrot.lane.b32.xlu0 %v3425_v15, %s9953_s14 }
 0x71e   : > { %v2836_v17 = vsub.f32 %v11426_v20, %v2763_v59 }
 0x71f   : > { %v2758_v60 = vpop.permute.xlu0 %2757 }
 0x720   : > { %v2835_v13 = vsub.f32 %v11429_v1, %v2758_v60  ;;  %v2853_v30 = vmul.f32 1.442695, %v2836_v17 }
 0x721   : > { %v3007_v47 = vpop.permute.xlu1 %3006  ;;  %3474 = vrot.lane.b32.xlu1 %v3428_v42, %s9953_s14  ;;  %3472 = vrot.lane.b32.xlu0 %v3427_v49, %s9953_s14 }
 0x722   : > { %v2851_v12 = vmul.f32 1.442695, %v2835_v13  ;;  %8507 = vmatprep.subr.mxu0 %v3007_v47 }
 0x723   : > { %8508 = vmatpush3.msra.mxu0 %v3007_v47  ;;  %v3005_v14 = vpop.permute.xlu0 %3004 }
 0x724   : > { %9124 = vpow2.f32 %v2851_v12  ;;  %8509 = vmatprep.subr.mxu0 %v3005_v14 }
 0x725   : > { %9126 = vpow2.f32 %v2853_v30  ;;  %v3003_v59 = vpop.permute.xlu1 %3002  ;;  %3476 = vrot.lane.b32.xlu0 %v3429_v43, %s9953_s14  ;;  %8510 = vmatpush3.msra.mxu0 %v3005_v14 }
 0x726   : > { %8511 = vmatprep.subr.mxu0 %v3003_v59 }
 0x727   : > { %8512 = vmatpush3.msra.mxu0 %v3003_v59  ;;  %v3001_v20 = vpop.permute.xlu0 %3000 }
 0x728   : > { %8513 = vmatprep.subr.mxu0 %v3001_v20 }
 0x729   : > { %v2999_v1 = vpop.permute.xlu1 %2998  ;;  %8514 = vmatpush3.msra.mxu0 %v3001_v20  ;;  %v14543_v20 = vld [vmem:[#allocation76_spill] sm:$0xff] }
 0x72a   : > { %8515 = vmatprep.subr.mxu0 %v2999_v1 }
 0x72b   : > { %8516 = vmatpush3.msra.mxu0 %v2999_v1  ;;  %v2997_v49 = vpop.permute.xlu0 %2996 }
 0x72c   : > { %8517 = vmatprep.subr.mxu0 %v2997_v49 }
 0x72d   : > { %v3509_v15 = vpop.permute.xlu1 %3508  ;;  %8518 = vmatpush3.msra.mxu0 %v2997_v49 }
 0x72e   : > { %8543 = vmatprep.subr.msk.mxu0 %vm1453_vm1, %v3509_v15 }
 0x72f   : > { %v3507_v17 = vpop.permute.xlu0 %3506 }
 0x731   : > { %v11701_v47 = vpop.eup %9124  ;;  %v3505_v42 = vpop.permute.xlu1 %3504 }
 0x732   : > { %v11703_v30 = vpop.eup %9126  ;;  %8519 = vmatprep.mubr.f32.mxu0 %v11701_v47 }
 0x733   : > { %8520 = vmatmul.mubr.f32.vlgmr.msra.gmra.mxu0 %v11703_v30  ;;  %v3501_v13 = vpop.permute.xlu0 %3500 }
 0x734   : > { %8544 = vmatpush3.xpose.msk.msra.mxu0 %vm1453_vm1, %v3509_v15 }
 0x735   : > { %8545 = vmatprep.subr.msk.mxu0 %vm1453_vm1, %v3507_v17  ;;  %v3503_v60 = vpop.permute.xlu1 %3502 }
 0x737   : > { %v3497_v43 = vpop.permute.xlu0 %3496 }
 0x738   : > { %8546 = vmatpush3.xpose.msk.msra.mxu0 %vm1453_vm1, %v3507_v17  ;;  %v14547_v17 = vld [vmem:[#allocation75_spill] sm:$0xff] }
 0x739   : > { %8547 = vmatprep.subr.msk.mxu0 %vm1453_vm1, %v3505_v42  ;;  %v3499_v12 = vpop.permute.xlu1 %3498 }
 0x73c   : > { %8548 = vmatpush3.xpose.msk.msra.mxu0 %vm1453_vm1, %v3505_v42 }
 0x73d   : > { %8549 = vmatprep.subr.msk.mxu0 %vm1453_vm1, %v3503_v60  ;;  %v3495_v14 = vpop.permute.xlu1 %3494 }
 0x740   : > { %8550 = vmatpush3.xpose.msk.msra.mxu0 %vm1453_vm1, %v3503_v60 }
 0x741   : > { %8551 = vmatprep.subr.msk.mxu0 %vm1453_vm1, %v3501_v13 }
 0x744   : > { %8552 = vmatpush3.xpose.msk.msra.mxu0 %vm1453_vm1, %v3501_v13  ;;  %1969 = vadd.xlane.f32.xlu0 %v11258_v11 }
 0x745   : > { %8553 = vmatprep.subr.msk.mxu0 %vm1453_vm1, %v3499_v12  ;;  %1967 = vadd.xlane.f32.xlu1 %v11255_v8 }
 0x748   : > { %8554 = vmatpush3.xpose.msk.msra.mxu0 %vm1453_vm1, %v3499_v12  ;;  %1971 = vadd.xlane.f32.xlu0 %v11298_v4  ;;  %v14549_v12 = vld [vmem:[#allocation77_spill] sm:$0xff] }
 0x749   : > { %8555 = vmatprep.subr.msk.mxu0 %vm1453_vm1, %v3497_v43  ;;  %1973 = vadd.xlane.f32.xlu1 %v11305_v38 }
 0x74c   : > { %8556 = vmatpush3.xpose.msk.msra.mxu0 %vm1453_vm1, %v3497_v43  ;;  %1975 = vadd.xlane.f32.xlu0 %v11315_v3  ;;  %v14550_v43 = vsub.f32 %v14549_v12, %v11045_v52 }
 0x74d   : > { %8557 = vmatprep.subr.msk.mxu0 %vm1453_vm1, %v3495_v14  ;;  %1977 = vadd.xlane.f32.xlu1 %v11321_v26 }
 0x750   : > { %8558 = vmatpush3.xpose.msk.msra.mxu0 %vm1453_vm1, %v3495_v14  ;;  %1979 = vadd.xlane.f32.xlu0 %v11324_v9 }
 0x751   : > { %1981 = vadd.xlane.f32.xlu1 %v11330_v7 }
 0x754   : > { %1983 = vadd.xlane.f32.xlu0 %v11334_v34  ;;  %v2773_v8 = vpop.permute.xlu0 %2772 }
 0x755   : > { %1985 = vadd.xlane.f32.xlu1 %v11337_v18  ;;  %v2838_v11 = vsub.f32 %v11436_v19, %v2773_v8 }
 0x757   : > { %v2857_v26 = vmul.f32 1.442695, %v2838_v11 }
 0x758   : > { %v2783_v4 = vpop.permute.xlu1 %2782  ;;  %1987 = vadd.xlane.f32.xlu0 %v11342_v22  ;;  %v2768_v38 = vpop.permute.xlu0 %2767 }
 0x759   : > { %v2837_v3 = vsub.f32 %v11438_v48, %v2768_v38  ;;  %1989 = vadd.xlane.f32.xlu1 %v11348_v0  ;;  %v2840_v9 = vsub.f32 %v11440_v62, %v2783_v4  ;;  %v14544_v0 = vld [vmem:[#allocation78_spill] sm:$0xff] }
 0x75a   : > { %v14545_v1 = vsub.f32 %v14543_v20, %v14544_v0  ;;  %v14551_v4 = vld [vmem:[#allocation74_spill] sm:$0xff]  ;;  %v14558_v0 = vld [vmem:[#allocation83_spill] sm:$0xff] }
 0x75b   : > { %v2855_v59 = vmul.f32 1.442695, %v2837_v3  ;;  %v2861_v22 = vmul.f32 1.442695, %v2840_v9 }
 0x75c   : > { %v2778_v7 = vpop.permute.xlu1 %2777  ;;  %1991 = vadd.xlane.f32.xlu0 %v11352_v2  ;;  %v2793_v34 = vpop.permute.xlu0 %2792  ;;  %v1777_v49 = vmul.f32 1.442695, %v14545_v1  ;;  %v14546_v2 = vld [vmem:[#allocation73_spill] sm:$0xff] }
 0x75d   : > { %v2839_v18 = vsub.f32 %v11442_v63, %v2778_v7  ;;  %1993 = vadd.xlane.f32.xlu1 %v11355_v23  ;;  %9128 = vpow2.f32 %v2855_v59  ;;  %v2842_v48 = vsub.f32 %v11444_v24, %v2793_v34  ;;  %v14548_v42 = vsub.f32 %v14546_v2, %v14547_v17  ;;  %v14555_v34 = vld [vmem:[#allocation80_spill] sm:$0xff]  ;;  %v14561_v2 = vld [vmem:[#allocation85_spill] sm:$0xff] }
 0x75e   : > { %9130 = vpow2.f32 %v2857_v26  ;;  %v14553_v26 = vld [vmem:[#allocation79_spill] sm:$0xff] }
 0x75f   : > { %v2859_v19 = vmul.f32 1.442695, %v2839_v18  ;;  %v1775_v63 = vmul.f32 1.442695, %v14548_v42  ;;  %v2865_v60 = vmul.f32 1.442695, %v2842_v48  ;;  %v14554_v52 = vsub.f32 %v14553_v26, %v11057_v58 }
 0x760   : > { %v2803_v62 = vpop.permute.xlu1 %2802  ;;  %1995 = vadd.xlane.f32.xlu0 %v11360_v21  ;;  %v2788_v15 = vpop.permute.xlu0 %2787  ;;  %v1779_v21 = vmul.f32 1.442695, %v14550_v43  ;;  %v14557_v58 = vld [vmem:[#allocation81_spill] sm:$0xff] }
 0x761   : > { %9132 = vpow2.f32 %v2859_v19  ;;  %v2841_v23 = vsub.f32 %v11446_v32, %v2788_v15  ;;  %1997 = vadd.xlane.f32.xlu1 %v11366_v6  ;;  %v2844_v24 = vsub.f32 %v11448_v28, %v2803_v62  ;;  %v14552_v32 = vsub.f32 %v14551_v4, %v11026_v50  ;;  %v14560_v15 = vld [vmem:[#allocation82_spill] sm:$0xff] }
 0x762   : > { %9134 = vpow2.f32 %v2861_v22  ;;  %v1783_v9 = vmul.f32 1.442695, %v14554_v52  ;;  %v14559_v1 = vsub.f32 %v14557_v58, %v14558_v0  ;;  %v14562_v17 = vsub.f32 %v14560_v15, %v14561_v2 }
 0x763   : > { %v2863_v13 = vmul.f32 1.442695, %v2841_v23  ;;  %9136 = vpow2.f32 %v1777_v49  ;;  %v1781_v38 = vmul.f32 1.442695, %v14552_v32  ;;  %v2869_v6 = vmul.f32 1.442695, %v2844_v24 }
 0x764   : > { %v2798_v14 = vpop.permute.xlu1 %2797  ;;  %v2813_v8 = vpop.permute.xlu0 %2812  ;;  %9138 = vpow2.f32 %v1775_v63  ;;  %v1787_v49 = vmul.f32 1.442695, %v14559_v1  ;;  %v1789_v42 = vmul.f32 1.442695, %v14562_v17 }
 0x765   : > { %v2843_v11 = vsub.f32 %v11450_v54, %v2798_v14  ;;  %9140 = vpow2.f32 %v2863_v13  ;;  %v2846_v28 = vsub.f32 %v11454_v36, %v2813_v8  ;;  %v14556_v54 = vsub.f32 %v14555_v34, %v11062_v46  ;;  %v14570_v34 = vld [vmem:[#allocation90_spill] sm:$0xff] }
 0x766   : > { %9142 = vpow2.f32 %v2865_v60 }
 0x767   : > { %v2867_v3 = vmul.f32 1.442695, %v2843_v11  ;;  %9144 = vpow2.f32 %v1779_v21  ;;  %v1785_v18 = vmul.f32 1.442695, %v14556_v54  ;;  %v2873_v19 = vmul.f32 1.442695, %v2846_v28 }
 0x768   : > { %v2823_v59 = vpop.permute.xlu1 %2822  ;;  %v2808_v7 = vpop.permute.xlu0 %2807  ;;  %v14565_v11 = vld [vmem:[#allocation86_spill] sm:$0xff] }
 0x769   : > { %9146 = vpow2.f32 %v2867_v3  ;;  %v2845_v50 = vsub.f32 %v11458_v57, %v2808_v7  ;;  %v2848_v36 = vsub.f32 %v11462_v10, %v2823_v59  ;;  %v14566_v4 = vsub.f32 %v14565_v11, %v11105_v56  ;;  %v14569_v7 = vld [vmem:[#allocation88_spill] sm:$0xff] }
 0x76a   : > { %9148 = vpow2.f32 %v1781_v38  ;;  %v11766_v22 = vpop.eup %9128  ;;  %v14571_v54 = vsub.f32 %v14569_v7, %v14570_v34 }
 0x76b   : > { %9150 = vpow2.f32 %v2869_v6  ;;  %v2871_v48 = vmul.f32 1.442695, %v2845_v50  ;;  %v11769_v20 = vpop.eup %9130  ;;  %8522 = vmatprep.mubr.f32.mxu0 %v11766_v22  ;;  %v2877_v63 = vmul.f32 1.442695, %v2848_v36  ;;  %v1793_v32 = vmul.f32 1.442695, %v14566_v4 }
 0x76c   : > { %9152 = vpow2.f32 %v1783_v9  ;;  %v2818_v46 = vpop.permute.xlu1 %2817  ;;  %v3493_v62 = vpop.permute.xlu0 %3492  ;;  %8523 = vmatmul.mubr.f32.gmra.mxu0 %v11769_v20 }
 0x76d   : > { %9154 = vpow2.f32 %v1785_v18  ;;  %v2847_v57 = vsub.f32 %v11466_v45, %v2818_v46  ;;  %8559 = vmatprep.subr.msk.mxu0 %vm1453_vm1, %v3493_v62  ;;  %v14563_v45 = vld [vmem:[#allocation84_spill] sm:$0xff]  ;;  %v1797_v18 = vmul.f32 1.442695, %v14571_v54 }
 0x76e   : > { %v11778_v10 = vpop.eup %9132  ;;  %9156 = vpow2.f32 %v2871_v48  ;;  %8560 = vmatpush3.xpose.msk.msra.mxu0 %vm1453_vm1, %v3493_v62  ;;  %v14564_v24 = vsub.f32 %v14563_v45, %v11100_v53  ;;  %v14574_v62 = vsub.f32 %v11144_v51, %v11163_v40 }
 0x76f   : > { %9158 = vpow2.f32 %v2873_v19  ;;  %v2875_v23 = vmul.f32 1.442695, %v2847_v57  ;;  %8525 = vmatprep.mubr.f32.mxu0 %v11778_v10  ;;  %v11785_v60 = vpop.eup %9134  ;;  %v14572_v19 = vld [vmem:[#allocation89_spill] sm:$0xff] }
 0x770   : > { %9160 = vpow2.f32 %v1787_v49  ;;  %v1791_v13 = vmul.f32 1.442695, %v14564_v24  ;;  %v3491_v12 = vpop.permute.xlu1 %3490  ;;  %v2828_v43 = vpop.permute.xlu0 %2827  ;;  %8526 = vmatmul.mubr.f32.gmra.mxu0 %v11785_v60  ;;  %v14573_v36 = vsub.f32 %v14572_v19, %v11142_v44  ;;  %v1803_v57 = vmul.f32 1.442695, %v14574_v62  ;;  %v14582_v62 = vld [vmem:[#allocation72_spill] sm:$0xff] }
 0x771   : > { %v11790_v21 = vpop.eup %9136  ;;  %9162 = vpow2.f32 %v2875_v23  ;;  %v2849_v14 = vsub.f32 %v11473_v61, %v2828_v43  ;;  %8561 = vmatprep.subr.msk.mxu0 %vm1453_vm1, %v3491_v12  ;;  %v14567_v61 = vld [vmem:[#allocation87_spill] sm:$0xff]  ;;  %v14578_v43 = vld [vmem:[#allocation93_spill] sm:$0xff] }
 0x772   : > { %v11795_v8 = vpop.eup %9138  ;;  %9164 = vpow2.f32 %v1789_v42  ;;  %2200 = vperm.xlu1 %9091, %v11790_v21   ;;  %8562 = vmatpush3.xpose.msk.msra.mxu0 %vm1453_vm1, %v3491_v12  ;;  %v14568_v3 = vsub.f32 %v14567_v61, %v11121_v55  ;;  %v1799_v48 = vmul.f32 1.442695, %v14573_v36  ;;  %v14575_v42 = vld [vmem:[#allocation91_spill] sm:$0xff]  ;;  %v14577_v12 = vld [vmem:[#allocation92_spill] sm:$0xff] }
 0x773   : > { %v11799_v53 = vpop.eup %9140  ;;  %9166 = vpow2.f32 %v2877_v63  ;;  %v2879_v38 = vmul.f32 1.442695, %v2849_v14  ;;  %v14576_v63 = vsub.f32 %v11134_v41, %v14575_v42  ;;  %v14579_v14 = vsub.f32 %v14577_v12, %v14578_v43  ;;  %v14584_v42 = vld [vmem:[#allocation67_spill] sm:$0xff]  ;;  %v14587_v12 = vld [vmem:[#allocation66_spill] sm:$0xff] }
 0x774   : > { %v11804_v6 = vpop.eup %9142  ;;  %9168 = vpow2.f32 %v1791_v13  ;;  %v1795_v28 = vmul.f32 1.442695, %v14568_v3  ;;  %8528 = vmatprep.mubr.f32.mxu0 %v11799_v53  ;;  %v3489_v26 = vpop.permute.xlu1 %3488 }
 0x775   : > { %v2833_v52 = vpop.permute.xlu0 %2832  ;;  %v11810_v9 = vpop.eup %9144  ;;  %9170 = vpow2.f32 %v2879_v38  ;;  %8529 = vmatmul.mubr.f32.gmra.mxu0 %v11804_v6  ;;  %8563 = vmatprep.subr.msk.mxu0 %vm1453_vm1, %v3489_v26  ;;  %v1801_v23 = vmul.f32 1.442695, %v14576_v63  ;;  %v1805_v11 = vmul.f32 1.442695, %v14579_v14 }
 0x776   : > { %v2850_v56 = vsub.f32 %v11469_v5, %v2833_v52  ;;  %v11815_v59 = vpop.eup %9146  ;;  %2205 = vperm.xlu1 %9091, %v11810_v9   ;;  %2195 = vperm.xlu0 %9090, %v11795_v8   ;;  %9172 = vpow2.f32 %v1793_v32 }
 0x777   : > { %v11819_v55 = vpop.eup %9148  ;;  %8564 = vmatpush3.xpose.msk.msra.mxu0 %vm1453_vm1, %v3489_v26  ;;  %8531 = vmatprep.mubr.f32.mxu0 %v11815_v59  ;;  %9174 = vpow2.f32 %v1795_v28 }
 0x778   : > { %v2881_v50 = vmul.f32 1.442695, %v2850_v56  ;;  %v11826_v5 = vpop.eup %9150  ;;  %v3485_v58 = vpop.permute.xlu1 %3484 }
 0x779   : > { %v3487_v0 = vpop.permute.xlu0 %3486  ;;  %v11831_v1 = vpop.eup %9152  ;;  %8532 = vmatmul.mubr.f32.gmra.mxu0 %v11826_v5 }
 0x77a   : > { %9176 = vpow2.f32 %v2881_v50  ;;  %8565 = vmatprep.subr.msk.mxu0 %vm1453_vm1, %v3487_v0  ;;  %v11835_v49 = vpop.eup %9154  ;;  %2215 = vperm.xlu1 %9091, %v11831_v1  }
 0x77b   : > { %2210 = vperm.xlu0 %9090, %v11819_v55   ;;  %v11839_v46 = vpop.eup %9156  ;;  %9178 = vpow2.f32 %v1797_v18  ;;  %8566 = vmatpush3.xpose.msk.msra.mxu0 %vm1453_vm1, %v3487_v0  ;;  %v14581_v0 = vld [vmem:[#allocation69_spill] sm:$0xff] }
 0x77c   : > { %v11842_v44 = vpop.eup %9158  ;;  %9180 = vpow2.f32 %v1799_v48  ;;  %8534 = vmatprep.mubr.f32.mxu0 %v11839_v46  ;;  %8567 = vmatprep.subr.msk.mxu0 %vm1453_vm1, %v3485_v58  ;;  %v3481_v15 = vpop.permute.xlu1 %3480  ;;  %v14580_v48 = vld [vmem:[#allocation71_spill] sm:$0xff] }
 0x77d   : > { %v3483_v2 = vpop.permute.xlu0 %3482  ;;  %v11849_v17 = vpop.eup %9160  ;;  %8535 = vmatmul.mubr.f32.gmra.mxu0 %v11842_v44  ;;  %9182 = vpow2.f32 %v1803_v57 }
 0x77e   : > { %v11855_v45 = vpop.eup %9162  ;;  %2225 = vperm.xlu1 %9091, %v11849_v17   ;;  %9184 = vpow2.f32 %v1801_v23  ;;  %v14585_v23 = vld [vmem:[#allocation68_spill] sm:$0xff] }
 0x77f   : > { %2220 = vperm.xlu0 %9090, %v11835_v49   ;;  %v11859_v51 = vpop.eup %9164  ;;  %8568 = vmatpush3.xpose.msk.msra.mxu0 %vm1453_vm1, %v3485_v58  ;;  %9186 = vpow2.f32 %v1805_v11 }
 0x780   : > { %8537 = vmatprep.mubr.f32.mxu0 %v11855_v45  ;;  %v11863_v40 = vpop.eup %9166  ;;  %8569 = vmatprep.subr.msk.mxu0 %vm1453_vm1, %v3483_v2  ;;  %v3447_v24 = vpop.permute.xlu1 %3446 }
 0x781   : > { %v3479_v41 = vpop.permute.xlu0 %3478  ;;  %v11866_v13 = vpop.eup %9168  ;;  %8538 = vmatmul.mubr.f32.gmra.mxu0 %v11863_v40 }
 0x782   : > { %v11872_v4 = vpop.eup %9170  ;;  %2235 = vperm.xlu1 %9091, %v11866_v13  }
 0x783   : > { %2230 = vperm.xlu0 %9090, %v11859_v51   ;;  %8570 = vmatpush3.xpose.msk.msra.mxu0 %vm1453_vm1, %v3483_v2  ;;  %v11878_v32 = vpop.eup %9172 }
 0x784   : > { %8540 = vmatprep.mubr.f32.mxu0 %v11872_v4  ;;  %8571 = vmatprep.subr.msk.mxu0 %vm1453_vm1, %v3481_v15  ;;  %v3451_v61 = vpop.permute.xlu1 %3450  ;;  %v11881_v3 = vpop.eup %9174 }
 0x785   : > { %v3449_v38 = vpop.permute.xlu0 %3448 }
 0x786   : > { %2245 = vperm.xlu1 %9091, %v11881_v3  }
 0x787   : > { %v11883_v28 = vpop.eup %9176  ;;  %2240 = vperm.xlu0 %9090, %v11878_v32   ;;  %8572 = vmatpush3.xpose.msk.msra.mxu0 %vm1453_vm1, %v3481_v15  ;;  %v14583_v15 = vld [vmem:[#allocation70_spill] sm:$0xff] }
 0x788   : > { %v11888_v26 = vpop.eup %9178  ;;  %8541 = vmatmul.mubr.f32.gmra.mxu0 %v11883_v28  ;;  %8573 = vmatprep.subr.msk.mxu0 %vm1453_vm1, %v3479_v41  ;;  %v3455_v56 = vpop.permute.xlu1 %3454 }
 0x789   : > { %v3453_v52 = vpop.permute.xlu0 %3452  ;;  %v11892_v7 = vpop.eup %9180  ;;  %8575 = vmatprep.mubr.msk.f32.mxu0 %vm1453_vm1, %v3447_v24 }
 0x78a   : > { %2255 = vperm.xlu1 %9091, %v11892_v7   ;;  %v11898_v54 = vpop.eup %9182 }
 0x78b   : > { %2250 = vperm.xlu0 %9090, %v11888_v26   ;;  %8574 = vmatpush3.xpose.msk.msra.mxu0 %vm1453_vm1, %v3479_v41  ;;  %v11900_v18 = vpop.eup %9184  ;;  %v14586_v41 = vld [vmem:[#allocation65_spill] sm:$0xff] }
 0x78c   : > { %v3459_v50 = vpop.permute.xlu1 %3458  ;;  %v11906_v36 = vpop.eup %9186 }
 0x78d   : > { %v3457_v34 = vpop.permute.xlu0 %3456 }
 0x78e   : > { %8576 = vmatmul.mubr.msk.f32.vlgmr.msra.gmra.mxu0 %vm1453_vm1, %v3449_v38  ;;  %2265 = vperm.xlu1 %9091, %v11898_v54   ;;  %v1936_v38 = vld [vmem:[#allocation4 + $0x8] sm:$0xff] }
 0x78f   : > { %2260 = vperm.xlu0 %9090, %v11900_v18   ;;  %8578 = vmatprep.mubr.msk.f32.mxu0 %vm1453_vm1, %v3451_v61  ;;  %v1935_v61 = vld [vmem:[#allocation4] sm:$0xff] }
 0x790   : > { %v3463_v58 = vpop.permute.xlu1 %3462 }
 0x791   : > { %v3461_v19 = vpop.permute.xlu0 %3460 }
 0x792   : > { %4087 = vrot.lane.b32.xlu1 %v14580_v48, %s9953_s14  ;;  %8579 = vmatmul.mubr.msk.f32.gmra.mxu0 %vm1453_vm1, %v3453_v52  ;;  %v1952_v52 = vmul.f32 %v11790_v21, %v1936_v38  ;;  %v1939_v21 = vld [vmem:[#allocation4 + $0x20] sm:$0xff] }
 0x793   : > { %2270 = vperm.xlu0 %9090, %v11906_v36   ;;  %8581 = vmatprep.mubr.msk.f32.mxu0 %vm1453_vm1, %v3455_v56 }
 0x794   : > { %v3467_v2 = vpop.permute.xlu1 %3466 }
 0x795   : > { %v3465_v57 = vpop.permute.xlu0 %3464 }
 0x796   : > { %4083 = vrot.lane.b32.xlu1 %v14581_v0, %s9953_s14  ;;  %8582 = vmatmul.mubr.msk.f32.gmra.mxu0 %vm1453_vm1, %v3457_v34  ;;  %v1951_v34 = vmul.f32 %v11795_v8, %v1935_v61  ;;  %v1940_v8 = vld [vmem:[#allocation4 + $0x28] sm:$0xff]  ;;  %v14636_v0 = vld [vmem:[#allocation61_spill] sm:$0xff] }
 0x797   : > { %4085 = vrot.lane.b32.xlu0 %v14582_v62, %s9953_s14  ;;  %8584 = vmatprep.mubr.msk.f32.mxu0 %vm1453_vm1, %v3459_v50  ;;  %v1937_v50 = vld [vmem:[#allocation4 + $0x10] sm:$0xff] }
 0x798   : > { %v3471_v24 = vpop.permute.xlu1 %3470 }
 0x799   : > { %v3469_v63 = vpop.permute.xlu0 %3468 }
 0x79a   : > { %4081 = vrot.lane.b32.xlu1 %v14583_v15, %s9953_s14  ;;  %8585 = vmatmul.mubr.msk.f32.gmra.mxu0 %vm1453_vm1, %v3461_v19 }
 0x79b   : > { %4079 = vrot.lane.b32.xlu0 %v14584_v42, %s9953_s14  ;;  %8587 = vmatprep.mubr.msk.f32.mxu0 %vm1453_vm1, %v3463_v58  ;;  %v12144_v42 = vld [vmem:[#allocation3 + $0x100] sm:$0xff] }
 0x79c   : > { %v3475_v14 = vpop.permute.xlu1 %3474 }
 0x79d   : > { %v3473_v43 = vpop.permute.xlu0 %3472 }
 0x79e   : > { %4077 = vrot.lane.b32.xlu1 %v14585_v23, %s9953_s14  ;;  %8588 = vmatmul.mubr.msk.f32.gmra.mxu0 %vm1453_vm1, %v3465_v57 }
 0x79f   : > { %4075 = vrot.lane.b32.xlu0 %v14586_v41, %s9953_s14  ;;  %8590 = vmatprep.mubr.msk.f32.mxu0 %vm1453_vm1, %v3467_v2  ;;  %v12142_v41 = vld [vmem:[#allocation3 + $0x108] sm:$0xff] }
 0x7a0   : > { %14634 = vst [vmem:[#allocation80_spill] sm:$0xff] %v12142_v41 }
 0x7a1   : > { %v3477_v11 = vpop.permute.xlu0 %3476 }
 0x7a2   : > { %4073 = vrot.lane.b32.xlu1 %v14587_v12, %s9953_s14  ;;  %8591 = vmatmul.mubr.msk.f32.gmra.mxu0 %vm1453_vm1, %v3469_v63 }
 0x7a3   : > { %8593 = vmatprep.mubr.msk.f32.mxu0 %vm1453_vm1, %v3471_v24  ;;  %v1956_v24 = vmul.f32 %v11835_v49, %v1940_v8 }
 0x7a6   : > { %8594 = vmatmul.mubr.msk.f32.gmra.mxu0 %vm1453_vm1, %v3473_v43 }
 0x7a7   : > { %8596 = vmatprep.mubr.msk.f32.mxu0 %vm1453_vm1, %v3475_v14 }
 0x7aa   : > { %8597 = vmatmul.mubr.msk.f32.gmra.mxu0 %vm1453_vm1, %v3477_v11  ;;  %v1942_v11 = vld [vmem:[#allocation4 + $0x38] sm:$0xff] }
 0x7be   : > { %2916 = vadd.xlane.f32.xlu0 %v11701_v47 }
 0x7c2   : > { %2920 = vadd.xlane.f32.xlu0 %v11766_v22  ;;  %v1938_v22 = vld [vmem:[#allocation4 + $0x18] sm:$0xff] }
 0x7c6   : > { %2924 = vadd.xlane.f32.xlu0 %v11778_v10  ;;  %2918 = vadd.xlane.f32.xlu1 %v11703_v30  ;;  %v1953_v30 = vmul.f32 %v11810_v9, %v1937_v50  ;;  %v1941_v9 = vld [vmem:[#allocation4 + $0x30] sm:$0xff]  ;;  %v1944_v50 = vld [vmem:[#allocation4 + $0x48] sm:$0xff] }
 0x7ca   : > { %2928 = vadd.xlane.f32.xlu0 %v11799_v53  ;;  %2922 = vadd.xlane.f32.xlu1 %v11769_v20  ;;  %v1954_v53 = vmul.f32 %v11819_v55, %v1938_v22  ;;  %v1957_v55 = vmul.f32 %v11849_v17, %v1941_v9  ;;  %v1960_v22 = vmul.f32 %v11878_v32, %v1944_v50  ;;  %v1945_v17 = vld [vmem:[#allocation4 + $0x50] sm:$0xff] }
 0x7cb   : > { %v2179_v50 = vld [vmem:[#allocation5 + $0x10] sm:$0xff] }
 0x7cd   : > { %v1970_v56 = vpop.xlane.xlu0 %1969 }
 0x7ce   : > { %v2000_v19 = vadd.f32 %v1970_v56, %v1952_v52  ;;  %v1968_v47 = vpop.xlane.xlu1 %1967  ;;  %2926 = vadd.xlane.f32.xlu1 %v11785_v60  ;;  %v1955_v60 = vmul.f32 %v11831_v1, %v1939_v21  ;;  %v1958_v52 = vmul.f32 %v11859_v51, %v1942_v11  ;;  %v1943_v1 = vld [vmem:[#allocation4 + $0x40] sm:$0xff]  ;;  %v1961_v51 = vmul.f32 %v11881_v3, %v1945_v17  ;;  %v1949_v3 = vld [vmem:[#allocation4 + $0x70] sm:$0xff]  ;;  %v2180_v17 = vld [vmem:[#allocation5 + $0x18] sm:$0xff] }
 0x7cf   : > { %v1999_v10 = vadd.f32 %v1968_v47, %v1951_v34  ;;  %v1959_v49 = vmul.f32 %v11866_v13, %v1943_v1  ;;  %v1947_v13 = vld [vmem:[#allocation4 + $0x60] sm:$0xff] }
 0x7d0   : > { %2017 = vst.msk [vmem:[#allocation4 + $0x8] sm:$0xff] %vm2015_vm2, %v2000_v19  ;;  %v1963_v32 = vmul.f32 %v11892_v7, %v1947_v13 }
 0x7d1   : > { %2016 = vst.msk [vmem:[#allocation4] sm:$0xff] %vm2015_vm2, %v1999_v10  ;;  %v1972_v20 = vpop.xlane.xlu0 %1971 }
 0x7d2   : > { %v2001_v58 = vadd.f32 %v1972_v20, %v1953_v30  ;;  %v1974_v57 = vpop.xlane.xlu1 %1973  ;;  %v1946_v20 = vld [vmem:[#allocation4 + $0x58] sm:$0xff] }
 0x7d3   : > { %v2002_v2 = vadd.f32 %v1974_v57, %v1954_v53 }
 0x7d4   : > { %2018 = vst.msk [vmem:[#allocation4 + $0x10] sm:$0xff] %vm2015_vm2, %v2001_v58  ;;  %v1962_v58 = vmul.f32 %v11888_v26, %v1946_v20  ;;  %v1965_v26 = vmul.f32 %v11898_v54, %v1949_v3  ;;  %v2181_v20 = vld [vmem:[#allocation5 + $0x20] sm:$0xff] }
 0x7d5   : > { %2019 = vst.msk [vmem:[#allocation4 + $0x18] sm:$0xff] %vm2015_vm2, %v2002_v2  ;;  %v1976_v63 = vpop.xlane.xlu0 %1975  ;;  %v1948_v2 = vld [vmem:[#allocation4 + $0x68] sm:$0xff] }
 0x7d6   : > { %v2003_v43 = vadd.f32 %v1976_v63, %v1955_v60  ;;  %v1978_v14 = vpop.xlane.xlu1 %1977 }
 0x7d7   : > { %v2004_v38 = vadd.f32 %v1978_v14, %v1956_v24  ;;  %v1964_v24 = vmul.f32 %v11900_v18, %v1948_v2  ;;  %v1950_v14 = vld [vmem:[#allocation4 + $0x78] sm:$0xff]  ;;  %v2178_v18 = vld [vmem:[#allocation5 + $0x8] sm:$0xff] }
 0x7d8   : > { %2020 = vst.msk [vmem:[#allocation4 + $0x20] sm:$0xff] %vm2015_vm2, %v2003_v43  ;;  %v14591_v2 = vld [vmem:[#allocation54_spill] sm:$0xff] }
 0x7d9   : > { %2021 = vst.msk [vmem:[#allocation4 + $0x28] sm:$0xff] %vm2015_vm2, %v2004_v38  ;;  %v1980_v61 = vpop.xlane.xlu0 %1979 }
 0x7da   : > { %v2005_v56 = vadd.f32 %v1980_v61, %v1957_v55  ;;  %v1982_v34 = vpop.xlane.xlu1 %1981  ;;  %v1966_v55 = vmul.f32 %v11906_v36, %v1950_v14 }
 0x7db   : > { %v2006_v19 = vadd.f32 %v1982_v34, %v1958_v52  ;;  %v2177_v34 = vld [vmem:[#allocation5] sm:$0xff] }
 0x7dc   : > { %2022 = vst.msk [vmem:[#allocation4 + $0x30] sm:$0xff] %vm2015_vm2, %v2005_v56 }
 0x7dd   : > { %2023 = vst.msk [vmem:[#allocation4 + $0x38] sm:$0xff] %vm2015_vm2, %v2006_v19  ;;  %v1984_v47 = vpop.xlane.xlu0 %1983  ;;  %v14588_v19 = vld [vmem:[#allocation53_spill] sm:$0xff] }
 0x7de   : > { %v2007_v10 = vadd.f32 %v1984_v47, %v1959_v49  ;;  %v1986_v30 = vpop.xlane.xlu1 %1985 }
 0x7df   : > { %v2008_v53 = vadd.f32 %v1986_v30, %v1960_v22 }
 0x7e0   : > { %2024 = vst.msk [vmem:[#allocation4 + $0x40] sm:$0xff] %vm2015_vm2, %v2007_v10  ;;  %v14589_v10 = vld [vmem:[#allocation56_spill] sm:$0xff] }
 0x7e1   : > { %2025 = vst.msk [vmem:[#allocation4 + $0x48] sm:$0xff] %vm2015_vm2, %v2008_v53  ;;  %v1988_v21 = vpop.xlane.xlu0 %1987  ;;  %v14590_v53 = vld [vmem:[#allocation55_spill] sm:$0xff] }
 0x7e2   : > { %v2009_v57 = vadd.f32 %v1988_v21, %v1961_v51  ;;  %v1990_v8 = vpop.xlane.xlu1 %1989 }
 0x7e3   : > { %v2010_v60 = vadd.f32 %v1990_v8, %v1962_v58  ;;  %v2182_v8 = vld [vmem:[#allocation5 + $0x28] sm:$0xff] }
 0x7e4   : > { %2026 = vst.msk [vmem:[#allocation4 + $0x50] sm:$0xff] %vm2015_vm2, %v2009_v57 }
 0x7e5   : > { %2027 = vst.msk [vmem:[#allocation4 + $0x58] sm:$0xff] %vm2015_vm2, %v2010_v60  ;;  %v1992_v63 = vpop.xlane.xlu0 %1991 }
 0x7e6   : > { %v2011_v9 = vadd.f32 %v1992_v63, %v1963_v32  ;;  %v1994_v43 = vpop.xlane.xlu1 %1993  ;;  %v2183_v32 = vld [vmem:[#allocation5 + $0x30] sm:$0xff] }
 0x7e7   : > { %v2012_v11 = vadd.f32 %v1994_v43, %v1964_v24  ;;  %v14592_v63 = vld [vmem:[#allocation95_spill] sm:$0xff] }
 0x7e8   : > { %2028 = vst.msk [vmem:[#allocation4 + $0x60] sm:$0xff] %vm2015_vm2, %v2011_v9 }
 0x7e9   : > { %2029 = vst.msk [vmem:[#allocation4 + $0x68] sm:$0xff] %vm2015_vm2, %v2012_v11  ;;  %v1996_v38 = vpop.xlane.xlu0 %1995  ;;  %v2184_v11 = vld [vmem:[#allocation5 + $0x38] sm:$0xff] }
 0x7ea   : > { %v2013_v7 = vadd.f32 %v1996_v38, %v1965_v26  ;;  %v1998_v61 = vpop.xlane.xlu1 %1997  ;;  %v14593_v26 = vld [vmem:[#allocation94_spill] sm:$0xff] }
 0x7eb   : > { %v2014_v52 = vadd.f32 %v1998_v61, %v1966_v55  ;;  %v2185_v55 = vld [vmem:[#allocation5 + $0x40] sm:$0xff] }
 0x7ec   : > { %2030 = vst.msk [vmem:[#allocation4 + $0x70] sm:$0xff] %vm2015_vm2, %v2013_v7  ;;  %v14594_v7 = vld [vmem:[#allocation97_spill] sm:$0xff] }
 0x7ed   : > { %2031 = vst.msk [vmem:[#allocation4 + $0x78] sm:$0xff] %vm2015_vm2, %v2014_v52 }
 0x7ee   : > { %v2201_v1 = vpop.permute.xlu1 %2200 }
 0x7ef   : > { %v2274_v56 = vmul.f32 %v2201_v1, %v2178_v18 }
 0x7f1   : > { %v2290_v49 = vadd.f32 %v14588_v19, %v2274_v56  ;;  %v2196_v54 = vpop.permute.xlu0 %2195 }
 0x7f2   : > { %v2273_v47 = vmul.f32 %v2196_v54, %v2177_v34  ;;  %v2206_v22 = vpop.permute.xlu1 %2205  ;;  %v2186_v34 = vld [vmem:[#allocation5 + $0x48] sm:$0xff]  ;;  %v14596_v54 = vld [vmem:[#allocation99_spill] sm:$0xff] }
 0x7f3   : > { %2306 = vst.msk [vmem:[#allocation5 + $0x8] sm:$0xff] %vm1453_vm1, %v2290_v49  ;;  %v2275_v36 = vmul.f32 %v2206_v22, %v2179_v50  ;;  %v14595_v50 = vld [vmem:[#allocation96_spill] sm:$0xff]  ;;  %v2187_v49 = vld [vmem:[#allocation5 + $0x50] sm:$0xff] }
 0x7f4   : > { %v2289_v30 = vadd.f32 %v2273_v47, %v14589_v10 }
 0x7f5   : > { %v2291_v51 = vadd.f32 %v2275_v36, %v14590_v53 }
 0x7f6   : > { %v2211_v21 = vpop.permute.xlu0 %2210  ;;  %2305 = vst.msk [vmem:[#allocation5] sm:$0xff] %vm1453_vm1, %v2289_v30  ;;  %v2216_v13 = vpop.permute.xlu1 %2215  ;;  %v2188_v30 = vld [vmem:[#allocation5 + $0x58] sm:$0xff] }
 0x7f7   : > { %v2276_v58 = vmul.f32 %v2211_v21, %v2180_v17  ;;  %2307 = vst.msk [vmem:[#allocation5 + $0x10] sm:$0xff] %vm1453_vm1, %v2291_v51  ;;  %v2277_v57 = vmul.f32 %v2216_v13, %v2181_v20  ;;  %v14597_v20 = vld [vmem:[#allocation98_spill] sm:$0xff]  ;;  %v2189_v51 = vld [vmem:[#allocation5 + $0x60] sm:$0xff] }
 0x7f8   : > { %v14598_v21 = vld [vmem:[#allocation101_spill] sm:$0xff] }
 0x7f9   : > { %v2292_v60 = vadd.f32 %v14591_v2, %v2276_v58  ;;  %v2293_v24 = vadd.f32 %v2277_v57, %v14592_v63  ;;  %v2190_v63 = vld [vmem:[#allocation5 + $0x68] sm:$0xff] }
 0x7fa   : > { %v2221_v3 = vpop.permute.xlu0 %2220  ;;  %v2226_v43 = vpop.permute.xlu1 %2225 }
 0x7fb   : > { %2308 = vst.msk [vmem:[#allocation5 + $0x18] sm:$0xff] %vm1453_vm1, %v2292_v60  ;;  %v2278_v9 = vmul.f32 %v2221_v3, %v2182_v8  ;;  %2309 = vst.msk [vmem:[#allocation5 + $0x20] sm:$0xff] %vm1453_vm1, %v2293_v24  ;;  %v2279_v14 = vmul.f32 %v2226_v43, %v2183_v32  ;;  %v14599_v60 = vld [vmem:[#allocation100_spill] sm:$0xff]  ;;  %v2191_v24 = vld [vmem:[#allocation5 + $0x70] sm:$0xff] }
 0x7fc   : > { %v14600_v3 = vld [vmem:[#allocation103_spill] sm:$0xff] }
 0x7fd   : > { %v2294_v38 = vadd.f32 %v14593_v26, %v2278_v9  ;;  %v2295_v61 = vadd.f32 %v2279_v14, %v14594_v7 }
 0x7fe   : > { %v2231_v52 = vpop.permute.xlu0 %2230  ;;  %v2236_v1 = vpop.permute.xlu1 %2235 }
 0x7ff   : > { %2310 = vst.msk [vmem:[#allocation5 + $0x28] sm:$0xff] %vm1453_vm1, %v2294_v38  ;;  %v2280_v18 = vmul.f32 %v2231_v52, %v2184_v11  ;;  %2311 = vst.msk [vmem:[#allocation5 + $0x30] sm:$0xff] %vm1453_vm1, %v2295_v61  ;;  %v2281_v56 = vmul.f32 %v2236_v1, %v2185_v55  ;;  %v2192_v38 = vld [vmem:[#allocation5 + $0x78] sm:$0xff]  ;;  %v14601_v55 = vld [vmem:[#allocation102_spill] sm:$0xff] }
 0x800   : > { %v14602_v61 = vld [vmem:[#allocation105_spill] sm:$0xff] }
 0x801   : > { %v2296_v19 = vadd.f32 %v14595_v50, %v2280_v18  ;;  %v2297_v47 = vadd.f32 %v2281_v56, %v14596_v54 }
 0x802   : > { %v2241_v22 = vpop.permute.xlu0 %2240  ;;  %v2246_v17 = vpop.permute.xlu1 %2245 }
 0x803   : > { %2312 = vst.msk [vmem:[#allocation5 + $0x38] sm:$0xff] %vm1453_vm1, %v2296_v19  ;;  %v2282_v36 = vmul.f32 %v2241_v22, %v2186_v34  ;;  %2313 = vst.msk [vmem:[#allocation5 + $0x40] sm:$0xff] %vm1453_vm1, %v2297_v47  ;;  %v2283_v10 = vmul.f32 %v2246_v17, %v2187_v49  ;;  %v14603_v34 = vld [vmem:[#allocation104_spill] sm:$0xff] }
 0x805   : > { %v2298_v53 = vadd.f32 %v14597_v20, %v2282_v36  ;;  %v2299_v58 = vadd.f32 %v2283_v10, %v14598_v21  ;;  %v12009_v10 = vpop.f32.mrf.mxu0  ;;  %v14604_v21 = vld [vmem:[#allocation107_spill] sm:$0xff] }
 0x806   : > { %v2251_v13 = vpop.permute.xlu0 %2250  ;;  %v2256_v8 = vpop.permute.xlu1 %2255 }
 0x807   : > { %2314 = vst.msk [vmem:[#allocation5 + $0x48] sm:$0xff] %vm1453_vm1, %v2298_v53  ;;  %v2284_v57 = vmul.f32 %v2251_v13, %v2188_v30  ;;  %2315 = vst.msk [vmem:[#allocation5 + $0x50] sm:$0xff] %vm1453_vm1, %v2299_v58  ;;  %v2285_v2 = vmul.f32 %v2256_v8, %v2189_v51  ;;  %v12011_v30 = vpop.f32.mrf.mxu0  ;;  %v14605_v58 = vld [vmem:[#allocation109_spill] sm:$0xff] }
 0x808   : > { %v14606_v13 = vsub.f32 %v14604_v21, %v14605_v58 }
 0x809   : > { %v2300_v32 = vadd.f32 %v14599_v60, %v2284_v57  ;;  %v2301_v9 = vadd.f32 %v2285_v2, %v14600_v3  ;;  %v14607_v60 = vld [vmem:[#allocation110_spill] sm:$0xff] }
 0x80a   : > { %v2261_v43 = vpop.permute.xlu0 %2260  ;;  %v2266_v14 = vpop.permute.xlu1 %2265  ;;  %v2723_v57 = vmul.f32 1.442695, %v14606_v13 }
 0x80b   : > { %2316 = vst.msk [vmem:[#allocation5 + $0x58] sm:$0xff] %vm1453_vm1, %v2300_v32  ;;  %2317 = vst.msk [vmem:[#allocation5 + $0x60] sm:$0xff] %vm1453_vm1, %v2301_v9  ;;  %v2286_v11 = vmul.f32 %v2261_v43, %v2190_v63  ;;  %v2287_v26 = vmul.f32 %v2266_v14, %v2191_v24  ;;  %v14608_v32 = vld [vmem:[#allocation112_spill] sm:$0xff]  ;;  %v14610_v9 = vld [vmem:[#allocation106_spill] sm:$0xff] }
 0x80c   : > { %9188 = vpow2.f32 %v2723_v57  ;;  %v14609_v63 = vsub.f32 %v14607_v60, %v14608_v32  ;;  %v14611_v43 = vld [vmem:[#allocation108_spill] sm:$0xff]  ;;  %v2884_v60 = vld [vmem:[#allocation4 + $0x80] sm:$0xff] }
 0x80d   : > { %v2302_v7 = vadd.f32 %v14601_v55, %v2286_v11  ;;  %v2303_v52 = vadd.f32 %v2287_v26, %v14602_v61  ;;  %v14612_v14 = vsub.f32 %v14610_v9, %v14611_v43  ;;  %v14614_v55 = vld [vmem:[#allocation116_spill] sm:$0xff]  ;;  %v2886_v43 = vld [vmem:[#allocation4 + $0x90] sm:$0xff] }
 0x80e   : > { %v2271_v18 = vpop.permute.xlu0 %2270  ;;  %v4088_v1 = vpop.permute.xlu1 %4087  ;;  %v2727_v24 = vmul.f32 1.442695, %v14609_v63 }
 0x80f   : > { %2318 = vst.msk [vmem:[#allocation5 + $0x68] sm:$0xff] %vm1453_vm1, %v2302_v7  ;;  %2319 = vst.msk [vmem:[#allocation5 + $0x70] sm:$0xff] %vm1453_vm1, %v2303_v52  ;;  %v2288_v56 = vmul.f32 %v2271_v18, %v2192_v38  ;;  %8599 = vmatprep.subr.mxu1 %v4088_v1  ;;  %v2725_v11 = vmul.f32 1.442695, %v14612_v14  ;;  %v14613_v38 = vld [vmem:[#allocation113_spill] sm:$0xff]  ;;  %v14617_v18 = vld [vmem:[#allocation111_spill] sm:$0xff] }
 0x810   : > { %8600 = vmatpush3.msra.mxu1 %v4088_v1  ;;  %9190 = vpow2.f32 %v2727_v24  ;;  %v14615_v7 = vsub.f32 %v14613_v38, %v14614_v55  ;;  %v14618_v1 = vld [vmem:[#allocation114_spill] sm:$0xff] }
 0x811   : > { %v2304_v50 = vadd.f32 %v14603_v34, %v2288_v56  ;;  %9192 = vpow2.f32 %v2725_v11  ;;  %v14619_v56 = vsub.f32 %v14617_v18, %v14618_v1  ;;  %v2888_v18 = vld [vmem:[#allocation4 + $0xa0] sm:$0xff]  ;;  %v2885_v1 = vld [vmem:[#allocation4 + $0x88] sm:$0xff] }
 0x812   : > { %v4086_v19 = vpop.permute.xlu0 %4085  ;;  %v4084_v49 = vpop.permute.xlu1 %4083  ;;  %v2731_v61 = vmul.f32 1.442695, %v14615_v7 }
 0x813   : > { %2320 = vst.msk [vmem:[#allocation5 + $0x78] sm:$0xff] %vm1453_vm1, %v2304_v50  ;;  %8601 = vmatprep.subr.mxu1 %v4086_v19  ;;  %v2729_v34 = vmul.f32 1.442695, %v14619_v56 }
 0x814   : > { %8602 = vmatpush3.msra.mxu1 %v4086_v19  ;;  %9194 = vpow2.f32 %v2731_v61  ;;  %v14621_v19 = vld [vmem:[#allocation117_spill] sm:$0xff] }
 0x815   : > { %8603 = vmatprep.subr.mxu1 %v4084_v49  ;;  %9196 = vpow2.f32 %v2729_v34 }
 0x816   : > { %8604 = vmatpush3.msra.mxu1 %v4084_v49  ;;  %v4080_v54 = vpop.permute.xlu0 %4079  ;;  %v4082_v47 = vpop.permute.xlu1 %4081  ;;  %v14622_v49 = vld [vmem:[#allocation120_spill] sm:$0xff] }
 0x817   : > { %8605 = vmatprep.subr.mxu1 %v4082_v47 }
 0x818   : > { %8606 = vmatpush3.msra.mxu1 %v4082_v47 }
 0x819   : > { %8607 = vmatprep.subr.mxu1 %v4080_v54  ;;  %v12056_v57 = vpop.eup %9188 }
 0x81a   : > { %v4078_v22 = vpop.permute.xlu1 %4077  ;;  %8608 = vmatpush3.msra.mxu1 %v4080_v54  ;;  %v4076_v36 = vpop.permute.xlu0 %4075  ;;  %v14623_v54 = vsub.f32 %v14621_v19, %v14622_v49  ;;  %v2900_v63 = vmul.f32 %v12056_v57, %v2884_v60  ;;  %v2887_v60 = vld [vmem:[#allocation4 + $0x98] sm:$0xff] }
 0x81b   : > { %8609 = vmatprep.subr.mxu1 %v4078_v22 }
 0x81c   : > { %8610 = vmatpush3.msra.mxu1 %v4078_v22  ;;  %v2735_v47 = vmul.f32 1.442695, %v14623_v54 }
 0x81d   : > { %8611 = vmatprep.subr.mxu1 %v4076_v36  ;;  %v12061_v24 = vpop.eup %9190 }
 0x81e   : > { %v4074_v17 = vpop.permute.xlu1 %4073  ;;  %8612 = vmatpush3.msra.mxu1 %v4076_v36  ;;  %v14625_v36 = vld [vmem:[#allocation115_spill] sm:$0xff]  ;;  %9198 = vpow2.f32 %v2735_v47  ;;  %v12065_v38 = vpop.eup %9192  ;;  %v2902_v55 = vmul.f32 %v12061_v24, %v2886_v43 }
 0x81f   : > { %8613 = vmatprep.subr.mxu1 %v4074_v17  ;;  %v2901_v47 = vmul.f32 %v12065_v38, %v2885_v1 }
 0x820   : > { %8614 = vmatpush3.msra.mxu1 %v4074_v17  ;;  %v14626_v17 = vld [vmem:[#allocation118_spill] sm:$0xff] }
 0x821   : > { %v14627_v21 = vsub.f32 %v14625_v36, %v14626_v17  ;;  %v12069_v7 = vpop.eup %9194 }
 0x822   : > { %v12073_v19 = vpop.eup %9196  ;;  %v2904_v54 = vmul.f32 %v12069_v7, %v2888_v18 }
 0x823   : > { %v2733_v58 = vmul.f32 1.442695, %v14627_v21 }
 0x825   : > { %9200 = vpow2.f32 %v2733_v58  ;;  %v2890_v58 = vld [vmem:[#allocation4 + $0xb0] sm:$0xff] }
 0x82b   : > { %v12080_v36 = vpop.eup %9198 }
 0x82c   : > { %v12013_v20 = vpop.f32.mrf.mxu0 }
 0x82e   : > { %v12015_v53 = vpop.f32.mrf.mxu0 }
 0x830   : > { %v12017_v51 = vpop.f32.mrf.mxu0 }
 0x832   : > { %v12022_v8 = vpop.f32.mrf.mxu0 }
 0x835   : > { %v12024_v2 = vpop.f32.mrf.mxu0 }
 0x837   : > { %v12029_v3 = vpop.f32.mrf.mxu0 }
 0x839   : > { %v12034_v26 = vpop.f32.mrf.mxu0 }
 0x83b   : > { %v12039_v52 = vpop.f32.mrf.mxu0 }
 0x83c   : > { %14616 = vst [vmem:[#allocation76_spill] sm:$0xff] %v12039_v52  ;;  %v12236_v52 = vld [vmem:[#allocation3 + $0x148] sm:$0xff] }
 0x83d   : > { %v12044_v50 = vpop.f32.mrf.mxu0  ;;  %14661 = vst [vmem:[#allocation93_spill] sm:$0xff] %v12236_v52 }
 0x83e   : > { %14620 = vst [vmem:[#allocation78_spill] sm:$0xff] %v12044_v50 }
 0x83f   : > { %v12049_v22 = vpop.f32.mrf.mxu0 }
 0x840   : > { %14624 = vst [vmem:[#allocation73_spill] sm:$0xff] %v12049_v22  ;;  %v12197_v22 = vld [vmem:[#allocation3 + $0x128] sm:$0xff] }
 0x841   : > { %v12054_v13 = vpop.f32.mrf.mxu0  ;;  %14653 = vst [vmem:[#allocation84_spill] sm:$0xff] %v12197_v22 }
 0x842   : > { %14628 = vst [vmem:[#allocation75_spill] sm:$0xff] %v12054_v13  ;;  %v12192_v13 = vld [vmem:[#allocation3 + $0x110] sm:$0xff] }
 0x843   : > { %v12058_v32 = vpop.f32.mrf.mxu0  ;;  %14651 = vst [vmem:[#allocation82_spill] sm:$0xff] %v12192_v13 }
 0x844   : > { %14629 = vst [vmem:[#allocation77_spill] sm:$0xff] %v12058_v32  ;;  %v14641_v32 = vld [vmem:[#allocation58_spill] sm:$0xff] }
 0x847   : > { %v2917_v9 = vpop.xlane.xlu0 %2916 }
 0x848   : > { %v2948_v14 = vadd.f32 %v2917_v9, %v2900_v63  ;;  %v12063_v11 = vpop.f32.mrf.mxu0 }
 0x849   : > { %14630 = vst [vmem:[#allocation74_spill] sm:$0xff] %v12063_v11  ;;  %v14639_v11 = vld [vmem:[#allocation60_spill] sm:$0xff] }
 0x84a   : > { %2964 = vst.msk [vmem:[#allocation4 + $0x80] sm:$0xff] %vm2015_vm2, %v2948_v14  ;;  %v12071_v56 = vpop.f32.mrf.mxu0  ;;  %v2906_v14 = vmul.f32 %v12080_v36, %v2890_v58  ;;  %v14632_v58 = vld [vmem:[#allocation64_spill] sm:$0xff] }
 0x84b   : > { %v2921_v61 = vpop.xlane.xlu0 %2920  ;;  %14631 = vst [vmem:[#allocation79_spill] sm:$0xff] %v12071_v56 }
 0x84c   : > { %v2950_v34 = vadd.f32 %v2921_v61, %v2902_v55  ;;  %v2903_v55 = vmul.f32 %v12073_v19, %v2887_v60  ;;  %v12090_v61 = vpop.eup %9200  ;;  %v14633_v60 = vld [vmem:[#allocation63_spill] sm:$0xff] }
 0x84e   : > { %2966 = vst.msk [vmem:[#allocation4 + $0x90] sm:$0xff] %vm2015_vm2, %v2950_v34  ;;  %v12076_v49 = vpop.f32.mrf.mxu0  ;;  %v2889_v34 = vld [vmem:[#allocation4 + $0xa8] sm:$0xff] }
 0x84f   : > { %3738 = vmax.xlane.f32.xlu0 %v12076_v49  ;;  %v2925_v17 = vpop.xlane.xlu0 %2924  ;;  %v2919_v21 = vpop.xlane.xlu1 %2918 }
 0x850   : > { %v2952_v63 = vadd.f32 %v2925_v17, %v2904_v54  ;;  %v2949_v9 = vadd.f32 %v2919_v21, %v2901_v47  ;;  %v12083_v43 = vpop.f32.mrf.mxu0  ;;  %v2905_v47 = vmul.f32 %v12090_v61, %v2889_v34 }
 0x851   : > { %3736 = vmax.xlane.f32.xlu1 %v12083_v43 }
 0x852   : > { %2968 = vst.msk [vmem:[#allocation4 + $0xa0] sm:$0xff] %vm2015_vm2, %v2952_v63  ;;  %2965 = vst.msk [vmem:[#allocation4 + $0x88] sm:$0xff] %vm2015_vm2, %v2949_v9  ;;  %v12100_v63 = vpop.f32.mrf.mxu0 }
 0x853   : > { %v2929_v18 = vpop.xlane.xlu0 %2928  ;;  %v2923_v1 = vpop.xlane.xlu1 %2922 }
 0x854   : > { %v2954_v12 = vadd.f32 %v2929_v18, %v2906_v14  ;;  %v2951_v54 = vadd.f32 %v2923_v1, %v2903_v55  ;;  %v12102_v9 = vpop.f32.mrf.mxu0 }
 0x856   : > { %2970 = vst.msk [vmem:[#allocation4 + $0xb0] sm:$0xff] %vm2015_vm2, %v2954_v12  ;;  %2967 = vst.msk [vmem:[#allocation4 + $0x98] sm:$0xff] %vm2015_vm2, %v2951_v54  ;;  %v12104_v14 = vpop.f32.mrf.mxu0 }
 0x857   : > { %v2927_v17 = vpop.xlane.xlu1 %2926 }
 0x858   : > { %v2953_v21 = vadd.f32 %v2927_v17, %v2905_v47  ;;  %v12106_v12 = vpop.f32.mrf.mxu0 }
 0x85a   : > { %2969 = vst.msk [vmem:[#allocation4 + $0xa8] sm:$0xff] %vm2015_vm2, %v2953_v21  ;;  %v12108_v55 = vpop.f32.mrf.mxu0 }
 0x85c   : > { %v12110_v18 = vpop.f32.mrf.mxu0 }
 0x85e   : > { %v12112_v1 = vpop.f32.mrf.mxu0 }
 0x860   : > { %v12115_v34 = vpop.f32.mrf.mxu0 }
 0x862   : > { %4069 = vrot.lane.b32.xlu1 %v14632_v58, %s9953_s14  ;;  %v12119_v54 = vpop.f32.mrf.mxu0 }
 0x864   : > { %v12123_v47 = vpop.f32.mrf.mxu0 }
 0x865   : > { %4071 = vrot.lane.b32.xlu0 %v14633_v60, %s9953_s14 }
 0x866   : > { %v12127_v17 = vpop.f32.mrf.mxu0 }
 0x868   : > { %v12131_v21 = vpop.f32.mrf.mxu0 }
 0x86a   : > { %v12134_v58 = vpop.f32.mrf.mxu0 }
 0x86c   : > { %v12138_v60 = vpop.f32.mrf.mxu0 }
 0x884   : > { %3742 = vmax.xlane.f32.xlu0 %v12100_v63 }
 0x886   : > { %3740 = vmax.xlane.f32.xlu1 %v12102_v9 }
 0x888   : > { %3746 = vmax.xlane.f32.xlu0 %v12104_v14 }
 0x88a   : > { %3744 = vmax.xlane.f32.xlu1 %v12106_v12 }
 0x88c   : > { %3750 = vmax.xlane.f32.xlu0 %v12108_v55 }
 0x88e   : > { %3748 = vmax.xlane.f32.xlu1 %v12110_v18 }
 0x890   : > { %3754 = vmax.xlane.f32.xlu0 %v12112_v1 }
 0x892   : > { %3752 = vmax.xlane.f32.xlu1 %v12115_v34 }
 0x894   : > { %3758 = vmax.xlane.f32.xlu0 %v12119_v54 }
 0x896   : > { %3756 = vmax.xlane.f32.xlu1 %v12123_v47 }
 0x898   : > { %3762 = vmax.xlane.f32.xlu0 %v12127_v17 }
 0x89a   : > { %3760 = vmax.xlane.f32.xlu1 %v12131_v21 }
 0x89c   : > { %3766 = vmax.xlane.f32.xlu0 %v12134_v58 }
 0x89e   : > { %3764 = vmax.xlane.f32.xlu1 %v12138_v60 }
 0x8d8   : > { %v3739_v23 = vpop.xlane.xlu0 %3738 }
 0x8d9   : > { %v12147_v15 = vmax.f32 %v12142_v41, %v3739_v23  ;;  %v14640_v41 = vld [vmem:[#allocation57_spill] sm:$0xff] }
 0x8da   : > { %v3737_v62 = vpop.xlane.xlu1 %3736 }
 0x8db   : > { %14635 = vst [vmem:[#allocation81_spill] sm:$0xff] %v12147_v15  ;;  %4460 = vst.msk [vmem:[#allocation3 + $0x108] sm:$0xff] %vm2015_vm2, %v12147_v15  ;;  %v12154_v48 = vmax.f32 %v12144_v42, %v3737_v62  ;;  %3839 = vperm.xlu0 %9090, %v12147_v15   ;;  %v14637_v62 = vld [vmem:[#allocation62_spill] sm:$0xff]  ;;  %v14638_v15 = vld [vmem:[#allocation59_spill] sm:$0xff] }
 0x8dc   : > { %v4072_v56 = vpop.permute.xlu0 %4071 }
 0x8dd   : > { %4459 = vst.msk [vmem:[#allocation3 + $0x100] sm:$0xff] %vm2015_vm2, %v12154_v48  ;;  %3834 = vperm.xlu1 %9091, %v12154_v48   ;;  %8615 = vmatprep.subr.mxu1 %v4072_v56 }
 0x8de   : > { %v4070_v23 = vpop.permute.xlu1 %4069  ;;  %8616 = vmatpush3.msra.mxu1 %v4072_v56  ;;  %v14642_v56 = vld [vmem:[#allocation51_spill] sm:$0xff] }
 0x8df   : > { %4067 = vrot.lane.b32.xlu0 %v14636_v0, %s9953_s14  ;;  %8617 = vmatprep.subr.mxu1 %v4070_v23  ;;  %v12190_v0 = vld [vmem:[#allocation3 + $0x118] sm:$0xff] }
 0x8e0   : > { %8618 = vmatpush3.msra.mxu1 %v4070_v23  ;;  %v14643_v23 = vld [vmem:[#allocation52_spill] sm:$0xff]  ;;  %14650 = vst [vmem:[#allocation83_spill] sm:$0xff] %v12190_v0 }
 0x8e1   : > { %4065 = vrot.lane.b32.xlu1 %v14637_v62, %s9953_s14  ;;  %v14644_v62 = vld [vmem:[#allocation49_spill] sm:$0xff] }
 0x8e3   : > { %4063 = vrot.lane.b32.xlu0 %v14638_v15, %s9953_s14  ;;  %v14645_v15 = vld [vmem:[#allocation47_spill] sm:$0xff] }
 0x8e5   : > { %4061 = vrot.lane.b32.xlu1 %v14639_v11, %s9953_s14  ;;  %v14646_v11 = vld [vmem:[#allocation50_spill] sm:$0xff] }
 0x8e7   : > { %4059 = vrot.lane.b32.xlu0 %v14640_v41, %s9953_s14  ;;  %v14647_v41 = vld [vmem:[#allocation45_spill] sm:$0xff] }
 0x8e9   : > { %4057 = vrot.lane.b32.xlu1 %v14641_v32, %s9953_s14  ;;  %v14648_v32 = vld [vmem:[#allocation48_spill] sm:$0xff] }
 0x8eb   : > { %4569 = vrot.lane.b32.xlu0 %v14642_v56, %s9954_s29  ;;  %v14649_v56 = vld [vmem:[#allocation46_spill] sm:$0xff] }
 0x8ed   : > { %4567 = vrot.lane.b32.xlu1 %v14643_v23, %s9954_s29 }
 0x8ef   : > { %4565 = vrot.lane.b32.xlu0 %v14644_v62, %s9954_s29 }
 0x8f1   : > { %4561 = vrot.lane.b32.xlu1 %v14645_v15, %s9954_s29 }
 0x8f3   : > { %4563 = vrot.lane.b32.xlu0 %v14646_v11, %s9954_s29 }
 0x8f5   : > { %4557 = vrot.lane.b32.xlu1 %v14647_v41, %s9954_s29 }
 0x8f7   : > { %4559 = vrot.lane.b32.xlu0 %v14648_v32, %s9954_s29 }
 0x8fb   : > { %4555 = vrot.lane.b32.xlu0 %v14649_v56, %s9954_s29  ;;  %v12207_v56 = vld [vmem:[#allocation3 + $0x120] sm:$0xff] }
 0x8fc   : > { %14655 = vst [vmem:[#allocation87_spill] sm:$0xff] %v12207_v56 }
 0x90d   : > { %v3743_v23 = vpop.xlane.xlu0 %3742 }
 0x90e   : > { %v12195_v62 = vmax.f32 %v12190_v0, %v3743_v23  ;;  %v12216_v0 = vld [vmem:[#allocation3 + $0x138] sm:$0xff] }
 0x90f   : > { %v3741_v15 = vpop.xlane.xlu1 %3740  ;;  %14657 = vst [vmem:[#allocation90_spill] sm:$0xff] %v12216_v0 }
 0x910   : > { %14652 = vst [vmem:[#allocation85_spill] sm:$0xff] %v12195_v62  ;;  %4462 = vst.msk [vmem:[#allocation3 + $0x118] sm:$0xff] %vm2015_vm2, %v12195_v62  ;;  %v12204_v32 = vmax.f32 %v12192_v13, %v3741_v15  ;;  %3849 = vperm.xlu1 %9091, %v12195_v62   ;;  %v12227_v13 = vld [vmem:[#allocation3 + $0x130] sm:$0xff] }
 0x911   : > { %v3747_v11 = vpop.xlane.xlu0 %3746  ;;  %14659 = vst [vmem:[#allocation91_spill] sm:$0xff] %v12227_v13 }
 0x912   : > { %14654 = vst [vmem:[#allocation86_spill] sm:$0xff] %v12204_v32  ;;  %4461 = vst.msk [vmem:[#allocation3 + $0x110] sm:$0xff] %vm2015_vm2, %v12204_v32  ;;  %v12214_v50 = vmax.f32 %v12197_v22, %v3747_v11 }
 0x913   : > { %v3745_v41 = vpop.xlane.xlu1 %3744 }
 0x914   : > { %14656 = vst [vmem:[#allocation88_spill] sm:$0xff] %v12214_v50  ;;  %4464 = vst.msk [vmem:[#allocation3 + $0x128] sm:$0xff] %vm2015_vm2, %v12214_v50  ;;  %v12223_v62 = vmax.f32 %v12207_v56, %v3745_v41  ;;  %3844 = vperm.xlu1 %9091, %v12204_v32   ;;  %3859 = vperm.xlu0 %9090, %v12214_v50   ;;  %v12247_v56 = vld [vmem:[#allocation3 + $0x140] sm:$0xff]  ;;  %v12256_v32 = vld [vmem:[#allocation3 + $0x158] sm:$0xff] }
 0x915   : > { %v3751_v23 = vpop.xlane.xlu0 %3750  ;;  %14663 = vst [vmem:[#allocation56_spill] sm:$0xff] %v12247_v56  ;;  %14665 = vst [vmem:[#allocation54_spill] sm:$0xff] %v12256_v32 }
 0x916   : > { %14658 = vst [vmem:[#allocation89_spill] sm:$0xff] %v12223_v62  ;;  %4463 = vst.msk [vmem:[#allocation3 + $0x120] sm:$0xff] %vm2015_vm2, %v12223_v62  ;;  %v12234_v15 = vmax.f32 %v12216_v0, %v3751_v23 }
 0x917   : > { %v3749_v22 = vpop.xlane.xlu1 %3748 }
 0x918   : > { %14660 = vst [vmem:[#allocation92_spill] sm:$0xff] %v12234_v15  ;;  %4466 = vst.msk [vmem:[#allocation3 + $0x138] sm:$0xff] %vm2015_vm2, %v12234_v15  ;;  %v12243_v50 = vmax.f32 %v12227_v13, %v3749_v22  ;;  %3854 = vperm.xlu0 %9090, %v12223_v62   ;;  %3869 = vperm.xlu1 %9091, %v12234_v15   ;;  %v12267_v13 = vld [vmem:[#allocation3 + $0x150] sm:$0xff]  ;;  %v12276_v62 = vld [vmem:[#allocation3 + $0x168] sm:$0xff] }
 0x919   : > { %v3755_v11 = vpop.xlane.xlu0 %3754  ;;  %14666 = vst [vmem:[#allocation95_spill] sm:$0xff] %v12267_v13  ;;  %14668 = vst [vmem:[#allocation97_spill] sm:$0xff] %v12276_v62 }
 0x91a   : > { %14662 = vst [vmem:[#allocation53_spill] sm:$0xff] %v12243_v50  ;;  %4465 = vst.msk [vmem:[#allocation3 + $0x130] sm:$0xff] %vm2015_vm2, %v12243_v50  ;;  %v12254_v41 = vmax.f32 %v12236_v52, %v3755_v11 }
 0x91b   : > { %v3753_v0 = vpop.xlane.xlu1 %3752 }
 0x91c   : > { %14664 = vst [vmem:[#allocation55_spill] sm:$0xff] %v12254_v41  ;;  %4468 = vst.msk [vmem:[#allocation3 + $0x148] sm:$0xff] %vm2015_vm2, %v12254_v41  ;;  %v12263_v15 = vmax.f32 %v12247_v56, %v3753_v0  ;;  %3864 = vperm.xlu1 %9091, %v12243_v50   ;;  %3879 = vperm.xlu0 %9090, %v12254_v41   ;;  %v12287_v56 = vld [vmem:[#allocation3 + $0x160] sm:$0xff]  ;;  %v12296_v50 = vld [vmem:[#allocation3 + $0x178] sm:$0xff] }
 0x91d   : > { %v3759_v23 = vpop.xlane.xlu0 %3758 }
 0x91e   : > { %4467 = vst.msk [vmem:[#allocation3 + $0x140] sm:$0xff] %vm2015_vm2, %v12263_v15  ;;  %v12274_v22 = vmax.f32 %v12256_v32, %v3759_v23  ;;  %v12307_v23 = vld [vmem:[#allocation3 + $0x170] sm:$0xff] }
 0x91f   : > { %v3757_v52 = vpop.xlane.xlu1 %3756 }
 0x920   : > { %14667 = vst [vmem:[#allocation94_spill] sm:$0xff] %v12274_v22  ;;  %4470 = vst.msk [vmem:[#allocation3 + $0x158] sm:$0xff] %vm2015_vm2, %v12274_v22  ;;  %v12283_v41 = vmax.f32 %v12267_v13, %v3757_v52  ;;  %3874 = vperm.xlu0 %9090, %v12263_v15   ;;  %3889 = vperm.xlu1 %9091, %v12274_v22  }
 0x921   : > { %v3763_v11 = vpop.xlane.xlu0 %3762 }
 0x922   : > { %14669 = vst [vmem:[#allocation96_spill] sm:$0xff] %v12283_v41  ;;  %4469 = vst.msk [vmem:[#allocation3 + $0x150] sm:$0xff] %vm2015_vm2, %v12283_v41  ;;  %v12294_v0 = vmax.f32 %v12276_v62, %v3763_v11 }
 0x923   : > { %v3761_v32 = vpop.xlane.xlu1 %3760 }
 0x924   : > { %4472 = vst.msk [vmem:[#allocation3 + $0x168] sm:$0xff] %vm2015_vm2, %v12294_v0  ;;  %v12303_v22 = vmax.f32 %v12287_v56, %v3761_v32  ;;  %3884 = vperm.xlu1 %9091, %v12283_v41   ;;  %3899 = vperm.xlu0 %9090, %v12294_v0  }
 0x925   : > { %v3767_v11 = vpop.xlane.xlu0 %3766 }
 0x926   : > { %4471 = vst.msk [vmem:[#allocation3 + $0x160] sm:$0xff] %vm2015_vm2, %v12303_v22  ;;  %v12314_v52 = vmax.f32 %v12296_v50, %v3767_v11  ;;  %v4485_v11 = vld [vmem:[#allocation2 + $0x10] sm:$0xff] }
 0x927   : > { %v3765_v62 = vpop.xlane.xlu1 %3764 }
 0x928   : > { %v12317_v32 = vmax.f32 %v12307_v23, %v3765_v62  ;;  %4474 = vst.msk [vmem:[#allocation3 + $0x178] sm:$0xff] %vm2015_vm2, %v12314_v52  ;;  %4553 = vrot.lane.b32.xlu1 %v10741_v37, %s9954_s29  ;;  %3894 = vperm.xlu0 %9090, %v12303_v22   ;;  %v4475_v37 = vld [vmem:[#allocation2 + $0x30] sm:$0xff]  ;;  %v4483_v62 = vld [vmem:[#allocation2 + $0x40] sm:$0xff] }
 0x92a   : > { %4473 = vst.msk [vmem:[#allocation3 + $0x170] sm:$0xff] %vm2015_vm2, %v12317_v32 }
 0x92c   : > { %3904 = vperm.xlu1 %9091, %v12317_v32   ;;  %4551 = vrot.lane.b32.xlu0 %v10743_v39, %s9954_s29  ;;  %v4476_v39 = vld [vmem:[#allocation2] sm:$0xff] }
 0x930   : > { %4549 = vrot.lane.b32.xlu0 %v10737_v33, %s9954_s29  ;;  %3909 = vperm.xlu1 %9091, %v12314_v52   ;;  %v4477_v33 = vld [vmem:[#allocation2 + $0x58] sm:$0xff] }
 0x934   : > { %4545 = vrot.lane.b32.xlu0 %v10733_v29, %s9954_s29  ;;  %4547 = vrot.lane.b32.xlu1 %v10739_v35, %s9954_s29  ;;  %v4479_v29 = vld [vmem:[#allocation2 + $0x50] sm:$0xff]  ;;  %v4478_v35 = vld [vmem:[#allocation2 + $0x18] sm:$0xff] }
 0x938   : > { %4541 = vrot.lane.b32.xlu0 %v10729_v25, %s9954_s29  ;;  %4543 = vrot.lane.b32.xlu1 %v10735_v31, %s9954_s29  ;;  %v4481_v25 = vld [vmem:[#allocation2 + $0x8] sm:$0xff] }
 0x939   : > { %v4480_v31 = vld [vmem:[#allocation2 + $0x68] sm:$0xff] }
 0x93c   : > { %4507 = vrot.lane.b32.xlu0 %v4475_v37, %s9954_s29  ;;  %4539 = vrot.lane.b32.xlu1 %v10731_v27, %s9954_s29  ;;  %v4482_v27 = vld [vmem:[#allocation2 + $0x48] sm:$0xff]  ;;  %v4484_v37 = vld [vmem:[#allocation2 + $0x20] sm:$0xff] }
 0x940   : > { %4511 = vrot.lane.b32.xlu0 %v4477_v33, %s9954_s29  ;;  %4509 = vrot.lane.b32.xlu1 %v4476_v39, %s9954_s29  ;;  %v4487_v33 = vld [vmem:[#allocation2 + $0x60] sm:$0xff]  ;;  %v4486_v39 = vld [vmem:[#allocation2 + $0x38] sm:$0xff] }
 0x944   : > { %4515 = vrot.lane.b32.xlu0 %v4479_v29, %s9954_s29  ;;  %4513 = vrot.lane.b32.xlu1 %v4478_v35, %s9954_s29  ;;  %v4489_v29 = vld [vmem:[#allocation2 + $0x78] sm:$0xff]  ;;  %v4488_v35 = vld [vmem:[#allocation2 + $0x70] sm:$0xff] }
 0x948   : > { %4519 = vrot.lane.b32.xlu0 %v4481_v25, %s9954_s29  ;;  %4517 = vrot.lane.b32.xlu1 %v4480_v31, %s9954_s29 }
 0x94c   : > { %4523 = vrot.lane.b32.xlu0 %v4483_v62, %s9954_s29  ;;  %4521 = vrot.lane.b32.xlu1 %v4482_v27, %s9954_s29 }
 0x950   : > { %4527 = vrot.lane.b32.xlu0 %v4485_v11, %s9954_s29  ;;  %4525 = vrot.lane.b32.xlu1 %v4484_v37, %s9954_s29  ;;  %v4490_v11 = vld [vmem:[#allocation2 + $0x28] sm:$0xff] }
 0x954   : > { %4531 = vrot.lane.b32.xlu0 %v4487_v33, %s9954_s29  ;;  %4529 = vrot.lane.b32.xlu1 %v4486_v39, %s9954_s29 }
 0x956   : > { %v3840_v25 = vpop.permute.xlu0 %3839 }
 0x957   : > { %v3913_v31 = vsub.f32 %v12076_v49, %v3840_v25 }
 0x958   : > { %v3835_v62 = vpop.permute.xlu1 %3834  ;;  %4535 = vrot.lane.b32.xlu0 %v4489_v29, %s9954_s29  ;;  %4533 = vrot.lane.b32.xlu1 %v4488_v35, %s9954_s29 }
 0x959   : > { %v3912_v27 = vsub.f32 %v12083_v43, %v3835_v62  ;;  %v3930_v37 = vmul.f32 1.442695, %v3913_v31 }
 0x95a   : > { %v4068_v41 = vpop.permute.xlu0 %4067 }
 0x95b   : > { %v3928_v13 = vmul.f32 1.442695, %v3912_v27  ;;  %8619 = vmatprep.subr.mxu1 %v4068_v41 }
 0x95c   : > { %v4066_v33 = vpop.permute.xlu1 %4065  ;;  %4537 = vrot.lane.b32.xlu1 %v4490_v11, %s9954_s29  ;;  %8620 = vmatpush3.msra.mxu1 %v4068_v41 }
 0x95d   : > { %9202 = vpow2.f32 %v3928_v13  ;;  %8621 = vmatprep.subr.mxu1 %v4066_v33 }
 0x95e   : > { %9204 = vpow2.f32 %v3930_v37  ;;  %8622 = vmatpush3.msra.mxu1 %v4066_v33  ;;  %v4064_v49 = vpop.permute.xlu0 %4063 }
 0x95f   : > { %8623 = vmatprep.subr.mxu1 %v4064_v49 }
 0x960   : > { %v4062_v39 = vpop.permute.xlu1 %4061  ;;  %8624 = vmatpush3.msra.mxu1 %v4064_v49 }
 0x961   : > { %8625 = vmatprep.subr.mxu1 %v4062_v39 }
 0x962   : > { %8626 = vmatpush3.msra.mxu1 %v4062_v39  ;;  %v4060_v43 = vpop.permute.xlu0 %4059 }
 0x963   : > { %8627 = vmatprep.subr.mxu1 %v4060_v43 }
 0x964   : > { %v4058_v29 = vpop.permute.xlu1 %4057  ;;  %8628 = vmatpush3.msra.mxu1 %v4060_v43 }
 0x965   : > { %8629 = vmatprep.subr.mxu1 %v4058_v29 }
 0x966   : > { %8630 = vmatpush3.msra.mxu1 %v4058_v29  ;;  %v4570_v35 = vpop.permute.xlu0 %4569 }
 0x967   : > { %8655 = vmatprep.subr.msk.mxu1 %vm1453_vm1, %v4570_v35 }
 0x968   : > { %v4568_v25 = vpop.permute.xlu1 %4567 }
 0x96a   : > { %v12365_v41 = vpop.eup %9202  ;;  %v4566_v31 = vpop.permute.xlu0 %4565 }
 0x96b   : > { %v12367_v13 = vpop.eup %9204  ;;  %8631 = vmatprep.mubr.f32.mxu1 %v12365_v41 }
 0x96c   : > { %8632 = vmatmul.mubr.f32.vlgmr.msra.gmra.mxu1 %v12367_v13  ;;  %v4562_v27 = vpop.permute.xlu1 %4561 }
 0x96d   : > { %8656 = vmatpush3.xpose.msk.msra.mxu1 %vm1453_vm1, %v4570_v35 }
 0x96e   : > { %8657 = vmatprep.subr.msk.mxu1 %vm1453_vm1, %v4568_v25  ;;  %v4564_v62 = vpop.permute.xlu0 %4563 }
 0x970   : > { %v4558_v37 = vpop.permute.xlu1 %4557 }
 0x971   : > { %8658 = vmatpush3.xpose.msk.msra.mxu1 %vm1453_vm1, %v4568_v25  ;;  %v14670_v25 = vld [vmem:[#allocation119_spill] sm:$0xff] }
 0x972   : > { %8659 = vmatprep.subr.msk.mxu1 %vm1453_vm1, %v4566_v31  ;;  %v4560_v11 = vpop.permute.xlu0 %4559 }
 0x975   : > { %8660 = vmatpush3.xpose.msk.msra.mxu1 %vm1453_vm1, %v4566_v31 }
 0x976   : > { %8661 = vmatprep.subr.msk.mxu1 %vm1453_vm1, %v4564_v62 }
 0x977   : > { %2930 = vadd.xlane.f32.xlu0 %v11804_v6  ;;  %v4556_v6 = vpop.permute.xlu0 %4555 }
 0x979   : > { %8662 = vmatpush3.xpose.msk.msra.mxu1 %vm1453_vm1, %v4564_v62 }
 0x97a   : > { %8663 = vmatprep.subr.msk.mxu1 %vm1453_vm1, %v4562_v27 }
 0x97b   : > { %2934 = vadd.xlane.f32.xlu0 %v11826_v5 }
 0x97d   : > { %8664 = vmatpush3.xpose.msk.msra.mxu1 %vm1453_vm1, %v4562_v27 }
 0x97e   : > { %8665 = vmatprep.subr.msk.mxu1 %vm1453_vm1, %v4560_v11 }
 0x97f   : > { %2936 = vadd.xlane.f32.xlu0 %v11839_v46 }
 0x980   : > { %2932 = vadd.xlane.f32.xlu1 %v11815_v59 }
 0x981   : > { %8666 = vmatpush3.xpose.msk.msra.mxu1 %vm1453_vm1, %v4560_v11 }
 0x982   : > { %8667 = vmatprep.subr.msk.mxu1 %vm1453_vm1, %v4558_v37 }
 0x983   : > { %2940 = vadd.xlane.f32.xlu0 %v11855_v45 }
 0x984   : > { %2938 = vadd.xlane.f32.xlu1 %v11842_v44 }
 0x985   : > { %8668 = vmatpush3.xpose.msk.msra.mxu1 %vm1453_vm1, %v4558_v37  ;;  %v14673_v37 = vld [vmem:[#allocation121_spill] sm:$0xff] }
 0x986   : > { %8669 = vmatprep.subr.msk.mxu1 %vm1453_vm1, %v4556_v6 }
 0x987   : > { %2944 = vadd.xlane.f32.xlu0 %v11872_v4 }
 0x988   : > { %2942 = vadd.xlane.f32.xlu1 %v11863_v40 }
 0x989   : > { %8670 = vmatpush3.xpose.msk.msra.mxu1 %vm1453_vm1, %v4556_v6 }
 0x98b   : > { %v3850_v59 = vpop.permute.xlu1 %3849 }
 0x98c   : > { %2946 = vadd.xlane.f32.xlu1 %v11883_v28  ;;  %v3915_v5 = vsub.f32 %v12100_v63, %v3850_v59  ;;  %v14671_v63 = vld [vmem:[#allocation122_spill] sm:$0xff] }
 0x98d   : > { %v14672_v31 = vsub.f32 %v14670_v25, %v14671_v63 }
 0x98e   : > { %v3934_v33 = vmul.f32 1.442695, %v3915_v5 }
 0x98f   : > { %v3845_v46 = vpop.permute.xlu1 %3844  ;;  %v3860_v45 = vpop.permute.xlu0 %3859  ;;  %v2737_v62 = vmul.f32 1.442695, %v14672_v31 }
 0x990   : > { %v3914_v44 = vsub.f32 %v12102_v9, %v3845_v46  ;;  %v3917_v39 = vsub.f32 %v12104_v14, %v3860_v45  ;;  %v14674_v14 = vsub.f32 %v14673_v37, %v11590_v16  ;;  %v14676_v46 = vld [vmem:[#allocation125_spill] sm:$0xff] }
 0x992   : > { %v3932_v49 = vmul.f32 1.442695, %v3914_v44  ;;  %v3938_v4 = vmul.f32 1.442695, %v3917_v39  ;;  %v2739_v6 = vmul.f32 1.442695, %v14674_v14 }
 0x993   : > { %v3870_v43 = vpop.permute.xlu1 %3869  ;;  %v3855_v29 = vpop.permute.xlu0 %3854  ;;  %v14678_v39 = vld [vmem:[#allocation124_spill] sm:$0xff] }
 0x994   : > { %9206 = vpow2.f32 %v3932_v49  ;;  %v3916_v40 = vsub.f32 %v12106_v12, %v3855_v29  ;;  %v3919_v35 = vsub.f32 %v12108_v55, %v3870_v43  ;;  %v14675_v55 = vld [vmem:[#allocation123_spill] sm:$0xff] }
 0x995   : > { %9208 = vpow2.f32 %v3934_v33  ;;  %v14677_v45 = vsub.f32 %v14675_v55, %v14676_v46  ;;  %v14679_v43 = vld [vmem:[#allocation127_spill] sm:$0xff]  ;;  %v14690_v46 = vld [vmem:[#allocation132_spill] sm:$0xff] }
 0x996   : > { %v3936_v28 = vmul.f32 1.442695, %v3916_v40  ;;  %v3942_v12 = vmul.f32 1.442695, %v3919_v35  ;;  %v14681_v35 = vld [vmem:[#allocation126_spill] sm:$0xff] }
 0x997   : > { %v3865_v27 = vpop.permute.xlu1 %3864  ;;  %v3880_v9 = vpop.permute.xlu0 %3879  ;;  %v2741_v44 = vmul.f32 1.442695, %v14677_v45  ;;  %v14691_v45 = vld [vmem:[#allocation135_spill] sm:$0xff] }
 0x998   : > { %v3918_v11 = vsub.f32 %v12110_v18, %v3865_v27  ;;  %9210 = vpow2.f32 %v3936_v28  ;;  %v3921_v5 = vsub.f32 %v12112_v1, %v3880_v9  ;;  %v14680_v18 = vsub.f32 %v14678_v39, %v14679_v43  ;;  %v14682_v28 = vld [vmem:[#allocation129_spill] sm:$0xff]  ;;  %v14685_v9 = vld [vmem:[#allocation131_spill] sm:$0xff] }
 0x999   : > { %9212 = vpow2.f32 %v3938_v4  ;;  %v14683_v25 = vsub.f32 %v14681_v35, %v14682_v28 }
 0x99a   : > { %v3940_v59 = vmul.f32 1.442695, %v3918_v11  ;;  %9214 = vpow2.f32 %v2737_v62  ;;  %v2743_v29 = vmul.f32 1.442695, %v14680_v18  ;;  %v3946_v1 = vmul.f32 1.442695, %v3921_v5 }
 0x99b   : > { %v3890_v33 = vpop.permute.xlu1 %3889  ;;  %v3875_v49 = vpop.permute.xlu0 %3874  ;;  %v2745_v63 = vmul.f32 1.442695, %v14683_v25  ;;  %v14694_v18 = vld [vmem:[#allocation136_spill] sm:$0xff] }
 0x99c   : > { %9216 = vpow2.f32 %v3940_v59  ;;  %v3920_v16 = vsub.f32 %v12115_v34, %v3875_v49  ;;  %v3923_v40 = vsub.f32 %v12119_v54, %v3890_v33 }
 0x99d   : > { %9218 = vpow2.f32 %v2739_v6  ;;  %3207 = vperm.xlu0 %9090, %v12056_v57   ;;  %3212 = vperm.xlu1 %9091, %v12065_v38   ;;  %v14684_v57 = vld [vmem:[#allocation128_spill] sm:$0xff] }
 0x99e   : > { %9220 = vpow2.f32 %v3942_v12  ;;  %v3944_v4 = vmul.f32 1.442695, %v3920_v16  ;;  %v14686_v38 = vsub.f32 %v14684_v57, %v14685_v9  ;;  %v3950_v37 = vmul.f32 1.442695, %v3923_v40  ;;  %v14688_v12 = vld [vmem:[#allocation133_spill] sm:$0xff] }
 0x99f   : > { %9222 = vpow2.f32 %v2741_v44  ;;  %v3885_v31 = vpop.permute.xlu1 %3884  ;;  %v3900_v62 = vpop.permute.xlu0 %3899 }
 0x9a0   : > { %9224 = vpow2.f32 %v2743_v29  ;;  %v3922_v34 = vsub.f32 %v12123_v47, %v3885_v31  ;;  %v2747_v11 = vmul.f32 1.442695, %v14686_v38  ;;  %v3925_v6 = vsub.f32 %v12127_v17, %v3900_v62  ;;  %v14687_v47 = vld [vmem:[#allocation130_spill] sm:$0xff] }
 0x9a1   : > { %v12422_v27 = vpop.eup %9206  ;;  %9226 = vpow2.f32 %v3944_v4  ;;  %3222 = vperm.xlu0 %9090, %v12073_v19   ;;  %3217 = vperm.xlu1 %9091, %v12061_v24   ;;  %v14689_v59 = vsub.f32 %v14687_v47, %v14688_v12  ;;  %v14692_v17 = vsub.f32 %v14690_v46, %v14691_v45 }
 0x9a2   : > { %v12429_v54 = vpop.eup %9208  ;;  %9228 = vpow2.f32 %v3946_v1  ;;  %v3948_v14 = vmul.f32 1.442695, %v3922_v34  ;;  %8634 = vmatprep.mubr.f32.mxu1 %v12422_v27  ;;  %v3954_v49 = vmul.f32 1.442695, %v3925_v6 }
 0x9a3   : > { %9230 = vpow2.f32 %v2745_v63  ;;  %v2749_v5 = vmul.f32 1.442695, %v14689_v59  ;;  %v4554_v55 = vpop.permute.xlu1 %4553  ;;  %8635 = vmatmul.mubr.f32.gmra.mxu1 %v12429_v54  ;;  %v3895_v19 = vpop.permute.xlu0 %3894  ;;  %v2751_v44 = vmul.f32 1.442695, %v14692_v17 }
 0x9a4   : > { %9232 = vpow2.f32 %v3948_v14  ;;  %v3924_v24 = vsub.f32 %v12131_v21, %v3895_v19  ;;  %8671 = vmatprep.subr.msk.mxu1 %vm1453_vm1, %v4554_v55  ;;  %v14693_v21 = vld [vmem:[#allocation134_spill] sm:$0xff] }
 0x9a5   : > { %9234 = vpow2.f32 %v2747_v11  ;;  %3232 = vperm.xlu0 %9090, %v12090_v61   ;;  %3227 = vperm.xlu1 %9091, %v12069_v7   ;;  %v12444_v33 = vpop.eup %9210  ;;  %v14695_v29 = vsub.f32 %v14693_v21, %v14694_v18 }
 0x9a6   : > { %9236 = vpow2.f32 %v3950_v37  ;;  %v3952_v39 = vmul.f32 1.442695, %v3924_v24  ;;  %8672 = vmatpush3.xpose.msk.msra.mxu1 %vm1453_vm1, %v4554_v55  ;;  %v12447_v43 = vpop.eup %9212  ;;  %8637 = vmatprep.mubr.f32.mxu1 %v12444_v33 }
 0x9a7   : > { %9238 = vpow2.f32 %v2749_v5  ;;  %v2753_v16 = vmul.f32 1.442695, %v14695_v29  ;;  %v3905_v1 = vpop.permute.xlu1 %3904  ;;  %v4552_v61 = vpop.permute.xlu0 %4551  ;;  %8638 = vmatmul.mubr.f32.gmra.mxu1 %v12447_v43 }
 0x9a8   : > { %v12453_v40 = vpop.eup %9214  ;;  %9240 = vpow2.f32 %v3952_v39  ;;  %v3926_v7 = vsub.f32 %v12138_v60, %v3905_v1  ;;  %8673 = vmatprep.subr.msk.mxu1 %vm1453_vm1, %v4552_v61 }
 0x9a9   : > { %v12458_v4 = vpop.eup %9216  ;;  %9242 = vpow2.f32 %v2751_v44  ;;  %3242 = vperm.xlu0 %9090, %v12453_v40   ;;  %3237 = vperm.xlu1 %9091, %v12080_v36  }
 0x9aa   : > { %v12462_v35 = vpop.eup %9218  ;;  %9244 = vpow2.f32 %v3954_v49  ;;  %v3956_v28 = vmul.f32 1.442695, %v3926_v7  ;;  %8674 = vmatpush3.xpose.msk.msra.mxu1 %vm1453_vm1, %v4552_v61  ;;  %8640 = vmatprep.mubr.f32.mxu1 %v12458_v4  ;;  %v14701_v61 = vld [vmem:[#allocation77_spill] sm:$0xff] }
 0x9ab   : > { %v12466_v60 = vpop.eup %9220  ;;  %9246 = vpow2.f32 %v2753_v16  ;;  %v3910_v25 = vpop.permute.xlu1 %3909 }
 0x9ac   : > { %v4550_v63 = vpop.permute.xlu0 %4549  ;;  %v12468_v31 = vpop.eup %9222  ;;  %9248 = vpow2.f32 %v3956_v28  ;;  %v3927_v62 = vsub.f32 %v12134_v58, %v3910_v25  ;;  %8641 = vmatmul.mubr.f32.gmra.mxu1 %v12466_v60  ;;  %v14702_v28 = vld [vmem:[#allocation74_spill] sm:$0xff]  ;;  %v14703_v25 = vld [vmem:[#allocation79_spill] sm:$0xff] }
 0x9ad   : > { %8675 = vmatprep.subr.msk.mxu1 %vm1453_vm1, %v4550_v63  ;;  %v12473_v36 = vpop.eup %9224  ;;  %3252 = vperm.xlu0 %9090, %v12468_v31  }
 0x9ae   : > { %3247 = vperm.xlu1 %9091, %v12462_v35   ;;  %v12477_v34 = vpop.eup %9226  ;;  %v3958_v57 = vmul.f32 1.442695, %v3927_v62  ;;  %8676 = vmatpush3.xpose.msk.msra.mxu1 %vm1453_vm1, %v4550_v63 }
 0x9af   : > { %v12480_v9 = vpop.eup %9228  ;;  %8643 = vmatprep.mubr.f32.mxu1 %v12477_v34  ;;  %v4548_v58 = vpop.permute.xlu1 %4547 }
 0x9b0   : > { %v4546_v38 = vpop.permute.xlu0 %4545  ;;  %v12483_v11 = vpop.eup %9230  ;;  %9250 = vpow2.f32 %v3958_v57  ;;  %8644 = vmatmul.mubr.f32.gmra.mxu1 %v12480_v9  ;;  %8677 = vmatprep.subr.msk.mxu1 %vm1453_vm1, %v4548_v58  ;;  %v14704_v57 = vld [vmem:[#allocation71_spill] sm:$0xff] }
 0x9b1   : > { %v12487_v37 = vpop.eup %9232  ;;  %3262 = vperm.xlu0 %9090, %v12483_v11  }
 0x9b2   : > { %3257 = vperm.xlu1 %9091, %v12473_v36   ;;  %v12491_v14 = vpop.eup %9234  ;;  %8678 = vmatpush3.xpose.msk.msra.mxu1 %vm1453_vm1, %v4548_v58 }
 0x9b3   : > { %8646 = vmatprep.mubr.f32.mxu1 %v12487_v37  ;;  %v12495_v6 = vpop.eup %9236  ;;  %8679 = vmatprep.subr.msk.mxu1 %vm1453_vm1, %v4546_v38  ;;  %v4544_v47 = vpop.permute.xlu1 %4543 }
 0x9b4   : > { %v4542_v12 = vpop.permute.xlu0 %4541  ;;  %v12498_v59 = vpop.eup %9238  ;;  %8647 = vmatmul.mubr.f32.gmra.mxu1 %v12495_v6 }
 0x9b5   : > { %v12501_v5 = vpop.eup %9240  ;;  %3272 = vperm.xlu0 %9090, %v12498_v59  }
 0x9b6   : > { %3267 = vperm.xlu1 %9091, %v12491_v14   ;;  %v12505_v55 = vpop.eup %9242  ;;  %8680 = vmatpush3.xpose.msk.msra.mxu1 %vm1453_vm1, %v4546_v38  ;;  %v14705_v38 = vld [vmem:[#allocation69_spill] sm:$0xff] }
 0x9b7   : > { %8649 = vmatprep.mubr.f32.mxu1 %v12501_v5  ;;  %v12509_v19 = vpop.eup %9244  ;;  %8681 = vmatprep.subr.msk.mxu1 %vm1453_vm1, %v4544_v47  ;;  %v4540_v24 = vpop.permute.xlu1 %4539 }
 0x9b8   : > { %v4508_v46 = vpop.permute.xlu0 %4507  ;;  %v12512_v45 = vpop.eup %9246  ;;  %8650 = vmatmul.mubr.f32.gmra.mxu1 %v12509_v19 }
 0x9b9   : > { %v12515_v17 = vpop.eup %9248  ;;  %3282 = vperm.xlu0 %9090, %v12512_v45  }
 0x9ba   : > { %3277 = vperm.xlu1 %9091, %v12505_v55   ;;  %8682 = vmatpush3.xpose.msk.msra.mxu1 %vm1453_vm1, %v4544_v47  ;;  %v14706_v47 = vld [vmem:[#allocation72_spill] sm:$0xff] }
 0x9bb   : > { %8652 = vmatprep.mubr.f32.mxu1 %v12515_v17  ;;  %8683 = vmatprep.subr.msk.mxu1 %vm1453_vm1, %v4542_v12  ;;  %v4510_v44 = vpop.permute.xlu1 %4509 }
 0x9bc   : > { %v4512_v49 = vpop.permute.xlu0 %4511 }
 0x9bd   : > { %v12522_v39 = vpop.eup %9250  ;;  %3319 = vrot.lane.b32.xlu0 %v12009_v10, %s9954_s29 }
 0x9be   : > { %3317 = vrot.lane.b32.xlu1 %v12011_v30, %s9954_s29  ;;  %8684 = vmatpush3.xpose.msk.msra.mxu1 %vm1453_vm1, %v4542_v12  ;;  %v14707_v12 = vld [vmem:[#allocation70_spill] sm:$0xff] }
 0x9bf   : > { %8653 = vmatmul.mubr.f32.gmra.mxu1 %v12522_v39  ;;  %8685 = vmatprep.subr.msk.mxu1 %vm1453_vm1, %v4540_v24  ;;  %v4514_v21 = vpop.permute.xlu1 %4513 }
 0x9c0   : > { %v4516_v18 = vpop.permute.xlu0 %4515  ;;  %8687 = vmatprep.mubr.msk.f32.mxu1 %vm1453_vm1, %v4508_v46  ;;  %v14709_v46 = vld [vmem:[#allocation68_spill] sm:$0xff] }
 0x9c1   : > { %3323 = vrot.lane.b32.xlu0 %v12013_v20, %s9954_s29 }
 0x9c2   : > { %3321 = vrot.lane.b32.xlu1 %v12015_v53, %s9954_s29  ;;  %8686 = vmatpush3.xpose.msk.msra.mxu1 %vm1453_vm1, %v4540_v24  ;;  %v14696_v53 = vsub.f32 %v12144_v42, %v12154_v48  ;;  %v14699_v48 = vld [vmem:[#allocation73_spill] sm:$0xff]  ;;  %v14708_v24 = vld [vmem:[#allocation67_spill] sm:$0xff] }
 0x9c3   : > { %v4518_v10 = vpop.permute.xlu1 %4517 }
 0x9c4   : > { %v4520_v30 = vpop.permute.xlu0 %4519 }
 0x9c5   : > { %8688 = vmatmul.mubr.msk.f32.vlgmr.msra.gmra.mxu1 %vm1453_vm1, %v4510_v44  ;;  %3327 = vrot.lane.b32.xlu0 %v12017_v51, %s9954_s29  ;;  %v3800_v51 = vmul.f32 1.442695, %v14696_v53  ;;  %v14710_v44 = vld [vmem:[#allocation65_spill] sm:$0xff] }
 0x9c6   : > { %3325 = vrot.lane.b32.xlu1 %v12022_v8, %s9954_s29  ;;  %8690 = vmatprep.mubr.msk.f32.mxu1 %vm1453_vm1, %v4512_v49  ;;  %v14697_v8 = vld [vmem:[#allocation76_spill] sm:$0xff]  ;;  %v14711_v49 = vld [vmem:[#allocation66_spill] sm:$0xff] }
 0x9c7   : > { %v4522_v29 = vpop.permute.xlu1 %4521  ;;  %9252 = vpow2.f32 %v3800_v51  ;;  %v2894_v51 = vld [vmem:[#allocation4 + $0xd0] sm:$0xff] }
 0x9c8   : > { %v4524_v20 = vpop.permute.xlu0 %4523 }
 0x9c9   : > { %8691 = vmatmul.mubr.msk.f32.gmra.mxu1 %vm1453_vm1, %v4514_v21  ;;  %3331 = vrot.lane.b32.xlu0 %v12024_v2, %s9954_s29  ;;  %v2891_v21 = vld [vmem:[#allocation4 + $0xb8] sm:$0xff] }
 0x9ca   : > { %3329 = vrot.lane.b32.xlu1 %v12029_v3, %s9954_s29  ;;  %8693 = vmatprep.mubr.msk.f32.mxu1 %vm1453_vm1, %v4516_v18  ;;  %v14698_v3 = vld [vmem:[#allocation78_spill] sm:$0xff]  ;;  %v2907_v18 = vmul.f32 %v12453_v40, %v2891_v21 }
 0x9cb   : > { %v4526_v16 = vpop.permute.xlu1 %4525 }
 0x9cc   : > { %v4528_v2 = vpop.permute.xlu0 %4527 }
 0x9cd   : > { %8694 = vmatmul.mubr.msk.f32.gmra.mxu1 %vm1453_vm1, %v4518_v10  ;;  %3335 = vrot.lane.b32.xlu0 %v12034_v26, %s9954_s29  ;;  %v14700_v26 = vld [vmem:[#allocation75_spill] sm:$0xff] }
 0x9ce   : > { %3333 = vrot.lane.b32.xlu1 %v14697_v8, %s9954_s29  ;;  %8696 = vmatprep.mubr.msk.f32.mxu1 %vm1453_vm1, %v4520_v30  ;;  %v2893_v30 = vld [vmem:[#allocation4 + $0xc8] sm:$0xff]  ;;  %v2892_v8 = vld [vmem:[#allocation4 + $0xc0] sm:$0xff] }
 0x9cf   : > { %v4530_v42 = vpop.permute.xlu1 %4529  ;;  %v2908_v40 = vmul.f32 %v12462_v35, %v2892_v8  ;;  %v2897_v35 = vld [vmem:[#allocation4 + $0xe8] sm:$0xff]  ;;  %v3191_v8 = vld [vmem:[#allocation5 + $0x10] sm:$0xff] }
 0x9d0   : > { %v4532_v1 = vpop.permute.xlu0 %4531 }
 0x9d1   : > { %8697 = vmatmul.mubr.msk.f32.gmra.mxu1 %vm1453_vm1, %v4522_v29  ;;  %3339 = vrot.lane.b32.xlu0 %v14698_v3, %s9954_s29  ;;  %v2896_v3 = vld [vmem:[#allocation4 + $0xe0] sm:$0xff] }
 0x9d2   : > { %3337 = vrot.lane.b32.xlu1 %v14699_v48, %s9954_s29  ;;  %8699 = vmatprep.mubr.msk.f32.mxu1 %vm1453_vm1, %v4524_v20  ;;  %v2909_v20 = vmul.f32 %v12468_v31, %v2893_v30 }
 0x9d3   : > { %v4534_v7 = vpop.permute.xlu1 %4533 }
 0x9d4   : > { %v4536_v63 = vpop.permute.xlu0 %4535  ;;  %v12576_v62 = vpop.eup %9252 }
 0x9d5   : > { %8700 = vmatmul.mubr.msk.f32.gmra.mxu1 %vm1453_vm1, %v4526_v16  ;;  %3343 = vrot.lane.b32.xlu0 %v14700_v26, %s9954_s29  ;;  %v2895_v26 = vld [vmem:[#allocation4 + $0xd8] sm:$0xff] }
 0x9d6   : > { %3341 = vrot.lane.b32.xlu1 %v14701_v61, %s9954_s29  ;;  %8702 = vmatprep.mubr.msk.f32.mxu1 %vm1453_vm1, %v4528_v2  ;;  %v2910_v2 = vmul.f32 %v12473_v36, %v2894_v51  ;;  %v2911_v36 = vmul.f32 %v12483_v11, %v2895_v26 }
 0x9d7   : > { %v4538_v58 = vpop.permute.xlu1 %4537 }
 0x9d9   : > { %8703 = vmatmul.mubr.msk.f32.gmra.mxu1 %vm1453_vm1, %v4530_v42  ;;  %3347 = vrot.lane.b32.xlu0 %v14702_v28, %s9954_s29 }
 0x9da   : > { %3345 = vrot.lane.b32.xlu1 %v14703_v25, %s9954_s29  ;;  %8705 = vmatprep.mubr.msk.f32.mxu1 %vm1453_vm1, %v4532_v1 }
 0x9dd   : > { %8706 = vmatmul.mubr.msk.f32.gmra.mxu1 %vm1453_vm1, %v4534_v7  ;;  %4268 = vperm.xlu0 %9090, %v12576_v62  }
 0x9de   : > { %5148 = vrot.lane.b32.xlu1 %v14704_v57, %s9954_s29  ;;  %8708 = vmatprep.mubr.msk.f32.mxu1 %vm1453_vm1, %v4536_v63  ;;  %v2913_v63 = vmul.f32 %v12498_v59, %v2897_v35 }
 0x9e1   : > { %8709 = vmatmul.mubr.msk.f32.gmra.mxu1 %vm1453_vm1, %v4538_v58  ;;  %5144 = vrot.lane.b32.xlu0 %v14705_v38, %s9954_s29  ;;  %v2899_v58 = vld [vmem:[#allocation4 + $0xf8] sm:$0xff] }
 0x9e2   : > { %5146 = vrot.lane.b32.xlu1 %v14706_v47, %s9954_s29  ;;  %v2915_v38 = vmul.f32 %v12512_v45, %v2899_v58  ;;  %v3197_v58 = vld [vmem:[#allocation5 + $0x40] sm:$0xff] }
 0x9e6   : > { %5142 = vrot.lane.b32.xlu1 %v14707_v12, %s9954_s29 }
 0x9ea   : > { %5140 = vrot.lane.b32.xlu1 %v14708_v24, %s9954_s29 }
 0x9ee   : > { %5138 = vrot.lane.b32.xlu1 %v14709_v46, %s9954_s29 }
 0x9f2   : > { %5136 = vrot.lane.b32.xlu1 %v14710_v44, %s9954_s29 }
 0x9f6   : > { %5134 = vrot.lane.b32.xlu1 %v14711_v49, %s9954_s29 }
 0xa00   : > { %3995 = vadd.xlane.f32.xlu0 %v12367_v13  ;;  %v2931_v10 = vpop.xlane.xlu0 %2930 }
 0xa01   : > { %v2955_v29 = vadd.f32 %v2931_v10, %v2907_v18  ;;  %v3190_v10 = vld [vmem:[#allocation5 + $0x8] sm:$0xff] }
 0xa03   : > { %2971 = vst.msk [vmem:[#allocation4 + $0xb8] sm:$0xff] %vm2015_vm2, %v2955_v29 }
 0xa04   : > { %3997 = vadd.xlane.f32.xlu0 %v12422_v27  ;;  %v2935_v53 = vpop.xlane.xlu0 %2934  ;;  %v2912_v27 = vmul.f32 %v12491_v14, %v2896_v3 }
 0xa05   : > { %v2957_v16 = vadd.f32 %v2935_v53, %v2909_v20  ;;  %v3192_v53 = vld [vmem:[#allocation5 + $0x18] sm:$0xff] }
 0xa07   : > { %2973 = vst.msk [vmem:[#allocation4 + $0xc8] sm:$0xff] %vm2015_vm2, %v2957_v16 }
 0xa08   : > { %4001 = vadd.xlane.f32.xlu0 %v12444_v33  ;;  %v2937_v13 = vpop.xlane.xlu0 %2936  ;;  %v2898_v33 = vld [vmem:[#allocation4 + $0xf0] sm:$0xff] }
 0xa09   : > { %v2958_v48 = vadd.f32 %v2937_v13, %v2910_v2  ;;  %v2933_v42 = vpop.xlane.xlu1 %2932  ;;  %v2914_v25 = vmul.f32 %v12505_v55, %v2898_v33 }
 0xa0a   : > { %v2956_v31 = vadd.f32 %v2933_v42, %v2908_v40  ;;  %v3193_v42 = vld [vmem:[#allocation5 + $0x20] sm:$0xff] }
 0xa0b   : > { %2974 = vst.msk [vmem:[#allocation4 + $0xd0] sm:$0xff] %vm2015_vm2, %v2958_v48 }
 0xa0c   : > { %2972 = vst.msk [vmem:[#allocation4 + $0xc0] sm:$0xff] %vm2015_vm2, %v2956_v31  ;;  %4005 = vadd.xlane.f32.xlu0 %v12458_v4  ;;  %v2941_v1 = vpop.xlane.xlu0 %2940 }
 0xa0d   : > { %v2960_v61 = vadd.f32 %v2941_v1, %v2912_v27  ;;  %v2939_v7 = vpop.xlane.xlu1 %2938 }
 0xa0e   : > { %v2959_v28 = vadd.f32 %v2939_v7, %v2911_v36  ;;  %v3196_v36 = vld [vmem:[#allocation5 + $0x38] sm:$0xff]  ;;  %v3195_v7 = vld [vmem:[#allocation5 + $0x30] sm:$0xff] }
 0xa0f   : > { %2976 = vst.msk [vmem:[#allocation4 + $0xe0] sm:$0xff] %vm2015_vm2, %v2960_v61 }
 0xa10   : > { %2975 = vst.msk [vmem:[#allocation4 + $0xd8] sm:$0xff] %vm2015_vm2, %v2959_v28  ;;  %4009 = vadd.xlane.f32.xlu0 %v12477_v34  ;;  %v2945_v14 = vpop.xlane.xlu0 %2944 }
 0xa11   : > { %v2962_v4 = vadd.f32 %v2945_v14, %v2914_v25  ;;  %v2943_v57 = vpop.xlane.xlu1 %2942 }
 0xa12   : > { %v2961_v11 = vadd.f32 %v2943_v57, %v2913_v63  ;;  %v3198_v63 = vld [vmem:[#allocation5 + $0x48] sm:$0xff] }
 0xa13   : > { %2978 = vst.msk [vmem:[#allocation4 + $0xf0] sm:$0xff] %vm2015_vm2, %v2962_v4 }
 0xa14   : > { %2977 = vst.msk [vmem:[#allocation4 + $0xe8] sm:$0xff] %vm2015_vm2, %v2961_v11  ;;  %4013 = vadd.xlane.f32.xlu0 %v12487_v37 }
 0xa15   : > { %v2947_v55 = vpop.xlane.xlu1 %2946 }
 0xa16   : > { %v2963_v47 = vadd.f32 %v2947_v55, %v2915_v38 }
 0xa18   : > { %2979 = vst.msk [vmem:[#allocation4 + $0xf8] sm:$0xff] %vm2015_vm2, %v2963_v47  ;;  %4017 = vadd.xlane.f32.xlu0 %v12501_v5  ;;  %v3208_v34 = vpop.permute.xlu0 %3207 }
 0xa19   : > { %v3213_v59 = vpop.permute.xlu1 %3212 }
 0xa1a   : > { %3993 = vadd.xlane.f32.xlu1 %v12365_v41  ;;  %v3286_v30 = vmul.f32 %v3213_v59, %v3190_v10 }
 0xa1c   : > { %4021 = vadd.xlane.f32.xlu0 %v12515_v17  ;;  %v3223_v12 = vpop.permute.xlu0 %3222 }
 0xa1d   : > { %v3218_v24 = vpop.permute.xlu1 %3217  ;;  %v3288_v16 = vmul.f32 %v3223_v12, %v3192_v53  ;;  %v3203_v53 = vld [vmem:[#allocation5 + $0x70] sm:$0xff] }
 0xa1e   : > { %3999 = vadd.xlane.f32.xlu1 %v12429_v54 }
 0xa20   : > { %v3233_v46 = vpop.permute.xlu0 %3232 }
 0xa21   : > { %v3228_v37 = vpop.permute.xlu1 %3227 }
 0xa22   : > { %4003 = vadd.xlane.f32.xlu1 %v12447_v43  ;;  %v3289_v26 = vmul.f32 %v3228_v37, %v3193_v42 }
 0xa24   : > { %v3243_v45 = vpop.permute.xlu0 %3242 }
 0xa25   : > { %v3238_v44 = vpop.permute.xlu1 %3237  ;;  %v3292_v61 = vmul.f32 %v3243_v45, %v3196_v36 }
 0xa26   : > { %4007 = vadd.xlane.f32.xlu1 %v12466_v60  ;;  %v3189_v60 = vld [vmem:[#allocation5] sm:$0xff]  ;;  %v3291_v35 = vmul.f32 %v3238_v44, %v3195_v7 }
 0xa28   : > { %v3253_v49 = vpop.permute.xlu0 %3252 }
 0xa29   : > { %v3248_v5 = vpop.permute.xlu1 %3247  ;;  %v3294_v57 = vmul.f32 %v3253_v49, %v3198_v63  ;;  %v3202_v49 = vld [vmem:[#allocation5 + $0x68] sm:$0xff] }
 0xa2a   : > { %4011 = vadd.xlane.f32.xlu1 %v12480_v9  ;;  %v3285_v9 = vmul.f32 %v3208_v34, %v3189_v60  ;;  %v3293_v11 = vmul.f32 %v3248_v5, %v3197_v58  ;;  %v3200_v34 = vld [vmem:[#allocation5 + $0x58] sm:$0xff]  ;;  %v3201_v60 = vld [vmem:[#allocation5 + $0x60] sm:$0xff]  ;;  %v14716_v58 = vld [vmem:[#allocation82_spill] sm:$0xff] }
 0xa2c   : > { %v3263_v21 = vpop.permute.xlu0 %3262 }
 0xa2d   : > { %v3258_v41 = vpop.permute.xlu1 %3257  ;;  %v3296_v12 = vmul.f32 %v3263_v21, %v3200_v34  ;;  %v14719_v34 = vld [vmem:[#allocation87_spill] sm:$0xff] }
 0xa2e   : > { %4015 = vadd.xlane.f32.xlu1 %v12495_v6 }
 0xa30   : > { %v12630_v17 = vpop.permute.xlu0 %3272 }
 0xa31   : > { %v12632_v18 = vpop.permute.xlu1 %3267  ;;  %v3298_v5 = vmul.f32 %v12630_v17, %v3202_v49 }
 0xa32   : > { %4019 = vadd.xlane.f32.xlu1 %v12509_v19  ;;  %v3287_v19 = vmul.f32 %v3218_v24, %v3191_v8  ;;  %v3199_v24 = vld [vmem:[#allocation5 + $0x50] sm:$0xff] }
 0xa34   : > { %v12635_v54 = vpop.permute.xlu0 %3282 }
 0xa35   : > { %v12637_v43 = vpop.permute.xlu1 %3277 }
 0xa36   : > { %4023 = vadd.xlane.f32.xlu1 %v12522_v39  ;;  %v3194_v39 = vld [vmem:[#allocation5 + $0x28] sm:$0xff] }
 0xa37   : > { %v3290_v48 = vmul.f32 %v3233_v46, %v3194_v39  ;;  %v3295_v46 = vmul.f32 %v3258_v41, %v3199_v24  ;;  %v3204_v41 = vld [vmem:[#allocation5 + $0x78] sm:$0xff] }
 0xa38   : > { %v3320_v29 = vpop.permute.xlu0 %3319 }
 0xa39   : > { %v3366_v20 = vadd.f32 %v3320_v29, %v3286_v30  ;;  %v3318_v6 = vpop.permute.xlu1 %3317  ;;  %v3297_v30 = vmul.f32 %v12632_v18, %v3201_v60  ;;  %v14725_v60 = vld [vmem:[#allocation56_spill] sm:$0xff] }
 0xa3a   : > { %v3365_v51 = vadd.f32 %v3318_v6, %v3285_v9  ;;  %v3300_v6 = vmul.f32 %v12635_v54, %v3204_v41  ;;  %v12662_v54 = vpop.f32.mrf.mxu1  ;;  %v3962_v41 = vld [vmem:[#allocation4 + $0x108] sm:$0xff] }
 0xa3b   : > { %3383 = vst.msk [vmem:[#allocation5 + $0x8] sm:$0xff] %vm3381_vm3, %v3366_v20 }
 0xa3c   : > { %3382 = vst.msk [vmem:[#allocation5] sm:$0xff] %vm3381_vm3, %v3365_v51  ;;  %v3324_v2 = vpop.permute.xlu0 %3323  ;;  %v3299_v51 = vmul.f32 %v12637_v43, %v3203_v53  ;;  %v14730_v53 = vld [vmem:[#allocation96_spill] sm:$0xff] }
 0xa3d   : > { %v3368_v13 = vadd.f32 %v3324_v2, %v3288_v16  ;;  %v3322_v40 = vpop.permute.xlu1 %3321 }
 0xa3e   : > { %v3367_v3 = vadd.f32 %v3322_v40, %v3287_v19  ;;  %v12664_v40 = vpop.f32.mrf.mxu1 }
 0xa3f   : > { %3385 = vst.msk [vmem:[#allocation5 + $0x18] sm:$0xff] %vm3381_vm3, %v3368_v13 }
 0xa40   : > { %3384 = vst.msk [vmem:[#allocation5 + $0x10] sm:$0xff] %vm3381_vm3, %v3367_v3  ;;  %v3328_v31 = vpop.permute.xlu0 %3327 }
 0xa41   : > { %v3370_v27 = vadd.f32 %v3328_v31, %v3290_v48  ;;  %v3326_v1 = vpop.permute.xlu1 %3325 }
 0xa42   : > { %v3369_v33 = vadd.f32 %v3326_v1, %v3289_v26 }
 0xa43   : > { %3387 = vst.msk [vmem:[#allocation5 + $0x28] sm:$0xff] %vm3381_vm3, %v3370_v27 }
 0xa44   : > { %3386 = vst.msk [vmem:[#allocation5 + $0x20] sm:$0xff] %vm3381_vm3, %v3369_v33  ;;  %v3332_v28 = vpop.permute.xlu0 %3331 }
 0xa45   : > { %v3372_v25 = vadd.f32 %v3332_v28, %v3292_v61  ;;  %v3330_v14 = vpop.permute.xlu1 %3329  ;;  %v14713_v28 = vld [vmem:[#allocation80_spill] sm:$0xff] }
 0xa46   : > { %v3371_v4 = vadd.f32 %v3330_v14, %v3291_v35 }
 0xa47   : > { %3389 = vst.msk [vmem:[#allocation5 + $0x38] sm:$0xff] %vm3381_vm3, %v3372_v25  ;;  %v14714_v25 = vld [vmem:[#allocation81_spill] sm:$0xff] }
 0xa48   : > { %3388 = vst.msk [vmem:[#allocation5 + $0x30] sm:$0xff] %vm3381_vm3, %v3371_v4  ;;  %v3336_v38 = vpop.permute.xlu0 %3335  ;;  %v14715_v14 = vsub.f32 %v14713_v28, %v14714_v25  ;;  %v3965_v25 = vld [vmem:[#allocation4 + $0x120] sm:$0xff] }
 0xa49   : > { %v3374_v55 = vadd.f32 %v3336_v38, %v3294_v57  ;;  %v3334_v47 = vpop.permute.xlu1 %3333 }
 0xa4a   : > { %v3373_v59 = vadd.f32 %v3334_v47, %v3293_v11  ;;  %v3802_v63 = vmul.f32 1.442695, %v14715_v14  ;;  %v14717_v11 = vld [vmem:[#allocation86_spill] sm:$0xff] }
 0xa4b   : > { %3391 = vst.msk [vmem:[#allocation5 + $0x48] sm:$0xff] %vm3381_vm3, %v3374_v55  ;;  %v14718_v38 = vsub.f32 %v14716_v58, %v14717_v11 }
 0xa4c   : > { %3390 = vst.msk [vmem:[#allocation5 + $0x40] sm:$0xff] %vm3381_vm3, %v3373_v59  ;;  %v3340_v37 = vpop.permute.xlu0 %3339  ;;  %9254 = vpow2.f32 %v3802_v63  ;;  %v14720_v59 = vld [vmem:[#allocation89_spill] sm:$0xff] }
 0xa4d   : > { %v3376_v45 = vadd.f32 %v3340_v37, %v3296_v12  ;;  %v3338_v44 = vpop.permute.xlu1 %3337  ;;  %v3804_v55 = vmul.f32 1.442695, %v14718_v38  ;;  %v14721_v12 = vsub.f32 %v14719_v34, %v14720_v59  ;;  %v3967_v34 = vld [vmem:[#allocation4 + $0x130] sm:$0xff] }
 0xa4e   : > { %v3375_v10 = vadd.f32 %v3338_v44, %v3295_v46  ;;  %v14723_v44 = vld [vmem:[#allocation53_spill] sm:$0xff]  ;;  %v14739_v59 = vld [vmem:[#allocation83_spill] sm:$0xff] }
 0xa4f   : > { %3393 = vst.msk [vmem:[#allocation5 + $0x58] sm:$0xff] %vm3381_vm3, %v3376_v45  ;;  %9256 = vpow2.f32 %v3804_v55  ;;  %v3808_v24 = vmul.f32 1.442695, %v14721_v12  ;;  %v14722_v45 = vld [vmem:[#allocation91_spill] sm:$0xff]  ;;  %v14740_v12 = vld [vmem:[#allocation85_spill] sm:$0xff] }
 0xa50   : > { %3392 = vst.msk [vmem:[#allocation5 + $0x50] sm:$0xff] %vm3381_vm3, %v3375_v10  ;;  %v3344_v21 = vpop.permute.xlu0 %3343  ;;  %v14724_v49 = vsub.f32 %v14722_v45, %v14723_v44 }
 0xa51   : > { %v3378_v9 = vadd.f32 %v3344_v21, %v3298_v5  ;;  %v3342_v29 = vpop.permute.xlu1 %3341  ;;  %9258 = vpow2.f32 %v3808_v24  ;;  %v14741_v24 = vsub.f32 %v14739_v59, %v14740_v12  ;;  %v3973_v59 = vld [vmem:[#allocation4 + $0x160] sm:$0xff] }
 0xa52   : > { %v3377_v20 = vadd.f32 %v3342_v29, %v3297_v30  ;;  %v3812_v10 = vmul.f32 1.442695, %v14724_v49  ;;  %v14726_v30 = vsub.f32 %v14725_v60, %v12263_v15  ;;  %v14754_v12 = vld [vmem:[#allocation93_spill] sm:$0xff] }
 0xa53   : > { %3395 = vst.msk [vmem:[#allocation5 + $0x68] sm:$0xff] %vm3381_vm3, %v3378_v9  ;;  %v3806_v45 = vmul.f32 1.442695, %v14741_v24  ;;  %v14755_v24 = vld [vmem:[#allocation55_spill] sm:$0xff] }
 0xa54   : > { %3394 = vst.msk [vmem:[#allocation5 + $0x60] sm:$0xff] %vm3381_vm3, %v3377_v20  ;;  %v3348_v17 = vpop.permute.xlu0 %3347  ;;  %9260 = vpow2.f32 %v3812_v10  ;;  %v3816_v21 = vmul.f32 1.442695, %v14726_v30  ;;  %v3969_v30 = vld [vmem:[#allocation4 + $0x140] sm:$0xff] }
 0xa55   : > { %v3380_v16 = vadd.f32 %v3348_v17, %v3300_v6  ;;  %v3346_v8 = vpop.permute.xlu1 %3345  ;;  %v14729_v6 = vld [vmem:[#allocation95_spill] sm:$0xff] }
 0xa56   : > { %v3379_v18 = vadd.f32 %v3346_v8, %v3299_v51  ;;  %9262 = vpow2.f32 %v3816_v21  ;;  %v14731_v51 = vsub.f32 %v14729_v6, %v14730_v53  ;;  %v14744_v21 = vld [vmem:[#allocation84_spill] sm:$0xff] }
 0xa57   : > { %3397 = vst.msk [vmem:[#allocation5 + $0x78] sm:$0xff] %vm3381_vm3, %v3380_v16 }
 0xa58   : > { %3396 = vst.msk [vmem:[#allocation5 + $0x70] sm:$0xff] %vm3381_vm3, %v3379_v18  ;;  %v12660_v19 = vpop.permute.xlu0 %4268  ;;  %v3820_v17 = vmul.f32 1.442695, %v14731_v51 }
 0xa59   : > { %14712 = vst [vmem:[#allocation99_spill] sm:$0xff] %v12660_v19  ;;  %v5149_v2 = vpop.permute.xlu1 %5148  ;;  %v12709_v9 = vpop.eup %9254  ;;  %v12929_v19 = vld [vmem:[#allocation3 + $0x1c8] sm:$0xff] }
 0xa5a   : > { %8711 = vmatprep.subr.mxu0 %v5149_v2  ;;  %v3978_v16 = vmul.f32 %v12709_v9, %v3962_v41  ;;  %9264 = vpow2.f32 %v3820_v17  ;;  %v14745_v41 = vld [vmem:[#allocation88_spill] sm:$0xff]  ;;  %14774 = vst [vmem:[#allocation114_spill] sm:$0xff] %v12929_v19 }
 0xa5b   : > { %8712 = vmatpush3.msra.mxu0 %v5149_v2  ;;  %v3963_v2 = vld [vmem:[#allocation4 + $0x110] sm:$0xff]  ;;  %v14746_v6 = vsub.f32 %v14744_v21, %v14745_v41 }
 0xa5c   : > { %v5145_v43 = vpop.permute.xlu0 %5144  ;;  %v12721_v15 = vpop.eup %9256 }
 0xa5d   : > { %v5147_v13 = vpop.permute.xlu1 %5146  ;;  %v3810_v53 = vmul.f32 1.442695, %v14746_v6 }
 0xa5e   : > { %8713 = vmatprep.subr.mxu0 %v5147_v13 }
 0xa5f   : > { %8714 = vmatpush3.msra.mxu0 %v5147_v13 }
 0xa60   : > { %8715 = vmatprep.subr.mxu0 %v5145_v43 }
 0xa61   : > { %v5143_v39 = vpop.permute.xlu1 %5142  ;;  %8716 = vmatpush3.msra.mxu0 %v5145_v43 }
 0xa62   : > { %8717 = vmatprep.subr.mxu0 %v5143_v39 }
 0xa63   : > { %v12666_v3 = vpop.f32.mrf.mxu1  ;;  %8718 = vmatpush3.msra.mxu0 %v5143_v39  ;;  %v14734_v39 = vsub.f32 %v12287_v56, %v12303_v22  ;;  %v14737_v56 = vsub.f32 %v12307_v23, %v12317_v32 }
 0xa65   : > { %v5141_v48 = vpop.permute.xlu1 %5140  ;;  %v12668_v42 = vpop.f32.mrf.mxu1  ;;  %v3828_v22 = vmul.f32 1.442695, %v14737_v56 }
 0xa66   : > { %8719 = vmatprep.subr.mxu0 %v5141_v48 }
 0xa67   : > { %8720 = vmatpush3.msra.mxu0 %v5141_v48  ;;  %v12670_v26 = vpop.f32.mrf.mxu1  ;;  %v3824_v48 = vmul.f32 1.442695, %v14734_v39  ;;  %v3971_v39 = vld [vmem:[#allocation4 + $0x150] sm:$0xff] }
 0xa69   : > { %v5139_v31 = vpop.permute.xlu1 %5138  ;;  %v12672_v27 = vpop.f32.mrf.mxu1  ;;  %9266 = vpow2.f32 %v3824_v48  ;;  %v14749_v48 = vld [vmem:[#allocation90_spill] sm:$0xff] }
 0xa6a   : > { %8721 = vmatprep.subr.mxu0 %v5139_v31  ;;  %9268 = vpow2.f32 %v3828_v22 }
 0xa6b   : > { %8722 = vmatpush3.msra.mxu0 %v5139_v31  ;;  %v3979_v31 = vmul.f32 %v12721_v15, %v3963_v2  ;;  %9270 = vpow2.f32 %v3806_v45  ;;  %v14756_v45 = vsub.f32 %v14754_v12, %v14755_v24 }
 0xa6c   : > { %v12674_v1 = vpop.f32.mrf.mxu1  ;;  %9272 = vpow2.f32 %v3810_v53 }
 0xa6d   : > { %v5137_v36 = vpop.permute.xlu1 %5136 }
 0xa6e   : > { %v12676_v33 = vpop.f32.mrf.mxu1  ;;  %8723 = vmatprep.subr.mxu0 %v5137_v36 }
 0xa6f   : > { %8724 = vmatpush3.msra.mxu0 %v5137_v36  ;;  %v12734_v36 = vpop.eup %9258 }
 0xa70   : > { %v12678_v61 = vpop.f32.mrf.mxu1  ;;  %v3981_v58 = vmul.f32 %v12734_v36, %v3965_v25  ;;  %v12747_v11 = vpop.eup %9260 }
 0xa71   : > { %v5135_v7 = vpop.permute.xlu1 %5134  ;;  %v3983_v44 = vmul.f32 %v12747_v11, %v3967_v34  ;;  %v12760_v49 = vpop.eup %9262 }
 0xa72   : > { %v12680_v35 = vpop.f32.mrf.mxu1  ;;  %8725 = vmatprep.subr.mxu0 %v5135_v7 }
 0xa73   : > { %8726 = vmatpush3.msra.mxu0 %v5135_v7 }
 0xa74   : > { %v12685_v4 = vpop.f32.mrf.mxu1 }
 0xa76   : > { %v12687_v57 = vpop.f32.mrf.mxu1 }
 0xa78   : > { %v12692_v47 = vpop.f32.mrf.mxu1 }
 0xa7a   : > { %v12697_v46 = vpop.f32.mrf.mxu1 }
 0xa7f   : > { %v12699_v37 = vpop.f32.mrf.mxu1 }
 0xa81   : > { %v12704_v5 = vpop.f32.mrf.mxu1 }
 0xa85   : > { %v12711_v29 = vpop.f32.mrf.mxu1 }
 0xa86   : > { %14727 = vst [vmem:[#allocation98_spill] sm:$0xff] %v12711_v29  ;;  %4799 = vmax.xlane.f32.xlu1 %v12711_v29 }
 0xa87   : > { %v12714_v20 = vpop.f32.mrf.mxu1 }
 0xa88   : > { %14728 = vst [vmem:[#allocation101_spill] sm:$0xff] %v12714_v20  ;;  %4797 = vmax.xlane.f32.xlu0 %v12714_v20 }
 0xa89   : > { %v12723_v8 = vpop.f32.mrf.mxu1  ;;  %v3996_v18 = vpop.xlane.xlu0 %3995 }
 0xa8a   : > { %14732 = vst [vmem:[#allocation100_spill] sm:$0xff] %v12723_v8  ;;  %4803 = vmax.xlane.f32.xlu1 %v12723_v8  ;;  %v4026_v13 = vadd.f32 %v3996_v18, %v3978_v16  ;;  %v3985_v16 = vmul.f32 %v12760_v49, %v3969_v30  ;;  %v12773_v18 = vpop.eup %9264  ;;  %v3961_v30 = vld [vmem:[#allocation4 + $0x100] sm:$0xff]  ;;  %v12997_v8 = vld [vmem:[#allocation3 + $0x1f0] sm:$0xff] }
 0xa8b   : > { %v12726_v43 = vpop.f32.mrf.mxu1  ;;  %v3987_v22 = vmul.f32 %v12773_v18, %v3971_v39 }
 0xa8c   : > { %14733 = vst [vmem:[#allocation103_spill] sm:$0xff] %v12726_v43  ;;  %4042 = vst.msk [vmem:[#allocation4 + $0x108] sm:$0xff] %vm2015_vm2, %v4026_v13  ;;  %4801 = vmax.xlane.f32.xlu0 %v12726_v43  ;;  %v12977_v43 = vld [vmem:[#allocation3 + $0x1e0] sm:$0xff] }
 0xa8d   : > { %v12736_v7 = vpop.f32.mrf.mxu1  ;;  %v3998_v28 = vpop.xlane.xlu0 %3997 }
 0xa8e   : > { %14735 = vst [vmem:[#allocation102_spill] sm:$0xff] %v12736_v7  ;;  %4807 = vmax.xlane.f32.xlu1 %v12736_v7  ;;  %v4027_v14 = vadd.f32 %v3998_v28, %v3979_v31  ;;  %v14750_v31 = vld [vmem:[#allocation92_spill] sm:$0xff] }
 0xa8f   : > { %v12739_v63 = vpop.f32.mrf.mxu1  ;;  %v14751_v28 = vsub.f32 %v14749_v48, %v14750_v31  ;;  %v12986_v7 = vld [vmem:[#allocation3 + $0x1f8] sm:$0xff] }
 0xa90   : > { %14736 = vst [vmem:[#allocation105_spill] sm:$0xff] %v12739_v63  ;;  %4043 = vst.msk [vmem:[#allocation4 + $0x110] sm:$0xff] %vm2015_vm2, %v4027_v14  ;;  %4805 = vmax.xlane.f32.xlu0 %v12739_v63 }
 0xa91   : > { %v12749_v38 = vpop.f32.mrf.mxu1  ;;  %v4002_v55 = vpop.xlane.xlu0 %4001  ;;  %v3814_v25 = vmul.f32 1.442695, %v14751_v28  ;;  %v3977_v28 = vmul.f32 %v12576_v62, %v3961_v30 }
 0xa92   : > { %14738 = vst [vmem:[#allocation104_spill] sm:$0xff] %v12749_v38  ;;  %4811 = vmax.xlane.f32.xlu1 %v12749_v38  ;;  %v4029_v23 = vadd.f32 %v4002_v55, %v3981_v58  ;;  %v12786_v58 = vpop.eup %9266 }
 0xa93   : > { %v12755_v32 = vpop.f32.mrf.mxu1  ;;  %9274 = vpow2.f32 %v3814_v25  ;;  %v3989_v21 = vmul.f32 %v12786_v58, %v3973_v59  ;;  %v12799_v41 = vpop.eup %9268 }
 0xa94   : > { %14742 = vst [vmem:[#allocation107_spill] sm:$0xff] %v12755_v32  ;;  %4045 = vst.msk [vmem:[#allocation4 + $0x120] sm:$0xff] %vm2015_vm2, %v4029_v23  ;;  %4809 = vmax.xlane.f32.xlu0 %v12755_v32  ;;  %v3818_v23 = vmul.f32 1.442695, %v14756_v45  ;;  %v12808_v25 = vpop.eup %9270  ;;  %v14763_v45 = vld [vmem:[#allocation97_spill] sm:$0xff]  ;;  %v12958_v32 = vld [vmem:[#allocation3 + $0x1d0] sm:$0xff] }
 0xa95   : > { %v12762_v10 = vpop.f32.mrf.mxu1  ;;  %v4006_v60 = vpop.xlane.xlu0 %4005 }
 0xa96   : > { %14743 = vst [vmem:[#allocation109_spill] sm:$0xff] %v12762_v10  ;;  %4815 = vmax.xlane.f32.xlu1 %v12762_v10  ;;  %v4031_v51 = vadd.f32 %v4006_v60, %v3983_v44  ;;  %9276 = vpow2.f32 %v3818_v23  ;;  %v14764_v23 = vsub.f32 %v14763_v45, %v12294_v0  ;;  %v12967_v10 = vld [vmem:[#allocation3 + $0x1e8] sm:$0xff] }
 0xa97   : > { %v12768_v17 = vpop.f32.mrf.mxu1 }
 0xa98   : > { %14747 = vst [vmem:[#allocation110_spill] sm:$0xff] %v12768_v17  ;;  %4047 = vst.msk [vmem:[#allocation4 + $0x130] sm:$0xff] %vm2015_vm2, %v4031_v51  ;;  %4813 = vmax.xlane.f32.xlu0 %v12768_v17  ;;  %v3975_v51 = vld [vmem:[#allocation4 + $0x170] sm:$0xff] }
 0xa99   : > { %v12775_v2 = vpop.f32.mrf.mxu1  ;;  %v4010_v13 = vpop.xlane.xlu0 %4009  ;;  %v3991_v12 = vmul.f32 %v12799_v41, %v3975_v51 }
 0xa9a   : > { %14748 = vst [vmem:[#allocation112_spill] sm:$0xff] %v12775_v2  ;;  %4819 = vmax.xlane.f32.xlu1 %v12775_v2  ;;  %v4033_v14 = vadd.f32 %v4010_v13, %v3985_v16  ;;  %v14759_v16 = vld [vmem:[#allocation54_spill] sm:$0xff]  ;;  %v12939_v2 = vld [vmem:[#allocation3 + $0x1c0] sm:$0xff] }
 0xa9b   : > { %v12781_v56 = vpop.f32.mrf.mxu1  ;;  %v14760_v13 = vld [vmem:[#allocation94_spill] sm:$0xff] }
 0xa9c   : > { %14752 = vst [vmem:[#allocation106_spill] sm:$0xff] %v12781_v56  ;;  %4049 = vst.msk [vmem:[#allocation4 + $0x140] sm:$0xff] %vm2015_vm2, %v4033_v14  ;;  %4817 = vmax.xlane.f32.xlu0 %v12781_v56  ;;  %v14761_v39 = vsub.f32 %v14759_v16, %v14760_v13  ;;  %v3966_v16 = vld [vmem:[#allocation4 + $0x128] sm:$0xff]  ;;  %v14765_v13 = vsub.f32 %v12296_v50, %v12314_v52 }
 0xa9d   : > { %v12788_v55 = vpop.f32.mrf.mxu1  ;;  %v4014_v34 = vpop.xlane.xlu0 %4013 }
 0xa9e   : > { %14753 = vst [vmem:[#allocation108_spill] sm:$0xff] %v12788_v55  ;;  %4823 = vmax.xlane.f32.xlu1 %v12788_v55  ;;  %v4035_v44 = vadd.f32 %v4014_v34, %v3987_v22  ;;  %v3822_v48 = vmul.f32 1.442695, %v14761_v39  ;;  %v3964_v22 = vld [vmem:[#allocation4 + $0x118] sm:$0xff]  ;;  %v3830_v39 = vmul.f32 1.442695, %v14765_v13 }
 0xa9f   : > { %v12794_v60 = vpop.f32.mrf.mxu1  ;;  %v3980_v30 = vmul.f32 %v12808_v25, %v3964_v22  ;;  %v14767_v13 = vld [vmem:[#allocation64_spill] sm:$0xff] }
 0xaa0   : > { %14757 = vst [vmem:[#allocation113_spill] sm:$0xff] %v12794_v60  ;;  %4051 = vst.msk [vmem:[#allocation4 + $0x150] sm:$0xff] %vm2015_vm2, %v4035_v44  ;;  %4821 = vmax.xlane.f32.xlu0 %v12794_v60  ;;  %9278 = vpow2.f32 %v3822_v48  ;;  %v3826_v44 = vmul.f32 1.442695, %v14764_v23 }
 0xaa1   : > { %v12801_v6 = vpop.f32.mrf.mxu1  ;;  %v4018_v53 = vpop.xlane.xlu0 %4017 }
 0xaa2   : > { %14758 = vst [vmem:[#allocation116_spill] sm:$0xff] %v12801_v6  ;;  %4827 = vmax.xlane.f32.xlu1 %v12801_v6  ;;  %v4037_v31 = vadd.f32 %v4018_v53, %v3989_v21  ;;  %v12820_v21 = vpop.eup %9272  ;;  %9280 = vpow2.f32 %v3826_v44  ;;  %v14766_v44 = vld [vmem:[#allocation63_spill] sm:$0xff]  ;;  %v12948_v6 = vld [vmem:[#allocation3 + $0x1d8] sm:$0xff] }
 0xaa3   : > { %v3994_v14 = vpop.xlane.xlu1 %3993  ;;  %v12810_v34 = vpop.f32.mrf.mxu1  ;;  %v3982_v0 = vmul.f32 %v12820_v21, %v3966_v16  ;;  %9282 = vpow2.f32 %v3830_v39  ;;  %v3974_v39 = vld [vmem:[#allocation4 + $0x168] sm:$0xff]  ;;  %14775 = vst [vmem:[#allocation117_spill] sm:$0xff] %v12948_v6 }
 0xaa4   : > { %14762 = vst [vmem:[#allocation111_spill] sm:$0xff] %v12810_v34  ;;  %4053 = vst.msk [vmem:[#allocation4 + $0x160] sm:$0xff] %vm2015_vm2, %v4037_v31  ;;  %v4025_v59 = vadd.f32 %v3994_v14, %v3977_v28  ;;  %4825 = vmax.xlane.f32.xlu0 %v12810_v34  ;;  %v12828_v48 = vpop.eup %9274  ;;  %v3968_v28 = vld [vmem:[#allocation4 + $0x138] sm:$0xff]  ;;  %v12920_v34 = vld [vmem:[#allocation3 + $0x1b0] sm:$0xff] }
 0xaa5   : > { %v4022_v24 = vpop.xlane.xlu0 %4021  ;;  %v3984_v22 = vmul.f32 %v12828_v48, %v3968_v28 }
 0xaa6   : > { %4041 = vst.msk [vmem:[#allocation4 + $0x100] sm:$0xff] %vm2015_vm2, %v4025_v59  ;;  %v4039_v62 = vadd.f32 %v4022_v24, %v3991_v12  ;;  %v12832_v59 = vpop.eup %9276  ;;  %v3970_v24 = vld [vmem:[#allocation4 + $0x148] sm:$0xff] }
 0xaa7   : > { %v4000_v53 = vpop.xlane.xlu1 %3999  ;;  %v3986_v52 = vmul.f32 %v12832_v59, %v3970_v24 }
 0xaa8   : > { %4055 = vst.msk [vmem:[#allocation4 + $0x170] sm:$0xff] %vm2015_vm2, %v4039_v62  ;;  %v4028_v51 = vadd.f32 %v4000_v53, %v3980_v30  ;;  %v3972_v62 = vld [vmem:[#allocation4 + $0x158] sm:$0xff] }
 0xaaa   : > { %4044 = vst.msk [vmem:[#allocation4 + $0x118] sm:$0xff] %vm2015_vm2, %v4028_v51 }
 0xaab   : > { %v4004_v31 = vpop.xlane.xlu1 %4003 }
 0xaac   : > { %v4030_v14 = vadd.f32 %v4004_v31, %v3982_v0 }
 0xaad   : > { %v12836_v45 = vpop.eup %9278 }
 0xaae   : > { %4046 = vst.msk [vmem:[#allocation4 + $0x128] sm:$0xff] %vm2015_vm2, %v4030_v14  ;;  %v3988_v53 = vmul.f32 %v12836_v45, %v3972_v62  ;;  %v14770_v62 = vld [vmem:[#allocation59_spill] sm:$0xff] }
 0xaaf   : > { %v4008_v12 = vpop.xlane.xlu1 %4007  ;;  %v12842_v16 = vpop.eup %9280 }
 0xab0   : > { %v4032_v50 = vadd.f32 %v4008_v12, %v3984_v22  ;;  %v3990_v31 = vmul.f32 %v12842_v16, %v3974_v39  ;;  %v12848_v28 = vpop.eup %9282  ;;  %v14768_v22 = vld [vmem:[#allocation61_spill] sm:$0xff]  ;;  %v3976_v12 = vld [vmem:[#allocation4 + $0x178] sm:$0xff] }
 0xab2   : > { %4048 = vst.msk [vmem:[#allocation4 + $0x138] sm:$0xff] %vm2015_vm2, %v4032_v50  ;;  %v3992_v50 = vmul.f32 %v12848_v28, %v3976_v12 }
 0xab3   : > { %v4012_v23 = vpop.xlane.xlu1 %4011  ;;  %5132 = vrot.lane.b32.xlu1 %v14766_v44, %s9954_s29 }
 0xab4   : > { %v4034_v30 = vadd.f32 %v4012_v23, %v3986_v52  ;;  %v14769_v23 = vld [vmem:[#allocation62_spill] sm:$0xff] }
 0xab6   : > { %4050 = vst.msk [vmem:[#allocation4 + $0x148] sm:$0xff] %vm2015_vm2, %v4034_v30  ;;  %v14771_v30 = vld [vmem:[#allocation60_spill] sm:$0xff] }
 0xab7   : > { %v4016_v51 = vpop.xlane.xlu1 %4015  ;;  %5130 = vrot.lane.b32.xlu1 %v14767_v13, %s9954_s29  ;;  %v12865_v13 = vld [vmem:[#allocation3 + $0x188] sm:$0xff] }
 0xab8   : > { %v4036_v0 = vadd.f32 %v4016_v51, %v3988_v53  ;;  %v14772_v53 = vld [vmem:[#allocation57_spill] sm:$0xff]  ;;  %v14773_v51 = vld [vmem:[#allocation58_spill] sm:$0xff] }
 0xaba   : > { %4052 = vst.msk [vmem:[#allocation4 + $0x158] sm:$0xff] %vm2015_vm2, %v4036_v0  ;;  %v12867_v0 = vld [vmem:[#allocation3 + $0x180] sm:$0xff] }
 0xabb   : > { %v4020_v14 = vpop.xlane.xlu1 %4019  ;;  %5128 = vrot.lane.b32.xlu1 %v14768_v22, %s9954_s29  ;;  %v12872_v22 = vld [vmem:[#allocation3 + $0x198] sm:$0xff] }
 0xabc   : > { %v4038_v24 = vadd.f32 %v4020_v14, %v3990_v31 }
 0xabe   : > { %4054 = vst.msk [vmem:[#allocation4 + $0x168] sm:$0xff] %vm2015_vm2, %v4038_v24 }
 0xabf   : > { %v4024_v52 = vpop.xlane.xlu1 %4023  ;;  %5126 = vrot.lane.b32.xlu1 %v14769_v23, %s9954_s29 }
 0xac0   : > { %v4040_v44 = vadd.f32 %v4024_v52, %v3992_v50  ;;  %v12882_v52 = vld [vmem:[#allocation3 + $0x190] sm:$0xff] }
 0xac2   : > { %4056 = vst.msk [vmem:[#allocation4 + $0x178] sm:$0xff] %vm2015_vm2, %v4040_v44 }
 0xac3   : > { %5124 = vrot.lane.b32.xlu1 %v14770_v62, %s9954_s29  ;;  %v12891_v62 = vld [vmem:[#allocation3 + $0x1a8] sm:$0xff] }
 0xac7   : > { %5122 = vrot.lane.b32.xlu1 %v14771_v30, %s9954_s29 }
 0xacb   : > { %5120 = vrot.lane.b32.xlu1 %v14772_v53, %s9954_s29  ;;  %v12910_v53 = vld [vmem:[#allocation3 + $0x1b8] sm:$0xff] }
 0xacf   : > { %5118 = vrot.lane.b32.xlu1 %v14773_v51, %s9954_s29  ;;  %s14820_s29 = sld [smem:[#allocation152_spill]] (!%p7674_p5) }
 0xb0f   : > { %v4800_v39 = vpop.xlane.xlu1 %4799 }
 0xb10   : > { %v12870_v31 = vmax.f32 %v12865_v13, %v4800_v39 }
 0xb11   : > { %v4798_v14 = vpop.xlane.xlu0 %4797 }
 0xb12   : > { %5521 = vst.msk [vmem:[#allocation3 + $0x188] sm:$0xff] %vm2015_vm2, %v12870_v31  ;;  %v12879_v24 = vmax.f32 %v12867_v0, %v4798_v14  ;;  %4900 = vperm.xlu0 %9090, %v12870_v31   ;;  %v12901_v14 = vld [vmem:[#allocation3 + $0x1a0] sm:$0xff] }
 0xb13   : > { %v4804_v50 = vpop.xlane.xlu1 %4803 }
 0xb14   : > { %5520 = vst.msk [vmem:[#allocation3 + $0x180] sm:$0xff] %vm2015_vm2, %v12879_v24  ;;  %v12889_v44 = vmax.f32 %v12872_v22, %v4804_v50 }
 0xb15   : > { %v4802_v30 = vpop.xlane.xlu0 %4801 }
 0xb16   : > { %5523 = vst.msk [vmem:[#allocation3 + $0x198] sm:$0xff] %vm2015_vm2, %v12889_v44  ;;  %4895 = vperm.xlu0 %9090, %v12879_v24   ;;  %v12899_v51 = vmax.f32 %v12882_v52, %v4802_v30 }
 0xb17   : > { %v4808_v39 = vpop.xlane.xlu1 %4807 }
 0xb18   : > { %v12904_v50 = vmax.f32 %v12891_v62, %v4808_v39  ;;  %5522 = vst.msk [vmem:[#allocation3 + $0x190] sm:$0xff] %vm2015_vm2, %v12899_v51 }
 0xb19   : > { %v4806_v12 = vpop.xlane.xlu0 %4805 }
 0xb1a   : > { %5525 = vst.msk [vmem:[#allocation3 + $0x1a8] sm:$0xff] %vm2015_vm2, %v12904_v50  ;;  %4910 = vperm.xlu0 %9090, %v12889_v44   ;;  %v12918_v30 = vmax.f32 %v12901_v14, %v4806_v12 }
 0xb1b   : > { %v4812_v39 = vpop.xlane.xlu1 %4811 }
 0xb1c   : > { %v12923_v23 = vmax.f32 %v12910_v53, %v4812_v39  ;;  %5524 = vst.msk [vmem:[#allocation3 + $0x1a0] sm:$0xff] %vm2015_vm2, %v12918_v30 }
 0xb1d   : > { %v4810_v56 = vpop.xlane.xlu0 %4809 }
 0xb1e   : > { %5527 = vst.msk [vmem:[#allocation3 + $0x1b8] sm:$0xff] %vm2015_vm2, %v12923_v23  ;;  %4905 = vperm.xlu0 %9090, %v12899_v51   ;;  %v12937_v12 = vmax.f32 %v12920_v34, %v4810_v56 }
 0xb1f   : > { %v4816_v39 = vpop.xlane.xlu1 %4815 }
 0xb20   : > { %v12942_v60 = vmax.f32 %v12929_v19, %v4816_v39  ;;  %5526 = vst.msk [vmem:[#allocation3 + $0x1b0] sm:$0xff] %vm2015_vm2, %v12937_v12 }
 0xb21   : > { %v4814_v17 = vpop.xlane.xlu0 %4813 }
 0xb22   : > { %5529 = vst.msk [vmem:[#allocation3 + $0x1c8] sm:$0xff] %vm2015_vm2, %v12942_v60  ;;  %4920 = vperm.xlu0 %9090, %v12904_v50   ;;  %v12956_v56 = vmax.f32 %v12939_v2, %v4814_v17 }
 0xb23   : > { %v4820_v39 = vpop.xlane.xlu1 %4819 }
 0xb24   : > { %v12961_v55 = vmax.f32 %v12948_v6, %v4820_v39  ;;  %5528 = vst.msk [vmem:[#allocation3 + $0x1c0] sm:$0xff] %vm2015_vm2, %v12956_v56 }
 0xb25   : > { %v4818_v63 = vpop.xlane.xlu0 %4817 }
 0xb26   : > { %5531 = vst.msk [vmem:[#allocation3 + $0x1d8] sm:$0xff] %vm2015_vm2, %v12961_v55  ;;  %4915 = vperm.xlu0 %9090, %v12918_v30   ;;  %v12975_v17 = vmax.f32 %v12958_v32, %v4818_v63 }
 0xb27   : > { %v4824_v39 = vpop.xlane.xlu1 %4823 }
 0xb28   : > { %v12980_v38 = vmax.f32 %v12967_v10, %v4824_v39  ;;  %5530 = vst.msk [vmem:[#allocation3 + $0x1d0] sm:$0xff] %vm2015_vm2, %v12975_v17 }
 0xb29   : > { %v4822_v20 = vpop.xlane.xlu0 %4821 }
 0xb2a   : > { %14776 = vst [vmem:[#allocation120_spill] sm:$0xff] %v12980_v38  ;;  %5533 = vst.msk [vmem:[#allocation3 + $0x1e8] sm:$0xff] %vm2015_vm2, %v12980_v38  ;;  %4960 = vperm.xlu1 %9091, %v12980_v38   ;;  %4930 = vperm.xlu0 %9090, %v12923_v23   ;;  %v12995_v63 = vmax.f32 %v12977_v43, %v4822_v20 }
 0xb2b   : > { %v4828_v39 = vpop.xlane.xlu1 %4827 }
 0xb2c   : > { %v13000_v6 = vmax.f32 %v12986_v7, %v4828_v39  ;;  %5532 = vst.msk [vmem:[#allocation3 + $0x1e0] sm:$0xff] %vm2015_vm2, %v12995_v63 }
 0xb2d   : > { %v4826_v29 = vpop.xlane.xlu0 %4825 }
 0xb2e   : > { %5535 = vst.msk [vmem:[#allocation3 + $0x1f8] sm:$0xff] %vm2015_vm2, %v13000_v6  ;;  %4970 = vperm.xlu1 %9091, %v13000_v6   ;;  %4925 = vperm.xlu0 %9090, %v12937_v12   ;;  %v13013_v20 = vmax.f32 %v12997_v8, %v4826_v29 }
 0xb2f   : > { %v5133_v39 = vpop.permute.xlu1 %5132 }
 0xb30   : > { %8727 = vmatprep.subr.mxu0 %v5133_v39  ;;  %5534 = vst.msk [vmem:[#allocation3 + $0x1f0] sm:$0xff] %vm2015_vm2, %v13013_v20 }
 0xb31   : > { %8728 = vmatpush3.msra.mxu0 %v5133_v39 }
 0xb32   : > { %4278 = vperm.xlu1 %9091, %v12721_v15   ;;  %4940 = vperm.xlu0 %9090, %v12942_v60  }
 0xb33   : > { %v5131_v38 = vpop.permute.xlu1 %5130 }
 0xb34   : > { %8729 = vmatprep.subr.mxu0 %v5131_v38 }
 0xb35   : > { %8730 = vmatpush3.msra.mxu0 %v5131_v38 }
 0xb36   : > { %4288 = vperm.xlu1 %9091, %v12734_v36   ;;  %4935 = vperm.xlu0 %9090, %v12956_v56  }
 0xb37   : > { %v5129_v29 = vpop.permute.xlu1 %5128 }
 0xb38   : > { %8731 = vmatprep.subr.mxu0 %v5129_v29 }
 0xb39   : > { %8732 = vmatpush3.msra.mxu0 %v5129_v29 }
 0xb3a   : > { %4298 = vperm.xlu1 %9091, %v12747_v11   ;;  %4950 = vperm.xlu0 %9090, %v12961_v55  }
 0xb3b   : > { %v5127_v19 = vpop.permute.xlu1 %5126 }
 0xb3c   : > { %8733 = vmatprep.subr.mxu0 %v5127_v19 }
 0xb3d   : > { %8734 = vmatpush3.msra.mxu0 %v5127_v19 }
 0xb3e   : > { %4308 = vperm.xlu1 %9091, %v12760_v49   ;;  %4945 = vperm.xlu0 %9090, %v12975_v17  }
 0xb3f   : > { %v5125_v15 = vpop.permute.xlu1 %5124 }
 0xb40   : > { %8735 = vmatprep.subr.mxu0 %v5125_v15 }
 0xb41   : > { %8736 = vmatpush3.msra.mxu0 %v5125_v15 }
 0xb42   : > { %4318 = vperm.xlu1 %9091, %v12773_v18   ;;  %4955 = vperm.xlu0 %9090, %v12995_v63  }
 0xb43   : > { %v5123_v36 = vpop.permute.xlu1 %5122 }
 0xb44   : > { %8737 = vmatprep.subr.mxu0 %v5123_v36 }
 0xb45   : > { %8738 = vmatpush3.msra.mxu0 %v5123_v36 }
 0xb46   : > { %4328 = vperm.xlu1 %9091, %v12786_v58   ;;  %4965 = vperm.xlu0 %9090, %v13013_v20  }
 0xb47   : > { %v5121_v11 = vpop.permute.xlu1 %5120 }
 0xb48   : > { %8739 = vmatprep.subr.mxu0 %v5121_v11 }
 0xb49   : > { %8740 = vmatpush3.msra.mxu0 %v5121_v11  ;;  %v14799_v11 = vld [vmem:[#allocation103_spill] sm:$0xff] }
 0xb4a   : > { %4338 = vperm.xlu1 %9091, %v12799_v41   ;;  %4273 = vperm.xlu0 %9090, %v12709_v9  }
 0xb4b   : > { %v5119_v19 = vpop.permute.xlu1 %5118 }
 0xb4c   : > { %8741 = vmatprep.subr.mxu0 %v5119_v19 }
 0xb4d   : > { %8742 = vmatpush3.msra.mxu0 %v5119_v19 }
 0xb4e   : > { %4378 = vrot.lane.b32.xlu1 %v12664_v40, %s9953_s14  ;;  %4283 = vperm.xlu0 %9090, %v12808_v25   ;;  %v14777_v40 = vsub.f32 %v12865_v13, %v12870_v31  ;;  %v14789_v13 = vld [vmem:[#allocation114_spill] sm:$0xff] }
 0xb50   : > { %v4863_v9 = vmul.f32 1.442695, %v14777_v40 }
 0xb52   : > { %4382 = vrot.lane.b32.xlu1 %v12668_v42, %s9953_s14  ;;  %4293 = vperm.xlu0 %9090, %v12820_v21   ;;  %9284 = vpow2.f32 %v4863_v9  ;;  %v14778_v42 = vsub.f32 %v12882_v52, %v12899_v51 }
 0xb56   : > { %4386 = vrot.lane.b32.xlu1 %v12672_v27, %s9953_s14  ;;  %4303 = vperm.xlu0 %9090, %v12828_v48   ;;  %v4865_v27 = vmul.f32 1.442695, %v14778_v42  ;;  %v14800_v42 = vld [vmem:[#allocation102_spill] sm:$0xff] }
 0xb58   : > { %9286 = vpow2.f32 %v4865_v27 }
 0xb5a   : > { %4390 = vrot.lane.b32.xlu1 %v12676_v33, %s9953_s14  ;;  %4313 = vperm.xlu0 %9090, %v12832_v59   ;;  %v14779_v33 = vsub.f32 %v12901_v14, %v12918_v30  ;;  %v14796_v30 = vld [vmem:[#allocation101_spill] sm:$0xff] }
 0xb5c   : > { %v4869_v38 = vmul.f32 1.442695, %v14779_v33 }
 0xb5e   : > { %4394 = vrot.lane.b32.xlu1 %v12680_v35, %s9953_s14  ;;  %4323 = vperm.xlu0 %9090, %v12836_v45   ;;  %9288 = vpow2.f32 %v4869_v38  ;;  %v14780_v35 = vsub.f32 %v12920_v34, %v12937_v12 }
 0xb5f   : > { %v13073_v58 = vpop.eup %9284 }
 0xb60   : > { %v4873_v49 = vmul.f32 1.442695, %v14780_v35  ;;  %v14801_v35 = vld [vmem:[#allocation105_spill] sm:$0xff] }
 0xb62   : > { %4398 = vrot.lane.b32.xlu1 %v12687_v57, %s9953_s14  ;;  %4333 = vperm.xlu0 %9090, %v12842_v16   ;;  %9290 = vpow2.f32 %v4873_v49  ;;  %v14781_v57 = vsub.f32 %v12939_v2, %v12956_v56  ;;  %v14797_v56 = vsub.f32 %v12986_v7, %v13000_v6 }
 0xb64   : > { %v4877_v18 = vmul.f32 1.442695, %v14781_v57 }
 0xb65   : > { %v13081_v41 = vpop.eup %9286 }
 0xb66   : > { %4402 = vrot.lane.b32.xlu1 %v12697_v46, %s9953_s14  ;;  %4343 = vperm.xlu0 %9090, %v12848_v28   ;;  %9292 = vpow2.f32 %v4877_v18  ;;  %v14782_v46 = vsub.f32 %v12958_v32, %v12975_v17  ;;  %v4891_v17 = vmul.f32 1.442695, %v14797_v56 }
 0xb6a   : > { %4406 = vrot.lane.b32.xlu1 %v12704_v5, %s9953_s14  ;;  %4380 = vrot.lane.b32.xlu0 %v12662_v54, %s9953_s14  ;;  %v4881_v5 = vmul.f32 1.442695, %v14782_v46  ;;  %v14783_v54 = vsub.f32 %v12977_v43, %v12995_v63 }
 0xb6b   : > { %v13089_v25 = vpop.eup %9288 }
 0xb6c   : > { %9294 = vpow2.f32 %v4881_v5  ;;  %v4885_v2 = vmul.f32 1.442695, %v14783_v54 }
 0xb6e   : > { %5334 = vperm.xlu1 %9091, %v13073_v58   ;;  %4384 = vrot.lane.b32.xlu0 %v12666_v3, %s9953_s14  ;;  %v14784_v3 = vsub.f32 %v12867_v0, %v12879_v24  ;;  %9296 = vpow2.f32 %v4885_v2  ;;  %v14790_v0 = vsub.f32 %v14789_v13, %v12942_v60  ;;  %v14794_v60 = vld [vmem:[#allocation120_spill] sm:$0xff] }
 0xb6f   : > { %v13100_v21 = vpop.eup %9290 }
 0xb70   : > { %v4861_v32 = vmul.f32 1.442695, %v14784_v3  ;;  %v4879_v31 = vmul.f32 1.442695, %v14790_v0 }
 0xb72   : > { %5339 = vperm.xlu1 %9091, %v13081_v41   ;;  %4388 = vrot.lane.b32.xlu0 %v12670_v26, %s9953_s14  ;;  %v14785_v26 = vsub.f32 %v12997_v8, %v13013_v20  ;;  %9298 = vpow2.f32 %v4861_v32  ;;  %v14787_v8 = vsub.f32 %v12891_v62, %v12904_v50  ;;  %v14802_v32 = vld [vmem:[#allocation104_spill] sm:$0xff] }
 0xb73   : > { %v13108_v48 = vpop.eup %9292 }
 0xb74   : > { %v4889_v34 = vmul.f32 1.442695, %v14785_v26  ;;  %v4871_v59 = vmul.f32 1.442695, %v14787_v8  ;;  %v14803_v8 = vld [vmem:[#allocation107_spill] sm:$0xff] }
 0xb76   : > { %5349 = vperm.xlu1 %9091, %v13089_v25   ;;  %4392 = vrot.lane.b32.xlu0 %v12674_v1, %s9953_s14  ;;  %v14786_v1 = vsub.f32 %v12872_v22, %v12889_v44  ;;  %9300 = vpow2.f32 %v4889_v34  ;;  %v14791_v22 = vld [vmem:[#allocation117_spill] sm:$0xff]  ;;  %v14793_v44 = vld [vmem:[#allocation98_spill] sm:$0xff] }
 0xb77   : > { %v14792_v24 = vsub.f32 %v14791_v22, %v12961_v55  ;;  %v14804_v22 = vld [vmem:[#allocation109_spill] sm:$0xff] }
 0xb78   : > { %v4867_v43 = vmul.f32 1.442695, %v14786_v1 }
 0xb79   : > { %v13116_v45 = vpop.eup %9294  ;;  %v4883_v52 = vmul.f32 1.442695, %v14792_v24 }
 0xb7a   : > { %5359 = vperm.xlu1 %9091, %v13100_v21   ;;  %4396 = vrot.lane.b32.xlu0 %v12678_v61, %s9953_s14  ;;  %9302 = vpow2.f32 %v4867_v43  ;;  %v14788_v61 = vsub.f32 %v12910_v53, %v12923_v23  ;;  %v14795_v53 = vsub.f32 %v12967_v10, %v14794_v60  ;;  %v14798_v10 = vld [vmem:[#allocation100_spill] sm:$0xff] }
 0xb7b   : > { %9304 = vpow2.f32 %v4871_v59  ;;  %v13124_v28 = vpop.eup %9296 }
 0xb7c   : > { %v4875_v16 = vmul.f32 1.442695, %v14788_v61  ;;  %v4887_v51 = vmul.f32 1.442695, %v14795_v53 }
 0xb7e   : > { %5369 = vperm.xlu1 %9091, %v13108_v48   ;;  %4400 = vrot.lane.b32.xlu0 %v12685_v4, %s9953_s14  ;;  %9306 = vpow2.f32 %v4875_v16 }
 0xb7f   : > { %v13129_v4 = vpop.eup %9298  ;;  %9308 = vpow2.f32 %v4879_v31 }
 0xb80   : > { %9310 = vpow2.f32 %v4883_v52 }
 0xb81   : > { %9312 = vpow2.f32 %v4887_v51 }
 0xb82   : > { %5379 = vperm.xlu1 %9091, %v13116_v45   ;;  %4404 = vrot.lane.b32.xlu0 %v12692_v47, %s9953_s14 }
 0xb83   : > { %v13134_v47 = vpop.eup %9300 }
 0xb86   : > { %5389 = vperm.xlu1 %9091, %v13124_v28   ;;  %4408 = vrot.lane.b32.xlu0 %v12699_v37, %s9953_s14 }
 0xb87   : > { %v13141_v23 = vpop.eup %9302 }
 0xb88   : > { %v13148_v14 = vpop.eup %9304 }
 0xb8a   : > { %5329 = vperm.xlu0 %9090, %v13129_v4   ;;  %5399 = vperm.xlu1 %9091, %v13134_v47  }
 0xb8b   : > { %v13155_v20 = vpop.eup %9306 }
 0xb8c   : > { %v13159_v15 = vpop.eup %9308 }
 0xb8d   : > { %v4901_v37 = vpop.permute.xlu0 %4900  ;;  %v13163_v40 = vpop.eup %9310 }
 0xb8e   : > { %5344 = vperm.xlu0 %9090, %v13141_v23   ;;  %v4974_v62 = vsub.f32 %v14793_v44, %v4901_v37  ;;  %v13167_v33 = vpop.eup %9312 }
 0xb90   : > { %v4991_v55 = vmul.f32 1.442695, %v4974_v62  ;;  %v14805_v62 = vld [vmem:[#allocation110_spill] sm:$0xff] }
 0xb91   : > { %v4896_v50 = vpop.permute.xlu0 %4895 }
 0xb92   : > { %v4973_v12 = vsub.f32 %v14796_v30, %v4896_v50  ;;  %5354 = vperm.xlu0 %9090, %v13148_v14   ;;  %v14806_v30 = vld [vmem:[#allocation108_spill] sm:$0xff] }
 0xb94   : > { %v4989_v63 = vmul.f32 1.442695, %v4973_v12 }
 0xb95   : > { %v4911_v39 = vpop.permute.xlu0 %4910 }
 0xb96   : > { %9314 = vpow2.f32 %v4989_v63  ;;  %5364 = vperm.xlu0 %9090, %v13155_v20   ;;  %v4976_v29 = vsub.f32 %v14798_v10, %v4911_v39 }
 0xb97   : > { %9316 = vpow2.f32 %v4991_v55 }
 0xb98   : > { %9318 = vpow2.f32 %v4891_v17  ;;  %v4995_v7 = vmul.f32 1.442695, %v4976_v29  ;;  %v14807_v17 = vld [vmem:[#allocation112_spill] sm:$0xff] }
 0xb99   : > { %v4906_v36 = vpop.permute.xlu0 %4905 }
 0xb9a   : > { %v4975_v19 = vsub.f32 %v14799_v11, %v4906_v36  ;;  %5374 = vperm.xlu0 %9090, %v13159_v15   ;;  %v14808_v36 = vld [vmem:[#allocation116_spill] sm:$0xff] }
 0xb9c   : > { %v4993_v6 = vmul.f32 1.442695, %v4975_v19 }
 0xb9d   : > { %v4921_v9 = vpop.permute.xlu0 %4920 }
 0xb9e   : > { %9320 = vpow2.f32 %v4993_v6  ;;  %5384 = vperm.xlu0 %9090, %v13163_v40   ;;  %v4978_v27 = vsub.f32 %v14800_v42, %v4921_v9  ;;  %v14809_v6 = vld [vmem:[#allocation106_spill] sm:$0xff] }
 0xb9f   : > { %9322 = vpow2.f32 %v4995_v7 }
 0xba0   : > { %v4999_v18 = vmul.f32 1.442695, %v4978_v27 }
 0xba1   : > { %v4916_v38 = vpop.permute.xlu0 %4915 }
 0xba2   : > { %v4977_v49 = vsub.f32 %v14801_v35, %v4916_v38  ;;  %5394 = vperm.xlu0 %9090, %v13167_v33  }
 0xba3   : > { %v9315_v57 = vpop.eup %9314 }
 0xba4   : > { %v13171_v46 = vpop.eup %9316  ;;  %v4997_v5 = vmul.f32 1.442695, %v4977_v49  ;;  %8743 = vmatprep.mubr.f32.mxu0 %v9315_v57 }
 0xba5   : > { %v13173_v54 = vpop.eup %9318  ;;  %v4961_v2 = vpop.permute.xlu1 %4960  ;;  %8744 = vmatmul.mubr.f32.vlgmr.msra.gmra.mxu0 %v13171_v46 }
 0xba6   : > { %v4931_v3 = vpop.permute.xlu0 %4930  ;;  %9324 = vpow2.f32 %v4997_v5  ;;  %5404 = vperm.xlu0 %9090, %v13173_v54   ;;  %v4986_v12 = vsub.f32 %v14806_v30, %v4961_v2 }
 0xba7   : > { %v4980_v26 = vsub.f32 %v14802_v32, %v4931_v3  ;;  %9326 = vpow2.f32 %v4999_v18 }
 0xba8   : > { %v5015_v29 = vmul.f32 1.442695, %v4986_v12 }
 0xba9   : > { %v5003_v34 = vmul.f32 1.442695, %v4980_v26  ;;  %v4971_v1 = vpop.permute.xlu1 %4970  ;;  %v14811_v26 = vld [vmem:[#allocation111_spill] sm:$0xff] }
 0xbaa   : > { %v4926_v43 = vpop.permute.xlu0 %4925  ;;  %v4988_v11 = vsub.f32 %v14808_v36, %v4971_v1  ;;  %v4256_v36 = vld [vmem:[#allocation5 + $0x30] sm:$0xff] }
 0xbab   : > { %v4979_v59 = vsub.f32 %v14803_v8, %v4926_v43  ;;  %v13179_v61 = vpop.eup %9320  ;;  %9328 = vpow2.f32 %v5003_v34 }
 0xbac   : > { %v9323_v16 = vpop.eup %9322  ;;  %8746 = vmatprep.mubr.f32.mxu0 %v13179_v61  ;;  %v5019_v38 = vmul.f32 1.442695, %v4988_v11 }
 0xbad   : > { %v5001_v13 = vmul.f32 1.442695, %v4979_v59  ;;  %v13182_v0 = vpop.permute.xlu1 %4278  ;;  %8747 = vmatmul.mubr.f32.gmra.mxu0 %v9323_v16 }
 0xbae   : > { %v4941_v31 = vpop.permute.xlu0 %4940  ;;  %5054 = vadd.xlane.f32.xlu1 %v9315_v57  ;;  %v14810_v57 = vld [vmem:[#allocation113_spill] sm:$0xff] }
 0xbaf   : > { %v4982_v24 = vsub.f32 %v14804_v22, %v4941_v31  ;;  %9330 = vpow2.f32 %v5001_v13  ;;  %v4250_v13 = vld [vmem:[#allocation5] sm:$0xff]  ;;  %v14812_v31 = vld [vmem:[#allocation99_spill] sm:$0xff] }
 0xbb0   : > { %v4346_v22 = vmul.f32 %v14812_v31, %v4250_v13 }
 0xbb1   : > { %v5007_v52 = vmul.f32 1.442695, %v4982_v24  ;;  %v13185_v37 = vpop.permute.xlu1 %4288 }
 0xbb2   : > { %v4936_v44 = vpop.permute.xlu0 %4935  ;;  %5060 = vadd.xlane.f32.xlu1 %v9323_v16 }
 0xbb3   : > { %9332 = vpow2.f32 %v5007_v52  ;;  %v4981_v60 = vsub.f32 %v14805_v62, %v4936_v44  ;;  %v9325_v53 = vpop.eup %9324 }
 0xbb4   : > { %v9327_v51 = vpop.eup %9326  ;;  %8749 = vmatprep.mubr.f32.mxu0 %v9325_v53 }
 0xbb5   : > { %v5005_v50 = vmul.f32 1.442695, %v4981_v60  ;;  %v13189_v55 = vpop.permute.xlu1 %4298  ;;  %8750 = vmatmul.mubr.f32.gmra.mxu0 %v9327_v51 }
 0xbb6   : > { %v4951_v56 = vpop.permute.xlu0 %4950  ;;  %5064 = vadd.xlane.f32.xlu1 %v9327_v51  ;;  %v4252_v51 = vld [vmem:[#allocation5 + $0x10] sm:$0xff] }
 0xbb7   : > { %9334 = vpow2.f32 %v5005_v50  ;;  %v4984_v63 = vsub.f32 %v14807_v17, %v4951_v56 }
 0xbb8   : > { %v9329_v10 = vpop.eup %9328 }
 0xbb9   : > { %v5011_v39 = vmul.f32 1.442695, %v4984_v63  ;;  %v13193_v19 = vpop.permute.xlu1 %4308 }
 0xbba   : > { %v4946_v7 = vpop.permute.xlu0 %4945  ;;  %5068 = vadd.xlane.f32.xlu1 %v9329_v10 }
 0xbbb   : > { %9336 = vpow2.f32 %v5011_v39  ;;  %v4983_v9 = vsub.f32 %v14809_v6, %v4946_v7  ;;  %v4258_v6 = vld [vmem:[#allocation5 + $0x40] sm:$0xff] }
 0xbbc   : > { %v9331_v42 = vpop.eup %9330  ;;  %9338 = vpow2.f32 %v5015_v29 }
 0xbbd   : > { %v5009_v27 = vmul.f32 1.442695, %v4983_v9  ;;  %8752 = vmatprep.mubr.f32.mxu0 %v9331_v42  ;;  %v13196_v35 = vpop.permute.xlu1 %4318  ;;  %v4354_v9 = vmul.f32 %v13193_v19, %v4258_v6  ;;  %v4265_v6 = vld [vmem:[#allocation5 + $0x78] sm:$0xff] }
 0xbbe   : > { %v4956_v49 = vpop.permute.xlu0 %4955  ;;  %8753 = vmatmul.mubr.f32.gmra.mxu0 %v9329_v10 }
 0xbbf   : > { %9340 = vpow2.f32 %v5009_v27  ;;  %v4985_v18 = vsub.f32 %v14810_v57, %v4956_v49  ;;  %v4260_v49 = vld [vmem:[#allocation5 + $0x50] sm:$0xff] }
 0xbc0   : > { %v9333_v5 = vpop.eup %9332  ;;  %9342 = vpow2.f32 %v5019_v38 }
 0xbc1   : > { %v5013_v2 = vmul.f32 1.442695, %v4985_v18  ;;  %5072 = vadd.xlane.f32.xlu1 %v9333_v5  ;;  %v13199_v3 = vpop.permute.xlu1 %4328 }
 0xbc2   : > { %v4966_v32 = vpop.permute.xlu0 %4965 }
 0xbc3   : > { %9344 = vpow2.f32 %v5013_v2  ;;  %v4987_v34 = vsub.f32 %v14811_v26, %v4966_v32  ;;  %v4262_v2 = vld [vmem:[#allocation5 + $0x60] sm:$0xff] }
 0xbc4   : > { %v9335_v1 = vpop.eup %9334  ;;  %v4358_v32 = vmul.f32 %v13199_v3, %v4262_v2 }
 0xbc5   : > { %v5017_v43 = vmul.f32 1.442695, %v4987_v34  ;;  %8755 = vmatprep.mubr.f32.mxu0 %v9335_v1  ;;  %v13202_v8 = vpop.permute.xlu1 %4338  ;;  %5056 = vadd.xlane.f32.xlu0 %v13171_v46  ;;  %v4348_v46 = vmul.f32 %v13182_v0, %v4252_v51  ;;  %v4255_v51 = vld [vmem:[#allocation5 + $0x28] sm:$0xff] }
 0xbc6   : > { %8756 = vmatmul.mubr.f32.gmra.mxu0 %v9333_v5  ;;  %v13205_v59 = vpop.permute.xlu0 %4273 }
 0xbc7   : > { %9346 = vpow2.f32 %v5017_v43  ;;  %v4251_v43 = vld [vmem:[#allocation5 + $0x8] sm:$0xff] }
 0xbc8   : > { %v9337_v16 = vpop.eup %9336 }
 0xbc9   : > { %5076 = vadd.xlane.f32.xlu1 %v9337_v16  ;;  %v4379_v24 = vpop.permute.xlu1 %4378  ;;  %5058 = vadd.xlane.f32.xlu0 %v13179_v61  ;;  %v9339_v44 = vpop.eup %9338  ;;  %v4254_v61 = vld [vmem:[#allocation5 + $0x20] sm:$0xff] }
 0xbca   : > { %v13209_v52 = vpop.permute.xlu0 %4283  ;;  %v4426_v62 = vadd.f32 %v4379_v24, %v4346_v22  ;;  %v4350_v63 = vmul.f32 %v13185_v37, %v4254_v61  ;;  %v4259_v61 = vld [vmem:[#allocation5 + $0x48] sm:$0xff] }
 0xbcc   : > { %v9341_v60 = vpop.eup %9340  ;;  %4443 = vst.msk [vmem:[#allocation5] sm:$0xff] %vm4442_vm4, %v4426_v62 }
 0xbcd   : > { %5080 = vadd.xlane.f32.xlu1 %v9339_v44  ;;  %8758 = vmatprep.mubr.f32.mxu0 %v9341_v60  ;;  %v4383_v50 = vpop.permute.xlu1 %4382  ;;  %v9343_v12 = vpop.eup %9342 }
 0xbce   : > { %5062 = vadd.xlane.f32.xlu0 %v9325_v53  ;;  %8759 = vmatmul.mubr.f32.gmra.mxu0 %v9337_v16  ;;  %v4294_v30 = vpop.permute.xlu0 %4293  ;;  %v4428_v56 = vadd.f32 %v4383_v50, %v4348_v46  ;;  %v4352_v53 = vmul.f32 %v13189_v55, %v4256_v36  ;;  %v4356_v55 = vmul.f32 %v13196_v35, %v4260_v49  ;;  %v4257_v50 = vld [vmem:[#allocation5 + $0x38] sm:$0xff] }
 0xbcf   : > { %v4347_v35 = vmul.f32 %v13205_v59, %v4251_v43  ;;  %v4351_v46 = vmul.f32 %v4294_v30, %v4255_v51 }
 0xbd0   : > { %v9345_v17 = vpop.eup %9344  ;;  %4445 = vst.msk [vmem:[#allocation5 + $0x10] sm:$0xff] %vm4442_vm4, %v4428_v56 }
 0xbd1   : > { %5084 = vadd.xlane.f32.xlu1 %v9343_v12  ;;  %8761 = vmatprep.mubr.f32.mxu0 %v9345_v17  ;;  %v4387_v39 = vpop.permute.xlu1 %4386 }
 0xbd2   : > { %5066 = vadd.xlane.f32.xlu0 %v9331_v42  ;;  %8762 = vmatmul.mubr.f32.gmra.mxu0 %v9339_v44  ;;  %v4304_v0 = vpop.permute.xlu0 %4303  ;;  %v4430_v10 = vadd.f32 %v4387_v39, %v4350_v63  ;;  %v4253_v44 = vld [vmem:[#allocation5 + $0x18] sm:$0xff] }
 0xbd3   : > { %v4349_v3 = vmul.f32 %v13209_v52, %v4253_v44  ;;  %v5027_v44 = vld [vmem:[#allocation4 + $0x1a8] sm:$0xff] }
 0xbd4   : > { %v9347_v29 = vpop.eup %9346  ;;  %4447 = vst.msk [vmem:[#allocation5 + $0x20] sm:$0xff] %vm4442_vm4, %v4430_v10  ;;  %v4261_v10 = vld [vmem:[#allocation5 + $0x58] sm:$0xff] }
 0xbd5   : > { %8764 = vmatprep.mubr.f32.mxu0 %v9347_v29  ;;  %v4391_v11 = vpop.permute.xlu1 %4390 }
 0xbd6   : > { %5070 = vadd.xlane.f32.xlu0 %v9335_v1  ;;  %8765 = vmatmul.mubr.f32.gmra.mxu0 %v9343_v12  ;;  %v4314_v37 = vpop.permute.xlu0 %4313  ;;  %v4432_v7 = vadd.f32 %v4391_v11, %v4352_v53  ;;  %v4264_v1 = vld [vmem:[#allocation5 + $0x70] sm:$0xff]  ;;  %v4353_v12 = vmul.f32 %v4304_v0, %v4257_v50  ;;  %v4263_v53 = vld [vmem:[#allocation5 + $0x68] sm:$0xff] }
 0xbd7   : > { %v4360_v16 = vmul.f32 %v13202_v8, %v4264_v1  ;;  %v4355_v52 = vmul.f32 %v4314_v37, %v4259_v61  ;;  %v5022_v1 = vld [vmem:[#allocation4 + $0x180] sm:$0xff] }
 0xbd8   : > { %4449 = vst.msk [vmem:[#allocation5 + $0x30] sm:$0xff] %vm4442_vm4, %v4432_v7  ;;  %v5038_v43 = vmul.f32 %v13129_v4, %v5022_v1  ;;  %v5029_v4 = vld [vmem:[#allocation4 + $0x1b8] sm:$0xff] }
 0xbd9   : > { %v4395_v42 = vpop.permute.xlu1 %4394 }
 0xbda   : > { %5074 = vadd.xlane.f32.xlu0 %v9341_v60  ;;  %v4324_v27 = vpop.permute.xlu0 %4323  ;;  %v4434_v38 = vadd.f32 %v4395_v42, %v4354_v9 }
 0xbdc   : > { %4451 = vst.msk [vmem:[#allocation5 + $0x40] sm:$0xff] %vm4442_vm4, %v4434_v38 }
 0xbdd   : > { %v4399_v57 = vpop.permute.xlu1 %4398 }
 0xbde   : > { %5078 = vadd.xlane.f32.xlu0 %v9345_v17  ;;  %v4334_v18 = vpop.permute.xlu0 %4333  ;;  %v4436_v5 = vadd.f32 %v4399_v57, %v4356_v55 }
 0xbdf   : > { %v4359_v11 = vmul.f32 %v4334_v18, %v4263_v53  ;;  %v5035_v53 = vld [vmem:[#allocation4 + $0x1e8] sm:$0xff] }
 0xbe0   : > { %4453 = vst.msk [vmem:[#allocation5 + $0x50] sm:$0xff] %vm4442_vm4, %v4436_v5 }
 0xbe1   : > { %v4403_v19 = vpop.permute.xlu1 %4402 }
 0xbe2   : > { %5082 = vadd.xlane.f32.xlu0 %v9347_v29  ;;  %v4344_v26 = vpop.permute.xlu0 %4343  ;;  %v4438_v34 = vadd.f32 %v4403_v19, %v4358_v32  ;;  %v4357_v29 = vmul.f32 %v4324_v27, %v4261_v10  ;;  %v5024_v10 = vld [vmem:[#allocation4 + $0x190] sm:$0xff] }
 0xbe3   : > { %v4361_v9 = vmul.f32 %v4344_v26, %v4265_v6 }
 0xbe4   : > { %4455 = vst.msk [vmem:[#allocation5 + $0x60] sm:$0xff] %vm4442_vm4, %v4438_v34 }
 0xbe5   : > { %v4407_v13 = vpop.permute.xlu1 %4406 }
 0xbe6   : > { %v4381_v31 = vpop.permute.xlu0 %4380  ;;  %v4440_v22 = vadd.f32 %v4407_v13, %v4360_v16 }
 0xbe7   : > { %v4427_v24 = vadd.f32 %v4381_v31, %v4347_v35  ;;  %v5025_v35 = vld [vmem:[#allocation4 + $0x198] sm:$0xff] }
 0xbe8   : > { %4457 = vst.msk [vmem:[#allocation5 + $0x70] sm:$0xff] %vm4442_vm4, %v4440_v22  ;;  %v5041_v22 = vmul.f32 %v13141_v23, %v5025_v35 }
 0xbe9   : > { %4444 = vst.msk [vmem:[#allocation5 + $0x8] sm:$0xff] %vm4442_vm4, %v4427_v24  ;;  %v13236_v38 = vpop.permute.xlu1 %5334 }
 0xbea   : > { %v4385_v62 = vpop.permute.xlu0 %4384 }
 0xbeb   : > { %v4429_v60 = vadd.f32 %v4385_v62, %v4349_v3 }
 0xbed   : > { %4446 = vst.msk [vmem:[#allocation5 + $0x18] sm:$0xff] %vm4442_vm4, %v4429_v60  ;;  %v13238_v27 = vpop.permute.xlu1 %5339  ;;  %v5043_v60 = vmul.f32 %v13148_v14, %v5027_v44 }
 0xbee   : > { %v4389_v8 = vpop.permute.xlu0 %4388 }
 0xbef   : > { %v4431_v59 = vadd.f32 %v4389_v8, %v4351_v46  ;;  %v5045_v8 = vmul.f32 %v13155_v20, %v5029_v4 }
 0xbf1   : > { %4448 = vst.msk [vmem:[#allocation5 + $0x28] sm:$0xff] %vm4442_vm4, %v4431_v59  ;;  %v13240_v49 = vpop.permute.xlu1 %5349 }
 0xbf2   : > { %v4393_v56 = vpop.permute.xlu0 %4392 }
 0xbf3   : > { %v4433_v17 = vadd.f32 %v4393_v56, %v4353_v12  ;;  %v5031_v12 = vld [vmem:[#allocation4 + $0x1c8] sm:$0xff] }
 0xbf4   : > { %v5047_v56 = vmul.f32 %v13159_v15, %v5031_v12  ;;  %v5040_v15 = vmul.f32 %v13081_v41, %v5024_v10  ;;  %v5036_v12 = vld [vmem:[#allocation4 + $0x1f0] sm:$0xff] }
 0xbf5   : > { %4450 = vst.msk [vmem:[#allocation5 + $0x38] sm:$0xff] %vm4442_vm4, %v4433_v17  ;;  %v13242_v55 = vpop.permute.xlu1 %5359 }
 0xbf6   : > { %v4397_v63 = vpop.permute.xlu0 %4396 }
 0xbf7   : > { %v4435_v39 = vadd.f32 %v4397_v63, %v4355_v52  ;;  %v5023_v52 = vld [vmem:[#allocation4 + $0x188] sm:$0xff] }
 0xbf8   : > { %v5039_v63 = vmul.f32 %v13073_v58, %v5023_v52  ;;  %v5051_v58 = vmul.f32 %v13167_v33, %v5035_v53 }
 0xbf9   : > { %4452 = vst.msk [vmem:[#allocation5 + $0x48] sm:$0xff] %vm4442_vm4, %v4435_v39  ;;  %v13246_v18 = vpop.permute.xlu1 %5369  ;;  %v5033_v39 = vld [vmem:[#allocation4 + $0x1d8] sm:$0xff] }
 0xbfa   : > { %v4401_v30 = vpop.permute.xlu0 %4400 }
 0xbfb   : > { %v4437_v36 = vadd.f32 %v4401_v30, %v4357_v29  ;;  %v5049_v30 = vmul.f32 %v13163_v40, %v5033_v39  ;;  %v5037_v40 = vld [vmem:[#allocation4 + $0x1f8] sm:$0xff] }
 0xbfc   : > { %v5053_v41 = vmul.f32 %v13173_v54, %v5037_v40 }
 0xbfd   : > { %4454 = vst.msk [vmem:[#allocation5 + $0x58] sm:$0xff] %vm4442_vm4, %v4437_v36  ;;  %v13250_v2 = vpop.permute.xlu1 %5379 }
 0xbfe   : > { %v4405_v0 = vpop.permute.xlu0 %4404 }
 0xbff   : > { %v4439_v7 = vadd.f32 %v4405_v0, %v4359_v11 }
 0xc01   : > { %4456 = vst.msk [vmem:[#allocation5 + $0x68] sm:$0xff] %vm4442_vm4, %v4439_v7  ;;  %v13254_v19 = vpop.permute.xlu1 %5389  ;;  %v5026_v7 = vld [vmem:[#allocation4 + $0x1a0] sm:$0xff] }
 0xc02   : > { %v4409_v37 = vpop.permute.xlu0 %4408 }
 0xc03   : > { %v4441_v42 = vadd.f32 %v4409_v37, %v4361_v9  ;;  %v5042_v37 = vmul.f32 %v13089_v25, %v5026_v7  ;;  %v5312_v7 = vld [vmem:[#allocation5 + $0x8] sm:$0xff] }
 0xc05   : > { %4458 = vst.msk [vmem:[#allocation5 + $0x78] sm:$0xff] %vm4442_vm4, %v4441_v42  ;;  %v13258_v34 = vpop.permute.xlu1 %5399 }
 0xc06   : > { %v13244_v57 = vpop.permute.xlu0 %5329 }
 0xc0a   : > { %v13248_v5 = vpop.permute.xlu0 %5344 }
 0xc0e   : > { %v13252_v32 = vpop.permute.xlu0 %5354 }
 0xc12   : > { %v13256_v26 = vpop.permute.xlu0 %5364 }
 0xc16   : > { %v13261_v13 = vpop.permute.xlu0 %5374 }
 0xc1a   : > { %v13265_v62 = vpop.permute.xlu0 %5384 }
 0xc1e   : > { %v13271_v50 = vpop.permute.xlu0 %5394 }
 0xc22   : > { %v13275_v61 = vpop.permute.xlu0 %5404 }
 0xc37   : > { %v5055_v16 = vpop.xlane.xlu1 %5054 }
 0xc38   : > { %v5086_v31 = vadd.f32 %v5055_v16, %v5038_v43  ;;  %v5028_v43 = vld [vmem:[#allocation4 + $0x1b0] sm:$0xff] }
 0xc3a   : > { %5102 = vst.msk [vmem:[#allocation4 + $0x180] sm:$0xff] %vm2015_vm2, %v5086_v31  ;;  %v5044_v31 = vmul.f32 %v13100_v21, %v5028_v43  ;;  %v5314_v43 = vld [vmem:[#allocation5 + $0x18] sm:$0xff] }
 0xc3b   : > { %v5061_v24 = vpop.xlane.xlu1 %5060 }
 0xc3c   : > { %v5089_v3 = vadd.f32 %v5061_v24, %v5041_v22  ;;  %v5030_v24 = vld [vmem:[#allocation4 + $0x1c0] sm:$0xff] }
 0xc3d   : > { %v5046_v25 = vmul.f32 %v13108_v48, %v5030_v24 }
 0xc3e   : > { %5105 = vst.msk [vmem:[#allocation4 + $0x198] sm:$0xff] %vm2015_vm2, %v5089_v3 }
 0xc3f   : > { %v5065_v51 = vpop.xlane.xlu1 %5064 }
 0xc40   : > { %v5091_v46 = vadd.f32 %v5065_v51, %v5043_v60  ;;  %v5032_v60 = vld [vmem:[#allocation4 + $0x1d0] sm:$0xff] }
 0xc41   : > { %v5048_v54 = vmul.f32 %v13116_v45, %v5032_v60  ;;  %v5052_v45 = vmul.f32 %v13134_v47, %v5036_v12  ;;  %v5319_v12 = vld [vmem:[#allocation5 + $0x40] sm:$0xff] }
 0xc42   : > { %5107 = vst.msk [vmem:[#allocation4 + $0x1a8] sm:$0xff] %vm2015_vm2, %v5091_v46  ;;  %v5034_v46 = vld [vmem:[#allocation4 + $0x1e0] sm:$0xff] }
 0xc43   : > { %v5069_v59 = vpop.xlane.xlu1 %5068 }
 0xc44   : > { %v5093_v23 = vadd.f32 %v5069_v59, %v5045_v8  ;;  %v5050_v59 = vmul.f32 %v13124_v28, %v5034_v46 }
 0xc46   : > { %5109 = vst.msk [vmem:[#allocation4 + $0x1b8] sm:$0xff] %vm2015_vm2, %v5093_v23 }
 0xc4a   : > { %v5073_v17 = vpop.xlane.xlu1 %5072 }
 0xc4b   : > { %v5095_v14 = vadd.f32 %v5073_v17, %v5047_v56 }
 0xc4d   : > { %5111 = vst.msk [vmem:[#allocation4 + $0x1c8] sm:$0xff] %vm2015_vm2, %v5095_v14 }
 0xc4e   : > { %v5057_v20 = vpop.xlane.xlu0 %5056 }
 0xc4f   : > { %v5087_v29 = vadd.f32 %v5057_v20, %v5039_v63 }
 0xc51   : > { %5103 = vst.msk [vmem:[#allocation4 + $0x188] sm:$0xff] %vm2015_vm2, %v5087_v29 }
 0xc52   : > { %v5077_v36 = vpop.xlane.xlu1 %5076  ;;  %v5059_v0 = vpop.xlane.xlu0 %5058 }
 0xc53   : > { %v5097_v11 = vadd.f32 %v5077_v36, %v5049_v30  ;;  %v5088_v6 = vadd.f32 %v5059_v0, %v5040_v15 }
 0xc55   : > { %5113 = vst.msk [vmem:[#allocation4 + $0x1d8] sm:$0xff] %vm2015_vm2, %v5097_v11  ;;  %5104 = vst.msk [vmem:[#allocation4 + $0x190] sm:$0xff] %vm2015_vm2, %v5088_v6  ;;  %v5408_v6 = vmul.f32 %v13236_v38, %v5312_v7 }
 0xc56   : > { %v5081_v9 = vpop.xlane.xlu1 %5080 }
 0xc57   : > { %v5099_v42 = vadd.f32 %v5081_v9, %v5051_v58  ;;  %v5063_v1 = vpop.xlane.xlu0 %5062  ;;  %v5311_v58 = vld [vmem:[#allocation5] sm:$0xff] }
 0xc58   : > { %v5090_v16 = vadd.f32 %v5063_v1, %v5042_v37  ;;  %v5407_v37 = vmul.f32 %v13244_v57, %v5311_v58  ;;  %v5316_v57 = vld [vmem:[#allocation5 + $0x28] sm:$0xff] }
 0xc59   : > { %5115 = vst.msk [vmem:[#allocation4 + $0x1e8] sm:$0xff] %vm2015_vm2, %v5099_v42  ;;  %v5412_v24 = vmul.f32 %v13252_v32, %v5316_v57 }
 0xc5a   : > { %5106 = vst.msk [vmem:[#allocation4 + $0x1a0] sm:$0xff] %vm2015_vm2, %v5090_v16  ;;  %v5085_v35 = vpop.xlane.xlu1 %5084  ;;  %v5410_v16 = vmul.f32 %v13248_v5, %v5314_v43 }
 0xc5b   : > { %v5101_v33 = vadd.f32 %v5085_v35, %v5053_v41  ;;  %v5067_v22 = vpop.xlane.xlu0 %5066  ;;  %v5313_v41 = vld [vmem:[#allocation5 + $0x10] sm:$0xff] }
 0xc5c   : > { %v5092_v44 = vadd.f32 %v5067_v22, %v5044_v31  ;;  %v5409_v31 = vmul.f32 %v13238_v27, %v5313_v41  ;;  %v5318_v27 = vld [vmem:[#allocation5 + $0x38] sm:$0xff] }
 0xc5d   : > { %5117 = vst.msk [vmem:[#allocation4 + $0x1f8] sm:$0xff] %vm2015_vm2, %v5101_v33 }
 0xc5e   : > { %5108 = vst.msk [vmem:[#allocation4 + $0x1b0] sm:$0xff] %vm2015_vm2, %v5092_v44  ;;  %v5315_v44 = vld [vmem:[#allocation5 + $0x20] sm:$0xff] }
 0xc5f   : > { %v5071_v3 = vpop.xlane.xlu0 %5070 }
 0xc60   : > { %v5094_v51 = vadd.f32 %v5071_v3, %v5046_v25  ;;  %v5411_v3 = vmul.f32 %v13240_v49, %v5315_v44  ;;  %v5320_v49 = vld [vmem:[#allocation5 + $0x48] sm:$0xff] }
 0xc62   : > { %5110 = vst.msk [vmem:[#allocation4 + $0x1c0] sm:$0xff] %vm2015_vm2, %v5094_v51 }
 0xc63   : > { %v5075_v4 = vpop.xlane.xlu0 %5074 }
 0xc64   : > { %v5096_v21 = vadd.f32 %v5075_v4, %v5048_v54  ;;  %v5414_v54 = vmul.f32 %v13256_v26, %v5318_v27  ;;  %v5317_v4 = vld [vmem:[#allocation5 + $0x30] sm:$0xff] }
 0xc65   : > { %v8745_v8 = vpop.f32.mrf.mxu0 }
 0xc66   : > { %5112 = vst.msk [vmem:[#allocation4 + $0x1d0] sm:$0xff] %vm2015_vm2, %v5096_v21  ;;  %5441 = vrot.lane.b32.xlu0 %v8745_v8, %s9952_s0  ;;  %v5413_v21 = vmul.f32 %v13242_v55, %v5317_v4  ;;  %v5322_v55 = vld [vmem:[#allocation5 + $0x58] sm:$0xff] }
 0xc67   : > { %v5079_v23 = vpop.xlane.xlu0 %5078  ;;  %v5232_v56 = vpop.f32.mrf.mxu0 }
 0xc68   : > { %v5098_v48 = vadd.f32 %v5079_v23, %v5050_v59  ;;  %5439 = vrot.lane.b32.xlu1 %v5232_v56, %s9952_s0  ;;  %v5416_v23 = vmul.f32 %v13261_v13, %v5320_v49  ;;  %v5415_v56 = vmul.f32 %v13246_v18, %v5319_v12  ;;  %v5324_v13 = vld [vmem:[#allocation5 + $0x68] sm:$0xff] }
 0xc6a   : > { %5114 = vst.msk [vmem:[#allocation4 + $0x1e0] sm:$0xff] %vm2015_vm2, %v5098_v48 }
 0xc6b   : > { %v5083_v17 = vpop.xlane.xlu0 %5082 }
 0xc6c   : > { %v5100_v14 = vadd.f32 %v5083_v17, %v5052_v45 }
 0xc6d   : > { %v8748_v52 = vpop.f32.mrf.mxu0 }
 0xc6e   : > { %5116 = vst.msk [vmem:[#allocation4 + $0x1f0] sm:$0xff] %vm2015_vm2, %v5100_v14  ;;  %5445 = vrot.lane.b32.xlu0 %v8748_v52, %s9952_s0  ;;  %v5418_v14 = vmul.f32 %v13265_v62, %v5322_v55  ;;  %v5321_v52 = vld [vmem:[#allocation5 + $0x50] sm:$0xff]  ;;  %v5326_v62 = vld [vmem:[#allocation5 + $0x78] sm:$0xff] }
 0xc6f   : > { %v5242_v28 = vpop.f32.mrf.mxu0 }
 0xc70   : > { %5443 = vrot.lane.b32.xlu1 %v5242_v28, %s9952_s0 }
 0xc75   : > { %v8751_v63 = vpop.f32.mrf.mxu0 }
 0xc76   : > { %5449 = vrot.lane.b32.xlu0 %v8751_v63, %s9952_s0  ;;  %v5417_v63 = vmul.f32 %v13250_v2, %v5321_v52 }
 0xc77   : > { %v5252_v39 = vpop.f32.mrf.mxu0 }
 0xc78   : > { %5447 = vrot.lane.b32.xlu1 %v5252_v39, %s9952_s0 }
 0xc7e   : > { %v8754_v20 = vpop.f32.mrf.mxu0 }
 0xc7f   : > { %5453 = vrot.lane.b32.xlu0 %v8754_v20, %s9952_s0 }
 0xc80   : > { %v5262_v47 = vpop.f32.mrf.mxu0 }
 0xc81   : > { %5451 = vrot.lane.b32.xlu1 %v5262_v47, %s9952_s0  ;;  %v5420_v47 = vmul.f32 %v13271_v50, %v5324_v13 }
 0xc86   : > { %v8757_v10 = vpop.f32.mrf.mxu0 }
 0xc87   : > { %5457 = vrot.lane.b32.xlu0 %v8757_v10, %s9952_s0  ;;  %v5323_v10 = vld [vmem:[#allocation5 + $0x60] sm:$0xff] }
 0xc88   : > { %v5272_v29 = vpop.f32.mrf.mxu0 }
 0xc89   : > { %5455 = vrot.lane.b32.xlu1 %v5272_v29, %s9952_s0 }
 0xc8e   : > { %v8760_v30 = vpop.f32.mrf.mxu0 }
 0xc8f   : > { %5461 = vrot.lane.b32.xlu0 %v8760_v30, %s9952_s0  ;;  %v5419_v30 = vmul.f32 %v13254_v19, %v5323_v10 }
 0xc90   : > { %v5282_v36 = vpop.f32.mrf.mxu0 }
 0xc91   : > { %5459 = vrot.lane.b32.xlu1 %v5282_v36, %s9952_s0 }
 0xc92   : > { %v8763_v15 = vpop.f32.mrf.mxu0 }
 0xc93   : > { %5465 = vrot.lane.b32.xlu0 %v8763_v15, %s9952_s0 }
 0xc94   : > { %v5292_v53 = vpop.f32.mrf.mxu0 }
 0xc95   : > { %5463 = vrot.lane.b32.xlu1 %v5292_v53, %s9952_s0  ;;  %v5422_v53 = vmul.f32 %v13275_v61, %v5326_v62 }
 0xc96   : > { %v8766_v11 = vpop.f32.mrf.mxu0 }
 0xc97   : > { %5469 = vrot.lane.b32.xlu0 %v8766_v11, %s9952_s0  ;;  %v5325_v11 = vld [vmem:[#allocation5 + $0x70] sm:$0xff] }
 0xc98   : > { %v5302_v0 = vpop.f32.mrf.mxu0  ;;  %v5421_v50 = vmul.f32 %v13258_v34, %v5325_v11 }
 0xc99   : > { %5467 = vrot.lane.b32.xlu1 %v5302_v0, %s9952_s0 }
 0xcd8   : > { %v5442_v9 = vpop.permute.xlu0 %5441 }
 0xcd9   : > { %v5488_v40 = vadd.f32 %v5442_v9, %v5408_v6 }
 0xcda   : > { %v5440_v42 = vpop.permute.xlu1 %5439 }
 0xcdb   : > { %5505 = vst.msk [vmem:[#allocation5 + $0x8] sm:$0xff] %vm5503_vm5, %v5488_v40  ;;  %v5487_v1 = vadd.f32 %v5440_v42, %v5407_v37 }
 0xcdd   : > { %5504 = vst.msk [vmem:[#allocation5] sm:$0xff] %vm5503_vm5, %v5487_v1 }
 0xce0   : > { %v5446_v35 = vpop.permute.xlu0 %5445 }
 0xce1   : > { %v5490_v38 = vadd.f32 %v5446_v35, %v5410_v16 }
 0xce2   : > { %v5444_v33 = vpop.permute.xlu1 %5443 }
 0xce3   : > { %5507 = vst.msk [vmem:[#allocation5 + $0x18] sm:$0xff] %vm5503_vm5, %v5490_v38  ;;  %v5489_v22 = vadd.f32 %v5444_v33, %v5409_v31 }
 0xce5   : > { %5506 = vst.msk [vmem:[#allocation5 + $0x10] sm:$0xff] %vm5503_vm5, %v5489_v22 }
 0xce8   : > { %v5450_v25 = vpop.permute.xlu0 %5449 }
 0xce9   : > { %v5492_v60 = vadd.f32 %v5450_v25, %v5412_v24 }
 0xcea   : > { %v5448_v5 = vpop.permute.xlu1 %5447 }
 0xceb   : > { %5509 = vst.msk [vmem:[#allocation5 + $0x28] sm:$0xff] %vm5503_vm5, %v5492_v60  ;;  %v5491_v51 = vadd.f32 %v5448_v5, %v5411_v3 }
 0xced   : > { %5508 = vst.msk [vmem:[#allocation5 + $0x20] sm:$0xff] %vm5503_vm5, %v5491_v51 }
 0xcf1   : > { %v5454_v46 = vpop.permute.xlu0 %5453 }
 0xcf2   : > { %v5494_v8 = vadd.f32 %v5454_v46, %v5414_v54 }
 0xcf3   : > { %v5452_v32 = vpop.permute.xlu1 %5451 }
 0xcf4   : > { %5511 = vst.msk [vmem:[#allocation5 + $0x38] sm:$0xff] %vm5503_vm5, %v5494_v8  ;;  %v5493_v59 = vadd.f32 %v5452_v32, %v5413_v21 }
 0xcf6   : > { %5510 = vst.msk [vmem:[#allocation5 + $0x30] sm:$0xff] %vm5503_vm5, %v5493_v59 }
 0xcf9   : > { %v5458_v48 = vpop.permute.xlu0 %5457 }
 0xcfa   : > { %v5496_v45 = vadd.f32 %v5458_v48, %v5416_v23 }
 0xcfb   : > { %v5456_v26 = vpop.permute.xlu1 %5455 }
 0xcfc   : > { %5513 = vst.msk [vmem:[#allocation5 + $0x48] sm:$0xff] %vm5503_vm5, %v5496_v45  ;;  %v5495_v17 = vadd.f32 %v5456_v26, %v5415_v56 }
 0xcfe   : > { %5512 = vst.msk [vmem:[#allocation5 + $0x40] sm:$0xff] %vm5503_vm5, %v5495_v17 }
 0xd01   : > { %v5462_v28 = vpop.permute.xlu0 %5461 }
 0xd02   : > { %v5498_v39 = vadd.f32 %v5462_v28, %v5418_v14 }
 0xd03   : > { %v5460_v20 = vpop.permute.xlu1 %5459 }
 0xd04   : > { %5515 = vst.msk [vmem:[#allocation5 + $0x58] sm:$0xff] %vm5503_vm5, %v5498_v39  ;;  %v5497_v18 = vadd.f32 %v5460_v20, %v5417_v63 }
 0xd05   : > { %v5466_v29 = vpop.permute.xlu0 %5465 }
 0xd06   : > { %5514 = vst.msk [vmem:[#allocation5 + $0x50] sm:$0xff] %vm5503_vm5, %v5497_v18  ;;  %v5500_v36 = vadd.f32 %v5466_v29, %v5420_v47 }
 0xd07   : > { %v5464_v15 = vpop.permute.xlu1 %5463 }
 0xd08   : > { %5517 = vst.msk [vmem:[#allocation5 + $0x68] sm:$0xff] %vm5503_vm5, %v5500_v36  ;;  %v5499_v2 = vadd.f32 %v5464_v15, %v5419_v30 }
 0xd09   : > { %v5470_v0 = vpop.permute.xlu0 %5469 }
 0xd0a   : > { %5516 = vst.msk [vmem:[#allocation5 + $0x60] sm:$0xff] %vm5503_vm5, %v5499_v2  ;;  %v5502_v7 = vadd.f32 %v5470_v0, %v5422_v53  ;;  %5539 = sbr.rel (%p7674_p5) target bundleno = 4839 (0x12e7), region = 128 }
 0xd0b   : > { %v5468_v6 = vpop.permute.xlu1 %5467 }
 0xd0c   : > { %5519 = vst.msk [vmem:[#allocation5 + $0x78] sm:$0xff] %vm5503_vm5, %v5502_v7  ;;  %v5501_v19 = vadd.f32 %v5468_v6, %v5421_v50 }
 0xd0e   : > { %5518 = vst.msk [vmem:[#allocation5 + $0x70] sm:$0xff] %vm5503_vm5, %v5501_v19 }
 0xd0f   : > { %v5558_v61 = vld [vmem:[#allocation4 + $0x10] sm:$0xff]  ;;  %v5556_v58 = vld [vmem:[#allocation4] sm:$0xff]  ;;  %v5559_v9 = vld [vmem:[#allocation4 + $0x18] sm:$0xff]  ;;  %v9955_v37 = vmov 0  }
 0xd10   : > { %9349 = vset.pattern.permute.xlu1 %v9955_v37  ;;  %9348 = vset.pattern.permute.xlu0 %v9955_v37  ;;  %9350 = vrcp.f32 %v5558_v61  ;;  %v5557_v34 = vld [vmem:[#allocation4 + $0x8] sm:$0xff]  ;;  %v5716_v42 = vld [vmem:[#allocation4 + $0x80] sm:$0xff]  ;;  %v5719_v16 = vld [vmem:[#allocation4 + $0x98] sm:$0xff] }
 0xd11   : > { %9352 = vrcp.f32 %v5556_v58  ;;  %v5717_v40 = vld [vmem:[#allocation4 + $0x88] sm:$0xff]  ;;  %v5560_v43 = vld [vmem:[#allocation4 + $0x20] sm:$0xff]  ;;  %v5718_v41 = vld [vmem:[#allocation4 + $0x90] sm:$0xff] }
 0xd12   : > { %9354 = vrcp.f32 %v5559_v9  ;;  %v5561_v1 = vld [vmem:[#allocation4 + $0x28] sm:$0xff]  ;;  %v5876_v57 = vld [vmem:[#allocation4 + $0x100] sm:$0xff]  ;;  %v5563_v44 = vld [vmem:[#allocation4 + $0x38] sm:$0xff] }
 0xd13   : > { %9356 = vrcp.f32 %v5557_v34  ;;  %v5877_v33 = vld [vmem:[#allocation4 + $0x108] sm:$0xff]  ;;  %v5562_v3 = vld [vmem:[#allocation4 + $0x30] sm:$0xff]  ;;  %v5720_v27 = vld [vmem:[#allocation4 + $0xa0] sm:$0xff] }
 0xd14   : > { %9358 = vrcp.f32 %v5717_v40  ;;  %v5721_v5 = vld [vmem:[#allocation4 + $0xa8] sm:$0xff]  ;;  %v6211_v54 = vld [vmem:[#allocation17 + $0x78] sm:$0xff]  ;;  %v6210_v21 = vld [vmem:[#allocation17 + $0x70] sm:$0xff] }
 0xd15   : > { %9360 = vrcp.f32 %v5716_v42  ;;  %8767 = vmatprep.subr.mxu0 %v6211_v54  ;;  %v5879_v46 = vld [vmem:[#allocation4 + $0x118] sm:$0xff]  ;;  %v5878_v32 = vld [vmem:[#allocation4 + $0x110] sm:$0xff]  ;;  %v6209_v59 = vld [vmem:[#allocation17 + $0x68] sm:$0xff] }
 0xd16   : > { %9362 = vrcp.f32 %v5561_v1  ;;  %8768 = vmatpush3.msra.mxu0 %v6211_v54  ;;  %v6037_v23 = vld [vmem:[#allocation4 + $0x188] sm:$0xff]  ;;  %v6208_v12 = vld [vmem:[#allocation17 + $0x60] sm:$0xff]  ;;  %v6207_v45 = vld [vmem:[#allocation17 + $0x58] sm:$0xff] }
 0xd17   : > { %9364 = vrcp.f32 %v5560_v43  ;;  %8769 = vmatprep.subr.mxu0 %v6210_v21  ;;  %v6036_v56 = vld [vmem:[#allocation4 + $0x180] sm:$0xff]  ;;  %v5565_v17 = vld [vmem:[#allocation4 + $0x48] sm:$0xff]  ;;  %v6206_v55 = vld [vmem:[#allocation17 + $0x50] sm:$0xff] }
 0xd18   : > { %9366 = vrcp.f32 %v5719_v16  ;;  %8770 = vmatpush3.msra.mxu0 %v6210_v21  ;;  %v5564_v52 = vld [vmem:[#allocation4 + $0x40] sm:$0xff]  ;;  %v6205_v28 = vld [vmem:[#allocation17 + $0x48] sm:$0xff]  ;;  %v5723_v39 = vld [vmem:[#allocation4 + $0xb8] sm:$0xff] }
 0xd19   : > { %9368 = vrcp.f32 %v5718_v41  ;;  %8771 = vmatprep.subr.mxu0 %v6209_v59  ;;  %v6204_v13 = vld [vmem:[#allocation17 + $0x40] sm:$0xff]  ;;  %v5722_v47 = vld [vmem:[#allocation4 + $0xb0] sm:$0xff]  ;;  %v6203_v18 = vld [vmem:[#allocation17 + $0x38] sm:$0xff] }
 0xd1a   : > { %9370 = vrcp.f32 %v5877_v33  ;;  %8772 = vmatpush3.msra.mxu0 %v6209_v59  ;;  %v5881_v29 = vld [vmem:[#allocation4 + $0x128] sm:$0xff]  ;;  %v6202_v30 = vld [vmem:[#allocation17 + $0x30] sm:$0xff]  ;;  %v5880_v62 = vld [vmem:[#allocation4 + $0x120] sm:$0xff] }
 0xd1b   : > { %9372 = vrcp.f32 %v5876_v57  ;;  %8773 = vmatprep.subr.mxu0 %v6208_v12  ;;  %v6201_v15 = vld [vmem:[#allocation17 + $0x28] sm:$0xff]  ;;  %v6039_v2 = vld [vmem:[#allocation4 + $0x198] sm:$0xff]  ;;  %v6200_v11 = vld [vmem:[#allocation17 + $0x20] sm:$0xff] }
 0xd1c   : > { %9374 = vrcp.f32 %v5563_v44  ;;  %8774 = vmatpush3.msra.mxu0 %v6208_v12  ;;  %v6038_v50 = vld [vmem:[#allocation4 + $0x190] sm:$0xff]  ;;  %v6199_v7 = vld [vmem:[#allocation17 + $0x18] sm:$0xff]  ;;  %v6197_v37 = vld [vmem:[#allocation17 + $0x8] sm:$0xff] }
 0xd1d   : > { %v9351_v35 = vpop.eup %9350  ;;  %9376 = vrcp.f32 %v5562_v3  ;;  %8775 = vmatprep.subr.mxu0 %v6207_v45  ;;  %v5567_v19 = vld [vmem:[#allocation4 + $0x58] sm:$0xff]  ;;  %v6198_v61 = vld [vmem:[#allocation17 + $0x10] sm:$0xff]  ;;  %v5725_v40 = vld [vmem:[#allocation4 + $0xc8] sm:$0xff] }
 0xd1e   : > { %v9353_v31 = vpop.eup %9352  ;;  %5600 = vperm.xlu1 %9349, %v9351_v35   ;;  %9378 = vrcp.f32 %v5721_v5  ;;  %8776 = vmatpush3.msra.mxu0 %v6207_v45  ;;  %v5566_v9 = vld [vmem:[#allocation4 + $0x50] sm:$0xff]  ;;  %v6196_v42 = vld [vmem:[#allocation17] sm:$0xff]  ;;  %v5883_v41 = vld [vmem:[#allocation4 + $0x138] sm:$0xff] }
 0xd1f   : > { %v9355_v38 = vpop.eup %9354  ;;  %5590 = vperm.xlu0 %9348, %v9353_v31   ;;  %9380 = vrcp.f32 %v5720_v27  ;;  %8777 = vmatprep.subr.mxu0 %v6206_v55  ;;  %v5724_v43 = vld [vmem:[#allocation4 + $0xc0] sm:$0xff]  ;;  %v5882_v31 = vld [vmem:[#allocation4 + $0x130] sm:$0xff]  ;;  %v6041_v33 = vld [vmem:[#allocation4 + $0x1a8] sm:$0xff] }
 0xd20   : > { %v9357_v22 = vpop.eup %9356  ;;  %9382 = vrcp.f32 %v5879_v46  ;;  %8778 = vmatpush3.msra.mxu0 %v6206_v55  ;;  %v6040_v57 = vld [vmem:[#allocation4 + $0x1a0] sm:$0xff]  ;;  %v5569_v44 = vld [vmem:[#allocation4 + $0x68] sm:$0xff]  ;;  %v5727_v5 = vld [vmem:[#allocation4 + $0xd8] sm:$0xff] }
 0xd21   : > { %v9359_v24 = vpop.eup %9358  ;;  %9384 = vrcp.f32 %v5878_v32  ;;  %8779 = vmatprep.subr.mxu0 %v6205_v28  ;;  %v5568_v3 = vld [vmem:[#allocation4 + $0x60] sm:$0xff]  ;;  %v5726_v27 = vld [vmem:[#allocation4 + $0xd0] sm:$0xff]  ;;  %v6043_v32 = vld [vmem:[#allocation4 + $0x1b8] sm:$0xff] }
 0xd22   : > { %5605 = vperm.xlu1 %9349, %v9355_v38   ;;  %v9361_v25 = vpop.eup %9360  ;;  %9386 = vrcp.f32 %v6037_v23  ;;  %8780 = vmatpush3.msra.mxu0 %v6205_v28  ;;  %v5884_v21 = vld [vmem:[#allocation4 + $0x140] sm:$0xff]  ;;  %v5571_v12 = vld [vmem:[#allocation4 + $0x78] sm:$0xff] }
 0xd23   : > { %5595 = vperm.xlu0 %9348, %v9357_v22   ;;  %v9363_v60 = vpop.eup %9362  ;;  %9388 = vrcp.f32 %v6036_v56  ;;  %8781 = vmatprep.subr.mxu0 %v6204_v13  ;;  %v5570_v56 = vld [vmem:[#allocation4 + $0x70] sm:$0xff]  ;;  %v5728_v55 = vld [vmem:[#allocation4 + $0xe0] sm:$0xff] }
 0xd24   : > { %v9365_v51 = vpop.eup %9364  ;;  %9390 = vrcp.f32 %v5565_v17  ;;  %8782 = vmatpush3.msra.mxu0 %v6204_v13  ;;  %v6045_v13 = vld [vmem:[#allocation4 + $0x1c8] sm:$0xff] }
 0xd25   : > { %v9367_v4 = vpop.eup %9366  ;;  %9392 = vrcp.f32 %v5564_v52  ;;  %8783 = vmatprep.subr.mxu0 %v6203_v18  ;;  %v5887_v52 = vld [vmem:[#allocation4 + $0x158] sm:$0xff] }
 0xd26   : > { %5755 = vperm.xlu1 %9349, %v9359_v24   ;;  %v9369_v8 = vpop.eup %9368  ;;  %9394 = vrcp.f32 %v5723_v39  ;;  %8784 = vmatpush3.msra.mxu0 %v6203_v18 }
 0xd27   : > { %5750 = vperm.xlu0 %9348, %v9361_v25   ;;  %v9371_v49 = vpop.eup %9370  ;;  %9396 = vrcp.f32 %v5722_v47  ;;  %8785 = vmatprep.subr.mxu0 %v6202_v30  ;;  %v6044_v47 = vld [vmem:[#allocation4 + $0x1c0] sm:$0xff] }
 0xd28   : > { %v9373_v48 = vpop.eup %9372  ;;  %8786 = vmatpush3.msra.mxu0 %v6202_v30  ;;  %9398 = vrcp.f32 %v5881_v29  ;;  %v5730_v30 = vld [vmem:[#allocation4 + $0xf0] sm:$0xff] }
 0xd29   : > { %v9375_v26 = vpop.eup %9374  ;;  %8787 = vmatprep.subr.mxu0 %v6201_v15  ;;  %9400 = vrcp.f32 %v5880_v62  ;;  %v5889_v62 = vld [vmem:[#allocation4 + $0x168] sm:$0xff] }
 0xd2a   : > { %5615 = vperm.xlu1 %9349, %v9363_v60   ;;  %v9377_v14 = vpop.eup %9376  ;;  %8788 = vmatpush3.msra.mxu0 %v6201_v15  ;;  %9402 = vrcp.f32 %v6039_v2 }
 0xd2b   : > { %5610 = vperm.xlu0 %9348, %v9365_v51   ;;  %v9379_v63 = vpop.eup %9378  ;;  %8789 = vmatprep.subr.mxu0 %v6200_v11  ;;  %9404 = vrcp.f32 %v6038_v50  ;;  %v6046_v50 = vld [vmem:[#allocation4 + $0x1d0] sm:$0xff] }
 0xd2c   : > { %v9381_v20 = vpop.eup %9380  ;;  %8790 = vmatpush3.msra.mxu0 %v6200_v11  ;;  %9406 = vrcp.f32 %v5567_v19  ;;  %v6047_v11 = vld [vmem:[#allocation4 + $0x1d8] sm:$0xff] }
 0xd2d   : > { %v9383_v10 = vpop.eup %9382  ;;  %8791 = vmatprep.subr.mxu0 %v6199_v7  ;;  %9408 = vrcp.f32 %v5566_v9  ;;  %v6049_v9 = vld [vmem:[#allocation4 + $0x1e8] sm:$0xff] }
 0xd2e   : > { %5765 = vperm.xlu1 %9349, %v9367_v4   ;;  %v9385_v36 = vpop.eup %9384  ;;  %8792 = vmatpush3.msra.mxu0 %v6199_v7  ;;  %9410 = vrcp.f32 %v5725_v40  ;;  %v5885_v4 = vld [vmem:[#allocation4 + $0x148] sm:$0xff] }
 0xd2f   : > { %5760 = vperm.xlu0 %9348, %v9369_v8   ;;  %v9387_v53 = vpop.eup %9386  ;;  %8793 = vmatprep.subr.mxu0 %v6198_v61  ;;  %9412 = vrcp.f32 %v5724_v43  ;;  %v6050_v43 = vld [vmem:[#allocation4 + $0x1f0] sm:$0xff] }
 0xd30   : > { %v9389_v0 = vpop.eup %9388  ;;  %8794 = vmatpush3.msra.mxu0 %v6198_v61  ;;  %9414 = vrcp.f32 %v5883_v41  ;;  %v5890_v61 = vld [vmem:[#allocation4 + $0x170] sm:$0xff] }
 0xd31   : > { %v9391_v6 = vpop.eup %9390  ;;  %8795 = vmatprep.subr.mxu0 %v6197_v37  ;;  %9416 = vrcp.f32 %v5882_v31 }
 0xd32   : > { %5915 = vperm.xlu1 %9349, %v9371_v49   ;;  %v9393_v58 = vpop.eup %9392  ;;  %8796 = vmatpush3.msra.mxu0 %v6197_v37  ;;  %9418 = vrcp.f32 %v6041_v33  ;;  %v6042_v49 = vld [vmem:[#allocation4 + $0x1b0] sm:$0xff] }
 0xd33   : > { %5910 = vperm.xlu0 %9348, %v9373_v48   ;;  %v9395_v34 = vpop.eup %9394  ;;  %8797 = vmatprep.subr.mxu0 %v6196_v42  ;;  %9420 = vrcp.f32 %v6040_v57  ;;  %v5542_v57 = vld [vmem:[#allocation5 + $0x10] sm:$0xff] }
 0xd34   : > { %v9397_v1 = vpop.eup %9396  ;;  %8798 = vmatpush3.msra.mxu0 %v6196_v42  ;;  %9422 = vrcp.f32 %v5569_v44  ;;  %v6051_v42 = vld [vmem:[#allocation4 + $0x1f8] sm:$0xff]  ;;  %v5540_v44 = vld [vmem:[#allocation5] sm:$0xff] }
 0xd35   : > { %v9399_v16 = vpop.eup %9398  ;;  %9424 = vrcp.f32 %v5568_v3 }
 0xd36   : > { %5625 = vperm.xlu1 %9349, %v9375_v26   ;;  %v9401_v35 = vpop.eup %9400  ;;  %9426 = vrcp.f32 %v5727_v5  ;;  %v5729_v26 = vld [vmem:[#allocation4 + $0xe8] sm:$0xff] }
 0xd37   : > { %5620 = vperm.xlu0 %9348, %v9377_v14   ;;  %v9403_v38 = vpop.eup %9402  ;;  %9428 = vrcp.f32 %v5726_v27  ;;  %v5541_v27 = vld [vmem:[#allocation5 + $0x8] sm:$0xff] }
 0xd38   : > { %v9405_v22 = vpop.eup %9404  ;;  %9430 = vrcp.f32 %v5885_v4 }
 0xd39   : > { %v9407_v24 = vpop.eup %9406  ;;  %9432 = vrcp.f32 %v5884_v21 }
 0xd3a   : > { %5775 = vperm.xlu1 %9349, %v9379_v63   ;;  %v9409_v25 = vpop.eup %9408  ;;  %9434 = vrcp.f32 %v6043_v32  ;;  %v5886_v63 = vld [vmem:[#allocation4 + $0x150] sm:$0xff] }
 0xd3b   : > { %5770 = vperm.xlu0 %9348, %v9381_v20   ;;  %v9411_v60 = vpop.eup %9410  ;;  %9436 = vrcp.f32 %v6042_v49 }
 0xd3c   : > { %v9413_v51 = vpop.eup %9412  ;;  %9438 = vrcp.f32 %v5571_v12 }
 0xd3d   : > { %v9415_v54 = vpop.eup %9414  ;;  %9440 = vrcp.f32 %v5570_v56 }
 0xd3e   : > { %5925 = vperm.xlu1 %9349, %v9383_v10   ;;  %v9417_v46 = vpop.eup %9416  ;;  %9442 = vrcp.f32 %v5729_v26  ;;  %v5731_v10 = vld [vmem:[#allocation4 + $0xf8] sm:$0xff] }
 0xd3f   : > { %5920 = vperm.xlu0 %9348, %v9385_v36   ;;  %v9419_v8 = vpop.eup %9418  ;;  %9444 = vrcp.f32 %v5728_v55 }
 0xd40   : > { %v9421_v59 = vpop.eup %9420  ;;  %9446 = vrcp.f32 %v5887_v52 }
 0xd41   : > { %v9423_v23 = vpop.eup %9422  ;;  %9448 = vrcp.f32 %v5886_v63 }
 0xd42   : > { %6075 = vperm.xlu1 %9349, %v9387_v53   ;;  %v9425_v48 = vpop.eup %9424  ;;  %9450 = vrcp.f32 %v6045_v13  ;;  %v5888_v53 = vld [vmem:[#allocation4 + $0x160] sm:$0xff] }
 0xd43   : > { %6070 = vperm.xlu0 %9348, %v9389_v0   ;;  %v9427_v45 = vpop.eup %9426  ;;  %9452 = vrcp.f32 %v6044_v47 }
 0xd44   : > { %v9429_v17 = vpop.eup %9428  ;;  %9454 = vrcp.f32 %v5731_v10 }
 0xd45   : > { %v9431_v14 = vpop.eup %9430  ;;  %9456 = vrcp.f32 %v5730_v30  ;;  %v5546_v30 = vld [vmem:[#allocation5 + $0x30] sm:$0xff] }
 0xd46   : > { %5635 = vperm.xlu1 %9349, %v9391_v6   ;;  %v9433_v28 = vpop.eup %9432  ;;  %9458 = vrcp.f32 %v5889_v62  ;;  %v5891_v6 = vld [vmem:[#allocation4 + $0x178] sm:$0xff] }
 0xd47   : > { %5630 = vperm.xlu0 %9348, %v9393_v58   ;;  %v9435_v39 = vpop.eup %9434  ;;  %9460 = vrcp.f32 %v5888_v53 }
 0xd48   : > { %v9437_v20 = vpop.eup %9436  ;;  %9462 = vrcp.f32 %v6047_v11 }
 0xd49   : > { %v9439_v18 = vpop.eup %9438  ;;  %9464 = vrcp.f32 %v6046_v50 }
 0xd4a   : > { %5785 = vperm.xlu1 %9349, %v9395_v34   ;;  %v9441_v29 = vpop.eup %9440  ;;  %9466 = vrcp.f32 %v5891_v6  ;;  %v6048_v34 = vld [vmem:[#allocation4 + $0x1e0] sm:$0xff] }
 0xd4b   : > { %5780 = vperm.xlu0 %9348, %v9397_v1   ;;  %v9443_v36 = vpop.eup %9442  ;;  %9468 = vrcp.f32 %v5890_v61 }
 0xd4c   : > { %v9445_v15 = vpop.eup %9444  ;;  %9470 = vrcp.f32 %v6049_v9 }
 0xd4d   : > { %v9447_v2 = vpop.eup %9446  ;;  %9472 = vrcp.f32 %v6048_v34 }
 0xd4e   : > { %5935 = vperm.xlu1 %9349, %v9399_v16   ;;  %v9449_v0 = vpop.eup %9448  ;;  %9474 = vrcp.f32 %v6051_v42 }
 0xd4f   : > { %5930 = vperm.xlu0 %9348, %v9401_v35   ;;  %v9451_v7 = vpop.eup %9450  ;;  %9476 = vrcp.f32 %v6050_v43 }
 0xd50   : > { %v9453_v19 = vpop.eup %9452 }
 0xd51   : > { %v9455_v58 = vpop.eup %9454 }
 0xd52   : > { %6085 = vperm.xlu1 %9349, %v9403_v38   ;;  %v9457_v37 = vpop.eup %9456 }
 0xd53   : > { %6080 = vperm.xlu0 %9348, %v9405_v22   ;;  %v9459_v40 = vpop.eup %9458 }
 0xd54   : > { %v9461_v1 = vpop.eup %9460 }
 0xd55   : > { %v9463_v16 = vpop.eup %9462 }
 0xd56   : > { %5645 = vperm.xlu1 %9349, %v9407_v24   ;;  %v9465_v41 = vpop.eup %9464 }
 0xd57   : > { %5640 = vperm.xlu0 %9348, %v9409_v25   ;;  %v9467_v35 = vpop.eup %9466 }
 0xd58   : > { %v9469_v31 = vpop.eup %9468 }
 0xd59   : > { %v9471_v38 = vpop.eup %9470 }
 0xd5a   : > { %5795 = vperm.xlu1 %9349, %v9411_v60   ;;  %v9473_v33 = vpop.eup %9472 }
 0xd5b   : > { %5790 = vperm.xlu0 %9348, %v9413_v51   ;;  %v9475_v22 = vpop.eup %9474  ;;  %v5543_v51 = vld [vmem:[#allocation5 + $0x18] sm:$0xff] }
 0xd5c   : > { %v9477_v24 = vpop.eup %9476 }
 0xd5e   : > { %5945 = vperm.xlu1 %9349, %v9415_v54  }
 0xd5f   : > { %5940 = vperm.xlu0 %9348, %v9417_v46  }
 0xd62   : > { %6095 = vperm.xlu1 %9349, %v9419_v8  }
 0xd63   : > { %6090 = vperm.xlu0 %9348, %v9421_v59   ;;  %v5545_v59 = vld [vmem:[#allocation5 + $0x28] sm:$0xff] }
 0xd66   : > { %5655 = vperm.xlu1 %9349, %v9423_v23   ;;  %v5544_v23 = vld [vmem:[#allocation5 + $0x20] sm:$0xff] }
 0xd67   : > { %5650 = vperm.xlu0 %9348, %v9425_v48  }
 0xd6a   : > { %5805 = vperm.xlu1 %9349, %v9427_v45  }
 0xd6b   : > { %5800 = vperm.xlu0 %9348, %v9429_v17  }
 0xd6e   : > { %5955 = vperm.xlu1 %9349, %v9431_v14  }
 0xd6f   : > { %5950 = vperm.xlu0 %9348, %v9433_v28  }
 0xd72   : > { %6105 = vperm.xlu1 %9349, %v9435_v39  }
 0xd73   : > { %6100 = vperm.xlu0 %9348, %v9437_v20  }
 0xd76   : > { %5665 = vperm.xlu1 %9349, %v9439_v18  }
 0xd77   : > { %5660 = vperm.xlu0 %9348, %v9441_v29   ;;  %v5547_v29 = vld [vmem:[#allocation5 + $0x38] sm:$0xff] }
 0xd7a   : > { %5815 = vperm.xlu1 %9349, %v9443_v36  }
 0xd7b   : > { %5810 = vperm.xlu0 %9348, %v9445_v15  }
 0xd7e   : > { %5965 = vperm.xlu1 %9349, %v9447_v2  }
 0xd7f   : > { %5960 = vperm.xlu0 %9348, %v9449_v0  }
 0xd82   : > { %6115 = vperm.xlu1 %9349, %v9451_v7  }
 0xd83   : > { %6110 = vperm.xlu0 %9348, %v9453_v19  }
 0xd86   : > { %5825 = vperm.xlu1 %9349, %v9455_v58  }
 0xd87   : > { %5820 = vperm.xlu0 %9348, %v9457_v37  }
 0xd8a   : > { %5975 = vperm.xlu1 %9349, %v9459_v40  }
 0xd8b   : > { %5970 = vperm.xlu0 %9348, %v9461_v1  }
 0xd8e   : > { %6125 = vperm.xlu1 %9349, %v9463_v16  }
 0xd8f   : > { %6120 = vperm.xlu0 %9348, %v9465_v41  }
 0xd92   : > { %5985 = vperm.xlu1 %9349, %v9467_v35  }
 0xd93   : > { %5980 = vperm.xlu0 %9348, %v9469_v31  }
 0xd96   : > { %6135 = vperm.xlu1 %9349, %v9471_v38   ;;  %v5549_v38 = vld [vmem:[#allocation5 + $0x48] sm:$0xff] }
 0xd97   : > { %6130 = vperm.xlu0 %9348, %v9473_v33   ;;  %v5548_v33 = vld [vmem:[#allocation5 + $0x40] sm:$0xff] }
 0xd99   : > { %v5601_v25 = vpop.permute.xlu1 %5600 }
 0xd9a   : > { %v5670_v3 = vmul.f32 %v5601_v25, %v5542_v57  ;;  %v5591_v60 = vpop.permute.xlu0 %5590  ;;  %6145 = vperm.xlu1 %9349, %v9475_v22  }
 0xd9b   : > { %v5668_v5 = vmul.f32 %v5591_v60, %v5540_v44  ;;  %6140 = vperm.xlu0 %9348, %v9477_v24  }
 0xd9c   : > { %5686 = vst.msk [vmem:[#allocation5 + $0x10] sm:$0xff] %vm1453_vm1, %v5670_v3 }
 0xd9d   : > { %5684 = vst.msk [vmem:[#allocation5] sm:$0xff] %vm1453_vm1, %v5668_v5  ;;  %v5606_v54 = vpop.permute.xlu1 %5605 }
 0xd9e   : > { %v5671_v4 = vmul.f32 %v5606_v54, %v5543_v51  ;;  %v5596_v46 = vpop.permute.xlu0 %5595 }
 0xd9f   : > { %v5669_v21 = vmul.f32 %v5596_v46, %v5541_v27 }
 0xda0   : > { %5687 = vst.msk [vmem:[#allocation5 + $0x18] sm:$0xff] %vm1453_vm1, %v5671_v4 }
 0xda1   : > { %5685 = vst.msk [vmem:[#allocation5 + $0x8] sm:$0xff] %vm1453_vm1, %v5669_v21  ;;  %v5756_v8 = vpop.permute.xlu1 %5755 }
 0xda2   : > { %v5751_v32 = vpop.permute.xlu0 %5750 }
 0xda3   : > { %v5702_v39 = vld [vmem:[#allocation5 + $0x10] sm:$0xff] }
 0xda4   : > { %v5700_v49 = vld [vmem:[#allocation5] sm:$0xff] }
 0xda5   : > { %v5828_v12 = vmul.f32 %v5751_v32, %v5700_v49  ;;  %v5616_v48 = vpop.permute.xlu1 %5615 }
 0xda6   : > { %v5673_v56 = vmul.f32 %v5616_v48, %v5545_v59  ;;  %v5611_v45 = vpop.permute.xlu0 %5610 }
 0xda7   : > { %5844 = vst.msk [vmem:[#allocation5] sm:$0xff] %vm3381_vm3, %v5828_v12  ;;  %v5672_v26 = vmul.f32 %v5611_v45, %v5544_v23  ;;  %v5703_v52 = vld [vmem:[#allocation5 + $0x18] sm:$0xff] }
 0xda8   : > { %v5701_v17 = vld [vmem:[#allocation5 + $0x8] sm:$0xff]  ;;  %5689 = vst.msk [vmem:[#allocation5 + $0x28] sm:$0xff] %vm1453_vm1, %v5673_v56 }
 0xda9   : > { %v5829_v55 = vmul.f32 %v5756_v8, %v5701_v17  ;;  %5688 = vst.msk [vmem:[#allocation5 + $0x20] sm:$0xff] %vm1453_vm1, %v5672_v26  ;;  %v5766_v14 = vpop.permute.xlu1 %5765  ;;  %v5551_v17 = vld [vmem:[#allocation5 + $0x58] sm:$0xff] }
 0xdaa   : > { %v5831_v28 = vmul.f32 %v5766_v14, %v5703_v52  ;;  %v5761_v63 = vpop.permute.xlu0 %5760 }
 0xdab   : > { %5845 = vst.msk [vmem:[#allocation5 + $0x8] sm:$0xff] %vm3381_vm3, %v5829_v55  ;;  %v5830_v13 = vmul.f32 %v5761_v63, %v5702_v39  ;;  %v5550_v55 = vld [vmem:[#allocation5 + $0x50] sm:$0xff] }
 0xdac   : > { %5847 = vst.msk [vmem:[#allocation5 + $0x18] sm:$0xff] %vm3381_vm3, %v5831_v28 }
 0xdad   : > { %5846 = vst.msk [vmem:[#allocation5 + $0x10] sm:$0xff] %vm3381_vm3, %v5830_v13  ;;  %v5916_v20 = vpop.permute.xlu1 %5915 }
 0xdae   : > { %v5911_v47 = vpop.permute.xlu0 %5910  ;;  %v5860_v18 = vld [vmem:[#allocation5] sm:$0xff] }
 0xdaf   : > { %v5988_v10 = vmul.f32 %v5911_v47, %v5860_v18  ;;  %v5705_v50 = vld [vmem:[#allocation5 + $0x28] sm:$0xff] }
 0xdb0   : > { %v5704_v19 = vld [vmem:[#allocation5 + $0x20] sm:$0xff] }
 0xdb1   : > { %6004 = vst.msk [vmem:[#allocation5] sm:$0xff] %vm4442_vm4, %v5988_v10  ;;  %v5626_v36 = vpop.permute.xlu1 %5625 }
 0xdb2   : > { %v5861_v62 = vld [vmem:[#allocation5 + $0x8] sm:$0xff]  ;;  %v5675_v15 = vmul.f32 %v5626_v36, %v5547_v29  ;;  %v5621_v53 = vpop.permute.xlu0 %5620 }
 0xdb3   : > { %v5989_v2 = vmul.f32 %v5916_v20, %v5861_v62  ;;  %v5674_v11 = vmul.f32 %v5621_v53, %v5546_v30  ;;  %v5863_v9 = vld [vmem:[#allocation5 + $0x18] sm:$0xff] }
 0xdb4   : > { %5691 = vst.msk [vmem:[#allocation5 + $0x38] sm:$0xff] %vm1453_vm1, %v5675_v15  ;;  %v5862_v40 = vld [vmem:[#allocation5 + $0x10] sm:$0xff] }
 0xdb5   : > { %6005 = vst.msk [vmem:[#allocation5 + $0x8] sm:$0xff] %vm4442_vm4, %v5989_v2  ;;  %v5776_v0 = vpop.permute.xlu1 %5775 }
 0xdb6   : > { %5690 = vst.msk [vmem:[#allocation5 + $0x30] sm:$0xff] %vm1453_vm1, %v5674_v11  ;;  %v5833_v7 = vmul.f32 %v5776_v0, %v5705_v50  ;;  %v5771_v6 = vpop.permute.xlu0 %5770 }
 0xdb7   : > { %v5832_v61 = vmul.f32 %v5771_v6, %v5704_v19 }
 0xdb8   : > { %5849 = vst.msk [vmem:[#allocation5 + $0x28] sm:$0xff] %vm3381_vm3, %v5833_v7  ;;  %v6020_v35 = vld [vmem:[#allocation5] sm:$0xff] }
 0xdb9   : > { %5848 = vst.msk [vmem:[#allocation5 + $0x20] sm:$0xff] %vm3381_vm3, %v5832_v61  ;;  %v5926_v58 = vpop.permute.xlu1 %5925 }
 0xdba   : > { %v5991_v37 = vmul.f32 %v5926_v58, %v5863_v9  ;;  %v5921_v34 = vpop.permute.xlu0 %5920  ;;  %v5553_v58 = vld [vmem:[#allocation5 + $0x68] sm:$0xff]  ;;  %v5552_v9 = vld [vmem:[#allocation5 + $0x60] sm:$0xff] }
 0xdbb   : > { %v5990_v42 = vmul.f32 %v5921_v34, %v5862_v40  ;;  %v5707_v3 = vld [vmem:[#allocation5 + $0x38] sm:$0xff] }
 0xdbc   : > { %6007 = vst.msk [vmem:[#allocation5 + $0x18] sm:$0xff] %vm4442_vm4, %v5991_v37  ;;  %v6021_v43 = vld [vmem:[#allocation5 + $0x8] sm:$0xff] }
 0xdbd   : > { %6006 = vst.msk [vmem:[#allocation5 + $0x10] sm:$0xff] %vm4442_vm4, %v5990_v42  ;;  %v6076_v1 = vpop.permute.xlu1 %6075  ;;  %v5706_v51 = vld [vmem:[#allocation5 + $0x30] sm:$0xff] }
 0xdbe   : > { %v6149_v16 = vmul.f32 %v6076_v1, %v6021_v43  ;;  %v6071_v41 = vpop.permute.xlu0 %6070 }
 0xdbf   : > { %v6148_v31 = vmul.f32 %v6071_v41, %v6020_v35  ;;  %v5865_v21 = vld [vmem:[#allocation5 + $0x28] sm:$0xff] }
 0xdc0   : > { %6165 = vst.msk [vmem:[#allocation5 + $0x8] sm:$0xff] %vm5503_vm5, %v6149_v16  ;;  %v5864_v59 = vld [vmem:[#allocation5 + $0x20] sm:$0xff] }
 0xdc1   : > { %6164 = vst.msk [vmem:[#allocation5] sm:$0xff] %vm5503_vm5, %v6148_v31  ;;  %v5636_v22 = vpop.permute.xlu1 %5635 }
 0xdc2   : > { %v5677_v57 = vmul.f32 %v5636_v22, %v5549_v38  ;;  %v5631_v24 = vpop.permute.xlu0 %5630 }
 0xdc3   : > { %v5676_v44 = vmul.f32 %v5631_v24, %v5548_v33  ;;  %v6023_v12 = vld [vmem:[#allocation5 + $0x18] sm:$0xff] }
 0xdc4   : > { %5693 = vst.msk [vmem:[#allocation5 + $0x48] sm:$0xff] %vm1453_vm1, %v5677_v57  ;;  %v6022_v45 = vld [vmem:[#allocation5 + $0x10] sm:$0xff] }
 0xdc5   : > { %5692 = vst.msk [vmem:[#allocation5 + $0x40] sm:$0xff] %vm1453_vm1, %v5676_v44  ;;  %v5786_v25 = vpop.permute.xlu1 %5785 }
 0xdc6   : > { %v5835_v60 = vmul.f32 %v5786_v25, %v5707_v3  ;;  %v5781_v5 = vpop.permute.xlu0 %5780 }
 0xdc7   : > { %v5834_v27 = vmul.f32 %v5781_v5, %v5706_v51  ;;  %v6181_v54 = vld [vmem:[#allocation5 + $0x8] sm:$0xff] }
 0xdc8   : > { %5851 = vst.msk [vmem:[#allocation5 + $0x38] sm:$0xff] %vm3381_vm3, %v5835_v60  ;;  %v6180_v4 = vld [vmem:[#allocation5] sm:$0xff] }
 0xdc9   : > { %5850 = vst.msk [vmem:[#allocation5 + $0x30] sm:$0xff] %vm3381_vm3, %v5834_v27  ;;  %8799 = vmatprep.mubr.f32.mxu0 %v6180_v4  ;;  %v5936_v46 = vpop.permute.xlu1 %5935 }
 0xdca   : > { %v5993_v8 = vmul.f32 %v5936_v46, %v5865_v21  ;;  %v5931_v32 = vpop.permute.xlu0 %5930  ;;  %8800 = vmatmul.mubr.f32.vlgmr.msra.gmra.mxu0 %v6181_v54  ;;  %v5555_v46 = vld [vmem:[#allocation5 + $0x78] sm:$0xff]  ;;  %v5554_v21 = vld [vmem:[#allocation5 + $0x70] sm:$0xff] }
 0xdcb   : > { %v5992_v49 = vmul.f32 %v5931_v32, %v5864_v59  ;;  %v5709_v13 = vld [vmem:[#allocation5 + $0x48] sm:$0xff] }
 0xdcc   : > { %6009 = vst.msk [vmem:[#allocation5 + $0x28] sm:$0xff] %vm4442_vm4, %v5993_v8  ;;  %v5708_v18 = vld [vmem:[#allocation5 + $0x40] sm:$0xff] }
 0xdcd   : > { %6008 = vst.msk [vmem:[#allocation5 + $0x20] sm:$0xff] %vm4442_vm4, %v5992_v49  ;;  %v6086_v23 = vpop.permute.xlu1 %6085 }
 0xdce   : > { %v6151_v48 = vmul.f32 %v6086_v23, %v6023_v12  ;;  %v6081_v56 = vpop.permute.xlu0 %6080 }
 0xdcf   : > { %v6150_v26 = vmul.f32 %v6081_v56, %v6022_v45  ;;  %v5867_v62 = vld [vmem:[#allocation5 + $0x38] sm:$0xff] }
 0xdd0   : > { %6167 = vst.msk [vmem:[#allocation5 + $0x18] sm:$0xff] %vm5503_vm5, %v6151_v48  ;;  %v5866_v2 = vld [vmem:[#allocation5 + $0x30] sm:$0xff] }
 0xdd1   : > { %6166 = vst.msk [vmem:[#allocation5 + $0x10] sm:$0xff] %vm5503_vm5, %v6150_v26  ;;  %v5646_v14 = vpop.permute.xlu1 %5645 }
 0xdd2   : > { %v5679_v52 = vmul.f32 %v5646_v14, %v5551_v17  ;;  %v5641_v28 = vpop.permute.xlu0 %5640 }
 0xdd3   : > { %v5678_v63 = vmul.f32 %v5641_v28, %v5550_v55  ;;  %v6025_v50 = vld [vmem:[#allocation5 + $0x28] sm:$0xff] }
 0xdd4   : > { %5695 = vst.msk [vmem:[#allocation5 + $0x58] sm:$0xff] %vm1453_vm1, %v5679_v52  ;;  %v6024_v19 = vld [vmem:[#allocation5 + $0x20] sm:$0xff] }
 0xdd5   : > { %5694 = vst.msk [vmem:[#allocation5 + $0x50] sm:$0xff] %vm1453_vm1, %v5678_v63  ;;  %v5796_v39 = vpop.permute.xlu1 %5795 }
 0xdd6   : > { %v5837_v20 = vmul.f32 %v5796_v39, %v5709_v13  ;;  %v5791_v47 = vpop.permute.xlu0 %5790 }
 0xdd7   : > { %v5836_v10 = vmul.f32 %v5791_v47, %v5708_v18  ;;  %v6183_v29 = vld [vmem:[#allocation5 + $0x18] sm:$0xff] }
 0xdd8   : > { %5853 = vst.msk [vmem:[#allocation5 + $0x48] sm:$0xff] %vm3381_vm3, %v5837_v20  ;;  %v6182_v30 = vld [vmem:[#allocation5 + $0x10] sm:$0xff] }
 0xdd9   : > { %5852 = vst.msk [vmem:[#allocation5 + $0x40] sm:$0xff] %vm3381_vm3, %v5836_v10  ;;  %8802 = vmatprep.mubr.f32.mxu0 %v6182_v30  ;;  %v5946_v36 = vpop.permute.xlu1 %5945 }
 0xdda   : > { %v5995_v15 = vmul.f32 %v5946_v36, %v5867_v62  ;;  %v5941_v53 = vpop.permute.xlu0 %5940  ;;  %8803 = vmatmul.mubr.f32.gmra.mxu0 %v6183_v29 }
 0xddb   : > { %v5994_v11 = vmul.f32 %v5941_v53, %v5866_v2  ;;  %v5711_v43 = vld [vmem:[#allocation5 + $0x58] sm:$0xff] }
 0xddc   : > { %6011 = vst.msk [vmem:[#allocation5 + $0x38] sm:$0xff] %vm4442_vm4, %v5995_v15  ;;  %v5710_v35 = vld [vmem:[#allocation5 + $0x50] sm:$0xff] }
 0xddd   : > { %6010 = vst.msk [vmem:[#allocation5 + $0x30] sm:$0xff] %vm4442_vm4, %v5994_v11  ;;  %v6096_v0 = vpop.permute.xlu1 %6095 }
 0xdde   : > { %v6153_v7 = vmul.f32 %v6096_v0, %v6025_v50  ;;  %v6091_v6 = vpop.permute.xlu0 %6090 }
 0xddf   : > { %v6152_v61 = vmul.f32 %v6091_v6, %v6024_v19  ;;  %v5869_v57 = vld [vmem:[#allocation5 + $0x48] sm:$0xff] }
 0xde0   : > { %6169 = vst.msk [vmem:[#allocation5 + $0x28] sm:$0xff] %vm5503_vm5, %v6153_v7  ;;  %v5868_v25 = vld [vmem:[#allocation5 + $0x40] sm:$0xff] }
 0xde1   : > { %6168 = vst.msk [vmem:[#allocation5 + $0x20] sm:$0xff] %vm5503_vm5, %v6152_v61  ;;  %v5656_v37 = vpop.permute.xlu1 %5655 }
 0xde2   : > { %v5681_v34 = vmul.f32 %v5656_v37, %v5553_v58  ;;  %v5651_v40 = vpop.permute.xlu0 %5650 }
 0xde3   : > { %v5680_v42 = vmul.f32 %v5651_v40, %v5552_v9  ;;  %v6027_v5 = vld [vmem:[#allocation5 + $0x38] sm:$0xff] }
 0xde4   : > { %5697 = vst.msk [vmem:[#allocation5 + $0x68] sm:$0xff] %vm1453_vm1, %v5681_v34  ;;  %v6026_v54 = vld [vmem:[#allocation5 + $0x30] sm:$0xff] }
 0xde5   : > { %5696 = vst.msk [vmem:[#allocation5 + $0x60] sm:$0xff] %vm1453_vm1, %v5680_v42  ;;  %v5806_v1 = vpop.permute.xlu1 %5805 }
 0xde6   : > { %v5839_v16 = vmul.f32 %v5806_v1, %v5711_v43  ;;  %v5801_v41 = vpop.permute.xlu0 %5800 }
 0xde7   : > { %v5838_v31 = vmul.f32 %v5801_v41, %v5710_v35  ;;  %v6185_v38 = vld [vmem:[#allocation5 + $0x28] sm:$0xff] }
 0xde8   : > { %5855 = vst.msk [vmem:[#allocation5 + $0x58] sm:$0xff] %vm3381_vm3, %v5839_v16  ;;  %v6184_v33 = vld [vmem:[#allocation5 + $0x20] sm:$0xff] }
 0xde9   : > { %5854 = vst.msk [vmem:[#allocation5 + $0x50] sm:$0xff] %vm3381_vm3, %v5838_v31  ;;  %8805 = vmatprep.mubr.f32.mxu0 %v6184_v33  ;;  %v5956_v22 = vpop.permute.xlu1 %5955 }
 0xdea   : > { %v5997_v24 = vmul.f32 %v5956_v22, %v5869_v57  ;;  %v5951_v44 = vpop.permute.xlu0 %5950  ;;  %8806 = vmatmul.mubr.f32.gmra.mxu0 %v6185_v38 }
 0xdeb   : > { %v5996_v3 = vmul.f32 %v5951_v44, %v5868_v25  ;;  %v5713_v12 = vld [vmem:[#allocation5 + $0x68] sm:$0xff] }
 0xdec   : > { %6013 = vst.msk [vmem:[#allocation5 + $0x48] sm:$0xff] %vm4442_vm4, %v5997_v24  ;;  %v5712_v45 = vld [vmem:[#allocation5 + $0x60] sm:$0xff] }
 0xded   : > { %6012 = vst.msk [vmem:[#allocation5 + $0x40] sm:$0xff] %vm4442_vm4, %v5996_v3  ;;  %v6106_v60 = vpop.permute.xlu1 %6105 }
 0xdee   : > { %v6155_v51 = vmul.f32 %v6106_v60, %v6027_v5  ;;  %v6101_v27 = vpop.permute.xlu0 %6100 }
 0xdef   : > { %v6154_v4 = vmul.f32 %v6101_v27, %v6026_v54  ;;  %v5871_v52 = vld [vmem:[#allocation5 + $0x58] sm:$0xff] }
 0xdf0   : > { %6171 = vst.msk [vmem:[#allocation5 + $0x38] sm:$0xff] %vm5503_vm5, %v6155_v51  ;;  %v5870_v39 = vld [vmem:[#allocation5 + $0x50] sm:$0xff] }
 0xdf1   : > { %6170 = vst.msk [vmem:[#allocation5 + $0x30] sm:$0xff] %vm5503_vm5, %v6154_v4  ;;  %v5666_v8 = vpop.permute.xlu1 %5665 }
 0xdf2   : > { %v5683_v32 = vmul.f32 %v5666_v8, %v5555_v46  ;;  %v5661_v59 = vpop.permute.xlu0 %5660 }
 0xdf3   : > { %v5682_v49 = vmul.f32 %v5661_v59, %v5554_v21  ;;  %v6029_v47 = vld [vmem:[#allocation5 + $0x48] sm:$0xff] }
 0xdf4   : > { %5699 = vst.msk [vmem:[#allocation5 + $0x78] sm:$0xff] %vm1453_vm1, %v5683_v32  ;;  %v6028_v29 = vld [vmem:[#allocation5 + $0x40] sm:$0xff] }
 0xdf5   : > { %5698 = vst.msk [vmem:[#allocation5 + $0x70] sm:$0xff] %vm1453_vm1, %v5682_v49  ;;  %v5816_v23 = vpop.permute.xlu1 %5815 }
 0xdf6   : > { %v5841_v48 = vmul.f32 %v5816_v23, %v5713_v12  ;;  %v5811_v56 = vpop.permute.xlu0 %5810  ;;  %v13416_v23 = vld [vmem:[%s14814_s7] ss:$0 sm:$0xff] }
 0xdf7   : > { %v5840_v26 = vmul.f32 %v5811_v56, %v5712_v45  ;;  %v6187_v17 = vld [vmem:[#allocation5 + $0x38] sm:$0xff] }
 0xdf8   : > { %5857 = vst.msk [vmem:[#allocation5 + $0x68] sm:$0xff] %vm3381_vm3, %v5841_v48  ;;  %v6186_v55 = vld [vmem:[#allocation5 + $0x30] sm:$0xff]  ;;  %v6365_v48 = vld [vmem:[%s10377_s28 + $0x8] sm:$0xff] }
 0xdf9   : > { %5856 = vst.msk [vmem:[#allocation5 + $0x60] sm:$0xff] %vm3381_vm3, %v5840_v26  ;;  %8808 = vmatprep.mubr.f32.mxu0 %v6186_v55  ;;  %v5966_v14 = vpop.permute.xlu1 %5965  ;;  %v6364_v26 = vld [vmem:[%s10377_s28] sm:$0xff] }
 0xdfa   : > { %v5999_v28 = vmul.f32 %v5966_v14, %v5871_v52  ;;  %v5961_v63 = vpop.permute.xlu0 %5960  ;;  %8809 = vmatmul.mubr.f32.gmra.mxu0 %v6187_v17 }
 0xdfb   : > { %v5998_v13 = vmul.f32 %v5961_v63, %v5870_v39  ;;  %v5715_v62 = vld [vmem:[#allocation5 + $0x78] sm:$0xff]  ;;  %v6366_v63 = vld [vmem:[%s10377_s28 + $0x10] sm:$0xff] }
 0xdfc   : > { %6015 = vst.msk [vmem:[#allocation5 + $0x58] sm:$0xff] %vm4442_vm4, %v5999_v28  ;;  %v5714_v2 = vld [vmem:[#allocation5 + $0x70] sm:$0xff] }
 0xdfd   : > { %6014 = vst.msk [vmem:[#allocation5 + $0x50] sm:$0xff] %vm4442_vm4, %v5998_v13  ;;  %v6116_v20 = vpop.permute.xlu1 %6115 }
 0xdfe   : > { %v6157_v18 = vmul.f32 %v6116_v20, %v6029_v47  ;;  %v6111_v10 = vpop.permute.xlu0 %6110  ;;  %v6367_v47 = vld [vmem:[%s10377_s28 + $0x18] sm:$0xff] }
 0xdff   : > { %v6156_v30 = vmul.f32 %v6111_v10, %v6028_v29  ;;  %v5873_v50 = vld [vmem:[#allocation5 + $0x68] sm:$0xff] }
 0xe00   : > { %6173 = vst.msk [vmem:[#allocation5 + $0x48] sm:$0xff] %vm5503_vm5, %v6157_v18  ;;  %v5872_v19 = vld [vmem:[#allocation5 + $0x60] sm:$0xff]  ;;  %v6369_v29 = vld [vmem:[%s10377_s28 + $0x28] sm:$0xff] }
 0xe01   : > { %6172 = vst.msk [vmem:[#allocation5 + $0x40] sm:$0xff] %vm5503_vm5, %v6156_v30  ;;  %v5826_v36 = vpop.permute.xlu1 %5825 }
 0xe02   : > { %v5843_v15 = vmul.f32 %v5826_v36, %v5715_v62  ;;  %v5821_v53 = vpop.permute.xlu0 %5820  ;;  %v6368_v62 = vld [vmem:[%s10377_s28 + $0x20] sm:$0xff] }
 0xe03   : > { %v5842_v11 = vmul.f32 %v5821_v53, %v5714_v2  ;;  %v6031_v34 = vld [vmem:[#allocation5 + $0x58] sm:$0xff] }
 0xe04   : > { %5859 = vst.msk [vmem:[#allocation5 + $0x78] sm:$0xff] %vm3381_vm3, %v5843_v15  ;;  %v6030_v1 = vld [vmem:[#allocation5 + $0x50] sm:$0xff] }
 0xe05   : > { %5858 = vst.msk [vmem:[#allocation5 + $0x70] sm:$0xff] %vm3381_vm3, %v5842_v11  ;;  %v5976_v0 = vpop.permute.xlu1 %5975 }
 0xe06   : > { %v6001_v7 = vmul.f32 %v5976_v0, %v5873_v50  ;;  %v5971_v6 = vpop.permute.xlu0 %5970  ;;  %v6371_v0 = vld [vmem:[%s10377_s28 + $0x38] sm:$0xff] }
 0xe07   : > { %v6000_v61 = vmul.f32 %v5971_v6, %v5872_v19  ;;  %v6189_v58 = vld [vmem:[#allocation5 + $0x48] sm:$0xff]  ;;  %v6370_v6 = vld [vmem:[%s10377_s28 + $0x30] sm:$0xff] }
 0xe08   : > { %6017 = vst.msk [vmem:[#allocation5 + $0x68] sm:$0xff] %vm4442_vm4, %v6001_v7  ;;  %v6188_v9 = vld [vmem:[#allocation5 + $0x40] sm:$0xff] }
 0xe09   : > { %6016 = vst.msk [vmem:[#allocation5 + $0x60] sm:$0xff] %vm4442_vm4, %v6000_v61  ;;  %8811 = vmatprep.mubr.f32.mxu0 %v6188_v9  ;;  %v6126_v37 = vpop.permute.xlu1 %6125 }
 0xe0a   : > { %v6159_v40 = vmul.f32 %v6126_v37, %v6031_v34  ;;  %v6121_v42 = vpop.permute.xlu0 %6120  ;;  %8812 = vmatmul.mubr.f32.gmra.mxu0 %v6189_v58  ;;  %v6373_v37 = vld [vmem:[%s10377_s28 + $0x48] sm:$0xff] }
 0xe0b   : > { %v6158_v43 = vmul.f32 %v6121_v42, %v6030_v1  ;;  %v5875_v41 = vld [vmem:[#allocation5 + $0x78] sm:$0xff]  ;;  %v6372_v42 = vld [vmem:[%s10377_s28 + $0x40] sm:$0xff] }
 0xe0c   : > { %6175 = vst.msk [vmem:[#allocation5 + $0x58] sm:$0xff] %vm5503_vm5, %v6159_v40  ;;  %v5874_v38 = vld [vmem:[#allocation5 + $0x70] sm:$0xff] }
 0xe0d   : > { %6174 = vst.msk [vmem:[#allocation5 + $0x50] sm:$0xff] %vm5503_vm5, %v6158_v43  ;;  %v5986_v16 = vpop.permute.xlu1 %5985 }
 0xe0e   : > { %v6003_v35 = vmul.f32 %v5986_v16, %v5875_v41  ;;  %v5981_v31 = vpop.permute.xlu0 %5980 }
 0xe0f   : > { %v6002_v33 = vmul.f32 %v5981_v31, %v5874_v38  ;;  %v6033_v57 = vld [vmem:[#allocation5 + $0x68] sm:$0xff] }
 0xe10   : > { %6019 = vst.msk [vmem:[#allocation5 + $0x78] sm:$0xff] %vm4442_vm4, %v6003_v35  ;;  %v6032_v25 = vld [vmem:[#allocation5 + $0x60] sm:$0xff]  ;;  %v6375_v35 = vld [vmem:[%s10377_s28 + $0x58] sm:$0xff] }
 0xe11   : > { %6018 = vst.msk [vmem:[#allocation5 + $0x70] sm:$0xff] %vm4442_vm4, %v6002_v33  ;;  %v6136_v22 = vpop.permute.xlu1 %6135  ;;  %v6374_v33 = vld [vmem:[%s10377_s28 + $0x50] sm:$0xff] }
 0xe12   : > { %v6161_v24 = vmul.f32 %v6136_v22, %v6033_v57  ;;  %v6131_v44 = vpop.permute.xlu0 %6130 }
 0xe13   : > { %v6160_v3 = vmul.f32 %v6131_v44, %v6032_v25  ;;  %v6191_v60 = vld [vmem:[#allocation5 + $0x58] sm:$0xff]  ;;  %v6377_v25 = vld [vmem:[%s10377_s28 + $0x68] sm:$0xff] }
 0xe14   : > { %6177 = vst.msk [vmem:[#allocation5 + $0x68] sm:$0xff] %vm5503_vm5, %v6161_v24  ;;  %v6190_v5 = vld [vmem:[#allocation5 + $0x50] sm:$0xff] }
 0xe15   : > { %6176 = vst.msk [vmem:[#allocation5 + $0x60] sm:$0xff] %vm5503_vm5, %v6160_v3  ;;  %8814 = vmatprep.mubr.f32.mxu0 %v6190_v5  ;;  %v6146_v51 = vpop.permute.xlu1 %6145  ;;  %v6376_v5 = vld [vmem:[%s10377_s28 + $0x60] sm:$0xff] }
 0xe16   : > { %8815 = vmatmul.mubr.f32.gmra.mxu0 %v6191_v60  ;;  %v6141_v4 = vpop.permute.xlu0 %6140 }
 0xe17   : > { %v6035_v27 = vld [vmem:[#allocation5 + $0x78] sm:$0xff] }
 0xe18   : > { %v6163_v54 = vmul.f32 %v6146_v51, %v6035_v27  ;;  %v6034_v46 = vld [vmem:[#allocation5 + $0x70] sm:$0xff] }
 0xe19   : > { %v6162_v21 = vmul.f32 %v6141_v4, %v6034_v46  ;;  %v6379_v46 = vld [vmem:[%s10377_s28 + $0x78] sm:$0xff] }
 0xe1a   : > { %6179 = vst.msk [vmem:[#allocation5 + $0x78] sm:$0xff] %vm5503_vm5, %v6163_v54 }
 0xe1b   : > { %6178 = vst.msk [vmem:[#allocation5 + $0x70] sm:$0xff] %vm5503_vm5, %v6162_v21  ;;  %v6193_v8 = vld [vmem:[#allocation5 + $0x68] sm:$0xff] }
 0xe1c   : > { %v6192_v32 = vld [vmem:[#allocation5 + $0x60] sm:$0xff] }
 0xe1d   : > { %8817 = vmatprep.mubr.f32.mxu0 %v6192_v32  ;;  %v6378_v32 = vld [vmem:[%s10377_s28 + $0x70] sm:$0xff] }
 0xe1e   : > { %8818 = vmatmul.mubr.f32.gmra.mxu0 %v6193_v8 }
 0xe21   : > { %v6195_v59 = vld [vmem:[#allocation5 + $0x78] sm:$0xff] }
 0xe22   : > { %v6194_v49 = vld [vmem:[#allocation5 + $0x70] sm:$0xff] }
 0xe23   : > { %8820 = vmatprep.mubr.f32.mxu0 %v6194_v49 }
 0xe24   : > { %8821 = vmatmul.mubr.f32.gmra.mxu0 %v6195_v59 }
 0xe8a   : > { %v8801_v12 = vpop.f32.mrf.mxu0 }
 0xe8b   : > { %v6291_v56 = vadd.f32 %v8801_v12, %v13416_v23 }
 0xe8c   : > { %v6285_v45 = vpop.f32.mrf.mxu0 }
 0xe8d   : > { %v6286_v17 = vadd.f32 %v13416_v23, %v6285_v45  ;;  %v13422_v55 = vadd.f32 %v6365_v48, %v6291_v56  ;;  %v6650_v48 = vld [vmem:[#allocation18 + $0xf8] sm:$0xff]  ;;  %v6649_v56 = vld [vmem:[#allocation18 + $0xf0] sm:$0xff]  ;;  %v6648_v45 = vld [vmem:[#allocation18 + $0xe8] sm:$0xff] }
 0xe8e   : > { %6663 = vmatprep.subr.mxu1 %v6650_v48  ;;  %v6621_v48 = vld [vmem:[#allocation18 + $0x10] sm:$0xff] }
 0xe8f   : > { %6400 = vadd.xlane.f32.xlu1 %v13422_v55  ;;  %v13425_v14 = vadd.f32 %v6364_v26, %v6286_v17  ;;  %v6647_v26 = vld [vmem:[#allocation18 + $0xe0] sm:$0xff]  ;;  %6664 = vmatpush1.msra.mxu1 %v6649_v56  ;;  %v6646_v17 = vld [vmem:[#allocation18 + $0xd8] sm:$0xff]  ;;  %v6620_v56 = vld [vmem:[#allocation18 + $0x8] sm:$0xff] }
 0xe90   : > { %6665 = vmatprep.subr.mxu1 %v6648_v45  ;;  %v6619_v45 = vld [vmem:[#allocation18] sm:$0xff] }
 0xe91   : > { %6398 = vadd.xlane.f32.xlu0 %v13425_v14  ;;  %6666 = vmatpush1.msra.mxu1 %v6647_v26 }
 0xe92   : > { %6667 = vmatprep.subr.mxu1 %v6646_v17 }
 0xe9a   : > { %v8804_v52 = vpop.f32.mrf.mxu0 }
 0xe9b   : > { %v6301_v13 = vadd.f32 %v8804_v52, %v13416_v23  ;;  %v6645_v52 = vld [vmem:[#allocation18 + $0xd0] sm:$0xff] }
 0xe9c   : > { %v6295_v28 = vpop.f32.mrf.mxu0  ;;  %6668 = vmatpush1.msra.mxu1 %v6645_v52 }
 0xe9d   : > { %v6296_v39 = vadd.f32 %v13416_v23, %v6295_v28  ;;  %v13435_v18 = vadd.f32 %v6367_v47, %v6301_v13 }
 0xe9f   : > { %v13431_v20 = vadd.f32 %v6366_v63, %v6296_v39 }
 0xea1   : > { %6402 = vadd.xlane.f32.xlu0 %v13431_v20 }
 0xea5   : > { %6404 = vadd.xlane.f32.xlu0 %v13435_v18 }
 0xeaa   : > { %v8807_v10 = vpop.f32.mrf.mxu0 }
 0xeab   : > { %v6311_v30 = vadd.f32 %v8807_v10, %v13416_v23 }
 0xeac   : > { %v6305_v36 = vpop.f32.mrf.mxu0 }
 0xead   : > { %v6306_v15 = vadd.f32 %v13416_v23, %v6305_v36  ;;  %v13442_v53 = vadd.f32 %v6369_v29, %v6311_v30  ;;  %v6644_v30 = vld [vmem:[#allocation18 + $0xc8] sm:$0xff]  ;;  %v6643_v36 = vld [vmem:[#allocation18 + $0xc0] sm:$0xff] }
 0xeae   : > { %6669 = vmatprep.subr.mxu1 %v6644_v30 }
 0xeaf   : > { %6408 = vadd.xlane.f32.xlu0 %v13442_v53  ;;  %v13445_v2 = vadd.f32 %v6368_v62, %v6306_v15  ;;  %6670 = vmatpush1.msra.mxu1 %v6643_v36  ;;  %v6642_v15 = vld [vmem:[#allocation18 + $0xb8] sm:$0xff] }
 0xeb0   : > { %6671 = vmatprep.subr.mxu1 %v6642_v15 }
 0xeb1   : > { %6406 = vadd.xlane.f32.xlu1 %v13445_v2 }
 0xeba   : > { %v8810_v11 = vpop.f32.mrf.mxu0 }
 0xebb   : > { %v6321_v50 = vadd.f32 %v8810_v11, %v13416_v23  ;;  %v6641_v11 = vld [vmem:[#allocation18 + $0xb0] sm:$0xff] }
 0xebc   : > { %v6315_v7 = vpop.f32.mrf.mxu0  ;;  %6672 = vmatpush1.msra.mxu1 %v6641_v11 }
 0xebd   : > { %v6316_v19 = vadd.f32 %v13416_v23, %v6315_v7  ;;  %v13452_v61 = vadd.f32 %v6371_v0, %v6321_v50  ;;  %v6639_v50 = vld [vmem:[#allocation18 + $0xa0] sm:$0xff] }
 0xebf   : > { %6412 = vadd.xlane.f32.xlu0 %v13452_v61  ;;  %v13455_v58 = vadd.f32 %v6370_v6, %v6316_v19  ;;  %v6638_v6 = vld [vmem:[#allocation18 + $0x98] sm:$0xff] }
 0xec1   : > { %6410 = vadd.xlane.f32.xlu1 %v13455_v58 }
 0xeca   : > { %v8813_v9 = vpop.f32.mrf.mxu0 }
 0xecb   : > { %v6331_v34 = vadd.f32 %v8813_v9, %v13416_v23 }
 0xecc   : > { %v6325_v40 = vpop.f32.mrf.mxu0 }
 0xecd   : > { %v6326_v1 = vadd.f32 %v13416_v23, %v6325_v40  ;;  %v13462_v43 = vadd.f32 %v6373_v37, %v6331_v34  ;;  %v6637_v37 = vld [vmem:[#allocation18 + $0x90] sm:$0xff]  ;;  %v6636_v34 = vld [vmem:[#allocation18 + $0x88] sm:$0xff]  ;;  %v6635_v40 = vld [vmem:[#allocation18 + $0x80] sm:$0xff] }
 0xecf   : > { %6416 = vadd.xlane.f32.xlu0 %v13462_v43  ;;  %v13465_v16 = vadd.f32 %v6372_v42, %v6326_v1  ;;  %v6634_v42 = vld [vmem:[#allocation18 + $0x78] sm:$0xff] }
 0xed1   : > { %6414 = vadd.xlane.f32.xlu1 %v13465_v16 }
 0xed6   : > { %v8816_v41 = vpop.f32.mrf.mxu0 }
 0xed7   : > { %v6341_v31 = vadd.f32 %v8816_v41, %v13416_v23  ;;  %v6632_v41 = vld [vmem:[#allocation18 + $0x68] sm:$0xff] }
 0xed8   : > { %v6335_v38 = vpop.f32.mrf.mxu0 }
 0xed9   : > { %v6336_v22 = vadd.f32 %v13416_v23, %v6335_v38  ;;  %v13472_v57 = vadd.f32 %v6375_v35, %v6341_v31  ;;  %v6631_v31 = vld [vmem:[#allocation18 + $0x60] sm:$0xff]  ;;  %v6630_v38 = vld [vmem:[#allocation18 + $0x58] sm:$0xff] }
 0xedb   : > { %6420 = vadd.xlane.f32.xlu0 %v13472_v57  ;;  %v13475_v24 = vadd.f32 %v6374_v33, %v6336_v22  ;;  %v6629_v33 = vld [vmem:[#allocation18 + $0x50] sm:$0xff]  ;;  %v6628_v22 = vld [vmem:[#allocation18 + $0x48] sm:$0xff] }
 0xedd   : > { %6418 = vadd.xlane.f32.xlu1 %v13475_v24 }
 0xede   : > { %v8819_v44 = vpop.f32.mrf.mxu0 }
 0xedf   : > { %v6351_v3 = vadd.f32 %v8819_v44, %v13416_v23 }
 0xee0   : > { %v6345_v60 = vpop.f32.mrf.mxu0 }
 0xee1   : > { %v6346_v51 = vadd.f32 %v13416_v23, %v6345_v60  ;;  %v13482_v27 = vadd.f32 %v6377_v25, %v6351_v3  ;;  %v6626_v60 = vld [vmem:[#allocation18 + $0x38] sm:$0xff] }
 0xee3   : > { %6424 = vadd.xlane.f32.xlu0 %v13482_v27  ;;  %v13485_v54 = vadd.f32 %v6376_v5, %v6346_v51 }
 0xee4   : > { %v8822_v4 = vpop.f32.mrf.mxu0 }
 0xee5   : > { %v6361_v21 = vadd.f32 %v8822_v4, %v13416_v23  ;;  %6422 = vadd.xlane.f32.xlu1 %v13485_v54  ;;  %v6625_v4 = vld [vmem:[#allocation18 + $0x30] sm:$0xff] }
 0xee6   : > { %v6355_v8 = vpop.f32.mrf.mxu0 }
 0xee7   : > { %v6356_v59 = vadd.f32 %v13416_v23, %v6355_v8  ;;  %v13492_v49 = vadd.f32 %v6379_v46, %v6361_v21  ;;  %v6624_v46 = vld [vmem:[#allocation18 + $0x28] sm:$0xff] }
 0xee9   : > { %6428 = vadd.xlane.f32.xlu0 %v13492_v49  ;;  %v13495_v12 = vadd.f32 %v6378_v32, %v6356_v59  ;;  %v6623_v32 = vld [vmem:[#allocation18 + $0x20] sm:$0xff]  ;;  %v6622_v59 = vld [vmem:[#allocation18 + $0x18] sm:$0xff] }
 0xeeb   : > { %6426 = vadd.xlane.f32.xlu1 %v13495_v12 }
 0xf18   : > { %v6401_v23 = vpop.xlane.xlu1 %6400 }
 0xf19   : > { %v6432_v28 = vmul.f32 0.0078125, %v6401_v23 }
 0xf1a   : > { %v6399_v63 = vpop.xlane.xlu0 %6398 }
 0xf1b   : > { %v13499_v39 = vsub.f32 %v13422_v55, %v6432_v28  ;;  %v6431_v13 = vmul.f32 0.0078125, %v6399_v63 }
 0xf1d   : > { %v13502_v47 = vsub.f32 %v13425_v14, %v6431_v13  ;;  %v6464_v10 = vmul.f32 %v13499_v39, %v13499_v39  ;;  %v6640_v14 = vld [vmem:[#allocation18 + $0xa8] sm:$0xff] }
 0xf1e   : > { %6673 = vmatprep.subr.mxu1 %v6640_v14 }
 0xf1f   : > { %6481 = vadd.xlane.f32.xlu0 %v6464_v10  ;;  %v6463_v29 = vmul.f32 %v13502_v47, %v13502_v47  ;;  %6674 = vmatpush1.msra.mxu1 %v6639_v50 }
 0xf20   : > { %6675 = vmatprep.subr.mxu1 %v6638_v6 }
 0xf21   : > { %6479 = vadd.xlane.f32.xlu1 %v6463_v29  ;;  %6676 = vmatpush1.msra.mxu1 %v6637_v37 }
 0xf22   : > { %6677 = vmatprep.subr.mxu1 %v6636_v34 }
 0xf23   : > { %6678 = vmatpush1.msra.mxu1 %v6635_v40 }
 0xf24   : > { %6679 = vmatprep.subr.mxu1 %v6634_v42 }
 0xf2a   : > { %v6403_v62 = vpop.xlane.xlu0 %6402 }
 0xf2b   : > { %v6433_v55 = vmul.f32 0.0078125, %v6403_v62 }
 0xf2d   : > { %v13509_v0 = vsub.f32 %v13431_v20, %v6433_v55  ;;  %v6633_v20 = vld [vmem:[#allocation18 + $0x70] sm:$0xff] }
 0xf2e   : > { %v6405_v7 = vpop.xlane.xlu0 %6404  ;;  %6680 = vmatpush1.msra.mxu1 %v6633_v20 }
 0xf2f   : > { %v6434_v19 = vmul.f32 0.0078125, %v6405_v7  ;;  %v6465_v9 = vmul.f32 %v13509_v0, %v13509_v0  ;;  %6681 = vmatprep.subr.mxu1 %v6632_v41 }
 0xf30   : > { %6682 = vmatpush1.msra.mxu1 %v6631_v31 }
 0xf31   : > { %v13514_v1 = vsub.f32 %v13435_v18, %v6434_v19  ;;  %6483 = vadd.xlane.f32.xlu1 %v6465_v9  ;;  %6683 = vmatprep.subr.mxu1 %v6630_v38  ;;  %v6627_v18 = vld [vmem:[#allocation18 + $0x40] sm:$0xff] }
 0xf32   : > { %6684 = vmatpush1.msra.mxu1 %v6629_v33 }
 0xf33   : > { %v6466_v35 = vmul.f32 %v13514_v1, %v13514_v1  ;;  %6685 = vmatprep.subr.mxu1 %v6628_v22 }
 0xf34   : > { %6686 = vmatpush1.msra.mxu1 %v6627_v18  ;;  %v6887_v18 = vld [vmem:[#allocation20 + $0xf8] sm:$0xff] }
 0xf35   : > { %6485 = vadd.xlane.f32.xlu0 %v6466_v35  ;;  %6687 = vmatprep.subr.mxu1 %v6626_v60  ;;  %v13592_v60 = vld [vmem:[#allocation20 + $0xe0] sm:$0xff] }
 0xf36   : > { %6688 = vmatpush1.msra.mxu1 %v6625_v4  ;;  %8071 = vmatprep.subr.mxu0 %v6887_v18  ;;  %v13595_v4 = vld [vmem:[#allocation20 + $0x60] sm:$0xff] }
 0xf37   : > { %6689 = vmatprep.subr.mxu1 %v6624_v46 }
 0xf38   : > { %v6409_v44 = vpop.xlane.xlu0 %6408  ;;  %6690 = vmatpush1.msra.mxu1 %v6623_v32 }
 0xf39   : > { %v6436_v25 = vmul.f32 0.0078125, %v6409_v44  ;;  %6691 = vmatprep.subr.mxu1 %v6622_v59  ;;  %v13579_v44 = vld [vmem:[#allocation20 + $0x78] sm:$0xff] }
 0xf3a   : > { %v6407_v3 = vpop.xlane.xlu1 %6406  ;;  %6692 = vmatpush1.msra.mxu1 %v6621_v48  ;;  %8072 = vmatpush3.msra.mxu0 %v13579_v44  ;;  %v13601_v59 = vld [vmem:[#allocation20 + $0x58] sm:$0xff] }
 0xf3b   : > { %v13519_v5 = vsub.f32 %v13442_v53, %v6436_v25  ;;  %v6435_v51 = vmul.f32 0.0078125, %v6407_v3  ;;  %6693 = vmatprep.subr.mxu1 %v6620_v56  ;;  %v13581_v25 = vld [vmem:[#allocation20 + $0xf0] sm:$0xff]  ;;  %v13589_v3 = vld [vmem:[#allocation20 + $0x68] sm:$0xff] }
 0xf3c   : > { %6694 = vmatpush1.msra.mxu1 %v6619_v45  ;;  %8073 = vmatprep.subr.mxu0 %v13581_v25  ;;  %v13604_v56 = vld [vmem:[#allocation20 + $0xd0] sm:$0xff] }
 0xf3d   : > { %v13522_v21 = vsub.f32 %v13445_v2, %v6435_v51  ;;  %v6468_v8 = vmul.f32 %v13519_v5, %v13519_v5  ;;  %v9956_v2 = vmov 0.0   ;;  %8855 = vmatprep.subr.mxu1 %v6887_v18  ;;  %v13607_v45 = vld [vmem:[#allocation20 + $0x50] sm:$0xff] }
 0xf3e   : > { %6727 = vmatprep.mubr.f32.mxu1 %v9956_v2 }
 0xf3f   : > { %6489 = vadd.xlane.f32.xlu0 %v6468_v8  ;;  %v6467_v53 = vmul.f32 %v13522_v21, %v13522_v21  ;;  %v13598_v8 = vld [vmem:[#allocation20 + $0xd8] sm:$0xff] }
 0xf41   : > { %6487 = vadd.xlane.f32.xlu1 %v6467_v53 }
 0xf48   : > { %v6413_v26 = vpop.xlane.xlu0 %6412 }
 0xf49   : > { %v6438_v17 = vmul.f32 0.0078125, %v6413_v26 }
 0xf4a   : > { %v6411_v52 = vpop.xlane.xlu1 %6410 }
 0xf4b   : > { %v13530_v23 = vsub.f32 %v13452_v61, %v6438_v17  ;;  %v6437_v28 = vmul.f32 0.0078125, %v6411_v52  ;;  %v13610_v17 = vld [vmem:[#allocation20 + $0xc8] sm:$0xff] }
 0xf4c   : > { %v13613_v52 = vld [vmem:[#allocation20 + $0x48] sm:$0xff] }
 0xf4d   : > { %v13533_v63 = vsub.f32 %v13455_v58, %v6437_v28  ;;  %v6470_v13 = vmul.f32 %v13530_v23, %v13530_v23  ;;  %v13616_v28 = vld [vmem:[#allocation20 + $0xc0] sm:$0xff] }
 0xf4f   : > { %6493 = vadd.xlane.f32.xlu0 %v6470_v13  ;;  %v6469_v10 = vmul.f32 %v13533_v63, %v13533_v63  ;;  %v13619_v13 = vld [vmem:[#allocation20 + $0x40] sm:$0xff] }
 0xf51   : > { %6491 = vadd.xlane.f32.xlu1 %v6469_v10  ;;  %v13622_v10 = vld [vmem:[#allocation20 + $0xb8] sm:$0xff] }
 0xf58   : > { %v6417_v29 = vpop.xlane.xlu0 %6416 }
 0xf59   : > { %v6440_v30 = vmul.f32 0.0078125, %v6417_v29  ;;  %v13625_v29 = vld [vmem:[#allocation20 + $0x38] sm:$0xff] }
 0xf5a   : > { %v6415_v36 = vpop.xlane.xlu1 %6414 }
 0xf5b   : > { %v13540_v62 = vsub.f32 %v13462_v43, %v6440_v30  ;;  %v6439_v61 = vmul.f32 0.0078125, %v6415_v36  ;;  %v13628_v30 = vld [vmem:[#allocation20 + $0xb0] sm:$0xff] }
 0xf5c   : > { %v13631_v36 = vld [vmem:[#allocation20 + $0x30] sm:$0xff] }
 0xf5d   : > { %v13543_v15 = vsub.f32 %v13465_v16, %v6439_v61  ;;  %v6472_v58 = vmul.f32 %v13540_v62, %v13540_v62  ;;  %v13634_v61 = vld [vmem:[#allocation20 + $0xa8] sm:$0xff] }
 0xf5f   : > { %6497 = vadd.xlane.f32.xlu0 %v6472_v58  ;;  %v6471_v55 = vmul.f32 %v13543_v15, %v13543_v15  ;;  %v13637_v58 = vld [vmem:[#allocation20 + $0x28] sm:$0xff] }
 0xf61   : > { %6495 = vadd.xlane.f32.xlu1 %v6471_v55  ;;  %v13640_v55 = vld [vmem:[#allocation20 + $0xa0] sm:$0xff] }
 0xf64   : > { %v6421_v11 = vpop.xlane.xlu0 %6420 }
 0xf65   : > { %v6442_v14 = vmul.f32 0.0078125, %v6421_v11  ;;  %v13643_v11 = vld [vmem:[#allocation20 + $0x20] sm:$0xff] }
 0xf66   : > { %v6419_v50 = vpop.xlane.xlu1 %6418 }
 0xf67   : > { %v13550_v7 = vsub.f32 %v13472_v57, %v6442_v14  ;;  %v6441_v43 = vmul.f32 0.0078125, %v6419_v50 }
 0xf69   : > { %v13553_v6 = vsub.f32 %v13475_v24, %v6441_v43  ;;  %v6474_v16 = vmul.f32 %v13550_v7, %v13550_v7 }
 0xf6b   : > { %6501 = vadd.xlane.f32.xlu0 %v6474_v16  ;;  %v6473_v19 = vmul.f32 %v13553_v6, %v13553_v6 }
 0xf6c   : > { %v6425_v9 = vpop.xlane.xlu0 %6424 }
 0xf6d   : > { %v6444_v37 = vmul.f32 0.0078125, %v6425_v9  ;;  %6499 = vadd.xlane.f32.xlu1 %v6473_v19 }
 0xf6e   : > { %v6423_v34 = vpop.xlane.xlu1 %6422 }
 0xf6f   : > { %v13560_v40 = vsub.f32 %v13482_v27, %v6444_v37  ;;  %v6443_v57 = vmul.f32 0.0078125, %v6423_v34 }
 0xf71   : > { %v13563_v42 = vsub.f32 %v13485_v54, %v6443_v57  ;;  %v6476_v24 = vmul.f32 %v13560_v40, %v13560_v40  ;;  %v13653_v57 = vld [vmem:[%s14815_s3] ss:$0 sm:$0xff] }
 0xf72   : > { %v6429_v20 = vpop.xlane.xlu0 %6428 }
 0xf73   : > { %v6446_v41 = vmul.f32 0.0078125, %v6429_v20  ;;  %6505 = vadd.xlane.f32.xlu0 %v6476_v24  ;;  %v6475_v35 = vmul.f32 %v13563_v42, %v13563_v42 }
 0xf74   : > { %v6427_v31 = vpop.xlane.xlu1 %6426 }
 0xf75   : > { %v13570_v38 = vsub.f32 %v13492_v49, %v6446_v41  ;;  %v6445_v33 = vmul.f32 0.0078125, %v6427_v31  ;;  %6503 = vadd.xlane.f32.xlu1 %v6475_v35  ;;  %v13583_v49 = vld [vmem:[#allocation20 + $0x70] sm:$0xff]  ;;  %v13659_v41 = vld [vmem:[%s14816_s9] ss:$0 sm:$0xff] }
 0xf76   : > { %8074 = vmatpush3.msra.mxu0 %v13583_v49 }
 0xf77   : > { %v13573_v27 = vsub.f32 %v13495_v12, %v6445_v33  ;;  %v6478_v54 = vmul.f32 %v13570_v38, %v13570_v38  ;;  %v13586_v12 = vld [vmem:[#allocation20 + $0xe8] sm:$0xff] }
 0xf78   : > { %8075 = vmatprep.subr.mxu0 %v13586_v12 }
 0xf79   : > { %6509 = vadd.xlane.f32.xlu0 %v6478_v54  ;;  %v6477_v22 = vmul.f32 %v13573_v27, %v13573_v27  ;;  %8076 = vmatpush3.msra.mxu0 %v13589_v3 }
 0xf7a   : > { %8077 = vmatprep.subr.mxu0 %v13592_v60 }
 0xf7b   : > { %6507 = vadd.xlane.f32.xlu1 %v6477_v22  ;;  %8078 = vmatpush3.msra.mxu0 %v13595_v4 }
 0xf7c   : > { %8079 = vmatprep.subr.mxu0 %v13598_v8 }
 0xf7d   : > { %8080 = vmatpush3.msra.mxu0 %v13601_v59 }
 0xf7e   : > { %8081 = vmatprep.subr.mxu0 %v13604_v56 }
 0xf7f   : > { %8082 = vmatpush3.msra.mxu0 %v13607_v45 }
 0xf80   : > { %8083 = vmatprep.subr.mxu0 %v13610_v17 }
 0xf81   : > { %8084 = vmatpush3.msra.mxu0 %v13613_v52 }
 0xf82   : > { %8085 = vmatprep.subr.mxu0 %v13616_v28 }
 0xf83   : > { %8086 = vmatpush3.msra.mxu0 %v13619_v13 }
 0xf84   : > { %8087 = vmatprep.subr.mxu0 %v13622_v10 }
 0xf85   : > { %8088 = vmatpush3.msra.mxu0 %v13625_v29 }
 0xf86   : > { %8089 = vmatprep.subr.mxu0 %v13628_v30 }
 0xf87   : > { %8090 = vmatpush3.msra.mxu0 %v13631_v36 }
 0xf88   : > { %8091 = vmatprep.subr.mxu0 %v13634_v61 }
 0xf89   : > { %8092 = vmatpush3.msra.mxu0 %v13637_v58 }
 0xf8a   : > { %8093 = vmatprep.subr.mxu0 %v13640_v55 }
 0xf8b   : > { %8094 = vmatpush3.msra.mxu0 %v13643_v11 }
 0xfa8   : > { %v6482_v51 = vpop.xlane.xlu0 %6481 }
 0xfa9   : > { %v6512_v46 = vmul.f32 0.0078125, %v6482_v51 }
 0xfaa   : > { %v6480_v32 = vpop.xlane.xlu1 %6479 }
 0xfab   : > { %v6528_v53 = vadd.f32 1e-05, %v6512_v46  ;;  %v6511_v48 = vmul.f32 0.0078125, %v6480_v32 }
 0xfad   : > { %9478 = vrsqrt.f32 %v6528_v53  ;;  %v6527_v26 = vadd.f32 1e-05, %v6511_v48 }
 0xfaf   : > { %9480 = vrsqrt.f32 %v6527_v26 }
 0xfba   : > { %v9479_v14 = vpop.eup %9478  ;;  %v6484_v50 = vpop.xlane.xlu1 %6483 }
 0xfbb   : > { %v6513_v43 = vmul.f32 0.0078125, %v6484_v50  ;;  %v6560_v37 = vmul.f32 %v9479_v14, %v13499_v39 }
 0xfbc   : > { %v9481_v16 = vpop.eup %9480 }
 0xfbd   : > { %v6529_v19 = vadd.f32 1e-05, %v6513_v43  ;;  %v6559_v9 = vmul.f32 %v9481_v16, %v13502_v47  ;;  %v6582_v39 = vmul.f32 %v13653_v57, %v6560_v37 }
 0xfbe   : > { %v6486_v34 = vpop.xlane.xlu0 %6485 }
 0xfbf   : > { %9482 = vrsqrt.f32 %v6529_v19  ;;  %v6514_v24 = vmul.f32 0.0078125, %v6486_v34  ;;  %v6581_v20 = vmul.f32 %v13653_v57, %v6559_v9  ;;  %v13669_v31 = vadd.f32 %v13659_v41, %v6582_v39 }
 0xfc1   : > { %v6530_v35 = vadd.f32 1e-05, %v6514_v24  ;;  %v13662_v47 = vadd.f32 %v13659_v41, %v6581_v20 }
 0xfc3   : > { %9484 = vrsqrt.f32 %v6530_v35  ;;  %6728 = vmatmul.mubr.f32.vlgmr.msra.gmra.mxu1 %v13662_v47 }
 0xfc4   : > { %6733 = vmatprep.mubr.f32.mxu1 %v9956_v2  ;;  %8871 = vmatpush3.msra.mxu1 %v13579_v44 }
 0xfc5   : > { %8856 = vmatprep.subr.mxu1 %v13581_v25 }
 0xfc6   : > { %8872 = vmatpush3.msra.mxu1 %v13583_v49 }
 0xfc7   : > { %6734 = vmatmul.mubr.f32.gmra.mxu1 %v13669_v31  ;;  %8857 = vmatprep.subr.mxu1 %v13586_v12 }
 0xfc8   : > { %v6490_v33 = vpop.xlane.xlu0 %6489  ;;  %6739 = vmatprep.mubr.f32.mxu1 %v9956_v2  ;;  %8873 = vmatpush3.msra.mxu1 %v13589_v3 }
 0xfc9   : > { %v6516_v54 = vmul.f32 0.0078125, %v6490_v33  ;;  %8858 = vmatprep.subr.mxu1 %v13592_v60 }
 0xfca   : > { %v6488_v22 = vpop.xlane.xlu1 %6487  ;;  %8874 = vmatpush3.msra.mxu1 %v13595_v4 }
 0xfcb   : > { %v6532_v18 = vadd.f32 1e-05, %v6516_v54  ;;  %v6515_v44 = vmul.f32 0.0078125, %v6488_v22  ;;  %8859 = vmatprep.subr.mxu1 %v13598_v8 }
 0xfcc   : > { %v9483_v25 = vpop.eup %9482  ;;  %8875 = vmatpush3.msra.mxu1 %v13601_v59 }
 0xfcd   : > { %9486 = vrsqrt.f32 %v6532_v18  ;;  %v6531_v49 = vadd.f32 1e-05, %v6515_v44  ;;  %v6561_v12 = vmul.f32 %v9483_v25, %v13509_v0  ;;  %8860 = vmatprep.subr.mxu1 %v13604_v56 }
 0xfce   : > { %8876 = vmatpush3.msra.mxu1 %v13607_v45 }
 0xfcf   : > { %9488 = vrsqrt.f32 %v6531_v49  ;;  %v6583_v3 = vmul.f32 %v13653_v57, %v6561_v12  ;;  %8861 = vmatprep.subr.mxu1 %v13610_v17 }
 0xfd0   : > { %v9485_v60 = vpop.eup %9484  ;;  %8877 = vmatpush3.msra.mxu1 %v13613_v52 }
 0xfd1   : > { %v13688_v51 = vadd.f32 %v13659_v41, %v6583_v3  ;;  %v6562_v4 = vmul.f32 %v9485_v60, %v13514_v1  ;;  %8862 = vmatprep.subr.mxu1 %v13616_v28 }
 0xfd2   : > { %8878 = vmatpush3.msra.mxu1 %v13619_v13 }
 0xfd3   : > { %6740 = vmatmul.mubr.f32.gmra.mxu1 %v13688_v51  ;;  %v6584_v0 = vmul.f32 %v13653_v57, %v6562_v4  ;;  %8863 = vmatprep.subr.mxu1 %v13622_v10 }
 0xfd4   : > { %6745 = vmatprep.mubr.f32.mxu1 %v9956_v2  ;;  %8879 = vmatpush3.msra.mxu1 %v13625_v29 }
 0xfd5   : > { %v13699_v46 = vadd.f32 %v13659_v41, %v6584_v0  ;;  %8864 = vmatprep.subr.mxu1 %v13628_v30  ;;  %v6875_v0 = vld [vmem:[#allocation20 + $0x98] sm:$0xff] }
 0xfd6   : > { %8880 = vmatpush3.msra.mxu1 %v13631_v36  ;;  %8095 = vmatprep.subr.mxu0 %v6875_v0 }
 0xfd7   : > { %6746 = vmatmul.mubr.f32.gmra.mxu1 %v13699_v46  ;;  %8865 = vmatprep.subr.mxu1 %v13634_v61 }
 0xfd8   : > { %v6494_v1 = vpop.xlane.xlu0 %6493  ;;  %6751 = vmatprep.mubr.f32.mxu1 %v9956_v2  ;;  %8881 = vmatpush3.msra.mxu1 %v13637_v58 }
 0xfd9   : > { %v6518_v8 = vmul.f32 0.0078125, %v6494_v1  ;;  %8866 = vmatprep.subr.mxu1 %v13640_v55 }
 0xfda   : > { %v9487_v32 = vpop.eup %9486  ;;  %v6492_v59 = vpop.xlane.xlu1 %6491  ;;  %8882 = vmatpush3.msra.mxu1 %v13643_v11 }
 0xfdb   : > { %v6534_v53 = vadd.f32 1e-05, %v6518_v8  ;;  %v6517_v48 = vmul.f32 0.0078125, %v6492_v59  ;;  %v6564_v17 = vmul.f32 %v9487_v32, %v13519_v5  ;;  %v6874_v8 = vld [vmem:[#allocation20 + $0x90] sm:$0xff]  ;;  %8867 = vmatprep.subr.mxu1 %v6875_v0 }
 0xfdc   : > { %v9489_v56 = vpop.eup %9488 }
 0xfdd   : > { %9490 = vrsqrt.f32 %v6534_v53  ;;  %v6533_v45 = vadd.f32 1e-05, %v6517_v48  ;;  %v6563_v26 = vmul.f32 %v9489_v56, %v13522_v21  ;;  %v6586_v13 = vmul.f32 %v13653_v57, %v6564_v17  ;;  %v6858_v48 = vld [vmem:[#allocation20 + $0x10] sm:$0xff]  ;;  %v6857_v17 = vld [vmem:[#allocation20 + $0x8] sm:$0xff] }
 0xfdf   : > { %9492 = vrsqrt.f32 %v6533_v45  ;;  %v6585_v52 = vmul.f32 %v13653_v57, %v6563_v26  ;;  %v13719_v10 = vadd.f32 %v13659_v41, %v6586_v13  ;;  %v6873_v45 = vld [vmem:[#allocation20 + $0x88] sm:$0xff]  ;;  %v6872_v13 = vld [vmem:[#allocation20 + $0x80] sm:$0xff] }
 0xfe1   : > { %v13713_v28 = vadd.f32 %v13659_v41, %v6585_v52 }
 0xfe3   : > { %6752 = vmatmul.mubr.f32.gmra.mxu1 %v13713_v28 }
 0xfe4   : > { %6757 = vmatprep.mubr.f32.mxu1 %v9956_v2 }
 0xfe7   : > { %6758 = vmatmul.mubr.f32.gmra.mxu1 %v13719_v10 }
 0xfe8   : > { %v6498_v21 = vpop.xlane.xlu0 %6497  ;;  %6763 = vmatprep.mubr.f32.mxu1 %v9956_v2 }
 0xfe9   : > { %v6520_v5 = vmul.f32 0.0078125, %v6498_v21 }
 0xfea   : > { %v9491_v29 = vpop.eup %9490  ;;  %v6496_v30 = vpop.xlane.xlu1 %6495 }
 0xfeb   : > { %v6536_v36 = vadd.f32 1e-05, %v6520_v5  ;;  %v6519_v61 = vmul.f32 0.0078125, %v6496_v30  ;;  %v6566_v14 = vmul.f32 %v9491_v29, %v13530_v23  ;;  %v6856_v29 = vld [vmem:[#allocation20] sm:$0xff] }
 0xfec   : > { %v9493_v58 = vpop.eup %9492 }
 0xfed   : > { %9494 = vrsqrt.f32 %v6536_v36  ;;  %v6535_v55 = vadd.f32 1e-05, %v6519_v61  ;;  %v6565_v11 = vmul.f32 %v9493_v58, %v13533_v63  ;;  %v6588_v16 = vmul.f32 %v13653_v57, %v6566_v14 }
 0xfef   : > { %9496 = vrsqrt.f32 %v6535_v55  ;;  %v6587_v50 = vmul.f32 %v13653_v57, %v6565_v11  ;;  %v13733_v37 = vadd.f32 %v13659_v41, %v6588_v16 }
 0xff1   : > { %v13727_v43 = vadd.f32 %v13659_v41, %v6587_v50 }
 0xff3   : > { %6764 = vmatmul.mubr.f32.gmra.mxu1 %v13727_v43 }
 0xff4   : > { %v6502_v19 = vpop.xlane.xlu0 %6501  ;;  %6769 = vmatprep.mubr.f32.mxu1 %v9956_v2 }
 0xff5   : > { %v6522_v9 = vmul.f32 0.0078125, %v6502_v19 }
 0xff6   : > { %v6500_v63 = vpop.xlane.xlu1 %6499 }
 0xff7   : > { %v6538_v34 = vadd.f32 1e-05, %v6522_v9  ;;  %v6521_v23 = vmul.f32 0.0078125, %v6500_v63  ;;  %6770 = vmatmul.mubr.f32.gmra.mxu1 %v13733_v37 }
 0xff8   : > { %6775 = vmatprep.mubr.f32.mxu1 %v9956_v2 }
 0xff9   : > { %9498 = vrsqrt.f32 %v6538_v34  ;;  %v6537_v24 = vadd.f32 1e-05, %v6521_v23 }
 0xffa   : > { %v9495_v20 = vpop.eup %9494 }
 0xffb   : > { %9500 = vrsqrt.f32 %v6537_v24  ;;  %v6568_v22 = vmul.f32 %v9495_v20, %v13540_v62  ;;  %v6859_v62 = vld [vmem:[#allocation20 + $0x18] sm:$0xff]  ;;  %v6653_v20 = vlaneseq }
 0xffc   : > { %v9497_v35 = vpop.eup %9496  ;;  %v6506_v39 = vpop.xlane.xlu0 %6505  ;;  %8096 = vmatpush3.msra.mxu0 %v6859_v62  ;;  %8883 = vmatpush3.msra.mxu1 %v6859_v62 }
 0xffd   : > { %v6524_v33 = vmul.f32 0.0078125, %v6506_v39  ;;  %v6567_v54 = vmul.f32 %v9497_v35, %v13543_v15  ;;  %v6590_v60 = vmul.f32 %v13653_v57, %v6568_v22  ;;  %8097 = vmatprep.subr.mxu0 %v6874_v8  ;;  %8868 = vmatprep.subr.mxu1 %v6874_v8  ;;  %v6651_v39 = vld [vmem:[%s14817_s13] sm:$0x3] }
 0xffe   : > { %v6504_v18 = vpop.xlane.xlu1 %6503  ;;  %8098 = vmatpush3.msra.mxu0 %v6858_v48  ;;  %8884 = vmatpush3.msra.mxu1 %v6858_v48 }
 0xfff   : > { %v6540_v44 = vadd.f32 1e-05, %v6524_v33  ;;  %v6523_v25 = vmul.f32 0.0078125, %v6504_v18  ;;  %v6589_v49 = vmul.f32 %v13653_v57, %v6567_v54  ;;  %v13747_v53 = vadd.f32 %v13659_v41, %v6590_v60  ;;  %8099 = vmatprep.subr.mxu0 %v6873_v45  ;;  %8869 = vmatprep.subr.mxu1 %v6873_v45 }
0x1000   : > { %8100 = vmatpush3.msra.mxu0 %v6857_v17  ;;  %8885 = vmatpush3.msra.mxu1 %v6857_v17 }
0x1001   : > { %9502 = vrsqrt.f32 %v6540_v44  ;;  %v6539_v12 = vadd.f32 1e-05, %v6523_v25  ;;  %v13741_v3 = vadd.f32 %v13659_v41, %v6589_v49  ;;  %8101 = vmatprep.subr.mxu0 %v6872_v13  ;;  %8870 = vmatprep.subr.mxu1 %v6872_v13 }
0x1002   : > { %v6510_v4 = vpop.xlane.xlu0 %6509  ;;  %8102 = vmatpush3.msra.mxu0 %v6856_v29  ;;  %8886 = vmatpush3.msra.mxu1 %v6856_v29 }
0x1003   : > { %9504 = vrsqrt.f32 %v6539_v12  ;;  %v6526_v1 = vmul.f32 0.0078125, %v6510_v4  ;;  %6776 = vmatmul.mubr.f32.gmra.mxu1 %v13741_v3 }
0x1004   : > { %v6508_v15 = vpop.xlane.xlu1 %6507  ;;  %6781 = vmatprep.mubr.f32.mxu1 %v9956_v2 }
0x1005   : > { %v6542_v32 = vadd.f32 1e-05, %v6526_v1  ;;  %v6525_v59 = vmul.f32 0.0078125, %v6508_v15 }
0x1006   : > { %v9499_v56 = vpop.eup %9498 }
0x1007   : > { %v6541_v26 = vadd.f32 1e-05, %v6525_v59  ;;  %6782 = vmatmul.mubr.f32.gmra.mxu1 %v13747_v53  ;;  %9506 = vrsqrt.f32 %v6542_v32  ;;  %v6570_v5 = vmul.f32 %v9499_v56, %v13550_v7 }
0x1008   : > { %v9501_v52 = vpop.eup %9500  ;;  %6787 = vmatprep.mubr.f32.mxu1 %v9956_v2 }
0x1009   : > { %9508 = vrsqrt.f32 %v6541_v26  ;;  %v6569_v21 = vmul.f32 %v9501_v52, %v13553_v6  ;;  %v6592_v61 = vmul.f32 %v13653_v57, %v6570_v5 }
0x100b   : > { %v6591_v30 = vmul.f32 %v13653_v57, %v6569_v21  ;;  %v13761_v6 = vadd.f32 %v13659_v41, %v6592_v61 }
0x100d   : > { %v13755_v36 = vadd.f32 %v13659_v41, %v6591_v30 }
0x100e   : > { %v9503_v58 = vpop.eup %9502 }
0x100f   : > { %6788 = vmatmul.mubr.f32.gmra.mxu1 %v13755_v36  ;;  %v6572_v11 = vmul.f32 %v9503_v58, %v13560_v40 }
0x1010   : > { %v9505_v7 = vpop.eup %9504  ;;  %6793 = vmatprep.mubr.f32.mxu1 %v9956_v2 }
0x1011   : > { %v6571_v55 = vmul.f32 %v9505_v7, %v13563_v42  ;;  %v6594_v19 = vmul.f32 %v13653_v57, %v6572_v11 }
0x1013   : > { %6794 = vmatmul.mubr.f32.gmra.mxu1 %v13761_v6  ;;  %v6593_v14 = vmul.f32 %v13653_v57, %v6571_v55  ;;  %v13776_v40 = vadd.f32 %v13659_v41, %v6594_v19 }
0x1014   : > { %6799 = vmatprep.mubr.f32.mxu1 %v9956_v2  ;;  %v9507_v50 = vpop.eup %9506 }
0x1015   : > { %v13769_v16 = vadd.f32 %v13659_v41, %v6593_v14  ;;  %v6574_v34 = vmul.f32 %v9507_v50, %v13570_v38  ;;  %v6654_v38 = vshrl.u32 %v6653_v20, 7 }
0x1016   : > { %v9509_v9 = vpop.eup %9508 }
0x1017   : > { %6800 = vmatmul.mubr.f32.gmra.mxu1 %v13769_v16  ;;  %v6573_v63 = vmul.f32 %v9509_v9, %v13573_v27  ;;  %v6596_v24 = vmul.f32 %v13653_v57, %v6574_v34  ;;  %v6655_v35 = vsub.s32 0, %v6654_v38  ;;  %v6659_v33 = vsub.s32 1, %v6654_v38 }
0x1018   : > { %6805 = vmatprep.mubr.f32.mxu1 %v9956_v2 }
0x1019   : > { %v6595_v42 = vmul.f32 %v13653_v57, %v6573_v63  ;;  %v13789_v27 = vadd.f32 %v13659_v41, %v6596_v24  ;;  %v13795_v54 = vrot.slane %v6651_v39, %v6655_v35  ;;  %v13797_v57 = vrot.slane %v6651_v39, %v6659_v33 }
0x101b   : > { %6806 = vmatmul.mubr.f32.gmra.mxu1 %v13776_v40  ;;  %v13783_v23 = vadd.f32 %v13659_v41, %v6595_v42 }
0x101c   : > { %6811 = vmatprep.mubr.f32.mxu1 %v9956_v2 }
0x101f   : > { %6812 = vmatmul.mubr.f32.gmra.mxu1 %v13783_v23 }
0x1020   : > { %6817 = vmatprep.mubr.f32.mxu1 %v9956_v2 }
0x1023   : > { %6818 = vmatmul.mubr.f32.gmra.mxu1 %v13789_v27 }
0x1083   : > { %v6729_v22 = vpop.f32.mrf.mxu1 }
0x1084   : > { %v6730_v2 = vadd.f32 %v6729_v22, %v13795_v54 }
0x1085   : > { %v6731_v18 = vpop.f32.mrf.mxu1 }
0x1086   : > { %v6732_v41 = vadd.f32 %v6731_v18, %v13797_v57  ;;  %v6824_v49 = vmax.f32 %v6730_v2, 0.0 }
0x1087   : > { %v6735_v44 = vpop.f32.mrf.mxu1 }
0x1088   : > { %v6825_v25 = vmax.f32 %v6732_v41, 0.0  ;;  %v6736_v12 = vadd.f32 %v6735_v44, %v13795_v54 }
0x1089   : > { %v6737_v60 = vpop.f32.mrf.mxu1 }
0x108a   : > { %v6738_v4 = vadd.f32 %v6737_v60, %v13797_v57  ;;  %6959 = vmatprep.mubr.f32.mxu0 %v6825_v25  ;;  %v6826_v1 = vmax.f32 %v6736_v12, 0.0 }
0x108b   : > { %6960 = vmatmul.mubr.f32.vlgmr.msra.gmra.mxu0 %v6824_v49 }
0x108c   : > { %v6827_v0 = vmax.f32 %v6738_v4, 0.0 }
0x108e   : > { %6964 = vmatprep.mubr.f32.mxu0 %v6827_v0 }
0x108f   : > { %6965 = vmatmul.mubr.f32.gmra.mxu0 %v6826_v1 }
0x1093   : > { %v6741_v62 = vpop.f32.mrf.mxu1 }
0x1094   : > { %v6742_v15 = vadd.f32 %v6741_v62, %v13795_v54 }
0x1095   : > { %v6743_v8 = vpop.f32.mrf.mxu1 }
0x1096   : > { %v6744_v32 = vadd.f32 %v6743_v8, %v13797_v57  ;;  %v6828_v56 = vmax.f32 %v6742_v15, 0.0 }
0x1097   : > { %v6747_v59 = vpop.f32.mrf.mxu1 }
0x1098   : > { %v6829_v48 = vmax.f32 %v6744_v32, 0.0  ;;  %v6748_v45 = vadd.f32 %v6747_v59, %v13795_v54 }
0x1099   : > { %v6749_v26 = vpop.f32.mrf.mxu1 }
0x109a   : > { %v6750_v17 = vadd.f32 %v6749_v26, %v13797_v57  ;;  %6969 = vmatprep.mubr.f32.mxu0 %v6829_v48  ;;  %v6830_v13 = vmax.f32 %v6748_v45, 0.0 }
0x109b   : > { %6970 = vmatmul.mubr.f32.gmra.mxu0 %v6828_v56 }
0x109c   : > { %v6831_v52 = vmax.f32 %v6750_v17, 0.0 }
0x109e   : > { %6974 = vmatprep.mubr.f32.mxu0 %v6831_v52 }
0x109f   : > { %6975 = vmatmul.mubr.f32.gmra.mxu0 %v6830_v13 }
0x10a3   : > { %v6753_v21 = vpop.f32.mrf.mxu1 }
0x10a4   : > { %v6754_v5 = vadd.f32 %v6753_v21, %v13795_v54 }
0x10a5   : > { %v6755_v29 = vpop.f32.mrf.mxu1 }
0x10a6   : > { %v6756_v30 = vadd.f32 %v6755_v29, %v13797_v57  ;;  %v6832_v7 = vmax.f32 %v6754_v5, 0.0 }
0x10a7   : > { %v6759_v61 = vpop.f32.mrf.mxu1 }
0x10a8   : > { %v6833_v58 = vmax.f32 %v6756_v30, 0.0  ;;  %v6760_v55 = vadd.f32 %v6759_v61, %v13795_v54 }
0x10a9   : > { %v6761_v11 = vpop.f32.mrf.mxu1 }
0x10aa   : > { %v6762_v14 = vadd.f32 %v6761_v11, %v13797_v57  ;;  %6979 = vmatprep.mubr.f32.mxu0 %v6833_v58  ;;  %v6834_v19 = vmax.f32 %v6760_v55, 0.0 }
0x10ab   : > { %6980 = vmatmul.mubr.f32.gmra.mxu0 %v6832_v7 }
0x10ac   : > { %v6835_v50 = vmax.f32 %v6762_v14, 0.0 }
0x10ae   : > { %6984 = vmatprep.mubr.f32.mxu0 %v6835_v50 }
0x10af   : > { %6985 = vmatmul.mubr.f32.gmra.mxu0 %v6834_v19 }
0x10b3   : > { %v6765_v9 = vpop.f32.mrf.mxu1 }
0x10b4   : > { %v6766_v63 = vadd.f32 %v6765_v9, %v13795_v54 }
0x10b5   : > { %v6767_v42 = vpop.f32.mrf.mxu1 }
0x10b6   : > { %v6768_v34 = vadd.f32 %v6767_v42, %v13797_v57  ;;  %v6836_v38 = vmax.f32 %v6766_v63, 0.0 }
0x10b7   : > { %v6771_v24 = vpop.f32.mrf.mxu1 }
0x10b8   : > { %v6837_v20 = vmax.f32 %v6768_v34, 0.0  ;;  %v6772_v35 = vadd.f32 %v6771_v24, %v13795_v54 }
0x10b9   : > { %v6773_v39 = vpop.f32.mrf.mxu1 }
0x10ba   : > { %v6774_v33 = vadd.f32 %v6773_v39, %v13797_v57  ;;  %6989 = vmatprep.mubr.f32.mxu0 %v6837_v20  ;;  %v6838_v2 = vmax.f32 %v6772_v35, 0.0 }
0x10bb   : > { %6990 = vmatmul.mubr.f32.gmra.mxu0 %v6836_v38 }
0x10bc   : > { %v6839_v22 = vmax.f32 %v6774_v33, 0.0 }
0x10be   : > { %6994 = vmatprep.mubr.f32.mxu0 %v6839_v22 }
0x10bf   : > { %6995 = vmatmul.mubr.f32.gmra.mxu0 %v6838_v2 }
0x10c3   : > { %v6777_v18 = vpop.f32.mrf.mxu1 }
0x10c4   : > { %v6778_v41 = vadd.f32 %v6777_v18, %v13795_v54 }
0x10c5   : > { %v6779_v44 = vpop.f32.mrf.mxu1 }
0x10c6   : > { %v6780_v25 = vadd.f32 %v6779_v44, %v13797_v57  ;;  %v6840_v60 = vmax.f32 %v6778_v41, 0.0 }
0x10c7   : > { %v6783_v49 = vpop.f32.mrf.mxu1 }
0x10c8   : > { %v6841_v12 = vmax.f32 %v6780_v25, 0.0  ;;  %v6784_v4 = vadd.f32 %v6783_v49, %v13795_v54  ;;  %v13834_v25 = vld [vmem:[%s14818_s4] ss:$0 sm:$0xff] }
0x10c9   : > { %v6785_v0 = vpop.f32.mrf.mxu1 }
0x10ca   : > { %v6786_v1 = vadd.f32 %v6785_v0, %v13797_v57  ;;  %6999 = vmatprep.mubr.f32.mxu0 %v6841_v12  ;;  %v6842_v15 = vmax.f32 %v6784_v4, 0.0 }
0x10cb   : > { %7000 = vmatmul.mubr.f32.gmra.mxu0 %v6840_v60 }
0x10cc   : > { %v6843_v62 = vmax.f32 %v6786_v1, 0.0 }
0x10ce   : > { %7004 = vmatprep.mubr.f32.mxu0 %v6843_v62 }
0x10cf   : > { %v6789_v8 = vpop.f32.mrf.mxu1  ;;  %7005 = vmatmul.mubr.f32.gmra.mxu0 %v6842_v15 }
0x10d0   : > { %v6790_v32 = vadd.f32 %v6789_v8, %v13795_v54 }
0x10d1   : > { %v6791_v59 = vpop.f32.mrf.mxu1 }
0x10d2   : > { %v6792_v48 = vadd.f32 %v6791_v59, %v13797_v57  ;;  %v6844_v26 = vmax.f32 %v6790_v32, 0.0 }
0x10d3   : > { %v6795_v56 = vpop.f32.mrf.mxu1 }
0x10d4   : > { %v6845_v45 = vmax.f32 %v6792_v48, 0.0  ;;  %v6796_v17 = vadd.f32 %v6795_v56, %v13795_v54 }
0x10d5   : > { %v6797_v52 = vpop.f32.mrf.mxu1 }
0x10d6   : > { %v6798_v13 = vadd.f32 %v6797_v52, %v13797_v57  ;;  %7009 = vmatprep.mubr.f32.mxu0 %v6845_v45  ;;  %v6846_v29 = vmax.f32 %v6796_v17, 0.0 }
0x10d7   : > { %v6801_v21 = vpop.f32.mrf.mxu1  ;;  %7010 = vmatmul.mubr.f32.gmra.mxu0 %v6844_v26 }
0x10d8   : > { %v6847_v5 = vmax.f32 %v6798_v13, 0.0  ;;  %v6802_v30 = vadd.f32 %v6801_v21, %v13795_v54 }
0x10d9   : > { %v6803_v61 = vpop.f32.mrf.mxu1 }
0x10da   : > { %v6804_v58 = vadd.f32 %v6803_v61, %v13797_v57  ;;  %7014 = vmatprep.mubr.f32.mxu0 %v6847_v5  ;;  %v6848_v11 = vmax.f32 %v6802_v30, 0.0 }
0x10db   : > { %v6807_v7 = vpop.f32.mrf.mxu1  ;;  %7015 = vmatmul.mubr.f32.gmra.mxu0 %v6846_v29 }
0x10dc   : > { %v6849_v55 = vmax.f32 %v6804_v58, 0.0  ;;  %v6808_v14 = vadd.f32 %v6807_v7, %v13795_v54 }
0x10dd   : > { %v6809_v50 = vpop.f32.mrf.mxu1 }
0x10de   : > { %v6810_v19 = vadd.f32 %v6809_v50, %v13797_v57  ;;  %7019 = vmatprep.mubr.f32.mxu1 %v6849_v55  ;;  %v6850_v42 = vmax.f32 %v6808_v14, 0.0 }
0x10df   : > { %v6813_v9 = vpop.f32.mrf.mxu1  ;;  %7020 = vmatmul.mubr.f32.vlgmr.msra.gmra.mxu1 %v6848_v11 }
0x10e0   : > { %v6851_v63 = vmax.f32 %v6810_v19, 0.0  ;;  %v6814_v34 = vadd.f32 %v6813_v9, %v13795_v54 }
0x10e1   : > { %v6815_v24 = vpop.f32.mrf.mxu1 }
0x10e2   : > { %v6816_v20 = vadd.f32 %v6815_v24, %v13797_v57  ;;  %7024 = vmatprep.mubr.f32.mxu1 %v6851_v63  ;;  %v6852_v39 = vmax.f32 %v6814_v34, 0.0 }
0x10e3   : > { %v6819_v38 = vpop.f32.mrf.mxu1  ;;  %7025 = vmatmul.mubr.f32.gmra.mxu1 %v6850_v42 }
0x10e4   : > { %v6853_v35 = vmax.f32 %v6816_v20, 0.0  ;;  %v6820_v33 = vadd.f32 %v6819_v38, %v13795_v54 }
0x10e5   : > { %v6821_v22 = vpop.f32.mrf.mxu1 }
0x10e6   : > { %v6822_v2 = vadd.f32 %v6821_v22, %v13797_v57  ;;  %7029 = vmatprep.mubr.f32.mxu1 %v6853_v35  ;;  %v6854_v41 = vmax.f32 %v6820_v33, 0.0 }
0x10e7   : > { %7030 = vmatmul.mubr.f32.gmra.mxu1 %v6852_v39 }
0x10e8   : > { %v6855_v18 = vmax.f32 %v6822_v2, 0.0 }
0x10ea   : > { %7034 = vmatprep.mubr.f32.mxu1 %v6855_v18 }
0x10eb   : > { %7035 = vmatmul.mubr.f32.gmra.mxu1 %v6854_v41 }
0x114b   : > { %v8103_v44 = vpop.f32.mrf.mxu0 }
0x114d   : > { %v8104_v49 = vpop.f32.mrf.mxu0 }
0x114e   : > { %v8105_v12 = vadd.f32 %v8104_v49, %v8103_v44 }
0x114f   : > { %v8106_v60 = vpop.f32.mrf.mxu0 }
0x1150   : > { %v6962_v54 = vadd.f32 %v8105_v12, %v13834_v25 }
0x1151   : > { %v8107_v4 = vpop.f32.mrf.mxu0 }
0x1152   : > { %v8108_v0 = vadd.f32 %v8107_v4, %v8106_v60  ;;  %v13838_v57 = vadd.f32 %v6962_v54, %v13662_v47 }
0x1154   : > { %v6967_v1 = vadd.f32 %v8108_v0, %v13834_v25  ;;  %7058 = vadd.xlane.f32.xlu1 %v13838_v57 }
0x1156   : > { %v13843_v62 = vadd.f32 %v6967_v1, %v13669_v31 }
0x1158   : > { %7060 = vadd.xlane.f32.xlu0 %v13843_v62 }
0x115b   : > { %v8109_v15 = vpop.f32.mrf.mxu0 }
0x115d   : > { %v8110_v8 = vpop.f32.mrf.mxu0 }
0x115e   : > { %v8111_v32 = vadd.f32 %v8110_v8, %v8109_v15 }
0x115f   : > { %v8112_v59 = vpop.f32.mrf.mxu0 }
0x1160   : > { %v6972_v48 = vadd.f32 %v8111_v32, %v13834_v25 }
0x1161   : > { %v8113_v56 = vpop.f32.mrf.mxu0 }
0x1162   : > { %v8114_v45 = vadd.f32 %v8113_v56, %v8112_v59  ;;  %v13848_v47 = vadd.f32 %v6972_v48, %v13688_v51 }
0x1164   : > { %v6977_v26 = vadd.f32 %v8114_v45, %v13834_v25  ;;  %7062 = vadd.xlane.f32.xlu1 %v13848_v47 }
0x1166   : > { %v13853_v31 = vadd.f32 %v6977_v26, %v13699_v46 }
0x1168   : > { %7064 = vadd.xlane.f32.xlu0 %v13853_v31 }
0x116b   : > { %v8115_v17 = vpop.f32.mrf.mxu0 }
0x116d   : > { %v8116_v52 = vpop.f32.mrf.mxu0 }
0x116e   : > { %v8117_v13 = vadd.f32 %v8116_v52, %v8115_v17 }
0x116f   : > { %v8118_v21 = vpop.f32.mrf.mxu0 }
0x1170   : > { %v6982_v5 = vadd.f32 %v8117_v13, %v13834_v25 }
0x1171   : > { %v8119_v29 = vpop.f32.mrf.mxu0 }
0x1172   : > { %v8120_v30 = vadd.f32 %v8119_v29, %v8118_v21  ;;  %v13858_v51 = vadd.f32 %v6982_v5, %v13713_v28 }
0x1174   : > { %v6987_v61 = vadd.f32 %v8120_v30, %v13834_v25  ;;  %7066 = vadd.xlane.f32.xlu1 %v13858_v51 }
0x1176   : > { %v13863_v46 = vadd.f32 %v6987_v61, %v13719_v10 }
0x1178   : > { %7068 = vadd.xlane.f32.xlu0 %v13863_v46 }
0x117b   : > { %v8121_v58 = vpop.f32.mrf.mxu0 }
0x117d   : > { %v8122_v7 = vpop.f32.mrf.mxu0 }
0x117e   : > { %v8123_v55 = vadd.f32 %v8122_v7, %v8121_v58 }
0x117f   : > { %v8124_v11 = vpop.f32.mrf.mxu0 }
0x1180   : > { %v6992_v14 = vadd.f32 %v8123_v55, %v13834_v25 }
0x1181   : > { %v8125_v50 = vpop.f32.mrf.mxu0 }
0x1182   : > { %v8126_v19 = vadd.f32 %v8125_v50, %v8124_v11  ;;  %v13868_v28 = vadd.f32 %v6992_v14, %v13727_v43 }
0x1184   : > { %v6997_v9 = vadd.f32 %v8126_v19, %v13834_v25  ;;  %7070 = vadd.xlane.f32.xlu1 %v13868_v28 }
0x1186   : > { %v13873_v10 = vadd.f32 %v6997_v9, %v13733_v37 }
0x1188   : > { %7072 = vadd.xlane.f32.xlu0 %v13873_v10 }
0x118b   : > { %v8127_v63 = vpop.f32.mrf.mxu0 }
0x118d   : > { %v8128_v42 = vpop.f32.mrf.mxu0 }
0x118e   : > { %v8129_v34 = vadd.f32 %v8128_v42, %v8127_v63 }
0x118f   : > { %v8130_v24 = vpop.f32.mrf.mxu0 }
0x1190   : > { %v7002_v20 = vadd.f32 %v8129_v34, %v13834_v25 }
0x1191   : > { %v8131_v38 = vpop.f32.mrf.mxu0 }
0x1192   : > { %v8132_v35 = vadd.f32 %v8131_v38, %v8130_v24  ;;  %v13878_v43 = vadd.f32 %v7002_v20, %v13741_v3 }
0x1194   : > { %v7007_v39 = vadd.f32 %v8132_v35, %v13834_v25  ;;  %7074 = vadd.xlane.f32.xlu1 %v13878_v43 }
0x1196   : > { %v13883_v37 = vadd.f32 %v7007_v39, %v13747_v53 }
0x1197   : > { %v8133_v33 = vpop.f32.mrf.mxu0 }
0x1198   : > { %7076 = vadd.xlane.f32.xlu0 %v13883_v37 }
0x1199   : > { %v8134_v22 = vpop.f32.mrf.mxu0 }
0x119a   : > { %v8135_v2 = vadd.f32 %v8134_v22, %v8133_v33 }
0x119b   : > { %v8136_v18 = vpop.f32.mrf.mxu0 }
0x119c   : > { %v7012_v41 = vadd.f32 %v8135_v2, %v13834_v25 }
0x119d   : > { %v8137_v44 = vpop.f32.mrf.mxu0 }
0x119e   : > { %v8138_v49 = vadd.f32 %v8137_v44, %v8136_v18  ;;  %v13888_v3 = vadd.f32 %v7012_v41, %v13755_v36 }
0x119f   : > { %v8139_v12 = vpop.f32.mrf.mxu1 }
0x11a0   : > { %v7017_v60 = vadd.f32 %v8138_v49, %v13834_v25  ;;  %7078 = vadd.xlane.f32.xlu1 %v13888_v3 }
0x11a1   : > { %v8140_v53 = vpop.f32.mrf.mxu1 }
0x11a2   : > { %v8141_v54 = vadd.f32 %v8140_v53, %v8139_v12  ;;  %v13893_v4 = vadd.f32 %v7017_v60, %v13761_v6 }
0x11a3   : > { %v8142_v0 = vpop.f32.mrf.mxu1 }
0x11a4   : > { %v7022_v1 = vadd.f32 %v8141_v54, %v13834_v25  ;;  %7080 = vadd.xlane.f32.xlu0 %v13893_v4 }
0x11a5   : > { %v8143_v15 = vpop.f32.mrf.mxu1 }
0x11a6   : > { %v8144_v8 = vadd.f32 %v8143_v15, %v8142_v0  ;;  %v13898_v36 = vadd.f32 %v7022_v1, %v13769_v16 }
0x11a7   : > { %v8145_v32 = vpop.f32.mrf.mxu1 }
0x11a8   : > { %v7027_v59 = vadd.f32 %v8144_v8, %v13834_v25  ;;  %7082 = vadd.xlane.f32.xlu1 %v13898_v36 }
0x11a9   : > { %v8146_v48 = vpop.f32.mrf.mxu1 }
0x11aa   : > { %v8147_v56 = vadd.f32 %v8146_v48, %v8145_v32  ;;  %v13903_v6 = vadd.f32 %v7027_v59, %v13776_v40 }
0x11ab   : > { %v8148_v45 = vpop.f32.mrf.mxu1 }
0x11ac   : > { %v7032_v26 = vadd.f32 %v8147_v56, %v13834_v25  ;;  %7084 = vadd.xlane.f32.xlu0 %v13903_v6 }
0x11ad   : > { %v8149_v17 = vpop.f32.mrf.mxu1 }
0x11ae   : > { %v8150_v52 = vadd.f32 %v8149_v17, %v8148_v45  ;;  %v13908_v16 = vadd.f32 %v7032_v26, %v13783_v23 }
0x11b0   : > { %v7037_v13 = vadd.f32 %v8150_v52, %v13834_v25  ;;  %7086 = vadd.xlane.f32.xlu1 %v13908_v16 }
0x11b2   : > { %v13913_v21 = vadd.f32 %v7037_v13, %v13789_v27 }
0x11b4   : > { %7088 = vadd.xlane.f32.xlu0 %v13913_v21 }
0x11dd   : > { %v7059_v40 = vpop.xlane.xlu1 %7058 }
0x11de   : > { %v7090_v5 = vmul.f32 0.0078125, %v7059_v40 }
0x11e0   : > { %v13917_v29 = vsub.f32 %v13838_v57, %v7090_v5 }
0x11e1   : > { %v7061_v30 = vpop.xlane.xlu0 %7060 }
0x11e2   : > { %v7091_v61 = vmul.f32 0.0078125, %v7061_v30  ;;  %v7122_v23 = vmul.f32 %v13917_v29, %v13917_v29 }
0x11e4   : > { %v13922_v58 = vsub.f32 %v13843_v62, %v7091_v61  ;;  %7138 = vadd.xlane.f32.xlu1 %v7122_v23 }
0x11e6   : > { %v7123_v27 = vmul.f32 %v13922_v58, %v13922_v58 }
0x11e8   : > { %7140 = vadd.xlane.f32.xlu0 %v7123_v27 }
0x11ed   : > { %v7063_v25 = vpop.xlane.xlu1 %7062 }
0x11ee   : > { %v7092_v7 = vmul.f32 0.0078125, %v7063_v25 }
0x11f0   : > { %v13927_v55 = vsub.f32 %v13848_v47, %v7092_v7 }
0x11f1   : > { %v7065_v57 = vpop.xlane.xlu0 %7064 }
0x11f2   : > { %v7093_v11 = vmul.f32 0.0078125, %v7065_v57  ;;  %v7124_v14 = vmul.f32 %v13927_v55, %v13927_v55 }
0x11f4   : > { %v13932_v50 = vsub.f32 %v13853_v31, %v7093_v11  ;;  %7142 = vadd.xlane.f32.xlu1 %v7124_v14 }
0x11f6   : > { %v7125_v62 = vmul.f32 %v13932_v50, %v13932_v50 }
0x11f8   : > { %7144 = vadd.xlane.f32.xlu0 %v7125_v62 }
0x11fd   : > { %v7067_v19 = vpop.xlane.xlu1 %7066 }
0x11fe   : > { %v7094_v9 = vmul.f32 0.0078125, %v7067_v19  ;;  %v14005_v19 = vld [vmem:[%s14820_s29] ss:$0 sm:$0xff] }
0x1200   : > { %v13937_v63 = vsub.f32 %v13858_v51, %v7094_v9 }
0x1201   : > { %v7069_v47 = vpop.xlane.xlu0 %7068 }
0x1202   : > { %v7095_v42 = vmul.f32 0.0078125, %v7069_v47  ;;  %v7126_v34 = vmul.f32 %v13937_v63, %v13937_v63 }
0x1204   : > { %v13942_v24 = vsub.f32 %v13863_v46, %v7095_v42  ;;  %7146 = vadd.xlane.f32.xlu1 %v7126_v34 }
0x1206   : > { %v7127_v31 = vmul.f32 %v13942_v24, %v13942_v24 }
0x1208   : > { %7148 = vadd.xlane.f32.xlu0 %v7127_v31 }
0x120d   : > { %v7071_v20 = vpop.xlane.xlu1 %7070 }
0x120e   : > { %v7096_v38 = vmul.f32 0.0078125, %v7071_v20 }
0x1210   : > { %v13947_v35 = vsub.f32 %v13868_v28, %v7096_v38 }
0x1211   : > { %v7073_v51 = vpop.xlane.xlu0 %7072 }
0x1212   : > { %v7097_v39 = vmul.f32 0.0078125, %v7073_v51  ;;  %v7128_v33 = vmul.f32 %v13947_v35, %v13947_v35 }
0x1214   : > { %v13952_v22 = vsub.f32 %v13873_v10, %v7097_v39  ;;  %7150 = vadd.xlane.f32.xlu1 %v7128_v33 }
0x1216   : > { %v7129_v46 = vmul.f32 %v13952_v22, %v13952_v22 }
0x1218   : > { %7152 = vadd.xlane.f32.xlu0 %v7129_v46 }
0x121d   : > { %v7075_v2 = vpop.xlane.xlu1 %7074 }
0x121e   : > { %v7098_v18 = vmul.f32 0.0078125, %v7075_v2 }
0x1220   : > { %v13957_v41 = vsub.f32 %v13878_v43, %v7098_v18 }
0x1221   : > { %v7077_v28 = vpop.xlane.xlu0 %7076 }
0x1222   : > { %v7099_v44 = vmul.f32 0.0078125, %v7077_v28  ;;  %v7130_v49 = vmul.f32 %v13957_v41, %v13957_v41 }
0x1224   : > { %v13962_v12 = vsub.f32 %v13883_v37, %v7099_v44  ;;  %7154 = vadd.xlane.f32.xlu1 %v7130_v49 }
0x1226   : > { %v7131_v10 = vmul.f32 %v13962_v12, %v13962_v12 }
0x1228   : > { %7156 = vadd.xlane.f32.xlu0 %v7131_v10 }
0x1229   : > { %v7079_v60 = vpop.xlane.xlu1 %7078 }
0x122a   : > { %v7100_v53 = vmul.f32 0.0078125, %v7079_v60 }
0x122c   : > { %v13967_v54 = vsub.f32 %v13888_v3, %v7100_v53 }
0x122d   : > { %v7081_v43 = vpop.xlane.xlu0 %7080 }
0x122e   : > { %v7101_v0 = vmul.f32 0.0078125, %v7081_v43  ;;  %v7132_v1 = vmul.f32 %v13967_v54, %v13967_v54 }
0x1230   : > { %v13972_v15 = vsub.f32 %v13893_v4, %v7101_v0  ;;  %7158 = vadd.xlane.f32.xlu1 %v7132_v1 }
0x1231   : > { %v7083_v37 = vpop.xlane.xlu1 %7082 }
0x1232   : > { %v7102_v8 = vmul.f32 0.0078125, %v7083_v37  ;;  %v7133_v32 = vmul.f32 %v13972_v15, %v13972_v15 }
0x1234   : > { %v13977_v59 = vsub.f32 %v13898_v36, %v7102_v8  ;;  %7160 = vadd.xlane.f32.xlu0 %v7133_v32 }
0x1235   : > { %v7085_v3 = vpop.xlane.xlu0 %7084 }
0x1236   : > { %v7103_v48 = vmul.f32 0.0078125, %v7085_v3  ;;  %v7134_v56 = vmul.f32 %v13977_v59, %v13977_v59 }
0x1238   : > { %v13982_v45 = vsub.f32 %v13903_v6, %v7103_v48  ;;  %7162 = vadd.xlane.f32.xlu1 %v7134_v56 }
0x1239   : > { %v7087_v4 = vpop.xlane.xlu1 %7086 }
0x123a   : > { %v7104_v26 = vmul.f32 0.0078125, %v7087_v4  ;;  %v7135_v17 = vmul.f32 %v13982_v45, %v13982_v45 }
0x123c   : > { %v13987_v52 = vsub.f32 %v13908_v16, %v7104_v26  ;;  %7164 = vadd.xlane.f32.xlu0 %v7135_v17 }
0x123d   : > { %v7089_v36 = vpop.xlane.xlu0 %7088 }
0x123e   : > { %v7105_v13 = vmul.f32 0.0078125, %v7089_v36  ;;  %v7136_v40 = vmul.f32 %v13987_v52, %v13987_v52 }
0x1240   : > { %v13992_v5 = vsub.f32 %v13913_v21, %v7105_v13  ;;  %7166 = vadd.xlane.f32.xlu1 %v7136_v40  ;;  %v13999_v21 = vld [vmem:[%s14819_s25] ss:$0 sm:$0xff] }
0x1242   : > { %v7137_v6 = vmul.f32 %v13992_v5, %v13992_v5 }
0x1244   : > { %7168 = vadd.xlane.f32.xlu0 %v7137_v6 }
0x126d   : > { %v7139_v30 = vpop.xlane.xlu1 %7138 }
0x126e   : > { %v7170_v61 = vmul.f32 0.0078125, %v7139_v30 }
0x1270   : > { %v7186_v23 = vadd.f32 1e-05, %v7170_v61 }
0x1271   : > { %v7141_v27 = vpop.xlane.xlu0 %7140 }
0x1272   : > { %9510 = vrsqrt.f32 %v7186_v23  ;;  %v7171_v16 = vmul.f32 0.0078125, %v7141_v27 }
0x1274   : > { %v7187_v25 = vadd.f32 1e-05, %v7171_v16 }
0x1276   : > { %9512 = vrsqrt.f32 %v7187_v25 }
0x127d   : > { %v7143_v7 = vpop.xlane.xlu1 %7142 }
0x127e   : > { %v7172_v57 = vmul.f32 0.0078125, %v7143_v7 }
0x127f   : > { %v9511_v11 = vpop.eup %9510 }
0x1280   : > { %v7218_v14 = vmul.f32 %v9511_v11, %v13917_v29  ;;  %v7188_v62 = vadd.f32 1e-05, %v7172_v57 }
0x1281   : > { %v7145_v9 = vpop.xlane.xlu0 %7144 }
0x1282   : > { %v7240_v47 = vmul.f32 %v13999_v21, %v7218_v14  ;;  %9514 = vrsqrt.f32 %v7188_v62  ;;  %v7173_v42 = vmul.f32 0.0078125, %v7145_v9 }
0x1283   : > { %v9513_v34 = vpop.eup %9512 }
0x1284   : > { %v7262_v31 = vadd.f32 %v14005_v19, %v7240_v47  ;;  %v7219_v20 = vmul.f32 %v9513_v34, %v13922_v58  ;;  %v7189_v38 = vadd.f32 1e-05, %v7173_v42 }
0x1286   : > { %7278 = vst [vmem:[%s10405_s12] sm:$0xff] %v7262_v31  ;;  %v7241_v29 = vmul.f32 %v13999_v21, %v7219_v20  ;;  %9516 = vrsqrt.f32 %v7189_v38 }
0x1288   : > { %v7263_v51 = vadd.f32 %v14005_v19, %v7241_v29 }
0x128a   : > { %7279 = vst [vmem:[%s10405_s12 + $0x8] sm:$0xff] %v7263_v51 }
0x128d   : > { %v7147_v39 = vpop.xlane.xlu1 %7146 }
0x128e   : > { %v7174_v33 = vmul.f32 0.0078125, %v7147_v39 }
0x128f   : > { %v9515_v46 = vpop.eup %9514 }
0x1290   : > { %v7220_v2 = vmul.f32 %v9515_v46, %v13927_v55  ;;  %v7190_v18 = vadd.f32 1e-05, %v7174_v33 }
0x1291   : > { %v7149_v28 = vpop.xlane.xlu0 %7148 }
0x1292   : > { %v7242_v44 = vmul.f32 %v13999_v21, %v7220_v2  ;;  %9518 = vrsqrt.f32 %v7190_v18  ;;  %v7175_v58 = vmul.f32 0.0078125, %v7149_v28 }
0x1293   : > { %v9517_v49 = vpop.eup %9516 }
0x1294   : > { %v7264_v10 = vadd.f32 %v14005_v19, %v7242_v44  ;;  %v7221_v60 = vmul.f32 %v9517_v49, %v13932_v50  ;;  %v7191_v53 = vadd.f32 1e-05, %v7175_v58 }
0x1296   : > { %7280 = vst [vmem:[%s10405_s12 + $0x10] sm:$0xff] %v7264_v10  ;;  %v7243_v43 = vmul.f32 %v13999_v21, %v7221_v60  ;;  %9520 = vrsqrt.f32 %v7191_v53 }
0x1298   : > { %v7265_v0 = vadd.f32 %v14005_v19, %v7243_v43 }
0x129a   : > { %7281 = vst [vmem:[%s10405_s12 + $0x18] sm:$0xff] %v7265_v0 }
0x129d   : > { %v7151_v55 = vpop.xlane.xlu1 %7150 }
0x129e   : > { %v7176_v1 = vmul.f32 0.0078125, %v7151_v55 }
0x129f   : > { %v9519_v37 = vpop.eup %9518 }
0x12a0   : > { %v7222_v8 = vmul.f32 %v9519_v37, %v13937_v63  ;;  %v7192_v32 = vadd.f32 1e-05, %v7176_v1 }
0x12a1   : > { %v7153_v3 = vpop.xlane.xlu0 %7152 }
0x12a2   : > { %v7244_v48 = vmul.f32 %v13999_v21, %v7222_v8  ;;  %9522 = vrsqrt.f32 %v7192_v32  ;;  %v7177_v50 = vmul.f32 0.0078125, %v7153_v3 }
0x12a3   : > { %v9521_v56 = vpop.eup %9520 }
0x12a4   : > { %v7266_v4 = vadd.f32 %v14005_v19, %v7244_v48  ;;  %v7223_v26 = vmul.f32 %v9521_v56, %v13942_v24  ;;  %v7193_v17 = vadd.f32 1e-05, %v7177_v50 }
0x12a6   : > { %7282 = vst [vmem:[%s10405_s12 + $0x20] sm:$0xff] %v7266_v4  ;;  %v7245_v36 = vmul.f32 %v13999_v21, %v7223_v26  ;;  %9524 = vrsqrt.f32 %v7193_v17 }
0x12a8   : > { %v7267_v13 = vadd.f32 %v14005_v19, %v7245_v36 }
0x12aa   : > { %7283 = vst [vmem:[%s10405_s12 + $0x28] sm:$0xff] %v7267_v13 }
0x12ad   : > { %v7155_v63 = vpop.xlane.xlu1 %7154 }
0x12ae   : > { %v7178_v40 = vmul.f32 0.0078125, %v7155_v63 }
0x12af   : > { %v9523_v6 = vpop.eup %9522 }
0x12b0   : > { %v7224_v30 = vmul.f32 %v9523_v6, %v13947_v35  ;;  %v7194_v61 = vadd.f32 1e-05, %v7178_v40 }
0x12b1   : > { %v7157_v23 = vpop.xlane.xlu0 %7156 }
0x12b2   : > { %v7246_v27 = vmul.f32 %v13999_v21, %v7224_v30  ;;  %9526 = vrsqrt.f32 %v7194_v61  ;;  %v7179_v24 = vmul.f32 0.0078125, %v7157_v23 }
0x12b3   : > { %v9525_v16 = vpop.eup %9524 }
0x12b4   : > { %v7268_v25 = vadd.f32 %v14005_v19, %v7246_v27  ;;  %v7225_v7 = vmul.f32 %v9525_v16, %v13952_v22  ;;  %v7195_v57 = vadd.f32 1e-05, %v7179_v24 }
0x12b6   : > { %7284 = vst [vmem:[%s10405_s12 + $0x30] sm:$0xff] %v7268_v25  ;;  %v7247_v11 = vmul.f32 %v13999_v21, %v7225_v7  ;;  %9528 = vrsqrt.f32 %v7195_v57 }
0x12b8   : > { %v7269_v14 = vadd.f32 %v14005_v19, %v7247_v11 }
0x12b9   : > { %v7159_v62 = vpop.xlane.xlu1 %7158 }
0x12ba   : > { %7285 = vst [vmem:[%s10405_s12 + $0x38] sm:$0xff] %v7269_v14  ;;  %v7180_v35 = vmul.f32 0.0078125, %v7159_v62 }
0x12bc   : > { %v7196_v9 = vadd.f32 1e-05, %v7180_v35 }
0x12bd   : > { %v7161_v47 = vpop.xlane.xlu0 %7160 }
0x12be   : > { %9530 = vrsqrt.f32 %v7196_v9  ;;  %v7181_v42 = vmul.f32 0.0078125, %v7161_v47 }
0x12bf   : > { %v9527_v34 = vpop.eup %9526 }
0x12c0   : > { %v7226_v31 = vmul.f32 %v9527_v34, %v13957_v41  ;;  %v7197_v20 = vadd.f32 1e-05, %v7181_v42 }
0x12c1   : > { %v7163_v22 = vpop.xlane.xlu1 %7162 }
0x12c2   : > { %v7248_v38 = vmul.f32 %v13999_v21, %v7226_v31  ;;  %9532 = vrsqrt.f32 %v7197_v20  ;;  %v7182_v29 = vmul.f32 0.0078125, %v7163_v22 }
0x12c3   : > { %v9529_v51 = vpop.eup %9528 }
0x12c4   : > { %v7270_v39 = vadd.f32 %v14005_v19, %v7248_v38  ;;  %v7227_v33 = vmul.f32 %v9529_v51, %v13962_v12  ;;  %v7198_v46 = vadd.f32 1e-05, %v7182_v29 }
0x12c5   : > { %v7165_v2 = vpop.xlane.xlu0 %7164 }
0x12c6   : > { %7286 = vst [vmem:[%s10405_s12 + $0x40] sm:$0xff] %v7270_v39  ;;  %v7249_v18 = vmul.f32 %v13999_v21, %v7227_v33  ;;  %9534 = vrsqrt.f32 %v7198_v46  ;;  %v7183_v28 = vmul.f32 0.0078125, %v7165_v2 }
0x12c8   : > { %v7271_v41 = vadd.f32 %v14005_v19, %v7249_v18  ;;  %v7199_v44 = vadd.f32 1e-05, %v7183_v28 }
0x12c9   : > { %v7167_v58 = vpop.xlane.xlu1 %7166 }
0x12ca   : > { %7287 = vst [vmem:[%s10405_s12 + $0x48] sm:$0xff] %v7271_v41  ;;  %9536 = vrsqrt.f32 %v7199_v44  ;;  %v7184_v49 = vmul.f32 0.0078125, %v7167_v58 }
0x12cb   : > { %v9531_v10 = vpop.eup %9530 }
0x12cc   : > { %v7228_v60 = vmul.f32 %v9531_v10, %v13967_v54  ;;  %v7200_v12 = vadd.f32 1e-05, %v7184_v49 }
0x12cd   : > { %v7169_v53 = vpop.xlane.xlu0 %7168 }
0x12ce   : > { %v7250_v43 = vmul.f32 %v13999_v21, %v7228_v60  ;;  %9538 = vrsqrt.f32 %v7200_v12  ;;  %v7185_v0 = vmul.f32 0.0078125, %v7169_v53 }
0x12cf   : > { %v9533_v55 = vpop.eup %9532 }
0x12d0   : > { %v7272_v1 = vadd.f32 %v14005_v19, %v7250_v43  ;;  %v7229_v37 = vmul.f32 %v9533_v55, %v13972_v15  ;;  %v7201_v8 = vadd.f32 1e-05, %v7185_v0 }
0x12d2   : > { %7288 = vst [vmem:[%s10405_s12 + $0x50] sm:$0xff] %v7272_v1  ;;  %v7251_v32 = vmul.f32 %v13999_v21, %v7229_v37  ;;  %9540 = vrsqrt.f32 %v7201_v8 }
0x12d3   : > { %v9535_v54 = vpop.eup %9534 }
0x12d4   : > { %v7273_v3 = vadd.f32 %v14005_v19, %v7251_v32  ;;  %v7230_v48 = vmul.f32 %v9535_v54, %v13977_v59 }
0x12d6   : > { %7289 = vst [vmem:[%s10405_s12 + $0x58] sm:$0xff] %v7273_v3  ;;  %v7252_v50 = vmul.f32 %v13999_v21, %v7230_v48 }
0x12d7   : > { %v9537_v56 = vpop.eup %9536 }
0x12d8   : > { %v7274_v4 = vadd.f32 %v14005_v19, %v7252_v50  ;;  %v7231_v15 = vmul.f32 %v9537_v56, %v13982_v45 }
0x12da   : > { %7290 = vst [vmem:[%s10405_s12 + $0x60] sm:$0xff] %v7274_v4  ;;  %v7253_v26 = vmul.f32 %v13999_v21, %v7231_v15 }
0x12db   : > { %v9539_v17 = vpop.eup %9538 }
0x12dc   : > { %v7275_v36 = vadd.f32 %v14005_v19, %v7253_v26  ;;  %v7232_v13 = vmul.f32 %v9539_v17, %v13987_v52 }
0x12de   : > { %7291 = vst [vmem:[%s10405_s12 + $0x68] sm:$0xff] %v7275_v36  ;;  %v7254_v59 = vmul.f32 %v13999_v21, %v7232_v13 }
0x12df   : > { %v9541_v63 = vpop.eup %9540 }
0x12e0   : > { %v7276_v40 = vadd.f32 %v14005_v19, %v7254_v59  ;;  %v7233_v6 = vmul.f32 %v9541_v63, %v13992_v5 }
0x12e2   : > { %7292 = vst [vmem:[%s10405_s12 + $0x70] sm:$0xff] %v7276_v40  ;;  %v7255_v30 = vmul.f32 %v13999_v21, %v7233_v6 }
0x12e4   : > { %v7277_v45 = vadd.f32 %v14005_v19, %v7255_v30 }
0x12e6   : > { %7293 = vst [vmem:[%s10405_s12 + $0x78] sm:$0xff] %v7277_v45 }
0x12e7 PF: > { %s14821_s19 = sld [smem:[#allocation33_spill]]  ;;  %s7310_s21 = sshll.u32 %s10405_s12, 4  ;;  %s14073_s21 = int_to_ptr.vmem [resolvable:$true] %s7310_s21 }
0x12e8   : > { %s14822_s22 = sld [smem:[#allocation34_spill]]  ;;  %s7295_s13 = scalar_lea.sflag [#allocation8], %s10373_s11 }
0x12e9   : > { %s14824_s15 = sld [smem:[#allocation153_spill]]  ;;  %s9782_s16 = scalar_lea.vmem %s14073_s21, 2048 }
0x12ea   : > { %p9783_p8 = scmp.ne.s32.totalorder %s14073_s21, %s9782_s16  ;;  %s9957_s1 = smov [#allocation21]  }
0x12eb   : > { %s9786_s12 = sshll.u32 %s9957_s1, 4  ;;  %s9787_s12 = int_to_ptr.vmem [resolvable:$false] %s9786_s12 }
0x12ec   : > { %p9784_p0 = pnand %p9783_p8, %p10293_p3  ;;  %s9788_s4 = scalar_lea.vmem %s9787_s12, 4096 }
0x12ed   : > { %s7682_s7 = sshll.u32 %s14821_s19, 4  ;;  %p9789_p2 = scmp.lt.s32.totalorder %s14073_s21, %s9787_s12 }
0x12ee   : > { %s7683_s10 = sshll.u32 %s14822_s22, 5  ;;  %p9785_p11 = pneg %p9784_p0 }
0x12ef   : > { %s7307_s3 = sadd.s32 %s7683_s10, %s7682_s7  ;;  %p9790_p1 = scmp.lt.s32.totalorder %s9788_s4, %s9782_s16 }
0x12f0   : > { %s7684_s5 = sshll.u32 %s7307_s3, 7 }
0x12f1   : > { %s14078_s23 = scalar_lea.hbm %s14824_s15, %s7684_s5  ;;  %p9791_p7 = por %p9790_p1, %p9789_p2 }
0x12f3   : > { %p9792_p4 = pnand %p9791_p7, %p9785_p11 }
0x12f5   : > { %9795 = shalt.err (!%p9792_p4)
}
0x12f6   : > { %s9796_s2 = scalar_lea.hbm %s14078_s23, 2048  ;;  %s9800_s0 = scalar_lea.hbm %s14824_s15, 8192 }
0x12f7   : > { %p9797_p6 = scmp.ne.s32.totalorder %s14078_s23, %s9796_s2  ;;  %p9801_p12 = scmp.lt.s32.totalorder %s14078_s23, %s14824_s15 }
0x12f8   : > { %p9802_p9 = scmp.lt.s32.totalorder %s9800_s0, %s9796_s2 }
0x12f9   : > { %p9798_p10 = pnand %p9797_p6, %p10293_p3 }
0x12fa   : > { %p9803_p5 = por %p9802_p9, %p9801_p12 }
0x12fb   : > { %p9799_p13 = pneg %p9798_p10 }
0x12fd   : > { %p9804_p8 = pnand %p9803_p5, %p9799_p13 }
0x12ff   : > { %9807 = shalt.err (!%p9804_p8)
}
0x1300   : > { %s9958_s19 = smov 128   ;;  %s9959_s22 = smov 8  }
0x1301   : > { %8917 = dma.vmem_to_hbm [thread:$0]  (%p10293_p3), %s14073_s21, 2048, %s14078_s23, %s7295_s13, %s9958_s19, %s9958_s19, %s9959_s22  }
0x1302 PF: > { %s14825_s7 = sld [smem:[#allocation30_spill]]  ;;  %p8965_p0 = scmp.ge.s32.totalorder %s9934_s18, 2 }
0x1303   : > { %s14826_s10 = sld [smem:[#allocation44_spill]] }
0x1308   : > { %s7325_s3 = sand.u32 1, %s14825_s7  }
0x1309   : > { %p14827_p11 = scmp.ne.s32.totalorder %s14826_s10, 0  ;;  %s7326_s5 = scalar_lea.sflag [#allocation8], %s7325_s3 }
0x130b   : > { %p8949_p2 = pnand %p8965_p0, %p14827_p11 }
0x130d   : > { %p8950_p1 = pneg %p8949_p2 }
0x130f   : > { %9881 = dma.done.wait (%p8950_p1), %s7326_s5, 2048  }
0x1310   : > { %9883 = vsyncadd (%p8950_p1), %s7326_s5, 4294965248  ;;  %s38_s18 = sadd.s32 1, %s9934_s18   ;;  %s14829_s21 = sld [smem:[#allocation28_spill]] }
0x1311   : > { %p14108_p7 = scmp.ge.s32.totalorder %s38_s18, 10   ;;  %s14830_s22 = sld [smem:[#allocation29_spill]] }
0x1312   : > { %s14831_s11 = sld [smem:[#allocation31_spill]]  ;;  %s14832_s8 = smov %s10320_s24 }
0x1313   : > { %s14833_s9 = sld [smem:[#allocation35_spill]]  ;;  %s14837_s23 = smov %s14857_s27 }
0x1314   : > { %s14834_s0 = sld [smem:[#allocation41_spill]]  ;;  %s14839_s25 = smov %s9906_s26 }
0x1315   : > { %s14835_s13 = sld [smem:[#allocation43_spill]]  ;;  %s14840_s26 = smov %s14832_s8 }
0x1316   : > { %s14841_s27 = smov %s9922_s30  ;;  %s14843_s29 = smov %s9930_s17 }
0x1317   : > { %s14844_s30 = smov %s14847_s20  ;;  %37 = sbr.rel (!%p14108_p7) target bundleno = 33 (0x21), region = 191 }
0x1318   : > { %s14838_s24 = smov %s14831_s11 }
0x1319   : > { %s14842_s28 = smov %s14833_s9 }
0x131b   : > { %s14845_s17 = smov %s14835_s13 }
0x131c   :  { %7331 = vsyncpa [#allocation7], 1 }
0x131d   :  { %7333 = vsyncpa [#allocation7 + $0x1], 1 }
0x131e   :  { %7334 = vsyncpa [#allocation10], 1 }
0x131f   :  { %7336 = vsyncpa [#allocation10 + $0x1], 1 }
0x1320   :  { %7337 = vsyncpa [#allocation13], 1 }
0x1321   :  { %7338 = vsyncpa [#allocation16], 1 }
0x1322   :  { %7339 = vsyncpa [#allocation19], 1 }
0x1323   :  { %7340 = vsyncpa [#allocation8], 1 }
0x1324   :  { %7342 = vsyncpa [#allocation8 + $0x1], 1 }

</bundles_post_ra>
